<compile_context>
chip_gen: v7x
topology: tpu7x:2x2x1
jax: 0.10.0
libtpu: 0.0.40
codegen_flags: <defaults>
</compile_context>

<pallas_src>
import functools

import jax
import jax.numpy as jnp
from jax.experimental import pallas as pl
from jax.experimental.pallas import tpu as pltpu

C_IN = 2048      # last_layer_index=[4]
C_MID = 512
C_OUT = 10
C_OUT_PAD = 128  # pad conv2 output channels to a full lane tile
EPS = 1e-5


def _recognition_kernel(N, H, W, emit_act,
                        xpad_ref, w1_ref, scale_ref, shift_ref, w2_ref,
                        out_ref, *rest):
    """Fused 3x3 conv (im2col + single long-K MXU matmul, accumulated over
    C_in tiles) + folded BatchNorm + ReLU + 1x1 conv, for one C_MID block."""
    if emit_act:
        act_ref, acc_ref, col_ref = rest
    else:
        act_ref = None
        acc_ref, col_ref = rest

    k = pl.program_id(1)              # C_in reduction step
    tc = xpad_ref.shape[-1]           # cin_tile
    HW = H * W

    # im2col for this C_in tile:
    #   col[n*H*W + h*W + w, tap*tc + c] = xpad[n, h+dh, w+dw, c], tap = dh*3+dw
    for n in range(N):
        for dh in range(3):
            for dw in range(3):
                tap = dh * 3 + dw
                col_ref[n * HW:(n + 1) * HW, tap * tc:(tap + 1) * tc] = (
                    xpad_ref[n, dh:dh + H, dw:dw + W, :].reshape(HW, tc))

    @pl.when(k == 0)
    def _():
        acc_ref[...] = jnp.zeros_like(acc_ref)

    # One long-K matmul per grid step (K = 9*tc); single accumulator RMW.
    acc_ref[...] += jnp.dot(col_ref[...], w1_ref[0, 0],
                            preferred_element_type=jnp.float32)

    @pl.when(k == pl.num_programs(1) - 1)
    def _():
        bn = acc_ref[...] * scale_ref[0, 0] + shift_ref[0, 0]       # (M, jm) f32
        if emit_act:
            act_ref[...] = bn.reshape(N, H, W, bn.shape[-1]).astype(act_ref.dtype)
        r = jnp.maximum(bn, 0.0).astype(w2_ref.dtype)               # ReLU -> bf16
        y = jnp.dot(r, w2_ref[0], preferred_element_type=jnp.float32)  # (M, 128)
        out_ref[...] = y.reshape(1, N, H, W, y.shape[-1]).astype(out_ref.dtype)


def recognition_forward(x, params, return_activations, *,
                        cin_tile=512, cmid_blocks=2):
    """x: (N, H, W, C_IN) float32, NHWC."""
    w1, gamma, beta, run_mean, run_var, w2, b2 = params
    N, H, W, cin = x.shape
    assert cin == C_IN and cin % cin_tile == 0
    assert C_MID % cmid_blocks == 0 and (C_MID // cmid_blocks) % 128 == 0
    nk = cin // cin_tile
    nj = cmid_blocks
    jm = C_MID // nj
    M = N * H * W
    assert M % 8 == 0

    # Fold BatchNorm (eval mode) into per-channel scale/shift (kept in f32).
    inv = gamma / jnp.sqrt(run_var + EPS)
    scale = inv.reshape(nj, 1, jm)
    shift = (beta - run_mean * inv).reshape(nj, 1, jm)

    # bf16 operands (f32 accumulation in-kernel); spatial zero-pad for the 3x3
    # conv; weight layout matching the im2col buffer:
    #   w1r[k, j, (dh*3+dw)*tc + c, m] = w1[dh, dw, k*tc + c, j*jm + m]
    xpad = jnp.pad(x, ((0, 0), (1, 1), (1, 1), (0, 0))).astype(jnp.bfloat16)
    w1r = (w1.reshape(3, 3, nk, cin_tile, nj, jm)
             .transpose(2, 4, 0, 1, 3, 5)
             .reshape(nk, nj, 9 * cin_tile, jm)
             .astype(jnp.bfloat16))
    w2r = (jnp.zeros((C_MID, C_OUT_PAD), w2.dtype).at[:, :C_OUT].set(w2)
              .reshape(nj, jm, C_OUT_PAD).astype(jnp.bfloat16))

    out_struct = jax.ShapeDtypeStruct((nj, N, H, W, C_OUT_PAD), jnp.float32)
    out_spec = pl.BlockSpec((1, N, H, W, C_OUT_PAD), lambda j, k: (j, 0, 0, 0, 0))
    if return_activations:
        out_shape = (out_struct,
                     jax.ShapeDtypeStruct((N, H, W, C_MID), x.dtype))
        out_specs = (out_spec,
                     pl.BlockSpec((N, H, W, jm), lambda j, k: (0, 0, 0, j)))
    else:
        out_shape = out_struct
        out_specs = out_spec

    kernel = functools.partial(_recognition_kernel, N, H, W, return_activations)

    res = pl.pallas_call(
        kernel,
        out_shape=out_shape,
        grid_spec=pltpu.PrefetchScalarGridSpec(
            num_scalar_prefetch=0,
            grid=(nj, nk),                     # (C_MID blocks, C_in reduction)
            in_specs=[
                pl.BlockSpec((N, H + 2, W + 2, cin_tile), lambda j, k: (0, 0, 0, k)),
                pl.BlockSpec((1, 1, 9 * cin_tile, jm),    lambda j, k: (k, j, 0, 0)),
                pl.BlockSpec((1, 1, jm),                  lambda j, k: (j, 0, 0)),
                pl.BlockSpec((1, 1, jm),                  lambda j, k: (j, 0, 0)),
                pl.BlockSpec((1, jm, C_OUT_PAD),          lambda j, k: (j, 0, 0)),
            ],
            out_specs=out_specs,
            scratch_shapes=[
                pltpu.VMEM((M, jm), jnp.float32),             # conv1 accumulator
                pltpu.VMEM((M, 9 * cin_tile), jnp.bfloat16),  # im2col buffer
            ],
        ),
        compiler_params=pltpu.CompilerParams(
            dimension_semantics=("parallel", "arbitrary")),
    )(xpad, w1r, scale, shift, w2r)

    if return_activations:
        part, act = res
    else:
        part = res

    # Sum C_MID-block partial conv2 outputs, drop lane padding, add bias.
    y = (jnp.sum(part, axis=0)[..., :C_OUT] + b2).astype(x.dtype)

    if return_activations:
        return y, act
    return y


def _reference(x, params):
    """Plain-JAX reference (high precision) for sanity checking."""
    w1, gamma, beta, run_mean, run_var, w2, b2 = params
    a = jax.lax.conv_general_dilated(
        x, w1, window_strides=(1, 1), padding="SAME",
        dimension_numbers=("NHWC", "HWIO", "NHWC"),
        precision=jax.lax.Precision.HIGHEST)
    bn = (a - run_mean) / jnp.sqrt(run_var + EPS) * gamma + beta
    r = jnp.maximum(bn, 0.0)
    y = jnp.einsum("nhwc,co->nhwo", r, w2,
                   precision=jax.lax.Precision.HIGHEST) + b2
    return y, bn


def _init_params(key):
    k1, k2, k3, k4, k5, k6, k7 = jax.random.split(key, 7)
    w1 = jax.random.normal(k1, (3, 3, C_IN, C_MID), jnp.float32) * (2.0 / (9 * C_IN)) ** 0.5
    gamma = 1.0 + 0.1 * jax.random.normal(k2, (C_MID,), jnp.float32)
    beta = 0.1 * jax.random.normal(k3, (C_MID,), jnp.float32)
    run_mean = 0.1 * jax.random.normal(k4, (C_MID,), jnp.float32)
    run_var = 0.5 + 0.5 * jnp.abs(jax.random.normal(k5, (C_MID,), jnp.float32))
    w2 = jax.random.normal(k6, (C_MID, C_OUT), jnp.float32) * (1.0 / C_MID) ** 0.5
    b2 = 0.1 * jax.random.normal(k7, (C_OUT,), jnp.float32)
    return (w1, gamma, beta, run_mean, run_var, w2, b2)


if __name__ == "__main__":
    key = jax.random.PRNGKey(0)
    pkey, xkey = jax.random.split(key)
    params = _init_params(pkey)

    N, H, W = 2, 8, 8
    x = jax.random.normal(xkey, (N, H, W, C_IN), jnp.float32)

    # return_activations=True path
    out, act = recognition_forward(x, params, return_activations=True)
    jax.block_until_ready((out, act))

    # return_activations=False path (kernel variant without act writeback)
    out_only = recognition_forward(x, params, return_activations=False)
    jax.block_until_ready(out_only)

    assert out.shape == (N, H, W, C_OUT) and act.shape == (N, H, W, C_MID)
    assert out_only.shape == (N, H, W, C_OUT)

    ref_out, ref_act = _reference(x, params)
    assert jnp.allclose(out, ref_out, rtol=5e-2, atol=1e-1), "conv2 output mismatch"
    assert jnp.allclose(act, ref_act, rtol=5e-2, atol=1e-1), "BN activation mismatch"
    assert jnp.allclose(out_only, out), "return_activations=False path mismatch"

    print("KERNEL_OK")
</pallas_src>

<mosaic_0001>
module attributes {stable_mosaic.version = 11 : i64} {
  func.func @_recognition_kernel(%arg0: i32, %arg1: i32, %arg2: memref<2x10x10x512xbf16, #tpu.memory_space<vmem>>, %arg3: memref<1x1x4608x256xbf16, #tpu.memory_space<vmem>>, %arg4: memref<1x1x256xf32, #tpu.memory_space<vmem>>, %arg5: memref<1x1x256xf32, #tpu.memory_space<vmem>>, %arg6: memref<1x256x128xbf16, #tpu.memory_space<vmem>>, %arg7: memref<1x2x8x8x128xf32, #tpu.memory_space<vmem>>, %arg8: memref<2x8x8x256xf32, #tpu.memory_space<vmem>>, %arg9: memref<128x256xf32, #tpu.memory_space<vmem>>, %arg10: memref<128x4608xbf16, #tpu.memory_space<vmem>>) attributes {dimension_semantics = [#tpu.dimension_semantics<parallel>, #tpu.dimension_semantics<arbitrary>], iteration_bounds = array<i64: 2, 4>, scalar_prefetch = 0 : i64, scratch_operands = 2 : i64, tpu.core_type = #tpu.core_type<tc>, window_params = [{transform_indices = @transform_0, window_bounds = array<i64: 2, 10, 10, 512>}, {transform_indices = @transform_1, window_bounds = array<i64: 1, 1, 4608, 256>}, {transform_indices = @transform_2, window_bounds = array<i64: 1, 1, 256>}, {transform_indices = @transform_3, window_bounds = array<i64: 1, 1, 256>}, {transform_indices = @transform_4, window_bounds = array<i64: 1, 256, 128>}, {transform_indices = @transform_5, window_bounds = array<i64: 1, 2, 8, 8, 128>}, {transform_indices = @transform_6, window_bounds = array<i64: 2, 8, 8, 256>}]} {
    %c0 = arith.constant 0 : index
    %c0_0 = arith.constant 0 : index
    %c0_1 = arith.constant 0 : index
    %c0_2 = arith.constant 0 : index
    %0 = vector.load %arg2[%c0, %c0_0, %c0_1, %c0_2] : memref<2x10x10x512xbf16, #tpu.memory_space<vmem>>, vector<1x8x8x512xbf16>
    %1 = vector.shape_cast %0 : vector<1x8x8x512xbf16> to vector<8x8x512xbf16>
    %2 = vector.shape_cast %1 : vector<8x8x512xbf16> to vector<64x512xbf16>
    %c0_3 = arith.constant 0 : index
    %c0_4 = arith.constant 0 : index
    %3 = vector.load %arg10[%c0_3, %c0_4] : memref<128x4608xbf16, #tpu.memory_space<vmem>>, vector<64x512xbf16>
    tpu.vector_store %arg10[%c0_3, %c0_4], %2 {strides = array<i32>} : memref<128x4608xbf16, #tpu.memory_space<vmem>>, vector<64x512xbf16>,
    %c0_5 = arith.constant 0 : index
    %c0_6 = arith.constant 0 : index
    %c1 = arith.constant 1 : index
    %c0_7 = arith.constant 0 : index
    %4 = vector.load %arg2[%c0_5, %c0_6, %c1, %c0_7] : memref<2x10x10x512xbf16, #tpu.memory_space<vmem>>, vector<1x8x8x512xbf16>
    %5 = vector.shape_cast %4 : vector<1x8x8x512xbf16> to vector<8x8x512xbf16>
    %6 = vector.shape_cast %5 : vector<8x8x512xbf16> to vector<64x512xbf16>
    %c0_8 = arith.constant 0 : index
    %c512 = arith.constant 512 : index
    %7 = vector.load %arg10[%c0_8, %c512] : memref<128x4608xbf16, #tpu.memory_space<vmem>>, vector<64x512xbf16>
    tpu.vector_store %arg10[%c0_8, %c512], %6 {strides = array<i32>} : memref<128x4608xbf16, #tpu.memory_space<vmem>>, vector<64x512xbf16>,
    %c0_9 = arith.constant 0 : index
    %c0_10 = arith.constant 0 : index
    %c2 = arith.constant 2 : index
    %c0_11 = arith.constant 0 : index
    %8 = vector.load %arg2[%c0_9, %c0_10, %c2, %c0_11] : memref<2x10x10x512xbf16, #tpu.memory_space<vmem>>, vector<1x8x8x512xbf16>
    %9 = vector.shape_cast %8 : vector<1x8x8x512xbf16> to vector<8x8x512xbf16>
    %10 = vector.shape_cast %9 : vector<8x8x512xbf16> to vector<64x512xbf16>
    %c0_12 = arith.constant 0 : index
    %c1024 = arith.constant 1024 : index
    %11 = vector.load %arg10[%c0_12, %c1024] : memref<128x4608xbf16, #tpu.memory_space<vmem>>, vector<64x512xbf16>
    tpu.vector_store %arg10[%c0_12, %c1024], %10 {strides = array<i32>} : memref<128x4608xbf16, #tpu.memory_space<vmem>>, vector<64x512xbf16>,
    %c0_13 = arith.constant 0 : index
    %c1_14 = arith.constant 1 : index
    %c0_15 = arith.constant 0 : index
    %c0_16 = arith.constant 0 : index
    %12 = vector.load %arg2[%c0_13, %c1_14, %c0_15, %c0_16] : memref<2x10x10x512xbf16, #tpu.memory_space<vmem>>, vector<1x8x8x512xbf16>
    %13 = vector.shape_cast %12 : vector<1x8x8x512xbf16> to vector<8x8x512xbf16>
    %14 = vector.shape_cast %13 : vector<8x8x512xbf16> to vector<64x512xbf16>
    %c0_17 = arith.constant 0 : index
    %c1536 = arith.constant 1536 : index
    %15 = vector.load %arg10[%c0_17, %c1536] : memref<128x4608xbf16, #tpu.memory_space<vmem>>, vector<64x512xbf16>
    tpu.vector_store %arg10[%c0_17, %c1536], %14 {strides = array<i32>} : memref<128x4608xbf16, #tpu.memory_space<vmem>>, vector<64x512xbf16>,
    %c0_18 = arith.constant 0 : index
    %c1_19 = arith.constant 1 : index
    %c1_20 = arith.constant 1 : index
    %c0_21 = arith.constant 0 : index
    %16 = vector.load %arg2[%c0_18, %c1_19, %c1_20, %c0_21] : memref<2x10x10x512xbf16, #tpu.memory_space<vmem>>, vector<1x8x8x512xbf16>
    %17 = vector.shape_cast %16 : vector<1x8x8x512xbf16> to vector<8x8x512xbf16>
    %18 = vector.shape_cast %17 : vector<8x8x512xbf16> to vector<64x512xbf16>
    %c0_22 = arith.constant 0 : index
    %c2048 = arith.constant 2048 : index
    %19 = vector.load %arg10[%c0_22, %c2048] : memref<128x4608xbf16, #tpu.memory_space<vmem>>, vector<64x512xbf16>
    tpu.vector_store %arg10[%c0_22, %c2048], %18 {strides = array<i32>} : memref<128x4608xbf16, #tpu.memory_space<vmem>>, vector<64x512xbf16>,
    %c0_23 = arith.constant 0 : index
    %c1_24 = arith.constant 1 : index
    %c2_25 = arith.constant 2 : index
    %c0_26 = arith.constant 0 : index
    %20 = vector.load %arg2[%c0_23, %c1_24, %c2_25, %c0_26] : memref<2x10x10x512xbf16, #tpu.memory_space<vmem>>, vector<1x8x8x512xbf16>
    %21 = vector.shape_cast %20 : vector<1x8x8x512xbf16> to vector<8x8x512xbf16>
    %22 = vector.shape_cast %21 : vector<8x8x512xbf16> to vector<64x512xbf16>
    %c0_27 = arith.constant 0 : index
    %c2560 = arith.constant 2560 : index
    %23 = vector.load %arg10[%c0_27, %c2560] : memref<128x4608xbf16, #tpu.memory_space<vmem>>, vector<64x512xbf16>
    tpu.vector_store %arg10[%c0_27, %c2560], %22 {strides = array<i32>} : memref<128x4608xbf16, #tpu.memory_space<vmem>>, vector<64x512xbf16>,
    %c0_28 = arith.constant 0 : index
    %c2_29 = arith.constant 2 : index
    %c0_30 = arith.constant 0 : index
    %c0_31 = arith.constant 0 : index
    %24 = vector.load %arg2[%c0_28, %c2_29, %c0_30, %c0_31] : memref<2x10x10x512xbf16, #tpu.memory_space<vmem>>, vector<1x8x8x512xbf16>
    %25 = vector.shape_cast %24 : vector<1x8x8x512xbf16> to vector<8x8x512xbf16>
    %26 = vector.shape_cast %25 : vector<8x8x512xbf16> to vector<64x512xbf16>
    %c0_32 = arith.constant 0 : index
    %c3072 = arith.constant 3072 : index
    %27 = vector.load %arg10[%c0_32, %c3072] : memref<128x4608xbf16, #tpu.memory_space<vmem>>, vector<64x512xbf16>
    tpu.vector_store %arg10[%c0_32, %c3072], %26 {strides = array<i32>} : memref<128x4608xbf16, #tpu.memory_space<vmem>>, vector<64x512xbf16>,
    %c0_33 = arith.constant 0 : index
    %c2_34 = arith.constant 2 : index
    %c1_35 = arith.constant 1 : index
    %c0_36 = arith.constant 0 : index
    %28 = vector.load %arg2[%c0_33, %c2_34, %c1_35, %c0_36] : memref<2x10x10x512xbf16, #tpu.memory_space<vmem>>, vector<1x8x8x512xbf16>
    %29 = vector.shape_cast %28 : vector<1x8x8x512xbf16> to vector<8x8x512xbf16>
    %30 = vector.shape_cast %29 : vector<8x8x512xbf16> to vector<64x512xbf16>
    %c0_37 = arith.constant 0 : index
    %c3584 = arith.constant 3584 : index
    %31 = vector.load %arg10[%c0_37, %c3584] : memref<128x4608xbf16, #tpu.memory_space<vmem>>, vector<64x512xbf16>
    tpu.vector_store %arg10[%c0_37, %c3584], %30 {strides = array<i32>} : memref<128x4608xbf16, #tpu.memory_space<vmem>>, vector<64x512xbf16>,
    %c0_38 = arith.constant 0 : index
    %c2_39 = arith.constant 2 : index
    %c2_40 = arith.constant 2 : index
    %c0_41 = arith.constant 0 : index
    %32 = vector.load %arg2[%c0_38, %c2_39, %c2_40, %c0_41] : memref<2x10x10x512xbf16, #tpu.memory_space<vmem>>, vector<1x8x8x512xbf16>
    %33 = vector.shape_cast %32 : vector<1x8x8x512xbf16> to vector<8x8x512xbf16>
    %34 = vector.shape_cast %33 : vector<8x8x512xbf16> to vector<64x512xbf16>
    %c0_42 = arith.constant 0 : index
    %c4096 = arith.constant 4096 : index
    %35 = vector.load %arg10[%c0_42, %c4096] : memref<128x4608xbf16, #tpu.memory_space<vmem>>, vector<64x512xbf16>
    tpu.vector_store %arg10[%c0_42, %c4096], %34 {strides = array<i32>} : memref<128x4608xbf16, #tpu.memory_space<vmem>>, vector<64x512xbf16>,
    %c1_43 = arith.constant 1 : index
    %c0_44 = arith.constant 0 : index
    %c0_45 = arith.constant 0 : index
    %c0_46 = arith.constant 0 : index
    %36 = vector.load %arg2[%c1_43, %c0_44, %c0_45, %c0_46] : memref<2x10x10x512xbf16, #tpu.memory_space<vmem>>, vector<1x8x8x512xbf16>
    %37 = vector.shape_cast %36 : vector<1x8x8x512xbf16> to vector<8x8x512xbf16>
    %38 = vector.shape_cast %37 : vector<8x8x512xbf16> to vector<64x512xbf16>
    %c64 = arith.constant 64 : index
    %c0_47 = arith.constant 0 : index
    %39 = vector.load %arg10[%c64, %c0_47] : memref<128x4608xbf16, #tpu.memory_space<vmem>>, vector<64x512xbf16>
    tpu.vector_store %arg10[%c64, %c0_47], %38 {strides = array<i32>} : memref<128x4608xbf16, #tpu.memory_space<vmem>>, vector<64x512xbf16>,
    %c1_48 = arith.constant 1 : index
    %c0_49 = arith.constant 0 : index
    %c1_50 = arith.constant 1 : index
    %c0_51 = arith.constant 0 : index
    %40 = vector.load %arg2[%c1_48, %c0_49, %c1_50, %c0_51] : memref<2x10x10x512xbf16, #tpu.memory_space<vmem>>, vector<1x8x8x512xbf16>
    %41 = vector.shape_cast %40 : vector<1x8x8x512xbf16> to vector<8x8x512xbf16>
    %42 = vector.shape_cast %41 : vector<8x8x512xbf16> to vector<64x512xbf16>
    %c64_52 = arith.constant 64 : index
    %c512_53 = arith.constant 512 : index
    %43 = vector.load %arg10[%c64_52, %c512_53] : memref<128x4608xbf16, #tpu.memory_space<vmem>>, vector<64x512xbf16>
    tpu.vector_store %arg10[%c64_52, %c512_53], %42 {strides = array<i32>} : memref<128x4608xbf16, #tpu.memory_space<vmem>>, vector<64x512xbf16>,
    %c1_54 = arith.constant 1 : index
    %c0_55 = arith.constant 0 : index
    %c2_56 = arith.constant 2 : index
    %c0_57 = arith.constant 0 : index
    %44 = vector.load %arg2[%c1_54, %c0_55, %c2_56, %c0_57] : memref<2x10x10x512xbf16, #tpu.memory_space<vmem>>, vector<1x8x8x512xbf16>
    %45 = vector.shape_cast %44 : vector<1x8x8x512xbf16> to vector<8x8x512xbf16>
    %46 = vector.shape_cast %45 : vector<8x8x512xbf16> to vector<64x512xbf16>
    %c64_58 = arith.constant 64 : index
    %c1024_59 = arith.constant 1024 : index
    %47 = vector.load %arg10[%c64_58, %c1024_59] : memref<128x4608xbf16, #tpu.memory_space<vmem>>, vector<64x512xbf16>
    tpu.vector_store %arg10[%c64_58, %c1024_59], %46 {strides = array<i32>} : memref<128x4608xbf16, #tpu.memory_space<vmem>>, vector<64x512xbf16>,
    %c1_60 = arith.constant 1 : index
    %c1_61 = arith.constant 1 : index
    %c0_62 = arith.constant 0 : index
    %c0_63 = arith.constant 0 : index
    %48 = vector.load %arg2[%c1_60, %c1_61, %c0_62, %c0_63] : memref<2x10x10x512xbf16, #tpu.memory_space<vmem>>, vector<1x8x8x512xbf16>
    %49 = vector.shape_cast %48 : vector<1x8x8x512xbf16> to vector<8x8x512xbf16>
    %50 = vector.shape_cast %49 : vector<8x8x512xbf16> to vector<64x512xbf16>
    %c64_64 = arith.constant 64 : index
    %c1536_65 = arith.constant 1536 : index
    %51 = vector.load %arg10[%c64_64, %c1536_65] : memref<128x4608xbf16, #tpu.memory_space<vmem>>, vector<64x512xbf16>
    tpu.vector_store %arg10[%c64_64, %c1536_65], %50 {strides = array<i32>} : memref<128x4608xbf16, #tpu.memory_space<vmem>>, vector<64x512xbf16>,
    %c1_66 = arith.constant 1 : index
    %c1_67 = arith.constant 1 : index
    %c1_68 = arith.constant 1 : index
    %c0_69 = arith.constant 0 : index
    %52 = vector.load %arg2[%c1_66, %c1_67, %c1_68, %c0_69] : memref<2x10x10x512xbf16, #tpu.memory_space<vmem>>, vector<1x8x8x512xbf16>
    %53 = vector.shape_cast %52 : vector<1x8x8x512xbf16> to vector<8x8x512xbf16>
    %54 = vector.shape_cast %53 : vector<8x8x512xbf16> to vector<64x512xbf16>
    %c64_70 = arith.constant 64 : index
    %c2048_71 = arith.constant 2048 : index
    %55 = vector.load %arg10[%c64_70, %c2048_71] : memref<128x4608xbf16, #tpu.memory_space<vmem>>, vector<64x512xbf16>
    tpu.vector_store %arg10[%c64_70, %c2048_71], %54 {strides = array<i32>} : memref<128x4608xbf16, #tpu.memory_space<vmem>>, vector<64x512xbf16>,
    %c1_72 = arith.constant 1 : index
    %c1_73 = arith.constant 1 : index
    %c2_74 = arith.constant 2 : index
    %c0_75 = arith.constant 0 : index
    %56 = vector.load %arg2[%c1_72, %c1_73, %c2_74, %c0_75] : memref<2x10x10x512xbf16, #tpu.memory_space<vmem>>, vector<1x8x8x512xbf16>
    %57 = vector.shape_cast %56 : vector<1x8x8x512xbf16> to vector<8x8x512xbf16>
    %58 = vector.shape_cast %57 : vector<8x8x512xbf16> to vector<64x512xbf16>
    %c64_76 = arith.constant 64 : index
    %c2560_77 = arith.constant 2560 : index
    %59 = vector.load %arg10[%c64_76, %c2560_77] : memref<128x4608xbf16, #tpu.memory_space<vmem>>, vector<64x512xbf16>
    tpu.vector_store %arg10[%c64_76, %c2560_77], %58 {strides = array<i32>} : memref<128x4608xbf16, #tpu.memory_space<vmem>>, vector<64x512xbf16>,
    %c1_78 = arith.constant 1 : index
    %c2_79 = arith.constant 2 : index
    %c0_80 = arith.constant 0 : index
    %c0_81 = arith.constant 0 : index
    %60 = vector.load %arg2[%c1_78, %c2_79, %c0_80, %c0_81] : memref<2x10x10x512xbf16, #tpu.memory_space<vmem>>, vector<1x8x8x512xbf16>
    %61 = vector.shape_cast %60 : vector<1x8x8x512xbf16> to vector<8x8x512xbf16>
    %62 = vector.shape_cast %61 : vector<8x8x512xbf16> to vector<64x512xbf16>
    %c64_82 = arith.constant 64 : index
    %c3072_83 = arith.constant 3072 : index
    %63 = vector.load %arg10[%c64_82, %c3072_83] : memref<128x4608xbf16, #tpu.memory_space<vmem>>, vector<64x512xbf16>
    tpu.vector_store %arg10[%c64_82, %c3072_83], %62 {strides = array<i32>} : memref<128x4608xbf16, #tpu.memory_space<vmem>>, vector<64x512xbf16>,
    %c1_84 = arith.constant 1 : index
    %c2_85 = arith.constant 2 : index
    %c1_86 = arith.constant 1 : index
    %c0_87 = arith.constant 0 : index
    %64 = vector.load %arg2[%c1_84, %c2_85, %c1_86, %c0_87] : memref<2x10x10x512xbf16, #tpu.memory_space<vmem>>, vector<1x8x8x512xbf16>
    %65 = vector.shape_cast %64 : vector<1x8x8x512xbf16> to vector<8x8x512xbf16>
    %66 = vector.shape_cast %65 : vector<8x8x512xbf16> to vector<64x512xbf16>
    %c64_88 = arith.constant 64 : index
    %c3584_89 = arith.constant 3584 : index
    %67 = vector.load %arg10[%c64_88, %c3584_89] : memref<128x4608xbf16, #tpu.memory_space<vmem>>, vector<64x512xbf16>
    tpu.vector_store %arg10[%c64_88, %c3584_89], %66 {strides = array<i32>} : memref<128x4608xbf16, #tpu.memory_space<vmem>>, vector<64x512xbf16>,
    %c1_90 = arith.constant 1 : index
    %c2_91 = arith.constant 2 : index
    %c2_92 = arith.constant 2 : index
    %c0_93 = arith.constant 0 : index
    %68 = vector.load %arg2[%c1_90, %c2_91, %c2_92, %c0_93] : memref<2x10x10x512xbf16, #tpu.memory_space<vmem>>, vector<1x8x8x512xbf16>
    %69 = vector.shape_cast %68 : vector<1x8x8x512xbf16> to vector<8x8x512xbf16>
    %70 = vector.shape_cast %69 : vector<8x8x512xbf16> to vector<64x512xbf16>
    %c64_94 = arith.constant 64 : index
    %c4096_95 = arith.constant 4096 : index
    %71 = vector.load %arg10[%c64_94, %c4096_95] : memref<128x4608xbf16, #tpu.memory_space<vmem>>, vector<64x512xbf16>
    tpu.vector_store %arg10[%c64_94, %c4096_95], %70 {strides = array<i32>} : memref<128x4608xbf16, #tpu.memory_space<vmem>>, vector<64x512xbf16>,
    %c0_i32 = arith.constant 0 : i32
    %72 = arith.cmpi eq, %arg1, %c0_i32 : i32
    %73 = arith.extui %72 : i1 to i32
    %c0_i32_96 = arith.constant 0 : i32
    %74 = arith.cmpi ne, %73, %c0_i32_96 : i32
    scf.if %74 {
      %cst_108 = arith.constant 0.000000e+00 : f32
      %85 = vector.broadcast %cst_108 : f32 to vector<128x256xf32>
      %c0_109 = arith.constant 0 : index
      %c0_110 = arith.constant 0 : index
      %86 = vector.load %arg9[%c0_109, %c0_110] : memref<128x256xf32, #tpu.memory_space<vmem>>, vector<128x256xf32>
      tpu.vector_store %arg9[%c0_109, %c0_110], %85 {strides = array<i32>} : memref<128x256xf32, #tpu.memory_space<vmem>>, vector<128x256xf32>,
    } else {
    }
    %c0_97 = arith.constant 0 : index
    %c0_98 = arith.constant 0 : index
    %75 = vector.load %arg9[%c0_97, %c0_98] : memref<128x256xf32, #tpu.memory_space<vmem>>, vector<128x256xf32>
    %c0_99 = arith.constant 0 : index
    %c0_100 = arith.constant 0 : index
    %76 = vector.load %arg10[%c0_99, %c0_100] : memref<128x4608xbf16, #tpu.memory_space<vmem>>, vector<128x4608xbf16>
    %c0_101 = arith.constant 0 : index
    %c0_102 = arith.constant 0 : index
    %c0_103 = arith.constant 0 : index
    %c0_104 = arith.constant 0 : index
    %77 = vector.load %arg3[%c0_101, %c0_102, %c0_103, %c0_104] : memref<1x1x4608x256xbf16, #tpu.memory_space<vmem>>, vector<1x1x4608x256xbf16>
    %78 = vector.shape_cast %77 : vector<1x1x4608x256xbf16> to vector<4608x256xbf16>
    %cst = arith.constant dense<0.000000e+00> : vector<128x256xf32>
    %79 = tpu.matmul %76, %78, %cst {dimension_numbers = #tpu.dot_dimension_numbers<[1], [0], [0], [1], [0, 0, 1, 1], [], []>} : vector<128x4608xbf16>, vector<4608x256xbf16>, vector<128x256xf32> -> vector<128x256xf32>
    %80 = arith.addf %75, %79 : vector<128x256xf32>
    %c0_105 = arith.constant 0 : index
    %c0_106 = arith.constant 0 : index
    %81 = vector.load %arg9[%c0_105, %c0_106] : memref<128x256xf32, #tpu.memory_space<vmem>>, vector<128x256xf32>
    tpu.vector_store %arg9[%c0_105, %c0_106], %80 {strides = array<i32>} : memref<128x256xf32, #tpu.memory_space<vmem>>, vector<128x256xf32>,
    %c3_i32 = arith.constant 3 : i32
    %82 = arith.cmpi eq, %arg1, %c3_i32 : i32
    %83 = arith.extui %82 : i1 to i32
    %c0_i32_107 = arith.constant 0 : i32
    %84 = arith.cmpi ne, %83, %c0_i32_107 : i32
    scf.if %84 {
      %c0_108 = arith.constant 0 : index
      %c0_109 = arith.constant 0 : index
      %85 = vector.load %arg9[%c0_108, %c0_109] : memref<128x256xf32, #tpu.memory_space<vmem>>, vector<128x256xf32>
      %c0_110 = arith.constant 0 : index
      %c0_111 = arith.constant 0 : index
      %c0_112 = arith.constant 0 : index
      %86 = vector.load %arg4[%c0_110, %c0_111, %c0_112] : memref<1x1x256xf32, #tpu.memory_space<vmem>>, vector<1x1x256xf32>
      %87 = vector.shape_cast %86 : vector<1x1x256xf32> to vector<256xf32>
      %88 = vector.shape_cast %87 : vector<256xf32> to vector<1x256xf32>
      %89 = vector.broadcast %88 : vector<1x256xf32> to vector<128x256xf32>
      %90 = arith.mulf %85, %89 : vector<128x256xf32>
      %c0_113 = arith.constant 0 : index
      %c0_114 = arith.constant 0 : index
      %c0_115 = arith.constant 0 : index
      %91 = vector.load %arg5[%c0_113, %c0_114, %c0_115] : memref<1x1x256xf32, #tpu.memory_space<vmem>>, vector<1x1x256xf32>
      %92 = vector.shape_cast %91 : vector<1x1x256xf32> to vector<256xf32>
      %93 = vector.shape_cast %92 : vector<256xf32> to vector<1x256xf32>
      %94 = vector.broadcast %93 : vector<1x256xf32> to vector<128x256xf32>
      %95 = arith.addf %90, %94 : vector<128x256xf32>
      %96 = vector.shape_cast %95 : vector<128x256xf32> to vector<2x8x8x256xf32>
      %c0_116 = arith.constant 0 : index
      %c0_117 = arith.constant 0 : index
      %c0_118 = arith.constant 0 : index
      %c0_119 = arith.constant 0 : index
      %97 = vector.load %arg8[%c0_116, %c0_117, %c0_118, %c0_119] : memref<2x8x8x256xf32, #tpu.memory_space<vmem>>, vector<2x8x8x256xf32>
      tpu.vector_store %arg8[%c0_116, %c0_117, %c0_118, %c0_119], %96 {strides = array<i32>} : memref<2x8x8x256xf32, #tpu.memory_space<vmem>>, vector<2x8x8x256xf32>,
      %cst_120 = arith.constant 0.000000e+00 : f32
      %98 = vector.broadcast %cst_120 : f32 to vector<128x256xf32>
      %99 = arith.maximumf %95, %98 : vector<128x256xf32>
      %100 = arith.truncf %99 : vector<128x256xf32> to vector<128x256xbf16>
      %c0_121 = arith.constant 0 : index
      %c0_122 = arith.constant 0 : index
      %c0_123 = arith.constant 0 : index
      %101 = vector.load %arg6[%c0_121, %c0_122, %c0_123] : memref<1x256x128xbf16, #tpu.memory_space<vmem>>, vector<1x256x128xbf16>
      %102 = vector.shape_cast %101 : vector<1x256x128xbf16> to vector<256x128xbf16>
      %cst_124 = arith.constant dense<0.000000e+00> : vector<128x128xf32>
      %103 = tpu.matmul %100, %102, %cst_124 {dimension_numbers = #tpu.dot_dimension_numbers<[1], [0], [0], [1], [0, 0, 1, 1], [], []>} : vector<128x256xbf16>, vector<256x128xbf16>, vector<128x128xf32> -> vector<128x128xf32>
      %104 = vector.shape_cast %103 : vector<128x128xf32> to vector<1x2x8x8x128xf32>
      %c0_125 = arith.constant 0 : index
      %c0_126 = arith.constant 0 : index
      %c0_127 = arith.constant 0 : index
      %c0_128 = arith.constant 0 : index
      %c0_129 = arith.constant 0 : index
      %105 = vector.load %arg7[%c0_125, %c0_126, %c0_127, %c0_128, %c0_129] : memref<1x2x8x8x128xf32, #tpu.memory_space<vmem>>, vector<1x2x8x8x128xf32>
      tpu.vector_store %arg7[%c0_125, %c0_126, %c0_127, %c0_128, %c0_129], %104 {strides = array<i32>} : memref<1x2x8x8x128xf32, #tpu.memory_space<vmem>>, vector<1x2x8x8x128xf32>,
    } else {
    }
    return
  }
  func.func @transform_0(%arg0: i32, %arg1: i32) -> (i32, i32, i32, i32) {
    %c0_i32 = arith.constant 0 : i32
    %c0_i32_0 = arith.constant 0 : i32
    %c0_i32_1 = arith.constant 0 : i32
    %c0_i32_2 = arith.constant 0 : i32
    return %c0_i32, %c0_i32_0, %c0_i32_1, %arg1 : i32, i32, i32, i32
  }
  func.func @transform_1(%arg0: i32, %arg1: i32) -> (i32, i32, i32, i32) {
    %c0_i32 = arith.constant 0 : i32
    %c0_i32_0 = arith.constant 0 : i32
    %c0_i32_1 = arith.constant 0 : i32
    return %arg1, %arg0, %c0_i32, %c0_i32_0 : i32, i32, i32, i32
  }
  func.func @transform_2(%arg0: i32, %arg1: i32) -> (i32, i32, i32) {
    %c0_i32 = arith.constant 0 : i32
    %c0_i32_0 = arith.constant 0 : i32
    %c0_i32_1 = arith.constant 0 : i32
    return %arg0, %c0_i32, %c0_i32_0 : i32, i32, i32
  }
  func.func @transform_3(%arg0: i32, %arg1: i32) -> (i32, i32, i32) {
    %c0_i32 = arith.constant 0 : i32
    %c0_i32_0 = arith.constant 0 : i32
    %c0_i32_1 = arith.constant 0 : i32
    return %arg0, %c0_i32, %c0_i32_0 : i32, i32, i32
  }
  func.func @transform_4(%arg0: i32, %arg1: i32) -> (i32, i32, i32) {
    %c0_i32 = arith.constant 0 : i32
    %c0_i32_0 = arith.constant 0 : i32
    %c0_i32_1 = arith.constant 0 : i32
    return %arg0, %c0_i32, %c0_i32_0 : i32, i32, i32
  }
  func.func @transform_5(%arg0: i32, %arg1: i32) -> (i32, i32, i32, i32, i32) {
    %c0_i32 = arith.constant 0 : i32
    %c0_i32_0 = arith.constant 0 : i32
    %c0_i32_1 = arith.constant 0 : i32
    %c0_i32_2 = arith.constant 0 : i32
    %c0_i32_3 = arith.constant 0 : i32
    return %arg0, %c0_i32, %c0_i32_0, %c0_i32_1, %c0_i32_2 : i32, i32, i32, i32, i32
  }
  func.func @transform_6(%arg0: i32, %arg1: i32) -> (i32, i32, i32, i32) {
    %c0_i32 = arith.constant 0 : i32
    %c0_i32_0 = arith.constant 0 : i32
    %c0_i32_1 = arith.constant 0 : i32
    %c0_i32_2 = arith.constant 0 : i32
    return %c0_i32, %c0_i32_0, %c0_i32_1, %arg0 : i32, i32, i32, i32
  }
}

</mosaic_0001>

<bundles_post_ra>
// kernel: tpu_custom_call.1
= control target key start
LH: loop header
LB: loop body
LE: loop exit
PB: predicated region body
PF: predicated region fallthrough
CT: control target
= control target key end

     0   :  { %s17187_s0 = inlined_call_operand.vmem [shape: bf16[2,10,10,2048], index: 0, kind: input, shape index: {}]   ;;  %s17188_s1 = inlined_call_operand.hbm [shape: bf16[4,2,4608,256], index: 1, kind: input, shape index: {}]   ;;  %s17189_s2 = inlined_call_operand.hbm [shape: f32[2,1,256], index: 2, kind: input, shape index: {}]   ;;  %s17190_s3 = inlined_call_operand.hbm [shape: f32[2,1,256], index: 3, kind: input, shape index: {}]   ;;  %s17191_s4 = inlined_call_operand.hbm [shape: bf16[2,256,128], index: 4, kind: input, shape index: {}]   ;;  %s17192_s5 = inlined_call_operand.hbm [shape: f32[2,2,8,8,128], index: 5, kind: output, shape index: {0}]   ;;  %s17193_s6 = inlined_call_operand.hbm [shape: f32[2,8,8,512], index: 6, kind: output, shape index: {1}]  }
   0x1   :  { %17213 = sst [smem:[#allocation35_spill]] %s17187_s0 }
   0x2   :  { %17214 = sst [smem:[#allocation36_spill]] %s17189_s2 }
   0x3   :  { %17215 = sst [smem:[#allocation37_spill]] %s17192_s5 }
   0x4   :  { %17216 = sst [smem:[#allocation38_spill]] %s17193_s6 }
   0x5   :  { %12 = vsyncpa [#allocation6], 0 }
   0x6   :  { %14 = vsyncpa [#allocation6 + $0x1], 0 }
   0x7   :  { %15 = vsyncpa [#allocation9], 0 }
   0x8   :  { %17 = vsyncpa [#allocation9 + $0x1], 0 }
   0x9   :  { %18 = vsyncpa [#allocation12], 0 }
   0xa   :  { %20 = vsyncpa [#allocation12 + $0x1], 0 }
   0xb   :  { %21 = vsyncpa [#allocation7], 0 }
   0xc   :  { %23 = vsyncpa [#allocation7 + $0x1], 0 }
   0xd   :  { %24 = vsyncpa [#allocation15], 0 }
   0xe   :  { %26 = vsyncpa [#allocation15 + $0x1], 0  ;;  %s14552_s21 = smov 0   ;;  %s14554_s22 = smov 0  }
   0xf   :  { %s14556_s23 = smov 0   ;;  %s14558_s24 = smov 0  }
  0x10   :  { %s14560_s25 = smov 0   ;;  %s14562_s26 = smov 0  }
  0x11   :  { %s14564_s27 = smov 0   ;;  %s14566_s28 = smov 0  }
  0x12   :  { %s14568_s29 = smov 0   ;;  %s14570_s30 = smov 0  }
  0x13   :  { %s14572_s7 = smov 0   ;;  %s14574_s8 = smov 0  }
  0x14   :  { %s14576_s9 = smov 0  }
  0x15 LB: > { %17217 = sst [smem:[#allocation21_spill]] %s14451_s21  ;;  %s14618_s10 = sadd.s32 4294967295, %s14499_s9   ;;  %s14499_s9 = sphi %s14576_s9, %s32_s9   ;;  %s14495_s8 = sphi %s14574_s8, %s17280_s8   ;;  %s14491_s7 = sphi %s14572_s7, %s17279_s7   ;;  %s14487_s30 = sphi %s14570_s30, %s17278_s30   ;;  %s14483_s29 = sphi %s14568_s29, %s17277_s29   ;;  %s14479_s28 = sphi %s14566_s28, %s17268_s28   ;;  %s14475_s27 = sphi %s14564_s27, %s17267_s27   ;;  %s14471_s26 = sphi %s14562_s26, %s17276_s26   ;;  %s14467_s25 = sphi %s14560_s25, %s17275_s25   ;;  %s14463_s24 = sphi %s14558_s24, %s17274_s24   ;;  %s14459_s23 = sphi %s14556_s23, %s17273_s23   ;;  %s14455_s22 = sphi %s14554_s22, %s17264_s22   ;;  %s14451_s21 = sphi %s14552_s21, %s17272_s21  }
  0x16   : > { %17218 = sst [smem:[#allocation22_spill]] %s14455_s22  ;;  %s41_s12 = sadd.s32 1, %s14491_s7 }
  0x17   : > { %17219 = sst [smem:[#allocation23_spill]] %s14459_s23  ;;  %s44_s13 = sadd.s32 1, %s14495_s8 }
  0x18   : > { %17220 = sst [smem:[#allocation24_spill]] %s14479_s28  ;;  %p42_p0 = scmp.ge.s32.totalorder %s41_s12, 4 }
  0x19   : > { %17221 = sst [smem:[#allocation25_spill]] %s14483_s29  ;;  %s51_s14 = sadd.s32 1, %s14479_s28 }
  0x1a   : > { %17222 = sst [smem:[#allocation26_spill]] %s14487_s30  ;;  %p58_p1 = scmp.ne.s32.totalorder %s14479_s28, %s14475_s27 }
  0x1b   : > { %p59_p2 = scmp.eq.s32.totalorder %s14499_s9, 0  ;;  %s17282_s12 = smov (%p42_p0, %s41_s12), 0 }
  0x1c   : > { %17223 = sst [smem:[#allocation27_spill]] %s17282_s12  ;;  %s17284_s13 = smov (!%p42_p0, %s44_s13), %s14495_s8 }
  0x1d   : > { %s48_s15 = ssub.s32 %s14491_s7, %s17282_s12  ;;  %p14634_p3 = por %p59_p2, %p58_p1 }
  0x1e   : > { %p46_p4 = scmp.ge.s32.totalorder %s17284_s13, 2  ;;  %p49_p5 = scmp.eq.s32.totalorder %s48_s15, 0 }
  0x1f   : > { %s79_s17 = sadd.s32 1, %s14471_s26  ;;  %p86_p6 = scmp.ne.s32.totalorder %s14471_s26, %s14467_s25 }
  0x20   : > { %s17286_s13 = smov (%p46_p4, %s17284_s13), 0  ;;  %p92_p8 = scmp.ne.s32.totalorder %s14467_s25, %s14463_s24 }
  0x21   : > { %17225 = sst [smem:[#allocation28_spill]] %s17286_s13  ;;  %s75_s19 = ssub.s32 %s14495_s8, %s17286_s13 }
  0x22   : > { %s14644_s18 = scalar_select %p49_p5, %s14479_s28, %s51_s14  }
  0x23   : > { %p14650_p7 = por %p86_p6, %p59_p2  ;;  %s76_s11 = sor.u32 %s75_s19, %s48_s15 }
  0x24   : > { %17226 = sst [smem:[#allocation29_spill]] %s14644_s18  ;;  %p77_p9 = scmp.eq.s32.totalorder %s76_s11, 0 }
  0x25   : > { %p93_p10 = scmp.eq.s32.totalorder %s14618_s10, 0  ;;  %p103_p11 = scmp.eq.s32.totalorder %s75_s19, 0 }
  0x26   : > { %s105_s12 = sadd.s32 1, %s14459_s23  ;;  %p112_p13 = scmp.ne.s32.totalorder %s14459_s23, %s14455_s22 }
  0x27   : > { %s14659_s6 = scalar_select %p77_p9, %s14471_s26, %s79_s17  }
  0x28   : > { %p14661_p12 = por %p93_p10, %p92_p8  ;;  %p14672_p0 = por %p112_p13, %p59_p2 }
  0x29   : > { %17228 = sst [smem:[#allocation30_spill]] %s14659_s6  ;;  %p118_p1 = scmp.ne.s32.totalorder %s14455_s22, %s14451_s21 }
  0x2a   : > { %s17229_s5 = scalar_select %p14661_p12, 1, 0 }
  0x2b   : > { %s14668_s14 = scalar_select %p103_p11, %s14459_s23, %s105_s12  }
  0x2c   : > { %p194_p4 = scmp.eq.s32.totalorder %s14618_s10, 7  ;;  %s17232_s24 = sadd.s32 4294967294, %s14499_s9  }
  0x2d   : > { %17230 = sst [smem:[#allocation31_spill]] %s14668_s14  ;;  %p200_p5 = scmp.eq.s32.totalorder %s17232_s24, 7 }
  0x2e   : > { %p14681_p6 = por %p118_p1, %p93_p10  ;;  %p14685_p8 = por %p194_p4, %p112_p13 }
  0x2f   : > { %p14689_p9 = por %p200_p5, %p118_p1  ;;  %p11154_p2 = scmp.ge.s32.totalorder %s14499_s9, 8 }
  0x30   : > { %s17233_s11 = scalar_select %p14681_p6, 1, 0 }
  0x31   : > { %s17235_s15 = scalar_select %p14685_p8, 1, 0 }
  0x32   : > { %17234 = sst [smem:[#allocation32_spill]] %s17233_s11  ;;  %242 = sbr.rel (%p11154_p2) target bundleno = 215 (0xd7), region = 16 }
  0x33   : > { %17236 = sst [smem:[#allocation33_spill]] %s17235_s15 }
  0x34   : > { %s17237_s12 = scalar_select %p14689_p9, 1, 0 }
  0x36   : > { %17238 = sst [smem:[#allocation34_spill]] %s17237_s12 }
  0x39   : > { %245 = sbr.rel (!%p14634_p3) target bundleno = 107 (0x6b), region = 20  ;;  %s247_s17 = sand.u32 (%p14634_p3), 1, %s14479_s28  }
  0x3a   : > { %s12559_s19 = sshll.u32 (%p14634_p3), %s14491_s7, 4  ;;  %s13189_s24 = smul.u32 (%p14634_p3), 640, %s247_s17 }
  0x3b   : > { %s17239_s0 = sld [smem:[#allocation35_spill]] (%p14634_p3) }
  0x3c   : > { %s14709_s6 = scalar_lea.vmem (%p14634_p3), [#allocation4], %s13189_s24 }
  0x41   : > { %s14701_s14 = scalar_lea.vmem %s17239_s0, %s12559_s19 }
  0x42   : > { %v265_v0 = vld [vmem:[%s14701_s14] sm:$0xff]  ;;  %v267_v1 = vld [vmem:[%s14701_s14 + $0x8] sm:$0xff] }
  0x43   : > { %v269_v2 = vld [vmem:[%s14701_s14 + $0x40] sm:$0xff]  ;;  %v271_v3 = vld [vmem:[%s14701_s14 + $0x48] sm:$0xff]  ;;  %266 = vst [vmem:[%s14709_s6] sm:$0xff] %v265_v0  ;;  %268 = vst [vmem:[%s14709_s6 + $0x8] sm:$0xff] %v267_v1 }
  0x44   : > { %v273_v4 = vld [vmem:[%s14701_s14 + $0x80] sm:$0xff]  ;;  %v275_v5 = vld [vmem:[%s14701_s14 + $0x88] sm:$0xff]  ;;  %270 = vst [vmem:[%s14709_s6 + $0x10] sm:$0xff] %v269_v2  ;;  %272 = vst [vmem:[%s14709_s6 + $0x18] sm:$0xff] %v271_v3 }
  0x45   : > { %274 = vst [vmem:[%s14709_s6 + $0x20] sm:$0xff] %v273_v4  ;;  %276 = vst [vmem:[%s14709_s6 + $0x28] sm:$0xff] %v275_v5  ;;  %v277_v6 = vld [vmem:[%s14701_s14 + $0xc0] sm:$0xff]  ;;  %v279_v7 = vld [vmem:[%s14701_s14 + $0xc8] sm:$0xff] }
  0x46   : > { %v281_v8 = vld [vmem:[%s14701_s14 + $0x100] sm:$0xff]  ;;  %278 = vst [vmem:[%s14709_s6 + $0x30] sm:$0xff] %v277_v6  ;;  %280 = vst [vmem:[%s14709_s6 + $0x38] sm:$0xff] %v279_v7  ;;  %v283_v9 = vld [vmem:[%s14701_s14 + $0x108] sm:$0xff] }
  0x47   : > { %282 = vst [vmem:[%s14709_s6 + $0x40] sm:$0xff] %v281_v8  ;;  %v285_v10 = vld [vmem:[%s14701_s14 + $0x140] sm:$0xff]  ;;  %v287_v11 = vld [vmem:[%s14701_s14 + $0x148] sm:$0xff]  ;;  %284 = vst [vmem:[%s14709_s6 + $0x48] sm:$0xff] %v283_v9 }
  0x48   : > { %286 = vst [vmem:[%s14709_s6 + $0x50] sm:$0xff] %v285_v10  ;;  %288 = vst [vmem:[%s14709_s6 + $0x58] sm:$0xff] %v287_v11  ;;  %v289_v12 = vld [vmem:[%s14701_s14 + $0x180] sm:$0xff]  ;;  %v291_v13 = vld [vmem:[%s14701_s14 + $0x188] sm:$0xff] }
  0x49   : > { %v293_v14 = vld [vmem:[%s14701_s14 + $0x1c0] sm:$0xff]  ;;  %290 = vst [vmem:[%s14709_s6 + $0x60] sm:$0xff] %v289_v12  ;;  %292 = vst [vmem:[%s14709_s6 + $0x68] sm:$0xff] %v291_v13  ;;  %v295_v15 = vld [vmem:[%s14701_s14 + $0x1c8] sm:$0xff] }
  0x4a   : > { %294 = vst [vmem:[%s14709_s6 + $0x70] sm:$0xff] %v293_v14  ;;  %v297_v16 = vld [vmem:[%s14701_s14 + $0x200] sm:$0xff]  ;;  %v299_v17 = vld [vmem:[%s14701_s14 + $0x208] sm:$0xff]  ;;  %296 = vst [vmem:[%s14709_s6 + $0x78] sm:$0xff] %v295_v15 }
  0x4b   : > { %298 = vst [vmem:[%s14709_s6 + $0x80] sm:$0xff] %v297_v16  ;;  %300 = vst [vmem:[%s14709_s6 + $0x88] sm:$0xff] %v299_v17  ;;  %v301_v18 = vld [vmem:[%s14701_s14 + $0x240] sm:$0xff]  ;;  %v303_v19 = vld [vmem:[%s14701_s14 + $0x248] sm:$0xff] }
  0x4c   : > { %v305_v20 = vld [vmem:[%s14701_s14 + $0x280] sm:$0xff]  ;;  %302 = vst [vmem:[%s14709_s6 + $0x90] sm:$0xff] %v301_v18  ;;  %304 = vst [vmem:[%s14709_s6 + $0x98] sm:$0xff] %v303_v19  ;;  %v307_v21 = vld [vmem:[%s14701_s14 + $0x288] sm:$0xff] }
  0x4d   : > { %306 = vst [vmem:[%s14709_s6 + $0xa0] sm:$0xff] %v305_v20  ;;  %v309_v22 = vld [vmem:[%s14701_s14 + $0x2c0] sm:$0xff]  ;;  %v311_v23 = vld [vmem:[%s14701_s14 + $0x2c8] sm:$0xff]  ;;  %308 = vst [vmem:[%s14709_s6 + $0xa8] sm:$0xff] %v307_v21 }
  0x4e   : > { %310 = vst [vmem:[%s14709_s6 + $0xb0] sm:$0xff] %v309_v22  ;;  %312 = vst [vmem:[%s14709_s6 + $0xb8] sm:$0xff] %v311_v23  ;;  %v313_v24 = vld [vmem:[%s14701_s14 + $0x300] sm:$0xff]  ;;  %v315_v25 = vld [vmem:[%s14701_s14 + $0x308] sm:$0xff] }
  0x4f   : > { %v317_v26 = vld [vmem:[%s14701_s14 + $0x340] sm:$0xff]  ;;  %314 = vst [vmem:[%s14709_s6 + $0xc0] sm:$0xff] %v313_v24  ;;  %316 = vst [vmem:[%s14709_s6 + $0xc8] sm:$0xff] %v315_v25  ;;  %v319_v27 = vld [vmem:[%s14701_s14 + $0x348] sm:$0xff] }
  0x50   : > { %318 = vst [vmem:[%s14709_s6 + $0xd0] sm:$0xff] %v317_v26  ;;  %v321_v28 = vld [vmem:[%s14701_s14 + $0x380] sm:$0xff]  ;;  %v323_v29 = vld [vmem:[%s14701_s14 + $0x388] sm:$0xff]  ;;  %320 = vst [vmem:[%s14709_s6 + $0xd8] sm:$0xff] %v319_v27 }
  0x51   : > { %322 = vst [vmem:[%s14709_s6 + $0xe0] sm:$0xff] %v321_v28  ;;  %324 = vst [vmem:[%s14709_s6 + $0xe8] sm:$0xff] %v323_v29  ;;  %v325_v30 = vld [vmem:[%s14701_s14 + $0x3c0] sm:$0xff]  ;;  %v327_v31 = vld [vmem:[%s14701_s14 + $0x3c8] sm:$0xff] }
  0x52   : > { %v329_v32 = vld [vmem:[%s14701_s14 + $0x400] sm:$0xff]  ;;  %326 = vst [vmem:[%s14709_s6 + $0xf0] sm:$0xff] %v325_v30  ;;  %328 = vst [vmem:[%s14709_s6 + $0xf8] sm:$0xff] %v327_v31  ;;  %v331_v33 = vld [vmem:[%s14701_s14 + $0x408] sm:$0xff] }
  0x53   : > { %330 = vst [vmem:[%s14709_s6 + $0x100] sm:$0xff] %v329_v32  ;;  %v333_v34 = vld [vmem:[%s14701_s14 + $0x440] sm:$0xff]  ;;  %v335_v35 = vld [vmem:[%s14701_s14 + $0x448] sm:$0xff]  ;;  %332 = vst [vmem:[%s14709_s6 + $0x108] sm:$0xff] %v331_v33 }
  0x54   : > { %334 = vst [vmem:[%s14709_s6 + $0x110] sm:$0xff] %v333_v34  ;;  %336 = vst [vmem:[%s14709_s6 + $0x118] sm:$0xff] %v335_v35  ;;  %v337_v36 = vld [vmem:[%s14701_s14 + $0x480] sm:$0xff]  ;;  %v339_v37 = vld [vmem:[%s14701_s14 + $0x488] sm:$0xff] }
  0x55   : > { %v341_v38 = vld [vmem:[%s14701_s14 + $0x4c0] sm:$0xff]  ;;  %338 = vst [vmem:[%s14709_s6 + $0x120] sm:$0xff] %v337_v36  ;;  %340 = vst [vmem:[%s14709_s6 + $0x128] sm:$0xff] %v339_v37  ;;  %v343_v39 = vld [vmem:[%s14701_s14 + $0x4c8] sm:$0xff] }
  0x56   : > { %342 = vst [vmem:[%s14709_s6 + $0x130] sm:$0xff] %v341_v38  ;;  %v345_v40 = vld [vmem:[%s14701_s14 + $0x500] sm:$0xff]  ;;  %v347_v41 = vld [vmem:[%s14701_s14 + $0x508] sm:$0xff]  ;;  %344 = vst [vmem:[%s14709_s6 + $0x138] sm:$0xff] %v343_v39 }
  0x57   : > { %346 = vst [vmem:[%s14709_s6 + $0x140] sm:$0xff] %v345_v40  ;;  %348 = vst [vmem:[%s14709_s6 + $0x148] sm:$0xff] %v347_v41  ;;  %v349_v42 = vld [vmem:[%s14701_s14 + $0x540] sm:$0xff]  ;;  %v351_v43 = vld [vmem:[%s14701_s14 + $0x548] sm:$0xff] }
  0x58   : > { %v353_v44 = vld [vmem:[%s14701_s14 + $0x580] sm:$0xff]  ;;  %350 = vst [vmem:[%s14709_s6 + $0x150] sm:$0xff] %v349_v42  ;;  %352 = vst [vmem:[%s14709_s6 + $0x158] sm:$0xff] %v351_v43  ;;  %v355_v45 = vld [vmem:[%s14701_s14 + $0x588] sm:$0xff] }
  0x59   : > { %354 = vst [vmem:[%s14709_s6 + $0x160] sm:$0xff] %v353_v44  ;;  %v357_v46 = vld [vmem:[%s14701_s14 + $0x5c0] sm:$0xff]  ;;  %v359_v47 = vld [vmem:[%s14701_s14 + $0x5c8] sm:$0xff]  ;;  %356 = vst [vmem:[%s14709_s6 + $0x168] sm:$0xff] %v355_v45 }
  0x5a   : > { %358 = vst [vmem:[%s14709_s6 + $0x170] sm:$0xff] %v357_v46  ;;  %360 = vst [vmem:[%s14709_s6 + $0x178] sm:$0xff] %v359_v47  ;;  %v361_v48 = vld [vmem:[%s14701_s14 + $0x600] sm:$0xff]  ;;  %v363_v49 = vld [vmem:[%s14701_s14 + $0x608] sm:$0xff] }
  0x5b   : > { %v365_v50 = vld [vmem:[%s14701_s14 + $0x640] sm:$0xff]  ;;  %362 = vst [vmem:[%s14709_s6 + $0x180] sm:$0xff] %v361_v48  ;;  %364 = vst [vmem:[%s14709_s6 + $0x188] sm:$0xff] %v363_v49  ;;  %v367_v51 = vld [vmem:[%s14701_s14 + $0x648] sm:$0xff] }
  0x5c   : > { %366 = vst [vmem:[%s14709_s6 + $0x190] sm:$0xff] %v365_v50  ;;  %v369_v52 = vld [vmem:[%s14701_s14 + $0x680] sm:$0xff]  ;;  %v371_v53 = vld [vmem:[%s14701_s14 + $0x688] sm:$0xff]  ;;  %368 = vst [vmem:[%s14709_s6 + $0x198] sm:$0xff] %v367_v51 }
  0x5d   : > { %370 = vst [vmem:[%s14709_s6 + $0x1a0] sm:$0xff] %v369_v52  ;;  %372 = vst [vmem:[%s14709_s6 + $0x1a8] sm:$0xff] %v371_v53  ;;  %v373_v54 = vld [vmem:[%s14701_s14 + $0x6c0] sm:$0xff]  ;;  %v375_v55 = vld [vmem:[%s14701_s14 + $0x6c8] sm:$0xff] }
  0x5e   : > { %v377_v56 = vld [vmem:[%s14701_s14 + $0x700] sm:$0xff]  ;;  %374 = vst [vmem:[%s14709_s6 + $0x1b0] sm:$0xff] %v373_v54  ;;  %376 = vst [vmem:[%s14709_s6 + $0x1b8] sm:$0xff] %v375_v55  ;;  %v379_v57 = vld [vmem:[%s14701_s14 + $0x708] sm:$0xff] }
  0x5f   : > { %378 = vst [vmem:[%s14709_s6 + $0x1c0] sm:$0xff] %v377_v56  ;;  %v381_v58 = vld [vmem:[%s14701_s14 + $0x740] sm:$0xff]  ;;  %v383_v59 = vld [vmem:[%s14701_s14 + $0x748] sm:$0xff]  ;;  %380 = vst [vmem:[%s14709_s6 + $0x1c8] sm:$0xff] %v379_v57 }
  0x60   : > { %382 = vst [vmem:[%s14709_s6 + $0x1d0] sm:$0xff] %v381_v58  ;;  %384 = vst [vmem:[%s14709_s6 + $0x1d8] sm:$0xff] %v383_v59  ;;  %v385_v60 = vld [vmem:[%s14701_s14 + $0x780] sm:$0xff]  ;;  %v387_v61 = vld [vmem:[%s14701_s14 + $0x788] sm:$0xff] }
  0x61   : > { %v389_v62 = vld [vmem:[%s14701_s14 + $0x7c0] sm:$0xff]  ;;  %386 = vst [vmem:[%s14709_s6 + $0x1e0] sm:$0xff] %v385_v60  ;;  %388 = vst [vmem:[%s14709_s6 + $0x1e8] sm:$0xff] %v387_v61  ;;  %v391_v63 = vld [vmem:[%s14701_s14 + $0x7c8] sm:$0xff] }
  0x62   : > { %390 = vst [vmem:[%s14709_s6 + $0x1f0] sm:$0xff] %v389_v62  ;;  %v393_v0 = vld [vmem:[%s14701_s14 + $0x800] sm:$0xff]  ;;  %v395_v1 = vld [vmem:[%s14701_s14 + $0x808] sm:$0xff]  ;;  %392 = vst [vmem:[%s14709_s6 + $0x1f8] sm:$0xff] %v391_v63 }
  0x63   : > { %394 = vst [vmem:[%s14709_s6 + $0x200] sm:$0xff] %v393_v0  ;;  %396 = vst [vmem:[%s14709_s6 + $0x208] sm:$0xff] %v395_v1  ;;  %v397_v2 = vld [vmem:[%s14701_s14 + $0x840] sm:$0xff]  ;;  %v399_v3 = vld [vmem:[%s14701_s14 + $0x848] sm:$0xff] }
  0x64   : > { %v401_v4 = vld [vmem:[%s14701_s14 + $0x880] sm:$0xff]  ;;  %398 = vst [vmem:[%s14709_s6 + $0x210] sm:$0xff] %v397_v2  ;;  %400 = vst [vmem:[%s14709_s6 + $0x218] sm:$0xff] %v399_v3  ;;  %v403_v5 = vld [vmem:[%s14701_s14 + $0x888] sm:$0xff] }
  0x65   : > { %402 = vst [vmem:[%s14709_s6 + $0x220] sm:$0xff] %v401_v4  ;;  %v405_v6 = vld [vmem:[%s14701_s14 + $0x8c0] sm:$0xff]  ;;  %v407_v7 = vld [vmem:[%s14701_s14 + $0x8c8] sm:$0xff]  ;;  %404 = vst [vmem:[%s14709_s6 + $0x228] sm:$0xff] %v403_v5 }
  0x66   : > { %406 = vst [vmem:[%s14709_s6 + $0x230] sm:$0xff] %v405_v6  ;;  %408 = vst [vmem:[%s14709_s6 + $0x238] sm:$0xff] %v407_v7  ;;  %v409_v8 = vld [vmem:[%s14701_s14 + $0x900] sm:$0xff]  ;;  %v411_v9 = vld [vmem:[%s14701_s14 + $0x908] sm:$0xff] }
  0x67   : > { %v413_v10 = vld [vmem:[%s14701_s14 + $0x940] sm:$0xff]  ;;  %410 = vst [vmem:[%s14709_s6 + $0x240] sm:$0xff] %v409_v8  ;;  %412 = vst [vmem:[%s14709_s6 + $0x248] sm:$0xff] %v411_v9  ;;  %v415_v11 = vld [vmem:[%s14701_s14 + $0x948] sm:$0xff] }
  0x68   : > { %414 = vst [vmem:[%s14709_s6 + $0x250] sm:$0xff] %v413_v10  ;;  %v417_v12 = vld [vmem:[%s14701_s14 + $0x980] sm:$0xff]  ;;  %v419_v13 = vld [vmem:[%s14701_s14 + $0x988] sm:$0xff]  ;;  %416 = vst [vmem:[%s14709_s6 + $0x258] sm:$0xff] %v415_v11 }
  0x69   : > { %418 = vst [vmem:[%s14709_s6 + $0x260] sm:$0xff] %v417_v12  ;;  %420 = vst [vmem:[%s14709_s6 + $0x268] sm:$0xff] %v419_v13  ;;  %v421_v14 = vld [vmem:[%s14701_s14 + $0x9c0] sm:$0xff]  ;;  %v423_v15 = vld [vmem:[%s14701_s14 + $0x9c8] sm:$0xff] }
  0x6a   : > { %422 = vst [vmem:[%s14709_s6 + $0x270] sm:$0xff] %v421_v14  ;;  %424 = vst [vmem:[%s14709_s6 + $0x278] sm:$0xff] %v423_v15 }
  0x6b PF: > { %s454_s16 = sand.u32 1, %s14499_s9   ;;  %s14867_s18 = sand.u32 1, %s14459_s23  }
  0x6c   : > { %s17209_s17 = sshll.u32 %s14867_s18, 1  ;;  %s17202_s19 = sshll.u32 %s14495_s8, 5 }
  0x6d   : > { %s17240_s2 = sld [smem:[#allocation36_spill]]  ;;  %s458_s6 = scalar_lea.vmem [#allocation8], %s17209_s17 }
  0x6e   : > { %s466_s28 = sshll.u32 %s458_s6, 4  ;;  %s431_s23 = sand.u32 1, %s14471_s26   ;;  %s14880_s28 = int_to_ptr.vmem [resolvable:$true] %s466_s28 }
  0x6f   : > { %s14883_s12 = scalar_lea.sflag [#allocation9], %s454_s16 }
  0x73   : > { %s14876_s14 = scalar_lea.hbm %s17240_s2, %s17202_s19  ;;  %s14213_s19 = scalar_lea.hbm %s17240_s2, 64 }
  0x74   : > { %s14209_s21 = scalar_lea.hbm %s14876_s14, 32  ;;  %p14214_p13 = scmp.lt.u32.totalorder %s14876_s14, %s17240_s2 }
  0x75   : > { %p14210_p3 = scmp.ne.s32.totalorder %s14876_s14, %s14209_s21  ;;  %p14215_p1 = scmp.lt.u32.totalorder %s14213_s19, %s14209_s21 }
  0x76   : > { %p14217_p5 = scmp.lt.u32.totalorder %s14209_s21, %s14876_s14 }
  0x77   : > { %p14211_p10 = pnand %p14210_p3, %p14672_p0  ;;  %p14216_p4 = por %p14215_p1, %p14214_p13 }
  0x79   : > { %p14212_p11 = pneg %p14211_p10  ;;  %p14218_p2 = por %p14217_p5, %p14216_p4 }
  0x7b   : > { %p14219_p9 = pnand %p14218_p2, %p14212_p11 }
  0x7d   : > { %14222 = shalt.err (!%p14219_p9)
}
  0x7e   : > { %s14223_s16 = scalar_lea.vmem %s14880_s28, 32  ;;  %s14501_s6 = smov [#allocation8]  }
  0x7f   : > { %p14224_p3 = scmp.ne.s32.totalorder %s14880_s28, %s14223_s16  ;;  %s14227_s0 = sshll.u32 %s14501_s6, 4  ;;  %s14228_s0 = int_to_ptr.vmem [resolvable:$false] %s14227_s0 }
  0x80   : > { %s14229_s30 = scalar_lea.vmem %s14228_s0, 64  ;;  %p14230_p6 = scmp.lt.s32.totalorder %s14880_s28, %s14228_s0 }
  0x81   : > { %p14225_p10 = pnand %p14224_p3, %p14672_p0  ;;  %p14231_p12 = scmp.lt.s32.totalorder %s14229_s30, %s14223_s16 }
  0x83   : > { %p14226_p8 = pneg %p14225_p10  ;;  %p14232_p13 = por %p14231_p12, %p14230_p6 }
  0x85   : > { %p14233_p1 = pnand %p14232_p13, %p14226_p8 }
  0x87   : > { %14236 = shalt.err (!%p14233_p1)
}
  0x88   : > { %13196 = dma.hbm_to_vmem [thread:$0]  (%p14672_p0), %s14876_s14, 32, %s14880_s28, %s14883_s12  }
  0x89   : > { %s13190_s21 = smul.u32 4608, %s431_s23  ;;  %s17241_s29 = sshll.u32 %s14495_s8, 5 }
  0x8a   : > { %s13191_s15 = smul.u32 1152, %s14495_s8  ;;  %s14923_s28 = scalar_lea.hbm %s17190_s3, %s17241_s29 }
  0x8b   : > { %s13192_s19 = smul.u32 2304, %s14491_s7  ;;  %s435_s24 = scalar_lea.vmem [#allocation5], %s13190_s21 }
  0x8c   : > { %s444_s16 = sshll.u32 %s435_s24, 4  ;;  %s14927_s14 = scalar_lea.sflag [#allocation6], %s431_s23  ;;  %s14911_s16 = int_to_ptr.vmem [resolvable:$true] %s444_s16 }
  0x8d   : > { %s441_s6 = sadd.s32 %s13192_s19, %s13191_s15  ;;  %s14241_s19 = scalar_lea.hbm %s17188_s1, 589824 }
  0x8e   : > { %s11157_s0 = sshll.u32 %s441_s6, 6 }
  0x8f   : > { %s14916_s2 = scalar_lea.hbm %s17188_s1, %s11157_s0 }
  0x90   : > { %s14237_s21 = scalar_lea.hbm %s14916_s2, 73728  ;;  %p14242_p9 = scmp.lt.u32.totalorder %s14916_s2, %s17188_s1 }
  0x91   : > { %p14238_p12 = scmp.ne.s32.totalorder %s14916_s2, %s14237_s21  ;;  %p14243_p11 = scmp.lt.u32.totalorder %s14241_s19, %s14237_s21 }
  0x92   : > { %p14245_p5 = scmp.lt.u32.totalorder %s14237_s21, %s14916_s2 }
  0x93   : > { %p14239_p6 = pnand %p14238_p12, %p14650_p7  ;;  %p14244_p4 = por %p14243_p11, %p14242_p9 }
  0x95   : > { %p14240_p8 = pneg %p14239_p6  ;;  %p14246_p2 = por %p14245_p5, %p14244_p4 }
  0x97   : > { %p14247_p3 = pnand %p14246_p2, %p14240_p8 }
  0x99   : > { %14250 = shalt.err (!%p14247_p3)
}
  0x9a   : > { %s14251_s23 = scalar_lea.vmem %s14911_s16, 73728  ;;  %s14502_s29 = smov [#allocation5]  }
  0x9b   : > { %p14252_p10 = scmp.ne.s32.totalorder %s14911_s16, %s14251_s23  ;;  %s14255_s11 = sshll.u32 %s14502_s29, 4  ;;  %s14256_s11 = int_to_ptr.vmem [resolvable:$false] %s14255_s11 }
  0x9c   : > { %s14257_s6 = scalar_lea.vmem %s14256_s11, 147456  ;;  %p14258_p12 = scmp.lt.s32.totalorder %s14911_s16, %s14256_s11 }
  0x9d   : > { %p14253_p13 = pnand %p14252_p10, %p14650_p7  ;;  %p14259_p6 = scmp.lt.s32.totalorder %s14257_s6, %s14251_s23 }
  0x9f   : > { %p14254_p1 = pneg %p14253_p13  ;;  %p14260_p9 = por %p14259_p6, %p14258_p12 }
  0xa1   : > { %p14261_p11 = pnand %p14260_p9, %p14254_p1 }
  0xa3   : > { %14264 = shalt.err (!%p14261_p11)
}
  0xa4   : > { %s14503_s0 = smov 128   ;;  %s14504_s30 = smov 8  }
  0xa5   : > { %13195 = dma.hbm_to_vmem [thread:$0]  (%p14650_p7), %s14916_s2, 73728, %s14911_s16, %s14927_s14, %s14503_s0, %s14503_s0, %s14504_s30  }
  0xa6   : > { %s17242_s21 = sshll.u32 %s14867_s18, 1  ;;  %s11164_s19 = sshll.u32 %s14867_s18, 7 }
  0xa7   : > { %s477_s17 = scalar_lea.vmem [#allocation10], %s17242_s21  ;;  %s14265_s24 = scalar_lea.hbm %s14923_s28, 32 }
  0xa8   : > { %s485_s15 = sshll.u32 %s477_s17, 4  ;;  %p14266_p8 = scmp.ne.s32.totalorder %s14923_s28, %s14265_s24  ;;  %s486_s15 = int_to_ptr.vmem [resolvable:$true] %s485_s15 }
  0xa9   : > { %s14269_s29 = scalar_lea.hbm %s17190_s3, 64  ;;  %p14270_p2 = scmp.lt.u32.totalorder %s14923_s28, %s17190_s3 }
  0xaa   : > { %p14267_p4 = pnand %p14266_p8, %p14672_p0  ;;  %p14271_p3 = scmp.lt.u32.totalorder %s14269_s29, %s14265_s24 }
  0xab   : > { %p14273_p10 = scmp.lt.u32.totalorder %s14265_s24, %s14923_s28 }
  0xac   : > { %p14268_p5 = pneg %p14267_p4  ;;  %p14272_p7 = por %p14271_p3, %p14270_p2 }
  0xae   : > { %p14274_p13 = por %p14273_p10, %p14272_p7 }
  0xb0   : > { %p14275_p1 = pnand %p14274_p13, %p14268_p5 }
  0xb2   : > { %14278 = shalt.err (!%p14275_p1)
}
  0xb3   : > { %s14279_s2 = scalar_lea.vmem %s486_s15, 32  ;;  %s14505_s20 = smov [#allocation10]  }
  0xb4   : > { %p14280_p12 = scmp.ne.s32.totalorder %s486_s15, %s14279_s2  ;;  %s14283_s16 = sshll.u32 %s14505_s20, 4  ;;  %s14284_s16 = int_to_ptr.vmem [resolvable:$false] %s14283_s16 }
  0xb5   : > { %s14285_s14 = scalar_lea.vmem %s14284_s16, 64  ;;  %p14286_p11 = scmp.lt.s32.totalorder %s486_s15, %s14284_s16 }
  0xb6   : > { %p14281_p6 = pnand %p14280_p12, %p14672_p0  ;;  %p14287_p8 = scmp.lt.s32.totalorder %s14285_s14, %s14279_s2 }
  0xb8   : > { %p14282_p9 = pneg %p14281_p6  ;;  %p14288_p4 = por %p14287_p8, %p14286_p11 }
  0xba   : > { %p14289_p2 = pnand %p14288_p4, %p14282_p9 }
  0xbc   : > { %14292 = shalt.err (!%p14289_p2)
}
  0xbd   : > { %13197 = dma.hbm_to_vmem [thread:$0]  (%p14672_p0), %s14923_s28, 32, %s486_s15, %s14883_s12  }
  0xbe   : > { %s12562_s0 = sshll.u32 %s14495_s8, 11  ;;  %s496_s24 = scalar_lea.vmem [#allocation11], %s11164_s19 }
  0xbf   : > { %s14976_s17 = scalar_lea.hbm %s17191_s4, %s12562_s0  ;;  %s503_s22 = sshll.u32 %s496_s24, 4  ;;  %s14980_s22 = int_to_ptr.vmem [resolvable:$true] %s503_s22 }
  0xc0   : > { %s493_s23 = scalar_lea.sflag [#allocation12], %s14867_s18  ;;  %s14293_s29 = scalar_lea.hbm %s14976_s17, 2048 }
  0xc1   : > { %p14294_p5 = scmp.ne.s32.totalorder %s14976_s17, %s14293_s29  ;;  %s14297_s15 = scalar_lea.hbm %s17191_s4, 4096 }
  0xc2   : > { %p14298_p10 = scmp.lt.u32.totalorder %s14976_s17, %s17191_s4  ;;  %p14299_p13 = scmp.lt.u32.totalorder %s14297_s15, %s14293_s29 }
  0xc3   : > { %p14295_p3 = pnand %p14294_p5, %p14672_p0  ;;  %p14301_p12 = scmp.lt.u32.totalorder %s14293_s29, %s14976_s17 }
  0xc4   : > { %p14300_p1 = por %p14299_p13, %p14298_p10 }
  0xc5   : > { %p14296_p7 = pneg %p14295_p3 }
  0xc6   : > { %p14302_p6 = por %p14301_p12, %p14300_p1 }
  0xc8   : > { %p14303_p9 = pnand %p14302_p6, %p14296_p7 }
  0xca   : > { %14306 = shalt.err (!%p14303_p9)
}
  0xcb   : > { %s14307_s19 = scalar_lea.vmem %s14980_s22, 2048  ;;  %s14506_s2 = smov [#allocation11]  }
  0xcc   : > { %p14308_p11 = scmp.ne.s32.totalorder %s14980_s22, %s14307_s19  ;;  %s14311_s20 = sshll.u32 %s14506_s2, 4  ;;  %s14312_s20 = int_to_ptr.vmem [resolvable:$false] %s14311_s20 }
  0xcd   : > { %s14313_s16 = scalar_lea.vmem %s14312_s20, 4096  ;;  %p14314_p2 = scmp.lt.s32.totalorder %s14980_s22, %s14312_s20 }
  0xce   : > { %p14309_p8 = pnand %p14308_p11, %p14672_p0  ;;  %p14315_p5 = scmp.lt.s32.totalorder %s14313_s16, %s14307_s19 }
  0xd0   : > { %p14310_p4 = pneg %p14309_p8  ;;  %p14316_p3 = por %p14315_p5, %p14314_p2 }
  0xd2   : > { %p14317_p10 = pnand %p14316_p3, %p14310_p4 }
  0xd4   : > { %14320 = shalt.err (!%p14317_p10)
}
  0xd5   : > { %s14507_s14 = smov 64   ;;  %s14508_s0 = smov 4  }
  0xd6   : > { %13198 = dma.hbm_to_vmem [thread:$0]  (%p14672_p0), %s14976_s17, 2048, %s14980_s22, %s493_s23, %s14507_s14, %s14507_s14, %s14508_s0  }
  0xd7 PF: > { %p11167_p7 = scmp.ge.s32.totalorder %s14499_s9, 1  ;;  %p511_p13 = scmp.lt.s32.totalorder %s14499_s9, 9 }
  0xd9   : > { %p512_p1 = pnand %p11167_p7, %p511_p13 }
  0xda   : > { %s518_s30 = sand.u32 (!%p512_p1), 1, %s14475_s27   ;;  %s524_s21 = sand.u32 (!%p512_p1), 1, %s14467_s25  }
  0xdb   : > { %515 = sbr.rel (%p512_p1) target bundleno = 1737 (0x6c9), region = 59  ;;  %s525_s28 = scalar_lea.sflag (!%p512_p1), [#allocation6], %s524_s21 }
  0xdc   : > { %s13193_s24 = smul.u32 (!%p512_p1), 640, %s518_s30  ;;  %p17243_p0 = scmp.ne.s32.totalorder (!%p512_p1), %s17229_s5, 0 }
  0xdd   : > { %s13194_s29 = smul.u32 (!%p512_p1), 4608, %s524_s21 }
  0xde   : > { %s15010_s12 = scalar_lea.vmem (!%p512_p1), [#allocation4], %s13193_s24 }
  0xdf   : > { %s15012_s13 = scalar_lea.vmem (!%p512_p1), [#allocation5], %s13194_s29 }
  0xe2   : > { %14430 = dma.done.wait (%p17243_p0), %s525_s28, 73728  }
  0xe3   : > { %14432 = vsyncadd (%p17243_p0), %s525_s28, 4294893568  ;;  %s17244_s18 = sld [smem:[#allocation22_spill]]  ;;  %s17245_s17 = sld [smem:[#allocation32_spill]] }
  0xe4   : > { %s533_s22 = sand.u32 1, %s14618_s10  }
  0xe5   : > { %s534_s15 = scalar_lea.sflag [#allocation9], %s533_s22 }
  0xe9   : > { %s15020_s23 = sand.u32 1, %s17244_s18   ;;  %p17246_p12 = scmp.ne.s32.totalorder %s17245_s17, 0 }
  0xea   : > { %s11168_s27 = sshll.u32 %s15020_s23, 1 }
  0xeb   : > { %s15023_s11 = scalar_lea.vmem [#allocation8], %s11168_s27 }
  0xec   : > { %14434 = dma.done.wait (%p17246_p12), %s534_s15, 64  }
  0xed   : > { %14436 = vsyncadd (%p17246_p12), %s534_s15, 4294967232  ;;  %s11170_s5 = sshll.u32 %s15020_s23, 7  ;;  %s15030_s6 = scalar_lea.vmem [#allocation10], %s11168_s27 }
  0xee   : > { %s552_s10 = scalar_lea.sflag [#allocation12], %s15020_s23  ;;  %s15035_s19 = scalar_lea.vmem [#allocation11], %s11170_s5 }
  0xef   : > { %14438 = dma.done.wait (%p17246_p12), %s552_s10, 2048  }
  0xf0   : > { %14440 = vsyncadd (%p17246_p12), %s552_s10, 4294965248  ;;  %s11172_s2 = sshll.u32 %s15020_s23, 8  ;;  %vm755_vm0 = vsmask.f32 3328  ;;  %v611_v16 = vld [vmem:[%s15010_s12] sm:$0xff]  ;;  %v15047_v18 = vld [vmem:[%s15010_s12 + $0x8] sm:$0xff] }
  0xf1   : > { %v15044_v17 = vld [vmem:[%s15010_s12 + $0x20] sm:$0xff]  ;;  %vm756_vm1 = vsmask.f32 7440  ;;  %v15052_v21 = vld [vmem:[%s15010_s12 + $0x28] sm:$0xff]  ;;  %v759_v24 = vshrl.u32 %v611_v16, 16  ;;  %v762_v25 = vshll.u32 %v611_v16, 16 }
  0xf2   : > { %v11173_v19 = vcombine.low %v611_v16, %v15044_v17  ;;  %v11174_v20 = vcombine.high %v611_v16, %v15044_v17  ;;  %v15055_v22 = vld [vmem:[%s15010_s12 + $0x40] sm:$0xff]  ;;  %v11175_v26 = vcombine.low %v15047_v18, %v15052_v21  ;;  %v11176_v27 = vcombine.high %v15047_v18, %v15052_v21  ;;  %v15069_v30 = vld [vmem:[%s15010_s12 + $0x48] sm:$0xff]  ;;  %v725_v50 = vld [vmem:[%s15010_s12 + $0x10] sm:$0x11]  ;;  %s16350_s20 = scalar_lea.vmem [#allocation13], %s11170_s5  ;;  %s16354_s16 = scalar_lea.vmem [#allocation14], %s11172_s2 }
  0xf3   : > { %v15058_v23 = vld [vmem:[%s15010_s12 + $0x60] sm:$0xff]  ;;  %v15072_v31 = vld [vmem:[%s15010_s12 + $0x68] sm:$0xff]  ;;  %v761_v38 = vrot.slane %v759_v24, 4  ;;  %v764_v39 = vrot.slane %v762_v25, 5  ;;  %v729_v51 = vld [vmem:[%s15010_s12 + $0x30] sm:$0x11] }
  0xf4   : > { %v11177_v28 = vcombine.low %v15055_v22, %v15058_v23  ;;  %v11178_v29 = vcombine.high %v15055_v22, %v15058_v23  ;;  %v15075_v32 = vld [vmem:[%s15010_s12 + $0x80] sm:$0xff]  ;;  %707 = vst [vmem:[#allocation3] sm:$0xff] %v11173_v19  ;;  %708 = vst [vmem:[#allocation3 + $0x8] sm:$0xff] %v11174_v20  ;;  %v11179_v33 = vcombine.low %v15069_v30, %v15072_v31  ;;  %v15085_v36 = vld [vmem:[%s15010_s12 + $0x88] sm:$0xff]  ;;  %v787_v53 = vshrl.u32 %v15044_v17, 16  ;;  %s17251_s14 = sld [smem:[#allocation25_spill]] }
  0xf5   : > { %v11180_v34 = vcombine.high %v15069_v30, %v15072_v31  ;;  %v15082_v35 = vld [vmem:[%s15010_s12 + $0xa0] sm:$0xff]  ;;  %v15088_v37 = vld [vmem:[%s15010_s12 + $0xa8] sm:$0xff]  ;;  %709 = vst [vmem:[#allocation3 + $0x10] sm:$0xff] %v11175_v26  ;;  %710 = vst [vmem:[#allocation3 + $0x18] sm:$0xff] %v11176_v27  ;;  %v765_v52 = vor.u32 %v764_v39, %v761_v38  ;;  %v768_v56 = vshll.u32 %v725_v50, 16  ;;  %v790_v57 = vshll.u32 %v15044_v17, 16 }
  0xf6   : > { %711 = vst [vmem:[#allocation3 + $0x120] sm:$0xff] %v11177_v28  ;;  %712 = vst [vmem:[#allocation3 + $0x128] sm:$0xff] %v11178_v29  ;;  %v11181_v40 = vcombine.low %v15075_v32, %v15082_v35  ;;  %v11182_v41 = vcombine.high %v15075_v32, %v15082_v35  ;;  %v11183_v42 = vcombine.low %v15085_v36, %v15088_v37  ;;  %v15099_v44 = vld [vmem:[%s15010_s12 + $0xc0] sm:$0xff]  ;;  %v15105_v46 = vld [vmem:[%s15010_s12 + $0xc8] sm:$0xff]  ;;  %v789_v61 = vrot.slane %v787_v53, 4 }
  0xf7   : > { %v11184_v43 = vcombine.high %v15085_v36, %v15088_v37  ;;  %v15102_v45 = vld [vmem:[%s15010_s12 + $0xe0] sm:$0xff]  ;;  %713 = vst [vmem:[#allocation3 + $0x130] sm:$0xff] %v11179_v33  ;;  %714 = vst [vmem:[#allocation3 + $0x138] sm:$0xff] %v11180_v34  ;;  %v15112_v49 = vld [vmem:[%s15010_s12 + $0xe8] sm:$0xff]  ;;  %v766_v60 = vrot.slane %v765_v52, 4  ;;  %v796_v62 = vshll.u32 %v729_v51, 16 }
  0xf8   : > { %v11185_v47 = vcombine.low %v15099_v44, %v15102_v45  ;;  %v11186_v48 = vcombine.high %v15099_v44, %v15102_v45  ;;  %715 = vst [vmem:[#allocation3 + $0x240] sm:$0xff] %v11181_v40  ;;  %716 = vst [vmem:[#allocation3 + $0x248] sm:$0xff] %v11182_v41  ;;  %v11187_v54 = vcombine.low %v15105_v46, %v15112_v49  ;;  %v726_v58 = vld [vmem:[%s15010_s12 + $0x18] sm:$0x11]  ;;  %v773_v63 = vshrl.u32 %v15047_v18, 16 }
  0xf9   : > { %717 = vst [vmem:[#allocation3 + $0x250] sm:$0xff] %v11183_v42  ;;  %718 = vst [vmem:[#allocation3 + $0x258] sm:$0xff] %v11184_v43  ;;  %v11188_v55 = vcombine.high %v15105_v46, %v15112_v49  ;;  %v770_v0 = vrot.slane %v768_v56, 5  ;;  %v792_v1 = vrot.slane %v790_v57, 5  ;;  %v730_v2 = vld [vmem:[%s15010_s12 + $0x38] sm:$0x11] }
  0xfa   : > { %719 = vst [vmem:[#allocation3 + $0x360] sm:$0xff] %v11185_v47  ;;  %720 = vst [vmem:[#allocation3 + $0x368] sm:$0xff] %v11186_v48  ;;  %v776_v3 = vshll.u32 %v15047_v18, 16  ;;  %v782_v4 = vshll.u32 %v726_v58, 16  ;;  %v798_v5 = vrot.slane %v796_v62, 5  ;;  %v775_v6 = vrot.slane %v773_v63, 4 }
  0xfb   : > { %vm15125_vm2 = vmor %vm755_vm0, %vm756_vm1  ;;  %721 = vst [vmem:[#allocation3 + $0x370] sm:$0xff] %v11187_v54  ;;  %v801_v7 = vshrl.u32 %v15052_v21, 16  ;;  %v804_v8 = vshll.u32 %v15052_v21, 16  ;;  %v733_v9 = vld [vmem:[%s15010_s12 + $0x50] sm:$0x11]  ;;  %v793_v11 = vor.u32 %v792_v1, %v789_v61  ;;  %v810_v16 = vshll.u32 %v730_v2, 16 }
  0xfc   : > { %722 = vst [vmem:[#allocation3 + $0x378] sm:$0xff] %v11188_v55  ;;  %v771_v10 = vsel %vm15125_vm2, %v766_v60, %v770_v0  ;;  %v778_v12 = vrot.slane %v776_v3, 5  ;;  %v784_v13 = vrot.slane %v782_v4, 5  ;;  %v815_v18 = vshrl.u32 %v15055_v22, 16  ;;  %v737_v28 = vld [vmem:[%s15010_s12 + $0x70] sm:$0x11] }
  0xfd   : > { %v803_v14 = vrot.slane %v801_v7, 4  ;;  %v806_v15 = vrot.slane %v804_v8, 5  ;;  %v15138_v19 = vrot.slane %v793_v11, 4  ;;  %v818_v24 = vshll.u32 %v15055_v22, 16  ;;  %v734_v41 = vld [vmem:[%s15010_s12 + $0x58] sm:$0x11] }
  0xfe   : > { %v779_v20 = vor.u32 %v778_v12, %v775_v6  ;;  %v824_v25 = vshll.u32 %v733_v9, 16  ;;  %v812_v27 = vrot.slane %v810_v16, 5  ;;  %v817_v29 = vrot.slane %v815_v18, 4  ;;  %v738_v63 = vld [vmem:[%s15010_s12 + $0x78] sm:$0x11]  ;;  %p11957_p6 = scmp.ne.s32.totalorder %s17251_s14, 0 }
  0xff   : > { %v807_v26 = vor.u32 %v806_v15, %v803_v14  ;;  %v843_v33 = vshrl.u32 %v15058_v23, 16  ;;  %v799_v34 = vsel %vm15125_vm2, %v15138_v19, %v798_v5  ;;  %v820_v39 = vrot.slane %v818_v24, 5  ;;  %v741_v4 = vld [vmem:[%s15010_s12 + $0x90] sm:$0x11]  ;;  %v11910_v59 = vld [vmem:[%s15010_s12 + $0x208] sm:$0xee] }
 0x100   : > { %v780_v38 = vrot.slane %v779_v20, 4  ;;  %v826_v40 = vrot.slane %v824_v25, 5  ;;  %v11189_v42 = vcombine.low %v771_v10, %v799_v34  ;;  %v11190_v43 = vcombine.high %v771_v10, %v799_v34  ;;  %v745_v24 = vld [vmem:[%s15010_s12 + $0xb0] sm:$0x11]  ;;  %v742_v34 = vld [vmem:[%s15010_s12 + $0x98] sm:$0x11] }
 0x101   : > { %v15147_v47 = vrot.slane %v807_v26, 4  ;;  %v845_v48 = vrot.slane %v843_v33, 4  ;;  %v821_v51 = vor.u32 %v820_v39, %v817_v29  ;;  %v846_v52 = vshll.u32 %v15058_v23, 16 }
 0x102   : > { %v785_v50 = vsel %vm15125_vm2, %v780_v38, %v784_v13  ;;  %v852_v53 = vshll.u32 %v737_v28, 16  ;;  %1046 = vst [vmem:[#allocation3 + $0x20] sm:$0xff] %v11189_v42  ;;  %1047 = vst [vmem:[#allocation3 + $0x28] sm:$0xff] %v11190_v43  ;;  %v829_v55 = vshrl.u32 %v15069_v30, 16  ;;  %v832_v56 = vshll.u32 %v15069_v30, 16 }
 0x103   : > { %v813_v54 = vsel %vm15125_vm2, %v15147_v47, %v812_v27  ;;  %v838_v57 = vshll.u32 %v734_v41, 16  ;;  %v15157_v61 = vrot.slane %v821_v51, 4  ;;  %v848_v62 = vrot.slane %v846_v52, 5 }
 0x104   : > { %v11191_v58 = vcombine.low %v785_v50, %v813_v54  ;;  %v11192_v60 = vcombine.high %v785_v50, %v813_v54  ;;  %v854_v0 = vrot.slane %v852_v53, 5  ;;  %v831_v1 = vrot.slane %v829_v55, 4 }
 0x105   : > { %v834_v2 = vrot.slane %v832_v56, 5  ;;  %v840_v3 = vrot.slane %v838_v57, 5  ;;  %v827_v5 = vsel %vm15125_vm2, %v15157_v61, %v826_v40  ;;  %v849_v6 = vor.u32 %v848_v62, %v845_v48 }
 0x106   : > { %1048 = vst [vmem:[#allocation3 + $0x30] sm:$0xff] %v11191_v58  ;;  %1049 = vst [vmem:[#allocation3 + $0x38] sm:$0xff] %v11192_v60  ;;  %v857_v7 = vshrl.u32 %v15072_v31, 16  ;;  %v860_v8 = vshll.u32 %v15072_v31, 16  ;;  %v866_v10 = vshll.u32 %v738_v63, 16  ;;  %v871_v11 = vshrl.u32 %v15075_v32, 16 }
 0x107   : > { %v835_v9 = vor.u32 %v834_v2, %v831_v1  ;;  %v874_v12 = vshll.u32 %v15075_v32, 16  ;;  %v15168_v13 = vrot.slane %v849_v6, 4  ;;  %v880_v16 = vshll.u32 %v741_v4, 16  ;;  %v746_v58 = vld [vmem:[%s15010_s12 + $0xb8] sm:$0x11] }
 0x108   : > { %v859_v14 = vrot.slane %v857_v7, 4  ;;  %v862_v15 = vrot.slane %v860_v8, 5  ;;  %v868_v20 = vrot.slane %v866_v10, 5  ;;  %v873_v25 = vrot.slane %v871_v11, 4  ;;  %v749_v2 = vld [vmem:[%s15010_s12 + $0xd0] sm:$0x11] }
 0x109   : > { %v15170_v18 = vrot.slane %v835_v9, 4  ;;  %v876_v26 = vrot.slane %v874_v12, 5  ;;  %v855_v27 = vsel %vm15125_vm2, %v15168_v13, %v854_v0  ;;  %v882_v29 = vrot.slane %v880_v16, 5 }
 0x10a   : > { %v863_v28 = vor.u32 %v862_v15, %v859_v14  ;;  %v899_v33 = vshrl.u32 %v15082_v35, 16  ;;  %v11193_v38 = vcombine.low %v827_v5, %v855_v27  ;;  %v11194_v39 = vcombine.high %v827_v5, %v855_v27 }
 0x10b   : > { %v841_v40 = vsel %vm15125_vm2, %v15170_v18, %v840_v3  ;;  %v877_v41 = vor.u32 %v876_v26, %v873_v25  ;;  %v902_v48 = vshll.u32 %v15082_v35, 16  ;;  %v908_v50 = vshll.u32 %v745_v24, 16  ;;  %v753_v24 = vld [vmem:[%s15010_s12 + $0xf0] sm:$0x11] }
 0x10c   : > { %v15181_v42 = vrot.slane %v863_v28, 4  ;;  %v901_v43 = vrot.slane %v899_v33, 4  ;;  %1050 = vst [vmem:[#allocation3 + $0x140] sm:$0xff] %v11193_v38  ;;  %1051 = vst [vmem:[#allocation3 + $0x148] sm:$0xff] %v11194_v39  ;;  %v885_v52 = vshrl.u32 %v15085_v36, 16  ;;  %v888_v53 = vshll.u32 %v15085_v36, 16 }
 0x10d   : > { %v15184_v51 = vrot.slane %v877_v41, 4  ;;  %v894_v54 = vshll.u32 %v742_v34, 16  ;;  %v904_v56 = vrot.slane %v902_v48, 5  ;;  %v910_v57 = vrot.slane %v908_v50, 5  ;;  %v750_v34 = vld [vmem:[%s15010_s12 + $0xd8] sm:$0x11] }
 0x10e   : > { %v869_v55 = vsel %vm15125_vm2, %v15181_v42, %v868_v20  ;;  %v913_v60 = vshrl.u32 %v15088_v37, 16  ;;  %v887_v1 = vrot.slane %v885_v52, 4  ;;  %v890_v4 = vrot.slane %v888_v53, 5  ;;  %v754_v52 = vld [vmem:[%s15010_s12 + $0xf8] sm:$0x11] }
 0x10f   : > { %v11195_v62 = vcombine.low %v841_v40, %v869_v55  ;;  %v11196_v63 = vcombine.high %v841_v40, %v869_v55  ;;  %v883_v0 = vsel %vm15125_vm2, %v15184_v51, %v882_v29  ;;  %v905_v3 = vor.u32 %v904_v56, %v901_v43 }
 0x110   : > { %v896_v5 = vrot.slane %v894_v54, 5  ;;  %v915_v6 = vrot.slane %v913_v60, 4  ;;  %vm1126_vm3 = vcmask 1042432   ;;  %vm1127_vm4 = vcmask 1046532  }
 0x111   : > { %1052 = vst [vmem:[#allocation3 + $0x150] sm:$0xff] %v11195_v62  ;;  %1053 = vst [vmem:[#allocation3 + $0x158] sm:$0xff] %v11196_v63  ;;  %v916_v7 = vshll.u32 %v15088_v37, 16  ;;  %v922_v8 = vshll.u32 %v746_v58, 16  ;;  %v927_v9 = vshrl.u32 %v15099_v44, 16  ;;  %v930_v10 = vshll.u32 %v15099_v44, 16 }
 0x112   : > { %v15200_v11 = vrot.slane %v905_v3, 4  ;;  %v891_v12 = vor.u32 %v890_v4, %v887_v1  ;;  %v936_v14 = vshll.u32 %v749_v2, 16  ;;  %v955_v15 = vshrl.u32 %v15102_v45, 16  ;;  %v1062_v58 = vld [vmem:[%s15010_s12] sm:$0xee]  ;;  %vm15234_vm5 = vmor %vm1126_vm3, %vm1127_vm4 }
 0x113   : > { %v918_v16 = vrot.slane %v916_v7, 5  ;;  %v924_v20 = vrot.slane %v922_v8, 5  ;;  %v929_v25 = vrot.slane %v927_v9, 4  ;;  %v932_v26 = vrot.slane %v930_v10, 5  ;;  %v1064_v1 = vld [vmem:[%s15010_s12 + $0x10] sm:$0x11] }
 0x114   : > { %v911_v27 = vsel %vm15125_vm2, %v15200_v11, %v910_v57  ;;  %v15207_v28 = vrot.slane %v891_v12, 4  ;;  %v938_v29 = vrot.slane %v936_v14, 5  ;;  %v957_v33 = vrot.slane %v955_v15, 4  ;;  %v1068_v7 = vld [vmem:[%s15010_s12 + $0x30] sm:$0x11] }
 0x115   : > { %v11197_v38 = vcombine.low %v883_v0, %v911_v27  ;;  %v11198_v39 = vcombine.high %v883_v0, %v911_v27  ;;  %v919_v40 = vor.u32 %v918_v16, %v915_v6  ;;  %v933_v41 = vor.u32 %v932_v26, %v929_v25  ;;  %v1066_v6 = vld [vmem:[%s15010_s12 + $0x20] sm:$0xee]  ;;  %v1063_v14 = vld [vmem:[%s15010_s12 + $0x8] sm:$0xee]  ;;  %v1065_v15 = vld [vmem:[%s15010_s12 + $0x18] sm:$0x11] }
 0x116   : > { %v897_v43 = vsel %vm15125_vm2, %v15207_v28, %v896_v5  ;;  %v958_v48 = vshll.u32 %v15102_v45, 16  ;;  %v964_v50 = vshll.u32 %v753_v24, 16  ;;  %v941_v53 = vshrl.u32 %v15105_v46, 16  ;;  %v1067_v27 = vld [vmem:[%s15010_s12 + $0x28] sm:$0xee] }
 0x117   : > { %1054 = vst [vmem:[#allocation3 + $0x260] sm:$0xff] %v11197_v38  ;;  %1055 = vst [vmem:[#allocation3 + $0x268] sm:$0xff] %v11198_v39  ;;  %v920_v54 = vrot.slane %v919_v40, 4  ;;  %v15216_v55 = vrot.slane %v933_v41, 4  ;;  %v944_v56 = vshll.u32 %v15105_v46, 16  ;;  %v950_v57 = vshll.u32 %v750_v34, 16 }
 0x118   : > { %v960_v60 = vrot.slane %v958_v48, 5  ;;  %v966_v62 = vrot.slane %v964_v50, 5  ;;  %v943_v63 = vrot.slane %v941_v53, 4  ;;  %v969_v0 = vshrl.u32 %v15112_v49, 16  ;;  %v1069_v39 = vld [vmem:[%s15010_s12 + $0x38] sm:$0x11] }
 0x119   : > { %v925_v2 = vsel %vm15125_vm2, %v920_v54, %v924_v20  ;;  %v939_v3 = vsel %vm15125_vm2, %v15216_v55, %v938_v29  ;;  %v946_v4 = vrot.slane %v944_v56, 5  ;;  %v952_v5 = vrot.slane %v950_v57, 5  ;;  %v1070_v50 = vld [vmem:[%s15010_s12 + $0x40] sm:$0xee]  ;;  %v1072_v57 = vld [vmem:[%s15010_s12 + $0x50] sm:$0x11] }
 0x11a   : > { %v11199_v8 = vcombine.low %v897_v43, %v925_v2  ;;  %v11200_v9 = vcombine.high %v897_v43, %v925_v2  ;;  %v961_v10 = vor.u32 %v960_v60, %v957_v33  ;;  %v971_v12 = vrot.slane %v969_v0, 4  ;;  %v1071_v2 = vld [vmem:[%s15010_s12 + $0x48] sm:$0xee] }
 0x11b   : > { %v947_v16 = vor.u32 %v946_v4, %v943_v63  ;;  %v972_v24 = vshll.u32 %v15112_v49, 16  ;;  %v978_v20 = vshll.u32 %v754_v52, 16  ;;  %v11205_v26 = vrot.slane %v1062_v58, 9  ;;  %v1074_v58 = vld [vmem:[%s15010_s12 + $0x60] sm:$0xee] }
 0x11c   : > { %1056 = vst [vmem:[#allocation3 + $0x270] sm:$0xff] %v11199_v8  ;;  %1057 = vst [vmem:[#allocation3 + $0x278] sm:$0xff] %v11200_v9  ;;  %v962_v29 = vrot.slane %v961_v10, 4  ;;  %v1131_v33 = vrot.slane %v1064_v1, 5  ;;  %v11207_v34 = vrot.slane %v1066_v6, 9  ;;  %v1139_v38 = vrot.slane %v1068_v7, 5 }
 0x11d   : > { %v15240_v40 = vrot.slane %v947_v16, 4  ;;  %v974_v41 = vrot.slane %v972_v24, 5  ;;  %v980_v43 = vrot.slane %v978_v20, 5  ;;  %v11206_v48 = vrot.slane %v1063_v14, 9  ;;  %v1073_v4 = vld [vmem:[%s15010_s12 + $0x58] sm:$0x11] }
 0x11e   : > { %v967_v52 = vsel %vm15125_vm2, %v962_v29, %v966_v62  ;;  %v1132_v53 = vsel %vm15234_vm5, %v11205_v26, %v1131_v33  ;;  %v1140_v54 = vsel %vm15234_vm5, %v11207_v34, %v1139_v38  ;;  %v1135_v56 = vrot.slane %v1065_v15, 5  ;;  %v1076_v62 = vld [vmem:[%s15010_s12 + $0x70] sm:$0x11]  ;;  %v1075_v10 = vld [vmem:[%s15010_s12 + $0x68] sm:$0xee] }
 0x11f   : > { %v11201_v60 = vcombine.low %v939_v3, %v967_v52  ;;  %v11202_v63 = vcombine.high %v939_v3, %v967_v52  ;;  %v953_v0 = vsel %vm15125_vm2, %v15240_v40, %v952_v5  ;;  %v975_v1 = vor.u32 %v974_v41, %v971_v12  ;;  %v1077_v14 = vld [vmem:[%s15010_s12 + $0x78] sm:$0x11]  ;;  %v1078_v16 = vld [vmem:[%s15010_s12 + $0x80] sm:$0xee]  ;;  %v1080_v29 = vld [vmem:[%s15010_s12 + $0x90] sm:$0x11] }
 0x120   : > { %v11221_v6 = vcombine.low %v1132_v53, %v1140_v54  ;;  %v11222_v7 = vcombine.high %v1132_v53, %v1140_v54  ;;  %v1136_v8 = vsel %vm15234_vm5, %v11206_v48, %v1135_v56  ;;  %v11208_v9 = vrot.slane %v1067_v27, 9  ;;  %v1082_v41 = vld [vmem:[%s15010_s12 + $0xa0] sm:$0xee]  ;;  %v1084_v48 = vld [vmem:[%s15010_s12 + $0xb0] sm:$0x11] }
 0x121   : > { %1058 = vst [vmem:[#allocation3 + $0x380] sm:$0xff] %v11201_v60  ;;  %1059 = vst [vmem:[#allocation3 + $0x388] sm:$0xff] %v11202_v63  ;;  %v976_v3 = vrot.slane %v975_v1, 4  ;;  %v1143_v15 = vrot.slane %v1069_v39, 5  ;;  %v11209_v5 = vrot.slane %v1070_v50, 9  ;;  %v1147_v12 = vrot.slane %v1072_v57, 5 }
 0x122   : > { %1257 = vst [vmem:[#allocation3 + $0x40] sm:$0xff] %v11221_v6  ;;  %1258 = vst [vmem:[#allocation3 + $0x48] sm:$0xff] %v11222_v7  ;;  %v11211_v24 = vrot.slane %v1074_v58, 9  ;;  %v1155_v20 = vrot.slane %v1076_v62, 5  ;;  %v11210_v26 = vrot.slane %v1071_v2, 9  ;;  %v1151_v27 = vrot.slane %v1073_v4, 5 }
 0x123   : > { %v981_v33 = vsel %vm15125_vm2, %v976_v3, %v980_v43  ;;  %v1144_v34 = vsel %vm15234_vm5, %v11208_v9, %v1143_v15  ;;  %v1148_v38 = vsel %vm15234_vm5, %v11209_v5, %v1147_v12  ;;  %v11212_v39 = vrot.slane %v1075_v10, 9  ;;  %v1079_v56 = vld [vmem:[%s15010_s12 + $0x88] sm:$0xee]  ;;  %v1081_v57 = vld [vmem:[%s15010_s12 + $0x98] sm:$0x11] }
 0x124   : > { %v11203_v50 = vcombine.low %v953_v0, %v981_v33  ;;  %v11204_v52 = vcombine.high %v953_v0, %v981_v33  ;;  %v11223_v53 = vcombine.low %v1136_v8, %v1144_v34  ;;  %v11224_v54 = vcombine.high %v1136_v8, %v1144_v34  ;;  %v1083_v58 = vld [vmem:[%s15010_s12 + $0xa8] sm:$0xee]  ;;  %v1085_v62 = vld [vmem:[%s15010_s12 + $0xb8] sm:$0x11]  ;;  %v1086_v2 = vld [vmem:[%s15010_s12 + $0xc0] sm:$0xee] }
 0x125   : > { %v1156_v43 = vsel %vm15234_vm5, %v11211_v24, %v1155_v20  ;;  %v1152_v60 = vsel %vm15234_vm5, %v11210_v26, %v1151_v27  ;;  %v1159_v63 = vrot.slane %v1077_v14, 5  ;;  %v11213_v1 = vrot.slane %v1078_v16, 9  ;;  %v1088_v8 = vld [vmem:[%s15010_s12 + $0xd0] sm:$0x11]  ;;  %v1090_v9 = vld [vmem:[%s15010_s12 + $0xe0] sm:$0xee] }
 0x126   : > { %1060 = vst [vmem:[#allocation3 + $0x390] sm:$0xff] %v11203_v50  ;;  %1061 = vst [vmem:[#allocation3 + $0x398] sm:$0xff] %v11204_v52  ;;  %v11225_v0 = vcombine.low %v1148_v38, %v1156_v43  ;;  %v11226_v4 = vcombine.high %v1148_v38, %v1156_v43  ;;  %v1163_v6 = vrot.slane %v1080_v29, 5  ;;  %v11215_v7 = vrot.slane %v1082_v41, 9  ;;  %v1092_v5 = vld [vmem:[%s15010_s12 + $0xf0] sm:$0x11] }
 0x127   : > { %1259 = vst [vmem:[#allocation3 + $0x50] sm:$0xff] %v11223_v53  ;;  %1260 = vst [vmem:[#allocation3 + $0x58] sm:$0xff] %v11224_v54  ;;  %v1160_v10 = vsel %vm15234_vm5, %v11212_v39, %v1159_v63  ;;  %v1171_v14 = vrot.slane %v1084_v48, 5  ;;  %v11214_v3 = vrot.slane %v1079_v56, 9  ;;  %v1167_v15 = vrot.slane %v1081_v57, 5 }
 0x128   : > { %1261 = vst [vmem:[#allocation3 + $0x160] sm:$0xff] %v11225_v0  ;;  %1262 = vst [vmem:[#allocation3 + $0x168] sm:$0xff] %v11226_v4  ;;  %v11227_v12 = vcombine.low %v1152_v60, %v1160_v10  ;;  %v11228_v16 = vcombine.high %v1152_v60, %v1160_v10  ;;  %v1164_v24 = vsel %vm15234_vm5, %v11213_v1, %v1163_v6  ;;  %v11216_v20 = vrot.slane %v1083_v58, 9  ;;  %v1087_v26 = vld [vmem:[%s15010_s12 + $0xc8] sm:$0xee] }
 0x129   : > { %v1089_v27 = vld [vmem:[%s15010_s12 + $0xd8] sm:$0x11]  ;;  %v1172_v29 = vsel %vm15234_vm5, %v11215_v7, %v1171_v14  ;;  %v1168_v33 = vsel %vm15234_vm5, %v11214_v3, %v1167_v15  ;;  %v1175_v34 = vrot.slane %v1085_v62, 5  ;;  %v11217_v38 = vrot.slane %v1086_v2, 9  ;;  %v1091_v39 = vld [vmem:[%s15010_s12 + $0xe8] sm:$0xee] }
 0x12a   : > { %1263 = vst [vmem:[#allocation3 + $0x170] sm:$0xff] %v11227_v12  ;;  %1264 = vst [vmem:[#allocation3 + $0x178] sm:$0xff] %v11228_v16  ;;  %v11229_v41 = vcombine.low %v1164_v24, %v1172_v29  ;;  %v11230_v48 = vcombine.high %v1164_v24, %v1172_v29  ;;  %v1179_v50 = vrot.slane %v1088_v8, 5  ;;  %v11219_v52 = vrot.slane %v1090_v9, 9  ;;  %v1093_v53 = vld [vmem:[%s15010_s12 + $0xf8] sm:$0x11] }
 0x12b   : > { %v1176_v54 = vsel %vm15234_vm5, %v11216_v20, %v1175_v34  ;;  %v1187_v56 = vrot.slane %v1092_v5, 5  ;;  %v11218_v57 = vrot.slane %v1087_v26, 9  ;;  %v1183_v58 = vrot.slane %v1089_v27, 5  ;;  %v11271_v5 = vld [vmem:[%s15010_s12 + $0x30] sm:$0x11] }
 0x12c   : > { %1265 = vst [vmem:[#allocation3 + $0x280] sm:$0xff] %v11229_v41  ;;  %1266 = vst [vmem:[#allocation3 + $0x288] sm:$0xff] %v11230_v48  ;;  %v11231_v43 = vcombine.low %v1168_v33, %v1176_v54  ;;  %v11232_v60 = vcombine.high %v1168_v33, %v1176_v54  ;;  %v1180_v63 = vsel %vm15234_vm5, %v11217_v38, %v1179_v50  ;;  %v11220_v1 = vrot.slane %v1091_v39, 9  ;;  %v11275_v12 = vld [vmem:[%s15010_s12 + $0x50] sm:$0x11] }
 0x12d   : > { %v1188_v62 = vsel %vm15234_vm5, %v11219_v52, %v1187_v56  ;;  %v1184_v2 = vsel %vm15234_vm5, %v11218_v57, %v1183_v58  ;;  %v1191_v0 = vrot.slane %v1093_v53, 5  ;;  %v11253_v4 = vcombine.low %v15044_v17, %v15055_v22  ;;  %v11279_v20 = vld [vmem:[%s15010_s12 + $0x70] sm:$0x11] }
 0x12e   : > { %1267 = vst [vmem:[#allocation3 + $0x290] sm:$0xff] %v11231_v43  ;;  %1268 = vst [vmem:[#allocation3 + $0x298] sm:$0xff] %v11232_v60  ;;  %v11233_v6 = vcombine.low %v1180_v63, %v1188_v62  ;;  %v11234_v7 = vcombine.high %v1180_v63, %v1188_v62  ;;  %v11254_v8 = vcombine.high %v15044_v17, %v15055_v22  ;;  %v15318_v17 = vld [vmem:[%s15010_s12 + $0x100] sm:$0xff]  ;;  %v15321_v22 = vld [vmem:[%s15010_s12 + $0x108] sm:$0xff]  ;;  %v1484_v50 = vshll.u32 %v11279_v20, 16 }
 0x12f   : > { %v11255_v9 = vcombine.low %v15052_v21, %v15069_v30  ;;  %v1192_v10 = vsel %vm15234_vm5, %v11220_v1, %v1191_v0  ;;  %1370 = vst [vmem:[#allocation3 + $0x60] sm:$0xff] %v11253_v4  ;;  %v11256_v14 = vcombine.high %v15052_v21, %v15069_v30  ;;  %v11257_v3 = vcombine.low %v15058_v23, %v15075_v32  ;;  %v11272_v30 = vld [vmem:[%s15010_s12 + $0x38] sm:$0x11]  ;;  %v11283_v34 = vld [vmem:[%s15010_s12 + $0x90] sm:$0x11] }
 0x130   : > { %v11258_v15 = vcombine.high %v15058_v23, %v15075_v32  ;;  %1269 = vst [vmem:[#allocation3 + $0x3a0] sm:$0xff] %v11233_v6  ;;  %1270 = vst [vmem:[#allocation3 + $0x3a8] sm:$0xff] %v11234_v7  ;;  %v11235_v16 = vcombine.low %v1184_v2, %v1192_v10  ;;  %v11236_v24 = vcombine.high %v1184_v2, %v1192_v10  ;;  %v11276_v32 = vld [vmem:[%s15010_s12 + $0x58] sm:$0x11]  ;;  %v1442_v41 = vshll.u32 %v11272_v30, 16  ;;  %v15366_v10 = vld [vmem:[%s15010_s12 + $0xa8] sm:$0xff] }
 0x131   : > { %1371 = vst [vmem:[#allocation3 + $0x68] sm:$0xff] %v11254_v8  ;;  %1372 = vst [vmem:[#allocation3 + $0x70] sm:$0xff] %v11255_v9  ;;  %v11259_v21 = vcombine.low %v15072_v31, %v15085_v36  ;;  %v11260_v23 = vcombine.high %v15072_v31, %v15085_v36  ;;  %v11261_v26 = vcombine.low %v15082_v35, %v15099_v44  ;;  %v11280_v31 = vld [vmem:[%s15010_s12 + $0x78] sm:$0x11]  ;;  %v1470_v48 = vshll.u32 %v11276_v32, 16 }
 0x132   : > { %1373 = vst [vmem:[#allocation3 + $0x78] sm:$0xff] %v11256_v14  ;;  %1374 = vst [vmem:[#allocation3 + $0x180] sm:$0xff] %v11257_v3  ;;  %v11262_v27 = vcombine.high %v15082_v35, %v15099_v44  ;;  %v11263_v29 = vcombine.low %v15088_v37, %v15105_v46  ;;  %v11264_v33 = vcombine.high %v15088_v37, %v15105_v46  ;;  %v11284_v36 = vld [vmem:[%s15010_s12 + $0x98] sm:$0x11]  ;;  %v1428_v37 = vshll.u32 %v11271_v5, 16  ;;  %v15383_v5 = vld [vmem:[%s15010_s12 + $0xe0] sm:$0xff] }
 0x133   : > { %1375 = vst [vmem:[#allocation3 + $0x188] sm:$0xff] %v11258_v15  ;;  %1271 = vst [vmem:[#allocation3 + $0x3b0] sm:$0xff] %v11235_v16  ;;  %v11265_v38 = vcombine.low %v15102_v45, %v15318_v17  ;;  %v11266_v39 = vcombine.high %v15102_v45, %v15318_v17  ;;  %v11267_v35 = vcombine.low %v15112_v49, %v15321_v22  ;;  %v1456_v46 = vshll.u32 %v11275_v12, 16  ;;  %v11287_v9 = vld [vmem:[%s15010_s12 + $0xb0] sm:$0x11] }
 0x134   : > { %1272 = vst [vmem:[#allocation3 + $0x3b8] sm:$0xff] %v11236_v24  ;;  %1376 = vst [vmem:[#allocation3 + $0x190] sm:$0xff] %v11259_v21  ;;  %v11268_v44 = vcombine.high %v15112_v49, %v15321_v22  ;;  %v1512_v45 = vshll.u32 %v11283_v34, 16  ;;  %v1498_v52 = vshll.u32 %v11280_v31, 16  ;;  %v1526_v53 = vshll.u32 %v11284_v36, 16 }
 0x135   : > { %1377 = vst [vmem:[#allocation3 + $0x198] sm:$0xff] %v11260_v23  ;;  %1378 = vst [vmem:[#allocation3 + $0x2a0] sm:$0xff] %v11261_v26  ;;  %v1430_v54 = vrot.slane %v1428_v37, 5  ;;  %v1458_v56 = vrot.slane %v1456_v46, 5  ;;  %v1444_v49 = vrot.slane %v1442_v41, 5  ;;  %v1472_v57 = vrot.slane %v1470_v48, 5 }
 0x136   : > { %1379 = vst [vmem:[#allocation3 + $0x2a8] sm:$0xff] %v11262_v27  ;;  %1380 = vst [vmem:[#allocation3 + $0x2b0] sm:$0xff] %v11263_v29  ;;  %v1486_v58 = vrot.slane %v1484_v50, 5  ;;  %v1514_v43 = vrot.slane %v1512_v45, 5  ;;  %v1500_v60 = vrot.slane %v1498_v52, 5  ;;  %v1528_v63 = vrot.slane %v1526_v53, 5 }
 0x137   : > { %1381 = vst [vmem:[#allocation3 + $0x2b8] sm:$0xff] %v11264_v33  ;;  %1382 = vst [vmem:[#allocation3 + $0x3c0] sm:$0xff] %v11265_v38  ;;  %v1431_v1 = vsel %vm15125_vm2, %v15138_v19, %v1430_v54  ;;  %v1459_v62 = vsel %vm15125_vm2, %v15157_v61, %v1458_v56  ;;  %v1445_v2 = vsel %vm15125_vm2, %v15147_v47, %v1444_v49  ;;  %v11291_v19 = vld [vmem:[%s15010_s12 + $0xd0] sm:$0x11]  ;;  %v11288_v3 = vld [vmem:[%s15010_s12 + $0xb8] sm:$0x11] }
 0x138   : > { %1383 = vst [vmem:[#allocation3 + $0x3c8] sm:$0xff] %v11266_v39  ;;  %1384 = vst [vmem:[#allocation3 + $0x3d0] sm:$0xff] %v11267_v35  ;;  %v1473_v0 = vsel %vm15125_vm2, %v15170_v18, %v1472_v57  ;;  %v11301_v4 = vcombine.low %v1431_v1, %v1459_v62  ;;  %v11302_v6 = vcombine.high %v1431_v1, %v1459_v62  ;;  %v11292_v15 = vld [vmem:[%s15010_s12 + $0xd8] sm:$0x11]  ;;  %v1540_v24 = vshll.u32 %v11287_v9, 16  ;;  %v15398_v48 = vld [vmem:[%s15010_s12 + $0xe8] sm:$0xff] }
 0x139   : > { %1385 = vst [vmem:[#allocation3 + $0x3d8] sm:$0xff] %v11268_v44  ;;  %v11303_v7 = vcombine.low %v1445_v2, %v1473_v0  ;;  %v11304_v8 = vcombine.high %v1445_v2, %v1473_v0  ;;  %v1487_v61 = vsel %vm15125_vm2, %v15168_v13, %v1486_v58  ;;  %v1515_v47 = vsel %vm15125_vm2, %v15184_v51, %v1514_v43  ;;  %v11295_v32 = vld [vmem:[%s15010_s12 + $0xf0] sm:$0x11]  ;;  %v11296_v54 = vld [vmem:[%s15010_s12 + $0xf8] sm:$0x11] }
 0x13a   : > { %v1501_v18 = vsel %vm15125_vm2, %v15181_v42, %v1500_v60  ;;  %v1529_v14 = vsel %vm15125_vm2, %v15207_v28, %v1528_v63  ;;  %1706 = vst [vmem:[#allocation3 + $0x80] sm:$0xff] %v11301_v4  ;;  %1707 = vst [vmem:[#allocation3 + $0x88] sm:$0xff] %v11302_v6  ;;  %v11305_v13 = vcombine.low %v1487_v61, %v1515_v47  ;;  %v1568_v21 = vshll.u32 %v11291_v19, 16  ;;  %v11299_v46 = vld [vmem:[%s15010_s12 + $0x110] sm:$0x11] }
 0x13b   : > { %1708 = vst [vmem:[#allocation3 + $0x90] sm:$0xff] %v11303_v7  ;;  %1709 = vst [vmem:[#allocation3 + $0x98] sm:$0xff] %v11304_v8  ;;  %v11306_v12 = vcombine.high %v1487_v61, %v1515_v47  ;;  %v11307_v51 = vcombine.low %v1501_v18, %v1529_v14  ;;  %v11308_v16 = vcombine.high %v1501_v18, %v1529_v14  ;;  %v1545_v42 = vshrl.u32 %v15366_v10, 16  ;;  %v11300_v57 = vld [vmem:[%s15010_s12 + $0x118] sm:$0x11] }
 0x13c   : > { %v1548_v23 = vshll.u32 %v15366_v10, 16  ;;  %1710 = vst [vmem:[#allocation3 + $0x1a0] sm:$0xff] %v11305_v13  ;;  %v1554_v28 = vshll.u32 %v11288_v3, 16  ;;  %v1582_v30 = vshll.u32 %v11292_v15, 16  ;;  %v1587_v20 = vshrl.u32 %v15383_v5, 16 }
 0x13d   : > { %1711 = vst [vmem:[#allocation3 + $0x1a8] sm:$0xff] %v11306_v12  ;;  %1712 = vst [vmem:[#allocation3 + $0x1b0] sm:$0xff] %v11307_v51  ;;  %v1590_v26 = vshll.u32 %v15383_v5, 16  ;;  %v1542_v27 = vrot.slane %v1540_v24, 5  ;;  %v1570_v29 = vrot.slane %v1568_v21, 5  ;;  %v1547_v33 = vrot.slane %v1545_v42, 4 }
 0x13e   : > { %1713 = vst [vmem:[#allocation3 + $0x1b8] sm:$0xff] %v11308_v16  ;;  %v1550_v34 = vrot.slane %v1548_v23, 5  ;;  %v1556_v31 = vrot.slane %v1554_v28, 5  ;;  %v1584_v36 = vrot.slane %v1582_v30, 5  ;;  %v1589_v38 = vrot.slane %v1587_v20, 4 }
 0x13f   : > { %v1592_v39 = vrot.slane %v1590_v26, 5  ;;  %v1543_v35 = vsel %vm15125_vm2, %v15200_v11, %v1542_v27  ;;  %v1571_v44 = vsel %vm15125_vm2, %v15216_v55, %v1570_v29  ;;  %v1596_v41 = vshll.u32 %v11295_v32, 16  ;;  %v11317_v63 = vld [vmem:[%s15010_s12 + $0x20] sm:$0xee]  ;;  %v11319_v4 = vld [vmem:[%s15010_s12 + $0x30] sm:$0x11] }
 0x140   : > { %v1551_v37 = vor.u32 %v1550_v34, %v1547_v33  ;;  %v11309_v50 = vcombine.low %v1543_v35, %v1571_v44  ;;  %v11310_v45 = vcombine.high %v1543_v35, %v1571_v44  ;;  %v1585_v52 = vsel %vm15125_vm2, %v15240_v40, %v1584_v36  ;;  %v11321_v19 = vld [vmem:[%s15010_s12 + $0x40] sm:$0xee]  ;;  %v11323_v61 = vld [vmem:[%s15010_s12 + $0x50] sm:$0x11]  ;;  %v11318_v15 = vld [vmem:[%s15010_s12 + $0x28] sm:$0xee] }
 0x141   : > { %v1593_v53 = vor.u32 %v1592_v39, %v1589_v38  ;;  %v1598_v11 = vrot.slane %v1596_v41, 5  ;;  %v1615_v55 = vshrl.u32 %v15318_v17, 16  ;;  %v1618_v49 = vshll.u32 %v15318_v17, 16  ;;  %v11320_v24 = vld [vmem:[%s15010_s12 + $0x38] sm:$0x11] }
 0x142   : > { %v15404_v56 = vrot.slane %v1551_v37, 4  ;;  %1714 = vst [vmem:[#allocation3 + $0x2c0] sm:$0xff] %v11309_v50  ;;  %1715 = vst [vmem:[#allocation3 + $0x2c8] sm:$0xff] %v11310_v45  ;;  %v1624_v43 = vshll.u32 %v11299_v46, 16  ;;  %v1601_v40 = vshrl.u32 %v15398_v48, 16  ;;  %v1604_v60 = vshll.u32 %v15398_v48, 16 }
 0x143   : > { %v15409_v58 = vrot.slane %v1593_v53, 4  ;;  %v1617_v62 = vrot.slane %v1615_v55, 4  ;;  %v1620_v2 = vrot.slane %v1618_v49, 5  ;;  %v1610_v0 = vshll.u32 %v11296_v54, 16  ;;  %v11322_v30 = vld [vmem:[%s15010_s12 + $0x48] sm:$0xee] }
 0x144   : > { %v1557_v1 = vsel %vm15125_vm2, %v15404_v56, %v1556_v31  ;;  %v1626_v9 = vrot.slane %v1624_v43, 5  ;;  %v1603_v18 = vrot.slane %v1601_v40, 4  ;;  %v1606_v14 = vrot.slane %v1604_v60, 5  ;;  %v11324_v29 = vld [vmem:[%s15010_s12 + $0x58] sm:$0x11] }
 0x145   : > { %v11311_v6 = vcombine.low %v1557_v1, %v1585_v52  ;;  %v11312_v7 = vcombine.high %v1557_v1, %v1585_v52  ;;  %v1599_v8 = vsel %vm15125_vm2, %v15409_v58, %v1598_v11  ;;  %v1621_v47 = vor.u32 %v1620_v2, %v1617_v62  ;;  %v11325_v38 = vld [vmem:[%s15010_s12 + $0x60] sm:$0xee]  ;;  %v11327_v39 = vld [vmem:[%s15010_s12 + $0x70] sm:$0x11]  ;;  %v11326_v45 = vld [vmem:[%s15010_s12 + $0x68] sm:$0xee] }
 0x146   : > { %v1612_v3 = vrot.slane %v1610_v0, 5  ;;  %v1629_v13 = vshrl.u32 %v15321_v22, 16  ;;  %v1632_v12 = vshll.u32 %v15321_v22, 16  ;;  %v1638_v51 = vshll.u32 %v11300_v57, 16  ;;  %v11329_v41 = vld [vmem:[%s15010_s12 + $0x80] sm:$0xee] }
 0x147   : > { %1716 = vst [vmem:[#allocation3 + $0x2d0] sm:$0xff] %v11311_v6  ;;  %1717 = vst [vmem:[#allocation3 + $0x2d8] sm:$0xff] %v11312_v7  ;;  %v11349_v16 = vrot.slane %v11317_v63, 9  ;;  %v1622_v21 = vrot.slane %v1621_v47, 4  ;;  %v1607_v42 = vor.u32 %v1606_v14, %v1603_v18  ;;  %v1788_v23 = vrot.slane %v11319_v4, 5 }
 0x148   : > { %v11351_v28 = vrot.slane %v11321_v19, 9  ;;  %v1631_v32 = vrot.slane %v1629_v13, 4  ;;  %v1634_v20 = vrot.slane %v1632_v12, 5  ;;  %v1640_v26 = vrot.slane %v1638_v51, 5  ;;  %v11331_v50 = vld [vmem:[%s15010_s12 + $0x90] sm:$0x11] }
 0x149   : > { %v1796_v27 = vrot.slane %v11323_v61, 5  ;;  %v1627_v33 = vsel %vm15125_vm2, %v1622_v21, %v1626_v9  ;;  %v15431_v34 = vrot.slane %v1607_v42, 4  ;;  %v1789_v31 = vsel %vm15234_vm5, %v11349_v16, %v1788_v23  ;;  %v11328_v55 = vld [vmem:[%s15010_s12 + $0x78] sm:$0x11]  ;;  %v11330_v49 = vld [vmem:[%s15010_s12 + $0x88] sm:$0xee] }
 0x14a   : > { %v11350_v36 = vrot.slane %v11318_v15, 9  ;;  %v11313_v35 = vcombine.low %v1599_v8, %v1627_v33  ;;  %v11314_v44 = vcombine.high %v1599_v8, %v1627_v33  ;;  %v1635_v37 = vor.u32 %v1634_v20, %v1631_v32  ;;  %v11332_v63 = vld [vmem:[%s15010_s12 + $0x98] sm:$0x11]  ;;  %v11333_v4 = vld [vmem:[%s15010_s12 + $0xa0] sm:$0xee] }
 0x14b   : > { %v1797_v46 = vsel %vm15234_vm5, %v11351_v28, %v1796_v27  ;;  %v1613_v52 = vsel %vm15125_vm2, %v15431_v34, %v1612_v3  ;;  %v1792_v11 = vrot.slane %v11320_v24, 5  ;;  %v11352_v43 = vrot.slane %v11322_v30, 9  ;;  %v11335_v19 = vld [vmem:[%s15010_s12 + $0xb0] sm:$0x11]  ;;  %v11337_v61 = vld [vmem:[%s15010_s12 + $0xc0] sm:$0xee] }
 0x14c   : > { %v11365_v53 = vcombine.low %v1789_v31, %v1797_v46  ;;  %v11366_v54 = vcombine.high %v1789_v31, %v1797_v46  ;;  %1718 = vst [vmem:[#allocation3 + $0x3e0] sm:$0xff] %v11313_v35  ;;  %1719 = vst [vmem:[#allocation3 + $0x3e8] sm:$0xff] %v11314_v44  ;;  %v1636_v57 = vrot.slane %v1635_v37, 4  ;;  %v1800_v40 = vrot.slane %v11324_v29, 5  ;;  %v11339_v15 = vld [vmem:[%s15010_s12 + $0xd0] sm:$0x11] }
 0x14d   : > { %v11353_v60 = vrot.slane %v11325_v38, 9  ;;  %v1793_v1 = vsel %vm15234_vm5, %v11350_v36, %v1792_v11  ;;  %v1804_v62 = vrot.slane %v11327_v39, 5  ;;  %v11355_v2 = vrot.slane %v11329_v41, 9  ;;  %v11334_v13 = vld [vmem:[%s15010_s12 + $0xa8] sm:$0xee] }
 0x14e   : > { %1914 = vst [vmem:[#allocation3 + $0xa0] sm:$0xff] %v11365_v53  ;;  %1915 = vst [vmem:[#allocation3 + $0xa8] sm:$0xff] %v11366_v54  ;;  %v1812_v0 = vrot.slane %v11331_v50, 5  ;;  %v1641_v6 = vsel %vm15125_vm2, %v1636_v57, %v1640_v26  ;;  %v1801_v7 = vsel %vm15234_vm5, %v11352_v43, %v1800_v40  ;;  %v11354_v8 = vrot.slane %v11326_v45, 9  ;;  %v11336_v12 = vld [vmem:[%s15010_s12 + $0xb8] sm:$0x11] }
 0x14f   : > { %v1808_v9 = vrot.slane %v11328_v55, 5  ;;  %v11315_v47 = vcombine.low %v1613_v52, %v1641_v6  ;;  %v11316_v18 = vcombine.high %v1613_v52, %v1641_v6  ;;  %v11367_v14 = vcombine.low %v1793_v1, %v1801_v7  ;;  %v11338_v42 = vld [vmem:[%s15010_s12 + $0xc8] sm:$0xee]  ;;  %v11340_v23 = vld [vmem:[%s15010_s12 + $0xd8] sm:$0x11] }
 0x150   : > { %v11368_v3 = vcombine.high %v1793_v1, %v1801_v7  ;;  %v1805_v51 = vsel %vm15234_vm5, %v11353_v60, %v1804_v62  ;;  %v1813_v16 = vsel %vm15234_vm5, %v11355_v2, %v1812_v0  ;;  %v11356_v21 = vrot.slane %v11330_v49, 9  ;;  %v11341_v26 = vld [vmem:[%s15010_s12 + $0xe0] sm:$0xee]  ;;  %v11343_v36 = vld [vmem:[%s15010_s12 + $0xf0] sm:$0x11] }
 0x151   : > { %v1809_v24 = vsel %vm15234_vm5, %v11354_v8, %v1808_v9  ;;  %1720 = vst [vmem:[#allocation3 + $0x3f0] sm:$0xff] %v11315_v47  ;;  %1721 = vst [vmem:[#allocation3 + $0x3f8] sm:$0xff] %v11316_v18  ;;  %v11369_v28 = vcombine.low %v1805_v51, %v1813_v16  ;;  %v11370_v30 = vcombine.high %v1805_v51, %v1813_v16  ;;  %v1816_v32 = vrot.slane %v11332_v63, 5  ;;  %v11345_v37 = vld [vmem:[%s15010_s12 + $0x100] sm:$0xee]  ;;  %v15497_v18 = vld [vmem:[%s15010_s12 + $0x48] sm:$0xff] }
 0x152   : > { %1916 = vst [vmem:[#allocation3 + $0xb0] sm:$0xff] %v11367_v14  ;;  %1917 = vst [vmem:[#allocation3 + $0xb8] sm:$0xff] %v11368_v3  ;;  %v11357_v20 = vrot.slane %v11333_v4, 9  ;;  %v1820_v27 = vrot.slane %v11335_v19, 5  ;;  %v11359_v29 = vrot.slane %v11337_v61, 9  ;;  %v1828_v33 = vrot.slane %v11339_v15, 5 }
 0x153   : > { %v11358_v31 = vrot.slane %v11334_v13, 9  ;;  %1918 = vst [vmem:[#allocation3 + $0x1c0] sm:$0xff] %v11369_v28  ;;  %1919 = vst [vmem:[#allocation3 + $0x1c8] sm:$0xff] %v11370_v30  ;;  %v1817_v38 = vsel %vm15234_vm5, %v11356_v21, %v1816_v32  ;;  %v1824_v39 = vrot.slane %v11336_v12, 5  ;;  %v11360_v35 = vrot.slane %v11338_v42, 9  ;;  %v15487_v7 = vld [vmem:[%s15010_s12 + $0x40] sm:$0xff] }
 0x154   : > { %v1832_v44 = vrot.slane %v11340_v23, 5  ;;  %v11371_v46 = vcombine.low %v1809_v24, %v1817_v38  ;;  %v11372_v41 = vcombine.high %v1809_v24, %v1817_v38  ;;  %v1821_v50 = vsel %vm15234_vm5, %v11357_v20, %v1820_v27  ;;  %v11347_v52 = vld [vmem:[%s15010_s12 + $0x110] sm:$0x11]  ;;  %v11342_v53 = vld [vmem:[%s15010_s12 + $0xe8] sm:$0xee]  ;;  %v15490_v8 = vld [vmem:[%s15010_s12 + $0x60] sm:$0xff] }
 0x155   : > { %v1829_v45 = vsel %vm15234_vm5, %v11359_v29, %v1828_v33  ;;  %v11344_v54 = vld [vmem:[%s15010_s12 + $0xf8] sm:$0x11]  ;;  %v1825_v49 = vsel %vm15234_vm5, %v11358_v31, %v1824_v39  ;;  %v11346_v43 = vld [vmem:[%s15010_s12 + $0x108] sm:$0xee]  ;;  %v11361_v1 = vrot.slane %v11341_v26, 9  ;;  %v1836_v62 = vrot.slane %v11343_v36, 5 }
 0x156   : > { %v11373_v11 = vcombine.low %v1821_v50, %v1829_v45  ;;  %v11374_v55 = vcombine.high %v1821_v50, %v1829_v45  ;;  %v1833_v57 = vsel %vm15234_vm5, %v11360_v35, %v1832_v44  ;;  %v11348_v40 = vld [vmem:[%s15010_s12 + $0x118] sm:$0x11]  ;;  %1920 = vst [vmem:[#allocation3 + $0x1d0] sm:$0xff] %v11371_v46  ;;  %1921 = vst [vmem:[#allocation3 + $0x1d8] sm:$0xff] %v11372_v41  ;;  %v11363_v2 = vrot.slane %v11345_v37, 9  ;;  %v15500_v14 = vld [vmem:[%s15010_s12 + $0x68] sm:$0xff] }
 0x157   : > { %v11375_v60 = vcombine.low %v1825_v49, %v1833_v57  ;;  %v11376_v63 = vcombine.high %v1825_v49, %v1833_v57  ;;  %v1844_v0 = vrot.slane %v11347_v52, 5  ;;  %v11362_v4 = vrot.slane %v11342_v53, 9  ;;  %v15515_v42 = vld [vmem:[%s15010_s12 + $0x80] sm:$0xff]  ;;  %v15525_v26 = vld [vmem:[%s15010_s12 + $0x88] sm:$0xff]  ;;  %v11415_v35 = vld [vmem:[%s15010_s12 + $0x50] sm:$0x11] }
 0x158   : > { %1922 = vst [vmem:[#allocation3 + $0x2e0] sm:$0xff] %v11373_v11  ;;  %1923 = vst [vmem:[#allocation3 + $0x2e8] sm:$0xff] %v11374_v55  ;;  %v1840_v6 = vrot.slane %v11344_v54, 5  ;;  %v1837_v9 = vsel %vm15234_vm5, %v11361_v1, %v1836_v62  ;;  %v11364_v19 = vrot.slane %v11346_v43, 9  ;;  %v1848_v61 = vrot.slane %v11348_v40, 5  ;;  %v15518_v23 = vld [vmem:[%s15010_s12 + $0xa0] sm:$0xff] }
 0x159   : > { %1924 = vst [vmem:[#allocation3 + $0x2f0] sm:$0xff] %v11375_v60  ;;  %1925 = vst [vmem:[#allocation3 + $0x2f8] sm:$0xff] %v11376_v63  ;;  %v11397_v47 = vcombine.low %v15487_v7, %v15490_v8  ;;  %v1845_v3 = vsel %vm15234_vm5, %v11363_v2, %v1844_v0  ;;  %v11398_v13 = vcombine.high %v15487_v7, %v15490_v8  ;;  %v15528_v27 = vld [vmem:[%s15010_s12 + $0xc0] sm:$0xff]  ;;  %v15531_v29 = vld [vmem:[%s15010_s12 + $0xc8] sm:$0xff]  ;;  %v2079_v52 = vshll.u32 %v15487_v7, 16 }
 0x15a   : > { %v1841_v15 = vsel %vm15234_vm5, %v11362_v4, %v1840_v6  ;;  %v11399_v12 = vcombine.low %v15497_v18, %v15500_v14  ;;  %v11377_v51 = vcombine.low %v1837_v9, %v1845_v3  ;;  %v11378_v16 = vcombine.high %v1837_v9, %v1845_v3  ;;  %v15542_v39 = vld [vmem:[%s15010_s12 + $0x120] sm:$0xff]  ;;  %v11419_v44 = vld [vmem:[%s15010_s12 + $0x70] sm:$0x11]  ;;  %v15555_v41 = vld [vmem:[%s15010_s12 + $0x128] sm:$0xff] }
 0x15b   : > { %v1849_v24 = vsel %vm15234_vm5, %v11364_v19, %v1848_v61  ;;  %2027 = vst [vmem:[#allocation3 + $0xc0] sm:$0xff] %v11397_v47  ;;  %v11400_v21 = vcombine.high %v15497_v18, %v15500_v14  ;;  %2028 = vst [vmem:[#allocation3 + $0xc8] sm:$0xff] %v11398_v13  ;;  %v11401_v32 = vcombine.low %v15515_v42, %v15518_v23  ;;  %v2104_v53 = vshrl.u32 %v15490_v8, 16  ;;  %v11416_v55 = vld [vmem:[%s15010_s12 + $0x58] sm:$0x11] }
 0x15c   : > { %v11379_v28 = vcombine.low %v1841_v15, %v1849_v24  ;;  %v11380_v30 = vcombine.high %v1841_v15, %v1849_v24  ;;  %2029 = vst [vmem:[#allocation3 + $0xd0] sm:$0xff] %v11399_v12  ;;  %v11402_v20 = vcombine.high %v15515_v42, %v15518_v23  ;;  %1926 = vst [vmem:[#allocation3 + $0x400] sm:$0xff] %v11377_v51  ;;  %v2107_v54 = vshll.u32 %v15490_v8, 16  ;;  %v11420_v57 = vld [vmem:[%s15010_s12 + $0x78] sm:$0x11] }
 0x15d   : > { %1927 = vst [vmem:[#allocation3 + $0x408] sm:$0xff] %v11378_v16  ;;  %2030 = vst [vmem:[#allocation3 + $0xd8] sm:$0xff] %v11400_v21  ;;  %v11403_v33 = vcombine.low %v15525_v26, %v15366_v10  ;;  %v11404_v31 = vcombine.high %v15525_v26, %v15366_v10  ;;  %v11405_v36 = vcombine.low %v15528_v27, %v15383_v5  ;;  %v2113_v11 = vshll.u32 %v11419_v44, 16 }
 0x15e   : > { %v11406_v38 = vcombine.high %v15528_v27, %v15383_v5  ;;  %1928 = vst [vmem:[#allocation3 + $0x410] sm:$0xff] %v11379_v28  ;;  %1929 = vst [vmem:[#allocation3 + $0x418] sm:$0xff] %v11380_v30  ;;  %v11407_v37 = vcombine.low %v15531_v29, %v15398_v48  ;;  %v11408_v10 = vcombine.high %v15531_v29, %v15398_v48  ;;  %v2076_v48 = vshrl.u32 %v15487_v7, 16 }
 0x15f   : > { %2031 = vst [vmem:[#allocation3 + $0x1e0] sm:$0xff] %v11401_v32  ;;  %2032 = vst [vmem:[#allocation3 + $0x1e8] sm:$0xff] %v11402_v20  ;;  %v11409_v46 = vcombine.low %v15318_v17, %v15542_v39  ;;  %v11410_v5 = vcombine.high %v15318_v17, %v15542_v39  ;;  %v11411_v50 = vcombine.low %v15321_v22, %v15555_v41  ;;  %v2085_v17 = vshll.u32 %v11415_v35, 16  ;;  %v11427_v20 = vld [vmem:[%s15010_s12 + $0xb0] sm:$0x11] }
 0x160   : > { %2033 = vst [vmem:[#allocation3 + $0x1f0] sm:$0xff] %v11403_v33  ;;  %2034 = vst [vmem:[#allocation3 + $0x1f8] sm:$0xff] %v11404_v31  ;;  %v11412_v45 = vcombine.high %v15321_v22, %v15555_v41  ;;  %v2078_v49 = vrot.slane %v2076_v48, 4  ;;  %v2081_v22 = vrot.slane %v2079_v52, 5  ;;  %v2090_v43 = vshrl.u32 %v15497_v18, 16 }
 0x161   : > { %2035 = vst [vmem:[#allocation3 + $0x300] sm:$0xff] %v11405_v36  ;;  %2036 = vst [vmem:[#allocation3 + $0x308] sm:$0xff] %v11406_v38  ;;  %v2093_v40 = vshll.u32 %v15497_v18, 16  ;;  %v2087_v60 = vrot.slane %v2085_v17, 5  ;;  %v2106_v63 = vrot.slane %v2104_v53, 4  ;;  %v2109_v1 = vrot.slane %v2107_v54, 5 }
 0x162   : > { %2037 = vst [vmem:[#allocation3 + $0x310] sm:$0xff] %v11407_v37  ;;  %2038 = vst [vmem:[#allocation3 + $0x318] sm:$0xff] %v11408_v10  ;;  %v2115_v62 = vrot.slane %v2113_v11, 5  ;;  %v2082_v2 = vor.u32 %v2081_v22, %v2078_v49  ;;  %v2092_v0 = vrot.slane %v2090_v43, 4  ;;  %v2099_v6 = vshll.u32 %v11416_v55, 16 }
 0x163   : > { %2039 = vst [vmem:[#allocation3 + $0x420] sm:$0xff] %v11409_v46  ;;  %2040 = vst [vmem:[#allocation3 + $0x428] sm:$0xff] %v11410_v5  ;;  %v2095_v4 = vrot.slane %v2093_v40, 5  ;;  %v2110_v7 = vor.u32 %v2109_v1, %v2106_v63  ;;  %v2118_v8 = vshrl.u32 %v15500_v14, 16  ;;  %v2121_v9 = vshll.u32 %v15500_v14, 16 }
 0x164   : > { %2041 = vst [vmem:[#allocation3 + $0x430] sm:$0xff] %v11411_v50  ;;  %2042 = vst [vmem:[#allocation3 + $0x438] sm:$0xff] %v11412_v45  ;;  %v2127_v19 = vshll.u32 %v11420_v57, 16  ;;  %v2083_v61 = vrot.slane %v2082_v2, 4  ;;  %v2101_v3 = vrot.slane %v2099_v6, 5  ;;  %v2132_v15 = vshrl.u32 %v15515_v42, 16 }
 0x165   : > { %v2096_v47 = vor.u32 %v2095_v4, %v2092_v0  ;;  %v11423_v18 = vld [vmem:[%s15010_s12 + $0x90] sm:$0x11]  ;;  %v2111_v13 = vrot.slane %v2110_v7, 4  ;;  %v2120_v12 = vrot.slane %v2118_v8, 4  ;;  %v2123_v51 = vrot.slane %v2121_v9, 5 }
 0x166   : > { %v2129_v16 = vrot.slane %v2127_v19, 5  ;;  %v2088_v24 = vsel %vm15125_vm2, %v2083_v61, %v2087_v60  ;;  %v2134_v28 = vrot.slane %v2132_v15, 4  ;;  %v2135_v14 = vshll.u32 %v15515_v42, 16  ;;  %v11424_v37 = vld [vmem:[%s15010_s12 + $0x98] sm:$0x11] }
 0x167   : > { %v2097_v21 = vrot.slane %v2096_v47, 4  ;;  %v2116_v30 = vsel %vm15125_vm2, %v2111_v13, %v2115_v62  ;;  %v2124_v32 = vor.u32 %v2123_v51, %v2120_v12  ;;  %v2141_v33 = vshll.u32 %v11423_v18, 16  ;;  %v11428_v10 = vld [vmem:[%s15010_s12 + $0xb8] sm:$0x11]  ;;  %v11435_v40 = vld [vmem:[%s15010_s12 + $0xf0] sm:$0x11] }
 0x168   : > { %v2160_v31 = vshrl.u32 %v15518_v23, 16  ;;  %v11445_v36 = vcombine.low %v2088_v24, %v2116_v30  ;;  %v11446_v38 = vcombine.high %v2088_v24, %v2116_v30  ;;  %v2137_v44 = vrot.slane %v2135_v14, 5  ;;  %v11436_v51 = vld [vmem:[%s15010_s12 + $0xf8] sm:$0x11]  ;;  %v11437_v14 = vld [vmem:[%s15010_s12 + $0x100] sm:$0xff] }
 0x169   : > { %v2102_v35 = vsel %vm15125_vm2, %v2097_v21, %v2101_v3  ;;  %v2125_v46 = vrot.slane %v2124_v32, 4  ;;  %v2143_v5 = vrot.slane %v2141_v33, 5  ;;  %v2163_v42 = vshll.u32 %v15518_v23, 16  ;;  %v11431_v23 = vld [vmem:[%s15010_s12 + $0xd0] sm:$0x11] }
 0x16a   : > { %v2162_v50 = vrot.slane %v2160_v31, 4  ;;  %2363 = vst [vmem:[#allocation3 + $0xe0] sm:$0xff] %v11445_v36  ;;  %2364 = vst [vmem:[#allocation3 + $0xe8] sm:$0xff] %v11446_v38  ;;  %v2138_v45 = vor.u32 %v2137_v44, %v2134_v28  ;;  %v2169_v48 = vshll.u32 %v11427_v20, 16  ;;  %v2146_v52 = vshrl.u32 %v15525_v26, 16 }
 0x16b   : > { %v2149_v17 = vshll.u32 %v15525_v26, 16  ;;  %v2130_v53 = vsel %vm15125_vm2, %v2125_v46, %v2129_v16  ;;  %v2165_v54 = vrot.slane %v2163_v42, 5  ;;  %v2155_v11 = vshll.u32 %v11424_v37, 16  ;;  %v11432_v3 = vld [vmem:[%s15010_s12 + $0xd8] sm:$0x11] }
 0x16c   : > { %v2183_v55 = vshll.u32 %v11428_v10, 16  ;;  %v11447_v49 = vcombine.low %v2102_v35, %v2130_v53  ;;  %v11448_v22 = vcombine.high %v2102_v35, %v2130_v53  ;;  %v2139_v57 = vrot.slane %v2138_v45, 4  ;;  %v11439_v33 = vld [vmem:[%s15010_s12 + $0x110] sm:$0x11]  ;;  %v11438_v45 = vld [vmem:[%s15010_s12 + $0x108] sm:$0xff] }
 0x16d   : > { %v2171_v43 = vrot.slane %v2169_v48, 5  ;;  %v2166_v60 = vor.u32 %v2165_v54, %v2162_v50  ;;  %v2148_v63 = vrot.slane %v2146_v52, 4  ;;  %v2151_v1 = vrot.slane %v2149_v17, 5  ;;  %v11440_v54 = vld [vmem:[%s15010_s12 + $0x118] sm:$0x11] }
 0x16e   : > { %v2157_v62 = vrot.slane %v2155_v11, 5  ;;  %2365 = vst [vmem:[#allocation3 + $0xf0] sm:$0xff] %v11447_v49  ;;  %2366 = vst [vmem:[#allocation3 + $0xf8] sm:$0xff] %v11448_v22  ;;  %v2144_v26 = vsel %vm15125_vm2, %v2139_v57, %v2143_v5  ;;  %v2185_v2 = vrot.slane %v2183_v55, 5  ;;  %v2188_v0 = vshrl.u32 %v15528_v27, 16 }
 0x16f   : > { %v2191_v4 = vshll.u32 %v15528_v27, 16  ;;  %v2167_v6 = vrot.slane %v2166_v60, 4  ;;  %v2152_v7 = vor.u32 %v2151_v1, %v2148_v63  ;;  %v2197_v8 = vshll.u32 %v11431_v23, 16  ;;  %v11443_v5 = vld [vmem:[%s15010_s12 + $0x130] sm:$0x11] }
 0x170   : > { %v2225_v9 = vshll.u32 %v11435_v40, 16  ;;  %v2186_v19 = vsel %vm15125_vm2, %v15404_v56, %v2185_v2  ;;  %v2190_v61 = vrot.slane %v2188_v0, 4  ;;  %v2202_v18 = vshrl.u32 %v15531_v29, 16  ;;  %v11444_v40 = vld [vmem:[%s15010_s12 + $0x138] sm:$0x11] }
 0x171   : > { %v2193_v47 = vrot.slane %v2191_v4, 5  ;;  %v2172_v15 = vsel %vm15125_vm2, %v2167_v6, %v2171_v43  ;;  %v2153_v13 = vrot.slane %v2152_v7, 4  ;;  %v2199_v27 = vrot.slane %v2197_v8, 5  ;;  %v11463_v7 = vld [vmem:[%s15010_s12 + $0x50] sm:$0x11] }
 0x172   : > { %v2227_v12 = vrot.slane %v2225_v9, 5  ;;  %v11449_v16 = vcombine.low %v2144_v26, %v2172_v15  ;;  %v11450_v24 = vcombine.high %v2144_v26, %v2172_v15  ;;  %v2204_v28 = vrot.slane %v2202_v18, 4 }
 0x173   : > { %v2194_v21 = vor.u32 %v2193_v47, %v2190_v61  ;;  %v2158_v56 = vsel %vm15125_vm2, %v2153_v13, %v2157_v62  ;;  %v2205_v32 = vshll.u32 %v15531_v29, 16  ;;  %v2211_v20 = vshll.u32 %v11432_v3, 16  ;;  %v11465_v61 = vld [vmem:[%s15010_s12 + $0x60] sm:$0xee]  ;;  %v11467_v47 = vld [vmem:[%s15010_s12 + $0x70] sm:$0x11] }
 0x174   : > { %v2228_v30 = vsel %vm15125_vm2, %v15409_v58, %v2227_v12  ;;  %2367 = vst [vmem:[#allocation3 + $0x200] sm:$0xff] %v11449_v16  ;;  %2368 = vst [vmem:[#allocation3 + $0x208] sm:$0xff] %v11450_v24  ;;  %v11451_v31 = vcombine.low %v2158_v56, %v2186_v19  ;;  %v11452_v36 = vcombine.high %v2158_v56, %v2186_v19  ;;  %v2239_v35 = vshll.u32 %v11436_v51, 16 }
 0x175   : > { %v2195_v38 = vrot.slane %v2194_v21, 4  ;;  %v2207_v44 = vrot.slane %v2205_v32, 5  ;;  %v2213_v37 = vrot.slane %v2211_v20, 5  ;;  %v2244_v10 = vshrl.u32 %v11437_v14, 16  ;;  %v11464_v21 = vld [vmem:[%s15010_s12 + $0x58] sm:$0x11] }
 0x176   : > { %v2247_v46 = vshll.u32 %v11437_v14, 16  ;;  %2369 = vst [vmem:[#allocation3 + $0x210] sm:$0xff] %v11451_v31  ;;  %2370 = vst [vmem:[#allocation3 + $0x218] sm:$0xff] %v11452_v36  ;;  %v2241_v29 = vrot.slane %v2239_v35, 5  ;;  %v2253_v50 = vshll.u32 %v11439_v33, 16  ;;  %v2272_v42 = vshrl.u32 %v15542_v39, 16 }
 0x177   : > { %v2200_v58 = vsel %vm15125_vm2, %v2195_v38, %v2199_v27  ;;  %v2208_v17 = vor.u32 %v2207_v44, %v2204_v28  ;;  %v2246_v53 = vrot.slane %v2244_v10, 4  ;;  %v2275_v43 = vshll.u32 %v15542_v39, 16  ;;  %v11462_v27 = vld [vmem:[%s15010_s12 + $0x48] sm:$0xee]  ;;  %v11468_v20 = vld [vmem:[%s15010_s12 + $0x78] sm:$0x11] }
 0x178   : > { %v11453_v48 = vcombine.low %v2200_v58, %v2228_v30  ;;  %v11454_v52 = vcombine.high %v2200_v58, %v2228_v30  ;;  %v2242_v11 = vsel %vm15125_vm2, %v15431_v34, %v2241_v29  ;;  %v2249_v55 = vrot.slane %v2247_v46, 5  ;;  %v11461_v34 = vld [vmem:[%s15010_s12 + $0x40] sm:$0xee]  ;;  %v11466_v32 = vld [vmem:[%s15010_s12 + $0x68] sm:$0xee] }
 0x179   : > { %v2255_v49 = vrot.slane %v2253_v50, 5  ;;  %v2274_v22 = vrot.slane %v2272_v42, 4  ;;  %v2209_v57 = vrot.slane %v2208_v17, 4  ;;  %v2281_v23 = vshll.u32 %v11443_v5, 16  ;;  %v11469_v38 = vld [vmem:[%s15010_s12 + $0x80] sm:$0xee] }
 0x17a   : > { %2371 = vst [vmem:[#allocation3 + $0x320] sm:$0xff] %v11453_v48  ;;  %2372 = vst [vmem:[#allocation3 + $0x328] sm:$0xff] %v11454_v52  ;;  %v2258_v60 = vshrl.u32 %v11438_v45, 16  ;;  %v2250_v63 = vor.u32 %v2249_v55, %v2246_v53  ;;  %v2261_v1 = vshll.u32 %v11438_v45, 16  ;;  %v2267_v62 = vshll.u32 %v11440_v54, 16 }
 0x17b   : > { %v2286_v26 = vshrl.u32 %v15555_v41, 16  ;;  %v2214_v2 = vsel %vm15125_vm2, %v2209_v57, %v2213_v37  ;;  %v2277_v0 = vrot.slane %v2275_v43, 5  ;;  %v2283_v4 = vrot.slane %v2281_v23, 5  ;;  %v11471_v46 = vld [vmem:[%s15010_s12 + $0x90] sm:$0x11] }
 0x17c   : > { %v2260_v6 = vrot.slane %v2258_v60, 4  ;;  %v11455_v39 = vcombine.low %v2214_v2, %v2242_v11  ;;  %v11456_v8 = vcombine.high %v2214_v2, %v2242_v11  ;;  %v2251_v9 = vrot.slane %v2250_v63, 4  ;;  %v11473_v58 = vld [vmem:[%s15010_s12 + $0xa0] sm:$0xee]  ;;  %v11475_v45 = vld [vmem:[%s15010_s12 + $0xb0] sm:$0x11] }
 0x17d   : > { %v2263_v19 = vrot.slane %v2261_v1, 5  ;;  %v2278_v3 = vor.u32 %v2277_v0, %v2274_v22  ;;  %v2269_v18 = vrot.slane %v2267_v62, 5  ;;  %v2288_v15 = vrot.slane %v2286_v26, 4  ;;  %v11470_v48 = vld [vmem:[%s15010_s12 + $0x88] sm:$0xee] }
 0x17e   : > { %v2289_v13 = vshll.u32 %v15555_v41, 16  ;;  %2373 = vst [vmem:[#allocation3 + $0x330] sm:$0xff] %v11455_v39  ;;  %2374 = vst [vmem:[#allocation3 + $0x338] sm:$0xff] %v11456_v8  ;;  %v2256_v12 = vsel %vm15125_vm2, %v2251_v9, %v2255_v49  ;;  %v2295_v16 = vshll.u32 %v11444_v40, 16  ;;  %v11493_v24 = vrot.slane %v11461_v34, 9 }
 0x17f   : > { %v2264_v51 = vor.u32 %v2263_v19, %v2260_v6  ;;  %v2279_v28 = vrot.slane %v2278_v3, 4  ;;  %v2445_v56 = vrot.slane %v11463_v7, 5  ;;  %v11495_v30 = vrot.slane %v11465_v61, 9  ;;  %v11472_v52 = vld [vmem:[%s15010_s12 + $0x98] sm:$0x11] }
 0x180   : > { %v2291_v14 = vrot.slane %v2289_v13, 5  ;;  %v2297_v33 = vrot.slane %v2295_v16, 5  ;;  %v2453_v31 = vrot.slane %v11467_v47, 5  ;;  %v11494_v36 = vrot.slane %v11462_v27, 9  ;;  %v11474_v55 = vld [vmem:[%s15010_s12 + $0xa8] sm:$0xee] }
 0x181   : > { %v2265_v41 = vrot.slane %v2264_v51, 4  ;;  %v2284_v35 = vsel %vm15125_vm2, %v2279_v28, %v2283_v4  ;;  %v2446_v37 = vsel %vm15234_vm5, %v11493_v24, %v2445_v56  ;;  %v2449_v10 = vrot.slane %v11464_v21, 5  ;;  %v11476_v49 = vld [vmem:[%s15010_s12 + $0xb8] sm:$0x11]  ;;  %v11477_v40 = vld [vmem:[%s15010_s12 + $0xc0] sm:$0xee] }
 0x182   : > { %v2292_v44 = vor.u32 %v2291_v14, %v2288_v15  ;;  %v11457_v29 = vcombine.low %v2256_v12, %v2284_v35  ;;  %v11458_v5 = vcombine.high %v2256_v12, %v2284_v35  ;;  %v2454_v42 = vsel %vm15234_vm5, %v11495_v30, %v2453_v31  ;;  %v11479_v60 = vld [vmem:[%s15010_s12 + $0xd0] sm:$0x11]  ;;  %v11481_v34 = vld [vmem:[%s15010_s12 + $0xe0] sm:$0xee]  ;;  %v11478_v39 = vld [vmem:[%s15010_s12 + $0xc8] sm:$0xee] }
 0x183   : > { %v2270_v50 = vsel %vm15125_vm2, %v2265_v41, %v2269_v18  ;;  %v11509_v53 = vcombine.low %v2446_v37, %v2454_v42  ;;  %v11510_v54 = vcombine.high %v2446_v37, %v2454_v42  ;;  %v2450_v11 = vsel %vm15234_vm5, %v11494_v36, %v2449_v10  ;;  %v11483_v7 = vld [vmem:[%s15010_s12 + $0xf0] sm:$0x11]  ;;  %v11480_v8 = vld [vmem:[%s15010_s12 + $0xd8] sm:$0x11]  ;;  %v11482_v3 = vld [vmem:[%s15010_s12 + $0xe8] sm:$0xee] }
 0x184   : > { %v2293_v17 = vrot.slane %v2292_v44, 4  ;;  %2375 = vst [vmem:[#allocation3 + $0x440] sm:$0xff] %v11457_v29  ;;  %2376 = vst [vmem:[#allocation3 + $0x448] sm:$0xff] %v11458_v5  ;;  %v11496_v22 = vrot.slane %v11466_v32, 9  ;;  %v2457_v57 = vrot.slane %v11468_v20, 5  ;;  %v11497_v43 = vrot.slane %v11469_v38, 9 }
 0x185   : > { %v2461_v23 = vrot.slane %v11471_v46, 5  ;;  %2571 = vst [vmem:[#allocation3 + $0x100] sm:$0xff] %v11509_v53  ;;  %2572 = vst [vmem:[#allocation3 + $0x108] sm:$0xff] %v11510_v54  ;;  %v11499_v1 = vrot.slane %v11473_v58, 9  ;;  %v2469_v62 = vrot.slane %v11475_v45, 5  ;;  %v11498_v26 = vrot.slane %v11470_v48, 9 }
 0x186   : > { %v2298_v63 = vsel %vm15125_vm2, %v2293_v17, %v2297_v33  ;;  %v2458_v4 = vsel %vm15234_vm5, %v11496_v22, %v2457_v57  ;;  %v2465_v47 = vrot.slane %v11472_v52, 5  ;;  %v11484_v18 = vld [vmem:[%s15010_s12 + $0xf8] sm:$0x11]  ;;  %v11500_v27 = vrot.slane %v11474_v55, 9  ;;  %v11485_v51 = vld [vmem:[%s15010_s12 + $0x100] sm:$0xee] }
 0x187   : > { %v11459_v2 = vcombine.low %v2270_v50, %v2298_v63  ;;  %v11460_v0 = vcombine.high %v2270_v50, %v2298_v63  ;;  %v2462_v6 = vsel %vm15234_vm5, %v11497_v43, %v2461_v23  ;;  %v11511_v9 = vcombine.low %v2450_v11, %v2458_v4  ;;  %v11487_v16 = vld [vmem:[%s15010_s12 + $0x110] sm:$0x11]  ;;  %v11489_v56 = vld [vmem:[%s15010_s12 + $0x120] sm:$0xee]  ;;  %v11486_v44 = vld [vmem:[%s15010_s12 + $0x108] sm:$0xee] }
 0x188   : > { %v11512_v19 = vcombine.high %v2450_v11, %v2458_v4  ;;  %v2470_v61 = vsel %vm15234_vm5, %v11499_v1, %v2469_v62  ;;  %v2473_v12 = vrot.slane %v11476_v49, 5  ;;  %v2466_v24 = vsel %vm15234_vm5, %v11498_v26, %v2465_v47  ;;  %v11491_v33 = vld [vmem:[%s15010_s12 + $0x130] sm:$0x11]  ;;  %v11488_v37 = vld [vmem:[%s15010_s12 + $0x118] sm:$0x11]  ;;  %v15693_v43 = vld [vmem:[%s15010_s12 + $0x140] sm:$0xff] }
 0x189   : > { %2377 = vst [vmem:[#allocation3 + $0x450] sm:$0xff] %v11459_v2  ;;  %2378 = vst [vmem:[#allocation3 + $0x458] sm:$0xff] %v11460_v0  ;;  %v11513_v15 = vcombine.low %v2462_v6, %v2470_v61  ;;  %v11514_v13 = vcombine.high %v2462_v6, %v2470_v61  ;;  %v11501_v21 = vrot.slane %v11477_v40, 9  ;;  %v2477_v28 = vrot.slane %v11479_v60, 5  ;;  %v11490_v5 = vld [vmem:[%s15010_s12 + $0x128] sm:$0xee] }
 0x18a   : > { %2573 = vst [vmem:[#allocation3 + $0x110] sm:$0xff] %v11511_v9  ;;  %2574 = vst [vmem:[#allocation3 + $0x118] sm:$0xff] %v11512_v19  ;;  %v11503_v14 = vrot.slane %v11481_v34, 9  ;;  %v2474_v30 = vsel %vm15234_vm5, %v11500_v27, %v2473_v12  ;;  %v2485_v32 = vrot.slane %v11483_v7, 5  ;;  %v11502_v20 = vrot.slane %v11478_v39, 9  ;;  %v15696_v23 = vld [vmem:[%s15010_s12 + $0x160] sm:$0xff] }
 0x18b   : > { %2575 = vst [vmem:[#allocation3 + $0x220] sm:$0xff] %v11513_v15  ;;  %2576 = vst [vmem:[#allocation3 + $0x228] sm:$0xff] %v11514_v13  ;;  %v2481_v41 = vrot.slane %v11480_v8, 5  ;;  %v11515_v31 = vcombine.low %v2466_v24, %v2474_v30  ;;  %v11516_v36 = vcombine.high %v2466_v24, %v2474_v30  ;;  %v2478_v38 = vsel %vm15234_vm5, %v11501_v21, %v2477_v28  ;;  %v11492_v52 = vld [vmem:[%s15010_s12 + $0x138] sm:$0x11]  ;;  %v15699_v40 = vld [vmem:[%s15010_s12 + $0x148] sm:$0xff] }
 0x18c   : > { %v11504_v35 = vrot.slane %v11482_v3, 9  ;;  %v2486_v10 = vsel %vm15234_vm5, %v11503_v14, %v2485_v32  ;;  %v2489_v58 = vrot.slane %v11484_v18, 5  ;;  %v11505_v29 = vrot.slane %v11485_v51, 9  ;;  %v15708_v26 = vld [vmem:[%s15010_s12 + $0x168] sm:$0xff]  ;;  %v15711_v34 = vld [vmem:[%s15010_s12 + $0x180] sm:$0xff] }
 0x18d   : > { %v2482_v46 = vsel %vm15234_vm5, %v11502_v20, %v2481_v41  ;;  %2577 = vst [vmem:[#allocation3 + $0x230] sm:$0xff] %v11515_v31  ;;  %2578 = vst [vmem:[#allocation3 + $0x238] sm:$0xff] %v11516_v36  ;;  %v11517_v50 = vcombine.low %v2478_v38, %v2486_v10  ;;  %v11518_v42 = vcombine.high %v2478_v38, %v2486_v10  ;;  %v2493_v45 = vrot.slane %v11487_v16, 5  ;;  %v15714_v2 = vld [vmem:[%s15010_s12 + $0x1a0] sm:$0xff]  ;;  %v15721_v39 = vld [vmem:[%s15010_s12 + $0x188] sm:$0xff] }
 0x18e   : > { %v11507_v48 = vrot.slane %v11489_v56, 9  ;;  %v2490_v17 = vsel %vm15234_vm5, %v11504_v35, %v2489_v58  ;;  %v2501_v53 = vrot.slane %v11491_v33, 5  ;;  %v11506_v54 = vrot.slane %v11486_v44, 9  ;;  %v15724_v8 = vld [vmem:[%s15010_s12 + $0x1a8] sm:$0xff]  ;;  %v15727_v9 = vld [vmem:[%s15010_s12 + $0x1c0] sm:$0xff] }
 0x18f   : > { %v2497_v11 = vrot.slane %v11488_v37, 5  ;;  %2579 = vst [vmem:[#allocation3 + $0x340] sm:$0xff] %v11517_v50  ;;  %2580 = vst [vmem:[#allocation3 + $0x348] sm:$0xff] %v11518_v42  ;;  %v11519_v55 = vcombine.low %v2482_v46, %v2490_v17  ;;  %v11520_v49 = vcombine.high %v2482_v46, %v2490_v17  ;;  %v2494_v22 = vsel %vm15234_vm5, %v11505_v29, %v2493_v45  ;;  %v15738_v18 = vld [vmem:[%s15010_s12 + $0x1e0] sm:$0xff]  ;;  %v15741_v15 = vld [vmem:[%s15010_s12 + $0x1c8] sm:$0xff] }
 0x190   : > { %v11508_v57 = vrot.slane %v11490_v5, 9  ;;  %v2502_v60 = vsel %vm15234_vm5, %v11507_v48, %v2501_v53  ;;  %v2505_v1 = vrot.slane %v11492_v52, 5  ;;  %v11541_v62 = vcombine.low %v15693_v43, %v15696_v23  ;;  %v15744_v13 = vld [vmem:[%s15010_s12 + $0x1e8] sm:$0xff]  ;;  %v15751_v24 = vld [vmem:[%s15010_s12 + $0x200] sm:$0xff]  ;;  %v11559_v28 = vld [vmem:[%s15010_s12 + $0x150] sm:$0x11] }
 0x191   : > { %v2498_v63 = vsel %vm15234_vm5, %v11506_v54, %v2497_v11  ;;  %2581 = vst [vmem:[#allocation3 + $0x350] sm:$0xff] %v11519_v55  ;;  %2582 = vst [vmem:[#allocation3 + $0x358] sm:$0xff] %v11520_v49  ;;  %v11521_v0 = vcombine.low %v2494_v22, %v2502_v60  ;;  %v11522_v4 = vcombine.high %v2494_v22, %v2502_v60  ;;  %v15754_v21 = vld [vmem:[%s15010_s12 + $0x220] sm:$0xff]  ;;  %v15766_v20 = vld [vmem:[%s15010_s12 + $0x208] sm:$0xff]  ;;  %v2733_v44 = vshrl.u32 %v15693_v43, 16 }
 0x192   : > { %v11542_v6 = vcombine.high %v15693_v43, %v15696_v23  ;;  %v11543_v7 = vcombine.low %v15699_v40, %v15708_v26  ;;  %v2506_v19 = vsel %vm15234_vm5, %v11508_v57, %v2505_v1  ;;  %2684 = vst [vmem:[#allocation3 + $0x480] sm:$0xff] %v11541_v62  ;;  %v11544_v61 = vcombine.high %v15699_v40, %v15708_v26  ;;  %v15769_v41 = vld [vmem:[%s15010_s12 + $0x228] sm:$0xff]  ;;  %v11563_v33 = vld [vmem:[%s15010_s12 + $0x170] sm:$0x11]  ;;  %v11560_v5 = vld [vmem:[%s15010_s12 + $0x158] sm:$0x11] }
 0x193   : > { %v11545_v47 = vcombine.low %v15711_v34, %v15714_v2  ;;  %v11546_v3 = vcombine.high %v15711_v34, %v15714_v2  ;;  %2583 = vst [vmem:[#allocation3 + $0x460] sm:$0xff] %v11521_v0  ;;  %2584 = vst [vmem:[#allocation3 + $0x468] sm:$0xff] %v11522_v4  ;;  %v11523_v27 = vcombine.low %v2498_v63, %v2506_v19  ;;  %v2736_v37 = vshll.u32 %v15693_v43, 16  ;;  %v11564_v53 = vld [vmem:[%s15010_s12 + $0x178] sm:$0x11] }
 0x194   : > { %v11524_v12 = vcombine.high %v2498_v63, %v2506_v19  ;;  %2685 = vst [vmem:[#allocation3 + $0x488] sm:$0xff] %v11542_v6  ;;  %2686 = vst [vmem:[#allocation3 + $0x490] sm:$0xff] %v11543_v7  ;;  %v11547_v51 = vcombine.low %v15721_v39, %v15724_v8  ;;  %v11548_v16 = vcombine.high %v15721_v39, %v15724_v8  ;;  %v2742_v10 = vshll.u32 %v11559_v28, 16  ;;  %v11567_v62 = vld [vmem:[%s15010_s12 + $0x190] sm:$0x11] }
 0x195   : > { %2687 = vst [vmem:[#allocation3 + $0x498] sm:$0xff] %v11544_v61  ;;  %2688 = vst [vmem:[#allocation3 + $0x5a0] sm:$0xff] %v11545_v47  ;;  %v11549_v14 = vcombine.low %v15727_v9, %v15738_v18  ;;  %v11550_v56 = vcombine.high %v15727_v9, %v15738_v18  ;;  %v11551_v30 = vcombine.low %v15741_v15, %v15744_v13  ;;  %v2761_v46 = vshrl.u32 %v15696_v23, 16 }
 0x196   : > { %2689 = vst [vmem:[#allocation3 + $0x5a8] sm:$0xff] %v11546_v3  ;;  %v11552_v32 = vcombine.high %v15741_v15, %v15744_v13  ;;  %2585 = vst [vmem:[#allocation3 + $0x470] sm:$0xff] %v11523_v27  ;;  %v11553_v31 = vcombine.low %v15751_v24, %v15754_v21  ;;  %v11554_v36 = vcombine.high %v15751_v24, %v15754_v21  ;;  %v2764_v58 = vshll.u32 %v15696_v23, 16 }
 0x197   : > { %2586 = vst [vmem:[#allocation3 + $0x478] sm:$0xff] %v11524_v12  ;;  %2690 = vst [vmem:[#allocation3 + $0x5b0] sm:$0xff] %v11547_v51  ;;  %v11555_v38 = vcombine.low %v15766_v20, %v15769_v41  ;;  %v11556_v35 = vcombine.high %v15766_v20, %v15769_v41  ;;  %v2770_v29 = vshll.u32 %v11563_v33, 16  ;;  %v2747_v50 = vshrl.u32 %v15699_v40, 16 }
 0x198   : > { %2691 = vst [vmem:[#allocation3 + $0x5b8] sm:$0xff] %v11548_v16  ;;  %2692 = vst [vmem:[#allocation3 + $0x6c0] sm:$0xff] %v11549_v14  ;;  %v2750_v42 = vshll.u32 %v15699_v40, 16  ;;  %v2735_v45 = vrot.slane %v2733_v44, 4  ;;  %v2738_v48 = vrot.slane %v2736_v37, 5  ;;  %v2744_v52 = vrot.slane %v2742_v10, 5 }
 0x199   : > { %2693 = vst [vmem:[#allocation3 + $0x6c8] sm:$0xff] %v11550_v56  ;;  %2694 = vst [vmem:[#allocation3 + $0x6d0] sm:$0xff] %v11551_v30  ;;  %v2763_v17 = vrot.slane %v2761_v46, 4  ;;  %v2766_v54 = vrot.slane %v2764_v58, 5  ;;  %v2772_v11 = vrot.slane %v2770_v29, 5  ;;  %v2749_v55 = vrot.slane %v2747_v50, 4 }
 0x19a   : > { %2695 = vst [vmem:[#allocation3 + $0x6d8] sm:$0xff] %v11552_v32  ;;  %2696 = vst [vmem:[#allocation3 + $0x7e0] sm:$0xff] %v11553_v31  ;;  %v2752_v49 = vrot.slane %v2750_v42, 5  ;;  %v2739_v22 = vor.u32 %v2738_v48, %v2735_v45  ;;  %v2756_v57 = vshll.u32 %v11560_v5, 16  ;;  %v2775_v43 = vshrl.u32 %v15708_v26, 16 }
 0x19b   : > { %2697 = vst [vmem:[#allocation3 + $0x7e8] sm:$0xff] %v11554_v36  ;;  %2698 = vst [vmem:[#allocation3 + $0x7f0] sm:$0xff] %v11555_v38  ;;  %v2778_v60 = vshll.u32 %v15708_v26, 16  ;;  %v2767_v63 = vor.u32 %v2766_v54, %v2763_v17  ;;  %v2784_v40 = vshll.u32 %v11564_v53, 16  ;;  %v2789_v0 = vshrl.u32 %v15711_v34, 16 }
 0x19c   : > { %2699 = vst [vmem:[#allocation3 + $0x7f8] sm:$0xff] %v11556_v35  ;;  %v2753_v1 = vor.u32 %v2752_v49, %v2749_v55  ;;  %v2740_v4 = vrot.slane %v2739_v22, 4  ;;  %v2758_v6 = vrot.slane %v2756_v57, 5  ;;  %v2777_v7 = vrot.slane %v2775_v43, 4  ;;  %v11571_v16 = vld [vmem:[%s15010_s12 + $0x1b0] sm:$0x11] }
 0x19d   : > { %v2780_v19 = vrot.slane %v2778_v60, 5  ;;  %v15792_v61 = vrot.slane %v2767_v63, 4  ;;  %v2786_v3 = vrot.slane %v2784_v40, 5  ;;  %v2791_v27 = vrot.slane %v2789_v0, 4  ;;  %v11568_v58 = vld [vmem:[%s15010_s12 + $0x198] sm:$0x11] }
 0x19e   : > { %v2754_v47 = vrot.slane %v2753_v1, 4  ;;  %v2745_v12 = vsel %vm15125_vm2, %v2740_v4, %v2744_v52  ;;  %v2792_v28 = vshll.u32 %v15711_v34, 16  ;;  %v2798_v14 = vshll.u32 %v11567_v62, 16  ;;  %v11572_v50 = vld [vmem:[%s15010_s12 + $0x1b8] sm:$0x11] }
 0x19f   : > { %v2781_v51 = vor.u32 %v2780_v19, %v2777_v7  ;;  %v2773_v56 = vsel %vm15125_vm2, %v15792_v61, %v2772_v11  ;;  %v2817_v32 = vshrl.u32 %v15714_v2, 16  ;;  %v2820_v33 = vshll.u32 %v15714_v2, 16  ;;  %v11575_v62 = vld [vmem:[%s15010_s12 + $0x1d0] sm:$0x11] }
 0x1a0   : > { %v2759_v30 = vsel %vm15125_vm2, %v2754_v47, %v2758_v6  ;;  %v11589_v31 = vcombine.low %v2745_v12, %v2773_v56  ;;  %v11590_v36 = vcombine.high %v2745_v12, %v2773_v56  ;;  %v2794_v35 = vrot.slane %v2792_v28, 5  ;;  %v11579_v47 = vld [vmem:[%s15010_s12 + $0x1f0] sm:$0x11] }
 0x1a1   : > { %v15805_v38 = vrot.slane %v2781_v51, 4  ;;  %v2800_v44 = vrot.slane %v2798_v14, 5  ;;  %v2819_v37 = vrot.slane %v2817_v32, 4  ;;  %v2822_v10 = vrot.slane %v2820_v33, 5 }
 0x1a2   : > { %v2826_v46 = vshll.u32 %v11571_v16, 16  ;;  %3020 = vst [vmem:[#allocation3 + $0x4a0] sm:$0xff] %v11589_v31  ;;  %3021 = vst [vmem:[#allocation3 + $0x4a8] sm:$0xff] %v11590_v36  ;;  %v2795_v5 = vor.u32 %v2794_v35, %v2791_v27  ;;  %v2803_v42 = vshrl.u32 %v15721_v39, 16  ;;  %v2806_v45 = vshll.u32 %v15721_v39, 16 }
 0x1a3   : > { %v2787_v29 = vsel %vm15125_vm2, %v15805_v38, %v2786_v3  ;;  %v2823_v17 = vor.u32 %v2822_v10, %v2819_v37  ;;  %v2812_v49 = vshll.u32 %v11568_v58, 16  ;;  %v2831_v57 = vshrl.u32 %v15724_v8, 16  ;;  %v11576_v31 = vld [vmem:[%s15010_s12 + $0x1d8] sm:$0x11] }
 0x1a4   : > { %v11591_v48 = vcombine.low %v2759_v30, %v2787_v29  ;;  %v11592_v52 = vcombine.high %v2759_v30, %v2787_v29  ;;  %v2828_v53 = vrot.slane %v2826_v46, 5  ;;  %v15814_v54 = vrot.slane %v2795_v5, 4 }
 0x1a5   : > { %v2805_v11 = vrot.slane %v2803_v42, 4  ;;  %v2808_v55 = vrot.slane %v2806_v45, 5  ;;  %v15816_v22 = vrot.slane %v2823_v17, 4  ;;  %v2834_v43 = vshll.u32 %v15724_v8, 16  ;;  %v11580_v45 = vld [vmem:[%s15010_s12 + $0x1f8] sm:$0x11] }
 0x1a6   : > { %3022 = vst [vmem:[#allocation3 + $0x4b0] sm:$0xff] %v11591_v48  ;;  %3023 = vst [vmem:[#allocation3 + $0x4b8] sm:$0xff] %v11592_v52  ;;  %v2840_v60 = vshll.u32 %v11572_v50, 16  ;;  %v2801_v63 = vsel %vm15125_vm2, %v15814_v54, %v2800_v44  ;;  %v2814_v40 = vrot.slane %v2812_v49, 5  ;;  %v2845_v0 = vshrl.u32 %v15727_v9, 16 }
 0x1a7   : > { %v2809_v1 = vor.u32 %v2808_v55, %v2805_v11  ;;  %v2829_v4 = vsel %vm15125_vm2, %v15816_v22, %v2828_v53  ;;  %v2833_v6 = vrot.slane %v2831_v57, 4  ;;  %v2836_v7 = vrot.slane %v2834_v43, 5  ;;  %v11583_v49 = vld [vmem:[%s15010_s12 + $0x210] sm:$0x11] }
 0x1a8   : > { %v2842_v19 = vrot.slane %v2840_v60, 5  ;;  %v11593_v3 = vcombine.low %v2801_v63, %v2829_v4  ;;  %v11594_v27 = vcombine.high %v2801_v63, %v2829_v4  ;;  %v2847_v51 = vrot.slane %v2845_v0, 4 }
 0x1a9   : > { %v15829_v12 = vrot.slane %v2809_v1, 4  ;;  %v2837_v16 = vor.u32 %v2836_v7, %v2833_v6  ;;  %v2848_v28 = vshll.u32 %v15727_v9, 16  ;;  %v2854_v14 = vshll.u32 %v11575_v62, 16 }
 0x1aa   : > { %v2873_v56 = vshrl.u32 %v15738_v18, 16  ;;  %3024 = vst [vmem:[#allocation3 + $0x5c0] sm:$0xff] %v11593_v3  ;;  %3025 = vst [vmem:[#allocation3 + $0x5c8] sm:$0xff] %v11594_v27  ;;  %v2876_v32 = vshll.u32 %v15738_v18, 16  ;;  %v2882_v33 = vshll.u32 %v11579_v47, 16  ;;  %v2859_v36 = vshrl.u32 %v15741_v15, 16 }
 0x1ab   : > { %v2815_v30 = vsel %vm15125_vm2, %v15829_v12, %v2814_v40  ;;  %v15839_v35 = vrot.slane %v2837_v16, 4  ;;  %v2850_v44 = vrot.slane %v2848_v28, 5  ;;  %v2856_v37 = vrot.slane %v2854_v14, 5 }
 0x1ac   : > { %v2875_v10 = vrot.slane %v2873_v56, 4  ;;  %v2878_v46 = vrot.slane %v2876_v32, 5  ;;  %v2884_v58 = vrot.slane %v2882_v33, 5  ;;  %v2861_v29 = vrot.slane %v2859_v36, 4  ;;  %v11584_v32 = vld [vmem:[%s15010_s12 + $0x218] sm:$0x11] }
 0x1ad   : > { %v2862_v5 = vshll.u32 %v15741_v15, 16  ;;  %v2843_v50 = vsel %vm15125_vm2, %v15839_v35, %v2842_v19  ;;  %v2851_v42 = vor.u32 %v2850_v44, %v2847_v51  ;;  %v2868_v48 = vshll.u32 %v11576_v31, 16  ;;  %v11587_v51 = vld [vmem:[%s15010_s12 + $0x230] sm:$0x11] }
 0x1ae   : > { %v2887_v52 = vshrl.u32 %v15744_v13, 16  ;;  %v11595_v17 = vcombine.low %v2815_v30, %v2843_v50  ;;  %v11596_v53 = vcombine.high %v2815_v30, %v2843_v50  ;;  %v2879_v11 = vor.u32 %v2878_v46, %v2875_v10 }
 0x1af   : > { %v2864_v55 = vrot.slane %v2862_v5, 5  ;;  %v15848_v57 = vrot.slane %v2851_v42, 4  ;;  %v2870_v43 = vrot.slane %v2868_v48, 5  ;;  %v2890_v63 = vshll.u32 %v15744_v13, 16  ;;  %v11605_v48 = vld [vmem:[%s15010_s12 + $0x140] sm:$0xee] }
 0x1b0   : > { %v2889_v60 = vrot.slane %v2887_v52, 4  ;;  %3026 = vst [vmem:[#allocation3 + $0x5d0] sm:$0xff] %v11595_v17  ;;  %3027 = vst [vmem:[#allocation3 + $0x5d8] sm:$0xff] %v11596_v53  ;;  %v15851_v1 = vrot.slane %v2879_v11, 4  ;;  %v2896_v62 = vshll.u32 %v11580_v45, 16  ;;  %v2901_v0 = vshrl.u32 %v15751_v24, 16 }
 0x1b1   : > { %v2865_v40 = vor.u32 %v2864_v55, %v2861_v29  ;;  %v2857_v4 = vsel %vm15125_vm2, %v15848_v57, %v2856_v37  ;;  %v2892_v6 = vrot.slane %v2890_v63, 5  ;;  %v2904_v7 = vshll.u32 %v15751_v24, 16  ;;  %v11607_v55 = vld [vmem:[%s15010_s12 + $0x150] sm:$0x11] }
 0x1b2   : > { %v2910_v19 = vshll.u32 %v11583_v49, 16  ;;  %v2885_v47 = vsel %vm15125_vm2, %v15851_v1, %v2884_v58  ;;  %v2898_v27 = vrot.slane %v2896_v62, 5  ;;  %v2903_v16 = vrot.slane %v2901_v0, 4  ;;  %v11588_v58 = vld [vmem:[%s15010_s12 + $0x238] sm:$0x11] }
 0x1b3   : > { %v15861_v3 = vrot.slane %v2865_v40, 4  ;;  %v11597_v28 = vcombine.low %v2857_v4, %v2885_v47  ;;  %v11598_v14 = vcombine.high %v2857_v4, %v2885_v47  ;;  %v2893_v56 = vor.u32 %v2892_v6, %v2889_v60  ;;  %v11609_v40 = vld [vmem:[%s15010_s12 + $0x160] sm:$0xee]  ;;  %v11611_v62 = vld [vmem:[%s15010_s12 + $0x170] sm:$0x11] }
 0x1b4   : > { %v2906_v30 = vrot.slane %v2904_v7, 5  ;;  %v2912_v31 = vrot.slane %v2910_v19, 5  ;;  %v2929_v36 = vshrl.u32 %v15754_v21, 16  ;;  %v2932_v44 = vshll.u32 %v15754_v21, 16  ;;  %v11606_v19 = vld [vmem:[%s15010_s12 + $0x148] sm:$0xee] }
 0x1b5   : > { %v2871_v33 = vsel %vm15125_vm2, %v15861_v3, %v2870_v43  ;;  %3028 = vst [vmem:[#allocation3 + $0x6e0] sm:$0xff] %v11597_v28  ;;  %3029 = vst [vmem:[#allocation3 + $0x6e8] sm:$0xff] %v11598_v14  ;;  %v2894_v37 = vrot.slane %v2893_v56, 4  ;;  %v2938_v46 = vshll.u32 %v11587_v51, 16  ;;  %v2915_v29 = vshrl.u32 %v15766_v20, 16 }
 0x1b6   : > { %v2907_v10 = vor.u32 %v2906_v30, %v2903_v16  ;;  %v2931_v5 = vrot.slane %v2929_v36, 4  ;;  %v2934_v50 = vrot.slane %v2932_v44, 5  ;;  %v2918_v42 = vshll.u32 %v15766_v20, 16  ;;  %v11608_v47 = vld [vmem:[%s15010_s12 + $0x158] sm:$0x11] }
 0x1b7   : > { %v2924_v45 = vshll.u32 %v11584_v32, 16  ;;  %v2899_v52 = vsel %vm15125_vm2, %v2894_v37, %v2898_v27  ;;  %v2940_v53 = vrot.slane %v2938_v46, 5  ;;  %v2917_v11 = vrot.slane %v2915_v29, 4  ;;  %v11610_v14 = vld [vmem:[%s15010_s12 + $0x168] sm:$0xee] }
 0x1b8   : > { %v15876_v17 = vrot.slane %v2907_v10, 4  ;;  %v11599_v49 = vcombine.low %v2871_v33, %v2899_v52  ;;  %v11600_v43 = vcombine.high %v2871_v33, %v2899_v52  ;;  %v2935_v60 = vor.u32 %v2934_v50, %v2931_v5  ;;  %v11613_v46 = vld [vmem:[%s15010_s12 + $0x180] sm:$0xee] }
 0x1b9   : > { %v2920_v63 = vrot.slane %v2918_v42, 5  ;;  %v2926_v4 = vrot.slane %v2924_v45, 5  ;;  %v2943_v6 = vshrl.u32 %v15769_v41, 16  ;;  %v2946_v7 = vshll.u32 %v15769_v41, 16  ;;  %v11615_v42 = vld [vmem:[%s15010_s12 + $0x190] sm:$0x11] }
 0x1ba   : > { %v2913_v0 = vsel %vm15125_vm2, %v15876_v17, %v2912_v31  ;;  %3030 = vst [vmem:[#allocation3 + $0x6f0] sm:$0xff] %v11599_v49  ;;  %3031 = vst [vmem:[#allocation3 + $0x6f8] sm:$0xff] %v11600_v43  ;;  %v2936_v27 = vrot.slane %v2935_v60, 4  ;;  %v2952_v16 = vshll.u32 %v11588_v58, 16  ;;  %v11637_v28 = vrot.slane %v11605_v48, 9 }
 0x1bb   : > { %v2921_v51 = vor.u32 %v2920_v63, %v2917_v11  ;;  %v2945_v56 = vrot.slane %v2943_v6, 4  ;;  %v2948_v30 = vrot.slane %v2946_v7, 5  ;;  %v3102_v32 = vrot.slane %v11607_v55, 5  ;;  %v11612_v31 = vld [vmem:[%s15010_s12 + $0x178] sm:$0x11] }
 0x1bc   : > { %v11639_v33 = vrot.slane %v11609_v40, 9  ;;  %v2941_v36 = vsel %vm15125_vm2, %v2936_v27, %v2940_v53  ;;  %v2954_v37 = vrot.slane %v2952_v16, 5  ;;  %v3110_v10 = vrot.slane %v11611_v62, 5  ;;  %v11617_v45 = vld [vmem:[%s15010_s12 + $0x1a0] sm:$0xee] }
 0x1bd   : > { %v15892_v44 = vrot.slane %v2921_v51, 4  ;;  %v11601_v58 = vcombine.low %v2913_v0, %v2941_v36  ;;  %v11602_v29 = vcombine.high %v2913_v0, %v2941_v36  ;;  %v2949_v5 = vor.u32 %v2948_v30, %v2945_v56  ;;  %v11619_v48 = vld [vmem:[%s15010_s12 + $0x1b0] sm:$0x11]  ;;  %v11614_v49 = vld [vmem:[%s15010_s12 + $0x188] sm:$0xee] }
 0x1be   : > { %v3103_v50 = vsel %vm15234_vm5, %v11637_v28, %v3102_v32  ;;  %v3111_v53 = vsel %vm15234_vm5, %v11639_v33, %v3110_v10  ;;  %v11638_v11 = vrot.slane %v11606_v19, 9  ;;  %v3106_v55 = vrot.slane %v11608_v47, 5  ;;  %v11616_v43 = vld [vmem:[%s15010_s12 + $0x198] sm:$0x11]  ;;  %v11618_v0 = vld [vmem:[%s15010_s12 + $0x1a8] sm:$0xee] }
 0x1bf   : > { %v2927_v52 = vsel %vm15125_vm2, %v15892_v44, %v2926_v4  ;;  %3032 = vst [vmem:[#allocation3 + $0x800] sm:$0xff] %v11601_v58  ;;  %3033 = vst [vmem:[#allocation3 + $0x808] sm:$0xff] %v11602_v29  ;;  %v2950_v60 = vrot.slane %v2949_v5, 4  ;;  %v11653_v63 = vcombine.low %v3103_v50, %v3111_v53  ;;  %v11654_v40 = vcombine.high %v3103_v50, %v3111_v53  ;;  %v11620_v6 = vld [vmem:[%s15010_s12 + $0x1b8] sm:$0x11] }
 0x1c0   : > { %v11640_v62 = vrot.slane %v11610_v14, 9  ;;  %v3107_v4 = vsel %vm15234_vm5, %v11638_v11, %v3106_v55  ;;  %v3114_v7 = vrot.slane %v11612_v31, 5  ;;  %v11641_v19 = vrot.slane %v11613_v46, 9  ;;  %v11621_v27 = vld [vmem:[%s15010_s12 + $0x1c0] sm:$0xee] }
 0x1c1   : > { %v3118_v47 = vrot.slane %v11615_v42, 5  ;;  %v11623_v51 = vld [vmem:[%s15010_s12 + $0x1d0] sm:$0x11]  ;;  %v2955_v16 = vsel %vm15125_vm2, %v2950_v60, %v2954_v37  ;;  %3228 = vst [vmem:[#allocation3 + $0x4c0] sm:$0xff] %v11653_v63  ;;  %3229 = vst [vmem:[#allocation3 + $0x4c8] sm:$0xff] %v11654_v40  ;;  %v11643_v28 = vrot.slane %v11617_v45, 9 }
 0x1c2   : > { %v3126_v14 = vrot.slane %v11619_v48, 5  ;;  %v11642_v56 = vrot.slane %v11614_v49, 9  ;;  %v11625_v30 = vld [vmem:[%s15010_s12 + $0x1e0] sm:$0xee]  ;;  %v11603_v32 = vcombine.low %v2927_v52, %v2955_v16  ;;  %v11604_v33 = vcombine.high %v2927_v52, %v2955_v16  ;;  %v11627_v10 = vld [vmem:[%s15010_s12 + $0x1f0] sm:$0x11] }
 0x1c3   : > { %v3115_v31 = vsel %vm15234_vm5, %v11640_v62, %v3114_v7  ;;  %v3119_v36 = vsel %vm15234_vm5, %v11641_v19, %v3118_v47  ;;  %v11622_v37 = vld [vmem:[%s15010_s12 + $0x1c8] sm:$0xee]  ;;  %v11624_v46 = vld [vmem:[%s15010_s12 + $0x1d8] sm:$0x11]  ;;  %v3122_v50 = vrot.slane %v11616_v43, 5  ;;  %v11644_v53 = vrot.slane %v11618_v0, 9 }
 0x1c4   : > { %v11655_v58 = vcombine.low %v3107_v4, %v3115_v31  ;;  %v11656_v29 = vcombine.high %v3107_v4, %v3115_v31  ;;  %v3127_v5 = vsel %vm15234_vm5, %v11643_v28, %v3126_v14  ;;  %v11626_v42 = vld [vmem:[%s15010_s12 + $0x1e8] sm:$0xee]  ;;  %v11628_v45 = vld [vmem:[%s15010_s12 + $0x1f8] sm:$0x11]  ;;  %3034 = vst [vmem:[#allocation3 + $0x810] sm:$0xff] %v11603_v32  ;;  %3035 = vst [vmem:[#allocation3 + $0x818] sm:$0xff] %v11604_v33 }
 0x1c5   : > { %v11657_v48 = vcombine.low %v3119_v36, %v3127_v5  ;;  %v11658_v52 = vcombine.high %v3119_v36, %v3127_v5  ;;  %v3130_v11 = vrot.slane %v11620_v6, 5  ;;  %v11629_v55 = vld [vmem:[%s15010_s12 + $0x200] sm:$0xee]  ;;  %v11631_v49 = vld [vmem:[%s15010_s12 + $0x210] sm:$0x11]  ;;  %v3123_v60 = vsel %vm15234_vm5, %v11642_v56, %v3122_v50 }
 0x1c6   : > { %3230 = vst [vmem:[#allocation3 + $0x4d0] sm:$0xff] %v11655_v58  ;;  %3231 = vst [vmem:[#allocation3 + $0x4d8] sm:$0xff] %v11656_v29  ;;  %v11645_v63 = vrot.slane %v11621_v27, 9  ;;  %v3134_v43 = vrot.slane %v11623_v51, 5  ;;  %v11647_v40 = vrot.slane %v11625_v30, 9  ;;  %v3142_v6 = vrot.slane %v11627_v10, 5 }
 0x1c7   : > { %v11633_v62 = vld [vmem:[%s15010_s12 + $0x220] sm:$0xee]  ;;  %3232 = vst [vmem:[#allocation3 + $0x5e0] sm:$0xff] %v11657_v48  ;;  %3233 = vst [vmem:[#allocation3 + $0x5e8] sm:$0xff] %v11658_v52  ;;  %v3131_v0 = vsel %vm15234_vm5, %v11644_v53, %v3130_v11  ;;  %v11646_v4 = vrot.slane %v11622_v37, 9  ;;  %v3138_v7 = vrot.slane %v11624_v46, 5 }
 0x1c8   : > { %v11635_v19 = vld [vmem:[%s15010_s12 + $0x230] sm:$0x11]  ;;  %v11659_v47 = vcombine.low %v3123_v60, %v3131_v0  ;;  %v11660_v16 = vcombine.high %v3123_v60, %v3131_v0  ;;  %v3135_v27 = vsel %vm15234_vm5, %v11645_v63, %v3134_v43  ;;  %v11648_v28 = vrot.slane %v11626_v42, 9  ;;  %v11630_v51 = vld [vmem:[%s15010_s12 + $0x208] sm:$0xee] }
 0x1c9   : > { %v11632_v14 = vld [vmem:[%s15010_s12 + $0x218] sm:$0x11]  ;;  %v3143_v56 = vsel %vm15234_vm5, %v11647_v40, %v3142_v6  ;;  %v3139_v30 = vsel %vm15234_vm5, %v11646_v4, %v3138_v7  ;;  %v3146_v32 = vrot.slane %v11628_v45, 5  ;;  %v11649_v33 = vrot.slane %v11629_v55, 9  ;;  %v11634_v31 = vld [vmem:[%s15010_s12 + $0x228] sm:$0xee] }
 0x1ca   : > { %3234 = vst [vmem:[#allocation3 + $0x5f0] sm:$0xff] %v11659_v47  ;;  %3235 = vst [vmem:[#allocation3 + $0x5f8] sm:$0xff] %v11660_v16  ;;  %v11661_v36 = vcombine.low %v3135_v27, %v3143_v56  ;;  %v11662_v10 = vcombine.high %v3135_v27, %v3143_v56  ;;  %v3150_v37 = vrot.slane %v11631_v49, 5  ;;  %v11651_v46 = vrot.slane %v11633_v62, 9  ;;  %v11636_v58 = vld [vmem:[%s15010_s12 + $0x238] sm:$0x11] }
 0x1cb   : > { %v3147_v29 = vsel %vm15234_vm5, %v11648_v28, %v3146_v32  ;;  %v3158_v5 = vrot.slane %v11635_v19, 5  ;;  %v11650_v50 = vrot.slane %v11630_v51, 9  ;;  %v3154_v42 = vrot.slane %v11632_v14, 5  ;;  %v11703_v19 = vld [vmem:[%s15010_s12 + $0x170] sm:$0x11] }
 0x1cc   : > { %3236 = vst [vmem:[#allocation3 + $0x700] sm:$0xff] %v11661_v36  ;;  %3237 = vst [vmem:[#allocation3 + $0x708] sm:$0xff] %v11662_v10  ;;  %v11663_v48 = vcombine.low %v3139_v30, %v3147_v29  ;;  %v11664_v52 = vcombine.high %v3139_v30, %v3147_v29  ;;  %v3151_v45 = vsel %vm15234_vm5, %v11649_v33, %v3150_v37  ;;  %v11652_v53 = vrot.slane %v11634_v31, 9  ;;  %v11707_v47 = vld [vmem:[%s15010_s12 + $0x190] sm:$0x11] }
 0x1cd   : > { %v3159_v11 = vsel %vm15234_vm5, %v11651_v46, %v3158_v5  ;;  %v3155_v55 = vsel %vm15234_vm5, %v11650_v50, %v3154_v42  ;;  %v3162_v49 = vrot.slane %v11636_v58, 5  ;;  %v11685_v60 = vcombine.low %v15696_v23, %v15711_v34  ;;  %v11711_v28 = vld [vmem:[%s15010_s12 + $0x1b0] sm:$0x11] }
 0x1ce   : > { %3238 = vst [vmem:[#allocation3 + $0x710] sm:$0xff] %v11663_v48  ;;  %3239 = vst [vmem:[#allocation3 + $0x718] sm:$0xff] %v11664_v52  ;;  %v11665_v63 = vcombine.low %v3151_v45, %v3159_v11  ;;  %v11666_v43 = vcombine.high %v3151_v45, %v3159_v11  ;;  %v11686_v40 = vcombine.high %v15696_v23, %v15711_v34  ;;  %v15968_v23 = vld [vmem:[%s15010_s12 + $0x240] sm:$0xff]  ;;  %v15971_v34 = vld [vmem:[%s15010_s12 + $0x248] sm:$0xff]  ;;  %v3455_v37 = vshll.u32 %v11711_v28, 16 }
 0x1cf   : > { %v11687_v62 = vcombine.low %v15708_v26, %v15721_v39  ;;  %v3163_v0 = vsel %vm15234_vm5, %v11652_v53, %v3162_v49  ;;  %3341 = vst [vmem:[#allocation3 + $0x4e0] sm:$0xff] %v11685_v60  ;;  %v11688_v6 = vcombine.high %v15708_v26, %v15721_v39  ;;  %v11689_v4 = vcombine.low %v15714_v2, %v15727_v9  ;;  %v11704_v39 = vld [vmem:[%s15010_s12 + $0x178] sm:$0x11]  ;;  %v11715_v32 = vld [vmem:[%s15010_s12 + $0x1d0] sm:$0x11] }
 0x1d0   : > { %v11690_v7 = vcombine.high %v15714_v2, %v15727_v9  ;;  %3240 = vst [vmem:[#allocation3 + $0x820] sm:$0xff] %v11665_v63  ;;  %3241 = vst [vmem:[#allocation3 + $0x828] sm:$0xff] %v11666_v43  ;;  %v11667_v16 = vcombine.low %v3155_v55, %v3163_v0  ;;  %v11668_v27 = vcombine.high %v3155_v55, %v3163_v0  ;;  %v11708_v9 = vld [vmem:[%s15010_s12 + $0x198] sm:$0x11]  ;;  %v3413_v36 = vshll.u32 %v11704_v39, 16  ;;  %v16016_v0 = vld [vmem:[%s15010_s12 + $0x1e8] sm:$0xff] }
 0x1d1   : > { %3342 = vst [vmem:[#allocation3 + $0x4e8] sm:$0xff] %v11686_v40  ;;  %3343 = vst [vmem:[#allocation3 + $0x4f0] sm:$0xff] %v11687_v62  ;;  %v11691_v26 = vcombine.low %v15724_v8, %v15741_v15  ;;  %v11692_v2 = vcombine.high %v15724_v8, %v15741_v15  ;;  %v11693_v51 = vcombine.low %v15738_v18, %v15751_v24  ;;  %v11712_v8 = vld [vmem:[%s15010_s12 + $0x1b8] sm:$0x11]  ;;  %v3441_v10 = vshll.u32 %v11708_v9, 16 }
 0x1d2   : > { %3344 = vst [vmem:[#allocation3 + $0x4f8] sm:$0xff] %v11688_v6  ;;  %3345 = vst [vmem:[#allocation3 + $0x600] sm:$0xff] %v11689_v4  ;;  %v11694_v14 = vcombine.high %v15738_v18, %v15751_v24  ;;  %v11695_v56 = vcombine.low %v15744_v13, %v15766_v20  ;;  %v11696_v30 = vcombine.high %v15744_v13, %v15766_v20  ;;  %v11716_v15 = vld [vmem:[%s15010_s12 + $0x1d8] sm:$0x11]  ;;  %v3399_v13 = vshll.u32 %v11703_v19, 16  ;;  %v16033_v19 = vld [vmem:[%s15010_s12 + $0x220] sm:$0xff] }
 0x1d3   : > { %3346 = vst [vmem:[#allocation3 + $0x608] sm:$0xff] %v11690_v7  ;;  %3242 = vst [vmem:[#allocation3 + $0x830] sm:$0xff] %v11667_v16  ;;  %v11697_v33 = vcombine.low %v15754_v21, %v15968_v23  ;;  %v11698_v31 = vcombine.high %v15754_v21, %v15968_v23  ;;  %v11699_v18 = vcombine.low %v15769_v41, %v15971_v34  ;;  %v3427_v20 = vshll.u32 %v11707_v47, 16  ;;  %v11719_v62 = vld [vmem:[%s15010_s12 + $0x1f0] sm:$0x11] }
 0x1d4   : > { %3243 = vst [vmem:[#allocation3 + $0x838] sm:$0xff] %v11668_v27  ;;  %3347 = vst [vmem:[#allocation3 + $0x610] sm:$0xff] %v11691_v26  ;;  %v11700_v24 = vcombine.high %v15769_v41, %v15971_v34  ;;  %v3483_v21 = vshll.u32 %v11715_v32, 16  ;;  %v3469_v46 = vshll.u32 %v11712_v8, 16  ;;  %v3497_v58 = vshll.u32 %v11716_v15, 16 }
 0x1d5   : > { %3348 = vst [vmem:[#allocation3 + $0x618] sm:$0xff] %v11692_v2  ;;  %3349 = vst [vmem:[#allocation3 + $0x720] sm:$0xff] %v11693_v51  ;;  %v3401_v29 = vrot.slane %v3399_v13, 5  ;;  %v3429_v5 = vrot.slane %v3427_v20, 5  ;;  %v3415_v41 = vrot.slane %v3413_v36, 5  ;;  %v3443_v50 = vrot.slane %v3441_v10, 5 }
 0x1d6   : > { %3350 = vst [vmem:[#allocation3 + $0x728] sm:$0xff] %v11694_v14  ;;  %3351 = vst [vmem:[#allocation3 + $0x730] sm:$0xff] %v11695_v56  ;;  %v3457_v42 = vrot.slane %v3455_v37, 5  ;;  %v3485_v48 = vrot.slane %v3483_v21, 5  ;;  %v3471_v52 = vrot.slane %v3469_v46, 5  ;;  %v3499_v45 = vrot.slane %v3497_v58, 5 }
 0x1d7   : > { %3352 = vst [vmem:[#allocation3 + $0x738] sm:$0xff] %v11696_v30  ;;  %3353 = vst [vmem:[#allocation3 + $0x840] sm:$0xff] %v11697_v33  ;;  %v3402_v53 = vsel %vm15125_vm2, %v15792_v61, %v3401_v29  ;;  %v3430_v11 = vsel %vm15125_vm2, %v15814_v54, %v3429_v5  ;;  %v3416_v55 = vsel %vm15125_vm2, %v15805_v38, %v3415_v41  ;;  %v11723_v61 = vld [vmem:[%s15010_s12 + $0x210] sm:$0x11]  ;;  %v11720_v4 = vld [vmem:[%s15010_s12 + $0x1f8] sm:$0x11] }
 0x1d8   : > { %3354 = vst [vmem:[#allocation3 + $0x848] sm:$0xff] %v11698_v31  ;;  %3355 = vst [vmem:[#allocation3 + $0x850] sm:$0xff] %v11699_v18  ;;  %v3444_v49 = vsel %vm15125_vm2, %v15829_v12, %v3443_v50  ;;  %v11733_v60 = vcombine.low %v3402_v53, %v3430_v11  ;;  %v11734_v63 = vcombine.high %v3402_v53, %v3430_v11  ;;  %v11724_v7 = vld [vmem:[%s15010_s12 + $0x218] sm:$0x11]  ;;  %v3511_v27 = vshll.u32 %v11719_v62, 16  ;;  %v16048_v10 = vld [vmem:[%s15010_s12 + $0x228] sm:$0xff] }
 0x1d9   : > { %3356 = vst [vmem:[#allocation3 + $0x858] sm:$0xff] %v11700_v24  ;;  %v11735_v43 = vcombine.low %v3416_v55, %v3444_v49  ;;  %v11736_v40 = vcombine.high %v3416_v55, %v3444_v49  ;;  %v3458_v54 = vsel %vm15125_vm2, %v15816_v22, %v3457_v42  ;;  %v3486_v38 = vsel %vm15125_vm2, %v15848_v57, %v3485_v48  ;;  %v11727_v9 = vld [vmem:[%s15010_s12 + $0x230] sm:$0x11]  ;;  %v11728_v29 = vld [vmem:[%s15010_s12 + $0x238] sm:$0x11] }
 0x1da   : > { %v3472_v12 = vsel %vm15125_vm2, %v15839_v35, %v3471_v52  ;;  %v3500_v6 = vsel %vm15125_vm2, %v15861_v3, %v3499_v45  ;;  %3677 = vst [vmem:[#allocation3 + $0x500] sm:$0xff] %v11733_v60  ;;  %3678 = vst [vmem:[#allocation3 + $0x508] sm:$0xff] %v11734_v63  ;;  %v11737_v22 = vcombine.low %v3458_v54, %v3486_v38  ;;  %v3539_v26 = vshll.u32 %v11723_v61, 16  ;;  %v11731_v20 = vld [vmem:[%s15010_s12 + $0x250] sm:$0x11] }
 0x1db   : > { %3679 = vst [vmem:[#allocation3 + $0x510] sm:$0xff] %v11735_v43  ;;  %3680 = vst [vmem:[#allocation3 + $0x518] sm:$0xff] %v11736_v40  ;;  %v11738_v47 = vcombine.high %v3458_v54, %v3486_v38  ;;  %v11739_v57 = vcombine.low %v3472_v12, %v3500_v6  ;;  %v11740_v16 = vcombine.high %v3472_v12, %v3500_v6  ;;  %v3516_v35 = vshrl.u32 %v16016_v0, 16  ;;  %v11732_v50 = vld [vmem:[%s15010_s12 + $0x258] sm:$0x11] }
 0x1dc   : > { %v3519_v2 = vshll.u32 %v16016_v0, 16  ;;  %3681 = vst [vmem:[#allocation3 + $0x620] sm:$0xff] %v11737_v22  ;;  %v3525_v3 = vshll.u32 %v11720_v4, 16  ;;  %v3553_v39 = vshll.u32 %v11724_v7, 16  ;;  %v3558_v28 = vshrl.u32 %v16033_v19, 16 }
 0x1dd   : > { %3682 = vst [vmem:[#allocation3 + $0x628] sm:$0xff] %v11738_v47  ;;  %3683 = vst [vmem:[#allocation3 + $0x630] sm:$0xff] %v11739_v57  ;;  %v3561_v51 = vshll.u32 %v16033_v19, 16  ;;  %v3513_v14 = vrot.slane %v3511_v27, 5  ;;  %v3541_v56 = vrot.slane %v3539_v26, 5  ;;  %v3518_v30 = vrot.slane %v3516_v35, 4 }
 0x1de   : > { %3684 = vst [vmem:[#allocation3 + $0x638] sm:$0xff] %v11740_v16  ;;  %v3521_v32 = vrot.slane %v3519_v2, 5  ;;  %v3527_v8 = vrot.slane %v3525_v3, 5  ;;  %v3555_v15 = vrot.slane %v3553_v39, 5  ;;  %v3560_v33 = vrot.slane %v3558_v28, 4 }
 0x1df   : > { %v3563_v31 = vrot.slane %v3561_v51, 5  ;;  %v3514_v18 = vsel %vm15125_vm2, %v15851_v1, %v3513_v14  ;;  %v3542_v24 = vsel %vm15125_vm2, %v15876_v17, %v3541_v56  ;;  %v3567_v36 = vshll.u32 %v11727_v9, 16  ;;  %v11749_v45 = vld [vmem:[%s15010_s12 + $0x160] sm:$0xee]  ;;  %v11751_v60 = vld [vmem:[%s15010_s12 + $0x170] sm:$0x11] }
 0x1e0   : > { %v3522_v13 = vor.u32 %v3521_v32, %v3518_v30  ;;  %v11741_v37 = vcombine.low %v3514_v18, %v3542_v24  ;;  %v11742_v21 = vcombine.high %v3514_v18, %v3542_v24  ;;  %v3556_v46 = vsel %vm15125_vm2, %v15892_v44, %v3555_v15  ;;  %v11753_v61 = vld [vmem:[%s15010_s12 + $0x180] sm:$0xee]  ;;  %v11755_v54 = vld [vmem:[%s15010_s12 + $0x190] sm:$0x11]  ;;  %v11750_v7 = vld [vmem:[%s15010_s12 + $0x168] sm:$0xee] }
 0x1e1   : > { %v3564_v58 = vor.u32 %v3563_v31, %v3560_v33  ;;  %v3569_v1 = vrot.slane %v3567_v36, 5  ;;  %v3586_v17 = vshrl.u32 %v15968_v23, 16  ;;  %v3589_v41 = vshll.u32 %v15968_v23, 16  ;;  %v11752_v27 = vld [vmem:[%s15010_s12 + $0x178] sm:$0x11] }
 0x1e2   : > { %v16054_v5 = vrot.slane %v3522_v13, 4  ;;  %3685 = vst [vmem:[#allocation3 + $0x740] sm:$0xff] %v11741_v37  ;;  %3686 = vst [vmem:[#allocation3 + $0x748] sm:$0xff] %v11742_v21  ;;  %v3595_v48 = vshll.u32 %v11731_v20, 16  ;;  %v3572_v44 = vshrl.u32 %v16048_v10, 16  ;;  %v3575_v52 = vshll.u32 %v16048_v10, 16 }
 0x1e3   : > { %v16059_v42 = vrot.slane %v3564_v58, 4  ;;  %v3588_v11 = vrot.slane %v3586_v17, 4  ;;  %v3591_v55 = vrot.slane %v3589_v41, 5  ;;  %v3581_v49 = vshll.u32 %v11728_v29, 16  ;;  %v11754_v39 = vld [vmem:[%s15010_s12 + $0x188] sm:$0xee] }
 0x1e4   : > { %v3528_v53 = vsel %vm15125_vm2, %v16054_v5, %v3527_v8  ;;  %v3597_v62 = vrot.slane %v3595_v48, 5  ;;  %v3574_v12 = vrot.slane %v3572_v44, 4  ;;  %v3577_v6 = vrot.slane %v3575_v52, 5  ;;  %v11756_v56 = vld [vmem:[%s15010_s12 + $0x198] sm:$0x11] }
 0x1e5   : > { %v11743_v63 = vcombine.low %v3528_v53, %v3556_v46  ;;  %v11744_v43 = vcombine.high %v3528_v53, %v3556_v46  ;;  %v3570_v40 = vsel %vm15125_vm2, %v16059_v42, %v3569_v1  ;;  %v3592_v38 = vor.u32 %v3591_v55, %v3588_v11  ;;  %v11757_v33 = vld [vmem:[%s15010_s12 + $0x1a0] sm:$0xee]  ;;  %v11759_v31 = vld [vmem:[%s15010_s12 + $0x1b0] sm:$0x11]  ;;  %v11758_v21 = vld [vmem:[%s15010_s12 + $0x1a8] sm:$0xee] }
 0x1e6   : > { %v3583_v4 = vrot.slane %v3581_v49, 5  ;;  %v3600_v22 = vshrl.u32 %v15971_v34, 16  ;;  %v3603_v47 = vshll.u32 %v15971_v34, 16  ;;  %v3609_v57 = vshll.u32 %v11732_v50, 16  ;;  %v11761_v36 = vld [vmem:[%s15010_s12 + $0x1c0] sm:$0xee] }
 0x1e7   : > { %3687 = vst [vmem:[#allocation3 + $0x750] sm:$0xff] %v11743_v63  ;;  %3688 = vst [vmem:[#allocation3 + $0x758] sm:$0xff] %v11744_v43  ;;  %v11781_v16 = vrot.slane %v11749_v45, 9  ;;  %v3593_v26 = vrot.slane %v3592_v38, 4  ;;  %v3578_v35 = vor.u32 %v3577_v6, %v3574_v12  ;;  %v3759_v2 = vrot.slane %v11751_v60, 5 }
 0x1e8   : > { %v11783_v3 = vrot.slane %v11753_v61, 9  ;;  %v3602_v9 = vrot.slane %v3600_v22, 4  ;;  %v3605_v28 = vrot.slane %v3603_v47, 5  ;;  %v3611_v51 = vrot.slane %v3609_v57, 5  ;;  %v11763_v37 = vld [vmem:[%s15010_s12 + $0x1d0] sm:$0x11] }
 0x1e9   : > { %v3767_v14 = vrot.slane %v11755_v54, 5  ;;  %v3598_v30 = vsel %vm15125_vm2, %v3593_v26, %v3597_v62  ;;  %v16081_v32 = vrot.slane %v3578_v35, 4  ;;  %v3760_v8 = vsel %vm15234_vm5, %v11781_v16, %v3759_v2  ;;  %v11760_v17 = vld [vmem:[%s15010_s12 + $0x1b8] sm:$0x11]  ;;  %v11762_v41 = vld [vmem:[%s15010_s12 + $0x1c8] sm:$0xee] }
 0x1ea   : > { %v11782_v15 = vrot.slane %v11750_v7, 9  ;;  %v11745_v18 = vcombine.low %v3570_v40, %v3598_v30  ;;  %v11746_v24 = vcombine.high %v3570_v40, %v3598_v30  ;;  %v3606_v13 = vor.u32 %v3605_v28, %v3602_v9  ;;  %v11764_v45 = vld [vmem:[%s15010_s12 + $0x1d8] sm:$0x11]  ;;  %v11765_v60 = vld [vmem:[%s15010_s12 + $0x1e0] sm:$0xee] }
 0x1eb   : > { %v3768_v20 = vsel %vm15234_vm5, %v11783_v3, %v3767_v14  ;;  %v3584_v46 = vsel %vm15125_vm2, %v16081_v32, %v3583_v4  ;;  %v3763_v1 = vrot.slane %v11752_v27, 5  ;;  %v11784_v48 = vrot.slane %v11754_v39, 9  ;;  %v11767_v61 = vld [vmem:[%s15010_s12 + $0x1f0] sm:$0x11]  ;;  %v11769_v54 = vld [vmem:[%s15010_s12 + $0x200] sm:$0xee] }
 0x1ec   : > { %v11797_v58 = vcombine.low %v3760_v8, %v3768_v20  ;;  %v11798_v29 = vcombine.high %v3760_v8, %v3768_v20  ;;  %3689 = vst [vmem:[#allocation3 + $0x860] sm:$0xff] %v11745_v18  ;;  %3690 = vst [vmem:[#allocation3 + $0x868] sm:$0xff] %v11746_v24  ;;  %v3607_v50 = vrot.slane %v3606_v13, 4  ;;  %v3771_v44 = vrot.slane %v11756_v56, 5  ;;  %v11771_v7 = vld [vmem:[%s15010_s12 + $0x210] sm:$0x11] }
 0x1ed   : > { %v11785_v52 = vrot.slane %v11757_v33, 9  ;;  %v3764_v53 = vsel %vm15234_vm5, %v11782_v15, %v3763_v1  ;;  %v3775_v11 = vrot.slane %v11759_v31, 5  ;;  %v11787_v55 = vrot.slane %v11761_v36, 9  ;;  %v11766_v22 = vld [vmem:[%s15010_s12 + $0x1e8] sm:$0xee] }
 0x1ee   : > { %3885 = vst [vmem:[#allocation3 + $0x520] sm:$0xff] %v11797_v58  ;;  %3886 = vst [vmem:[#allocation3 + $0x528] sm:$0xff] %v11798_v29  ;;  %v3783_v49 = vrot.slane %v11763_v37, 5  ;;  %v3612_v63 = vsel %vm15125_vm2, %v3607_v50, %v3611_v51  ;;  %v3772_v43 = vsel %vm15234_vm5, %v11784_v48, %v3771_v44  ;;  %v11786_v40 = vrot.slane %v11758_v21, 9  ;;  %v11768_v47 = vld [vmem:[%s15010_s12 + $0x1f8] sm:$0x11] }
 0x1ef   : > { %v3779_v62 = vrot.slane %v11760_v17, 5  ;;  %v11747_v38 = vcombine.low %v3584_v46, %v3612_v63  ;;  %v11748_v12 = vcombine.high %v3584_v46, %v3612_v63  ;;  %v11799_v6 = vcombine.low %v3764_v53, %v3772_v43  ;;  %v11770_v35 = vld [vmem:[%s15010_s12 + $0x208] sm:$0xee]  ;;  %v11772_v2 = vld [vmem:[%s15010_s12 + $0x218] sm:$0x11] }
 0x1f0   : > { %v11800_v4 = vcombine.high %v3764_v53, %v3772_v43  ;;  %v3776_v57 = vsel %vm15234_vm5, %v11785_v52, %v3775_v11  ;;  %v3784_v16 = vsel %vm15234_vm5, %v11787_v55, %v3783_v49  ;;  %v11788_v26 = vrot.slane %v11762_v41, 9  ;;  %v11773_v51 = vld [vmem:[%s15010_s12 + $0x220] sm:$0xee]  ;;  %v11775_v15 = vld [vmem:[%s15010_s12 + $0x230] sm:$0x11] }
 0x1f1   : > { %v3780_v27 = vsel %vm15234_vm5, %v11786_v40, %v3779_v62  ;;  %3691 = vst [vmem:[#allocation3 + $0x870] sm:$0xff] %v11747_v38  ;;  %3692 = vst [vmem:[#allocation3 + $0x878] sm:$0xff] %v11748_v12  ;;  %v11801_v3 = vcombine.low %v3776_v57, %v3784_v16  ;;  %v11802_v39 = vcombine.high %v3776_v57, %v3784_v16  ;;  %v3787_v9 = vrot.slane %v11764_v45, 5  ;;  %v11777_v13 = vld [vmem:[%s15010_s12 + $0x240] sm:$0xee]  ;;  %v16147_v12 = vld [vmem:[%s15010_s12 + $0x188] sm:$0xff] }
 0x1f2   : > { %3887 = vst [vmem:[#allocation3 + $0x530] sm:$0xff] %v11799_v6  ;;  %3888 = vst [vmem:[#allocation3 + $0x538] sm:$0xff] %v11800_v4  ;;  %v11789_v28 = vrot.slane %v11765_v60, 9  ;;  %v3791_v14 = vrot.slane %v11767_v61, 5  ;;  %v11791_v56 = vrot.slane %v11769_v54, 9  ;;  %v3799_v30 = vrot.slane %v11771_v7, 5 }
 0x1f3   : > { %v11790_v8 = vrot.slane %v11766_v22, 9  ;;  %3889 = vst [vmem:[#allocation3 + $0x640] sm:$0xff] %v11801_v3  ;;  %3890 = vst [vmem:[#allocation3 + $0x648] sm:$0xff] %v11802_v39  ;;  %v3788_v33 = vsel %vm15234_vm5, %v11788_v26, %v3787_v9  ;;  %v3795_v31 = vrot.slane %v11768_v47, 5  ;;  %v11792_v18 = vrot.slane %v11770_v35, 9  ;;  %v16137_v43 = vld [vmem:[%s15010_s12 + $0x180] sm:$0xff] }
 0x1f4   : > { %v3803_v24 = vrot.slane %v11772_v2, 5  ;;  %v11803_v20 = vcombine.low %v3780_v27, %v3788_v33  ;;  %v11804_v36 = vcombine.high %v3780_v27, %v3788_v33  ;;  %v3792_v37 = vsel %vm15234_vm5, %v11789_v28, %v3791_v14  ;;  %v11779_v46 = vld [vmem:[%s15010_s12 + $0x250] sm:$0x11]  ;;  %v11774_v58 = vld [vmem:[%s15010_s12 + $0x228] sm:$0xee]  ;;  %v16140_v40 = vld [vmem:[%s15010_s12 + $0x1a0] sm:$0xff] }
 0x1f5   : > { %v3800_v21 = vsel %vm15234_vm5, %v11791_v56, %v3799_v30  ;;  %v11776_v29 = vld [vmem:[%s15010_s12 + $0x238] sm:$0x11]  ;;  %v3796_v41 = vsel %vm15234_vm5, %v11790_v8, %v3795_v31  ;;  %v11778_v48 = vld [vmem:[%s15010_s12 + $0x248] sm:$0xee]  ;;  %v11793_v53 = vrot.slane %v11773_v51, 9  ;;  %v3807_v11 = vrot.slane %v11775_v15, 5 }
 0x1f6   : > { %v11805_v1 = vcombine.low %v3792_v37, %v3800_v21  ;;  %v11806_v17 = vcombine.high %v3792_v37, %v3800_v21  ;;  %v3804_v50 = vsel %vm15234_vm5, %v11792_v18, %v3803_v24  ;;  %v11780_v44 = vld [vmem:[%s15010_s12 + $0x258] sm:$0x11]  ;;  %3891 = vst [vmem:[#allocation3 + $0x650] sm:$0xff] %v11803_v20  ;;  %3892 = vst [vmem:[#allocation3 + $0x658] sm:$0xff] %v11804_v36  ;;  %v11795_v55 = vrot.slane %v11777_v13, 9  ;;  %v16150_v6 = vld [vmem:[%s15010_s12 + $0x1a8] sm:$0xff] }
 0x1f7   : > { %v11807_v52 = vcombine.low %v3796_v41, %v3804_v50  ;;  %v11808_v45 = vcombine.high %v3796_v41, %v3804_v50  ;;  %v3815_v49 = vrot.slane %v11779_v46, 5  ;;  %v11794_v60 = vrot.slane %v11774_v58, 9  ;;  %v16165_v35 = vld [vmem:[%s15010_s12 + $0x1c0] sm:$0xff]  ;;  %v16175_v51 = vld [vmem:[%s15010_s12 + $0x1c8] sm:$0xff]  ;;  %v11847_v18 = vld [vmem:[%s15010_s12 + $0x190] sm:$0x11] }
 0x1f8   : > { %3893 = vst [vmem:[#allocation3 + $0x760] sm:$0xff] %v11805_v1  ;;  %3894 = vst [vmem:[#allocation3 + $0x768] sm:$0xff] %v11806_v17  ;;  %v3811_v63 = vrot.slane %v11776_v29, 5  ;;  %v3808_v62 = vsel %vm15234_vm5, %v11793_v53, %v3807_v11  ;;  %v11796_v61 = vrot.slane %v11778_v48, 9  ;;  %v3819_v54 = vrot.slane %v11780_v44, 5  ;;  %v16168_v2 = vld [vmem:[%s15010_s12 + $0x1e0] sm:$0xff] }
 0x1f9   : > { %3895 = vst [vmem:[#allocation3 + $0x770] sm:$0xff] %v11807_v52  ;;  %3896 = vst [vmem:[#allocation3 + $0x778] sm:$0xff] %v11808_v45  ;;  %v11829_v38 = vcombine.low %v16137_v43, %v16140_v40  ;;  %v3816_v4 = vsel %vm15234_vm5, %v11795_v55, %v3815_v49  ;;  %v11830_v22 = vcombine.high %v16137_v43, %v16140_v40  ;;  %v16178_v14 = vld [vmem:[%s15010_s12 + $0x200] sm:$0xff]  ;;  %v16181_v56 = vld [vmem:[%s15010_s12 + $0x208] sm:$0xff]  ;;  %v4050_v46 = vshll.u32 %v16137_v43, 16 }
 0x1fa   : > { %v3812_v7 = vsel %vm15234_vm5, %v11794_v60, %v3811_v63  ;;  %v11831_v47 = vcombine.low %v16147_v12, %v16150_v6  ;;  %v11809_v57 = vcombine.low %v3808_v62, %v3816_v4  ;;  %v11810_v16 = vcombine.high %v3808_v62, %v3816_v4  ;;  %v16192_v31 = vld [vmem:[%s15010_s12 + $0x260] sm:$0xff]  ;;  %v11851_v24 = vld [vmem:[%s15010_s12 + $0x1b0] sm:$0x11]  ;;  %v16205_v36 = vld [vmem:[%s15010_s12 + $0x268] sm:$0xff] }
 0x1fb   : > { %v3820_v27 = vsel %vm15234_vm5, %v11796_v61, %v3819_v54  ;;  %3998 = vst [vmem:[#allocation3 + $0x540] sm:$0xff] %v11829_v38  ;;  %v11832_v26 = vcombine.high %v16147_v12, %v16150_v6  ;;  %3999 = vst [vmem:[#allocation3 + $0x548] sm:$0xff] %v11830_v22  ;;  %v11833_v9 = vcombine.low %v16165_v35, %v16168_v2  ;;  %v4075_v58 = vshrl.u32 %v16140_v40, 16  ;;  %v11848_v17 = vld [vmem:[%s15010_s12 + $0x198] sm:$0x11] }
 0x1fc   : > { %v11811_v3 = vcombine.low %v3812_v7, %v3820_v27  ;;  %v11812_v39 = vcombine.high %v3812_v7, %v3820_v27  ;;  %4000 = vst [vmem:[#allocation3 + $0x550] sm:$0xff] %v11831_v47  ;;  %v11834_v28 = vcombine.high %v16165_v35, %v16168_v2  ;;  %3897 = vst [vmem:[#allocation3 + $0x880] sm:$0xff] %v11809_v57  ;;  %v4078_v29 = vshll.u32 %v16140_v40, 16  ;;  %v11852_v50 = vld [vmem:[%s15010_s12 + $0x1b8] sm:$0x11] }
 0x1fd   : > { %3898 = vst [vmem:[#allocation3 + $0x888] sm:$0xff] %v11810_v16  ;;  %4001 = vst [vmem:[#allocation3 + $0x558] sm:$0xff] %v11832_v26  ;;  %v11835_v30 = vcombine.low %v16175_v51, %v16016_v0  ;;  %v11836_v8 = vcombine.high %v16175_v51, %v16016_v0  ;;  %v11837_v15 = vcombine.low %v16178_v14, %v16033_v19  ;;  %v4084_v1 = vshll.u32 %v11851_v24, 16 }
 0x1fe   : > { %v11838_v33 = vcombine.high %v16178_v14, %v16033_v19  ;;  %3899 = vst [vmem:[#allocation3 + $0x890] sm:$0xff] %v11811_v3  ;;  %3900 = vst [vmem:[#allocation3 + $0x898] sm:$0xff] %v11812_v39  ;;  %v11839_v13 = vcombine.low %v16181_v56, %v16048_v10  ;;  %v11840_v0 = vcombine.high %v16181_v56, %v16048_v10  ;;  %v4047_v10 = vshrl.u32 %v16137_v43, 16 }
 0x1ff   : > { %4002 = vst [vmem:[#allocation3 + $0x660] sm:$0xff] %v11833_v9  ;;  %4003 = vst [vmem:[#allocation3 + $0x668] sm:$0xff] %v11834_v28  ;;  %v11841_v20 = vcombine.low %v15968_v23, %v16192_v31  ;;  %v11842_v19 = vcombine.high %v15968_v23, %v16192_v31  ;;  %v11843_v37 = vcombine.low %v15971_v34, %v16205_v36  ;;  %v4056_v23 = vshll.u32 %v11847_v18, 16  ;;  %v11859_v28 = vld [vmem:[%s15010_s12 + $0x1f0] sm:$0x11] }
 0x200   : > { %4004 = vst [vmem:[#allocation3 + $0x670] sm:$0xff] %v11835_v30  ;;  %4005 = vst [vmem:[#allocation3 + $0x678] sm:$0xff] %v11836_v8  ;;  %v11844_v21 = vcombine.high %v15971_v34, %v16205_v36  ;;  %v4049_v41 = vrot.slane %v4047_v10, 4  ;;  %v4052_v34 = vrot.slane %v4050_v46, 5  ;;  %v4061_v48 = vshrl.u32 %v16147_v12, 16 }
 0x201   : > { %4006 = vst [vmem:[#allocation3 + $0x780] sm:$0xff] %v11837_v15  ;;  %4007 = vst [vmem:[#allocation3 + $0x788] sm:$0xff] %v11838_v33  ;;  %v4064_v44 = vshll.u32 %v16147_v12, 16  ;;  %v4058_v52 = vrot.slane %v4056_v23, 5  ;;  %v4077_v45 = vrot.slane %v4075_v58, 4  ;;  %v4080_v53 = vrot.slane %v4078_v29, 5 }
 0x202   : > { %4008 = vst [vmem:[#allocation3 + $0x790] sm:$0xff] %v11839_v13  ;;  %4009 = vst [vmem:[#allocation3 + $0x798] sm:$0xff] %v11840_v0  ;;  %v4086_v11 = vrot.slane %v4084_v1, 5  ;;  %v4053_v55 = vor.u32 %v4052_v34, %v4049_v41  ;;  %v4063_v49 = vrot.slane %v4061_v48, 4  ;;  %v4070_v63 = vshll.u32 %v11848_v17, 16 }
 0x203   : > { %4010 = vst [vmem:[#allocation3 + $0x8a0] sm:$0xff] %v11841_v20  ;;  %4011 = vst [vmem:[#allocation3 + $0x8a8] sm:$0xff] %v11842_v19  ;;  %v4066_v60 = vrot.slane %v4064_v44, 5  ;;  %v4081_v43 = vor.u32 %v4080_v53, %v4077_v45  ;;  %v4089_v40 = vshrl.u32 %v16150_v6, 16  ;;  %v4092_v62 = vshll.u32 %v16150_v6, 16 }
 0x204   : > { %4012 = vst [vmem:[#allocation3 + $0x8b0] sm:$0xff] %v11843_v37  ;;  %4013 = vst [vmem:[#allocation3 + $0x8b8] sm:$0xff] %v11844_v21  ;;  %v4098_v61 = vshll.u32 %v11852_v50, 16  ;;  %v4054_v54 = vrot.slane %v4053_v55, 4  ;;  %v4072_v4 = vrot.slane %v4070_v63, 5  ;;  %v4103_v7 = vshrl.u32 %v16165_v35, 16 }
 0x205   : > { %v4067_v38 = vor.u32 %v4066_v60, %v4063_v49  ;;  %v11855_v12 = vld [vmem:[%s15010_s12 + $0x1d0] sm:$0x11]  ;;  %v4082_v22 = vrot.slane %v4081_v43, 4  ;;  %v4091_v47 = vrot.slane %v4089_v40, 4  ;;  %v4094_v57 = vrot.slane %v4092_v62, 5 }
 0x206   : > { %v4100_v16 = vrot.slane %v4098_v61, 5  ;;  %v4059_v27 = vsel %vm15125_vm2, %v4054_v54, %v4058_v52  ;;  %v4105_v3 = vrot.slane %v4103_v7, 4  ;;  %v4106_v6 = vshll.u32 %v16165_v35, 16  ;;  %v11856_v13 = vld [vmem:[%s15010_s12 + $0x1d8] sm:$0x11] }
 0x207   : > { %v4068_v26 = vrot.slane %v4067_v38, 4  ;;  %v4087_v39 = vsel %vm15125_vm2, %v4082_v22, %v4086_v11  ;;  %v4095_v9 = vor.u32 %v4094_v57, %v4091_v47  ;;  %v4112_v30 = vshll.u32 %v11855_v12, 16  ;;  %v11860_v0 = vld [vmem:[%s15010_s12 + $0x1f8] sm:$0x11]  ;;  %v11867_v44 = vld [vmem:[%s15010_s12 + $0x230] sm:$0x11] }
 0x208   : > { %v4131_v8 = vshrl.u32 %v16168_v2, 16  ;;  %v11877_v15 = vcombine.low %v4059_v27, %v4087_v39  ;;  %v11878_v33 = vcombine.high %v4059_v27, %v4087_v39  ;;  %v4108_v24 = vrot.slane %v4106_v6, 5  ;;  %v11868_v57 = vld [vmem:[%s15010_s12 + $0x238] sm:$0x11]  ;;  %v11869_v6 = vld [vmem:[%s15010_s12 + $0x240] sm:$0xff] }
 0x209   : > { %v4073_v18 = vsel %vm15125_vm2, %v4068_v26, %v4072_v4  ;;  %v4096_v20 = vrot.slane %v4095_v9, 4  ;;  %v4114_v19 = vrot.slane %v4112_v30, 5  ;;  %v4134_v35 = vshll.u32 %v16168_v2, 16  ;;  %v11863_v2 = vld [vmem:[%s15010_s12 + $0x210] sm:$0x11] }
 0x20a   : > { %v4133_v37 = vrot.slane %v4131_v8, 4  ;;  %4334 = vst [vmem:[#allocation3 + $0x560] sm:$0xff] %v11877_v15  ;;  %4335 = vst [vmem:[#allocation3 + $0x568] sm:$0xff] %v11878_v33  ;;  %v4109_v21 = vor.u32 %v4108_v24, %v4105_v3  ;;  %v4140_v10 = vshll.u32 %v11859_v28, 16  ;;  %v4117_v46 = vshrl.u32 %v16175_v51, 16 }
 0x20b   : > { %v4120_v23 = vshll.u32 %v16175_v51, 16  ;;  %v4101_v58 = vsel %vm15125_vm2, %v4096_v20, %v4100_v16  ;;  %v4136_v29 = vrot.slane %v4134_v35, 5  ;;  %v4126_v1 = vshll.u32 %v11856_v13, 16  ;;  %v11864_v4 = vld [vmem:[%s15010_s12 + $0x218] sm:$0x11] }
 0x20c   : > { %v4154_v17 = vshll.u32 %v11860_v0, 16  ;;  %v11879_v41 = vcombine.low %v4073_v18, %v4101_v58  ;;  %v11880_v34 = vcombine.high %v4073_v18, %v4101_v58  ;;  %v4110_v50 = vrot.slane %v4109_v21, 4  ;;  %v11871_v30 = vld [vmem:[%s15010_s12 + $0x250] sm:$0x11]  ;;  %v11870_v21 = vld [vmem:[%s15010_s12 + $0x248] sm:$0xff] }
 0x20d   : > { %v4142_v48 = vrot.slane %v4140_v10, 5  ;;  %v4137_v52 = vor.u32 %v4136_v29, %v4133_v37  ;;  %v4119_v45 = vrot.slane %v4117_v46, 4  ;;  %v4122_v53 = vrot.slane %v4120_v23, 5  ;;  %v11872_v29 = vld [vmem:[%s15010_s12 + $0x258] sm:$0x11] }
 0x20e   : > { %v4128_v11 = vrot.slane %v4126_v1, 5  ;;  %4336 = vst [vmem:[#allocation3 + $0x570] sm:$0xff] %v11879_v41  ;;  %4337 = vst [vmem:[#allocation3 + $0x578] sm:$0xff] %v11880_v34  ;;  %v4115_v51 = vsel %vm15125_vm2, %v4110_v50, %v4114_v19  ;;  %v4156_v55 = vrot.slane %v4154_v17, 5  ;;  %v4159_v49 = vshrl.u32 %v16178_v14, 16 }
 0x20f   : > { %v4162_v60 = vshll.u32 %v16178_v14, 16  ;;  %v4138_v63 = vrot.slane %v4137_v52, 4  ;;  %v4123_v43 = vor.u32 %v4122_v53, %v4119_v45  ;;  %v4168_v40 = vshll.u32 %v11863_v2, 16  ;;  %v11875_v19 = vld [vmem:[%s15010_s12 + $0x270] sm:$0x11] }
 0x210   : > { %v4196_v62 = vshll.u32 %v11867_v44, 16  ;;  %v4157_v61 = vsel %vm15125_vm2, %v16054_v5, %v4156_v55  ;;  %v4161_v54 = vrot.slane %v4159_v49, 4  ;;  %v4173_v12 = vshrl.u32 %v16181_v56, 16  ;;  %v11876_v44 = vld [vmem:[%s15010_s12 + $0x278] sm:$0x11] }
 0x211   : > { %v4164_v38 = vrot.slane %v4162_v60, 5  ;;  %v4143_v7 = vsel %vm15125_vm2, %v4138_v63, %v4142_v48  ;;  %v4124_v22 = vrot.slane %v4123_v43, 4  ;;  %v4170_v14 = vrot.slane %v4168_v40, 5  ;;  %v11895_v43 = vld [vmem:[%s15010_s12 + $0x190] sm:$0x11] }
 0x212   : > { %v4198_v47 = vrot.slane %v4196_v62, 5  ;;  %v11881_v16 = vcombine.low %v4115_v51, %v4143_v7  ;;  %v11882_v27 = vcombine.high %v4115_v51, %v4143_v7  ;;  %v4175_v3 = vrot.slane %v4173_v12, 4 }
 0x213   : > { %v4165_v26 = vor.u32 %v4164_v38, %v4161_v54  ;;  %v4129_v5 = vsel %vm15125_vm2, %v4124_v22, %v4128_v11  ;;  %v4176_v9 = vshll.u32 %v16181_v56, 16  ;;  %v4182_v28 = vshll.u32 %v11864_v4, 16  ;;  %v11897_v54 = vld [vmem:[%s15010_s12 + $0x1a0] sm:$0xee]  ;;  %v11899_v38 = vld [vmem:[%s15010_s12 + $0x1b0] sm:$0x11] }
 0x214   : > { %v4199_v39 = vsel %vm15125_vm2, %v16059_v42, %v4198_v47  ;;  %4338 = vst [vmem:[#allocation3 + $0x680] sm:$0xff] %v11881_v16  ;;  %4339 = vst [vmem:[#allocation3 + $0x688] sm:$0xff] %v11882_v27  ;;  %v11883_v8 = vcombine.low %v4129_v5, %v4157_v61  ;;  %v11884_v15 = vcombine.high %v4129_v5, %v4157_v61  ;;  %v4210_v18 = vshll.u32 %v11868_v57, 16 }
 0x215   : > { %v4166_v33 = vrot.slane %v4165_v26, 4  ;;  %v4178_v24 = vrot.slane %v4176_v9, 5  ;;  %v4184_v13 = vrot.slane %v4182_v28, 5  ;;  %v4215_v0 = vshrl.u32 %v11869_v6, 16  ;;  %v11896_v26 = vld [vmem:[%s15010_s12 + $0x198] sm:$0x11] }
 0x216   : > { %v4218_v20 = vshll.u32 %v11869_v6, 16  ;;  %4340 = vst [vmem:[#allocation3 + $0x690] sm:$0xff] %v11883_v8  ;;  %4341 = vst [vmem:[#allocation3 + $0x698] sm:$0xff] %v11884_v15  ;;  %v4212_v56 = vrot.slane %v4210_v18, 5  ;;  %v4224_v37 = vshll.u32 %v11871_v30, 16  ;;  %v4243_v35 = vshrl.u32 %v16192_v31, 16 }
 0x217   : > { %v4171_v42 = vsel %vm15125_vm2, %v4166_v33, %v4170_v14  ;;  %v4179_v23 = vor.u32 %v4178_v24, %v4175_v3  ;;  %v4217_v58 = vrot.slane %v4215_v0, 4  ;;  %v4246_v48 = vshll.u32 %v16192_v31, 16  ;;  %v11894_v14 = vld [vmem:[%s15010_s12 + $0x188] sm:$0xee]  ;;  %v11900_v28 = vld [vmem:[%s15010_s12 + $0x1b8] sm:$0x11] }
 0x218   : > { %v11885_v10 = vcombine.low %v4171_v42, %v4199_v39  ;;  %v11886_v46 = vcombine.high %v4171_v42, %v4199_v39  ;;  %v4213_v1 = vsel %vm15125_vm2, %v16081_v32, %v4212_v56  ;;  %v4220_v17 = vrot.slane %v4218_v20, 5  ;;  %v11893_v32 = vld [vmem:[%s15010_s12 + $0x180] sm:$0xee]  ;;  %v11898_v9 = vld [vmem:[%s15010_s12 + $0x1a8] sm:$0xee] }
 0x219   : > { %v4226_v41 = vrot.slane %v4224_v37, 5  ;;  %v4245_v34 = vrot.slane %v4243_v35, 4  ;;  %v4180_v50 = vrot.slane %v4179_v23, 4  ;;  %v4252_v2 = vshll.u32 %v11875_v19, 16  ;;  %v11901_v33 = vld [vmem:[%s15010_s12 + $0x1c0] sm:$0xee] }
 0x21a   : > { %4342 = vst [vmem:[#allocation3 + $0x7a0] sm:$0xff] %v11885_v10  ;;  %4343 = vst [vmem:[#allocation3 + $0x7a8] sm:$0xff] %v11886_v46  ;;  %v4229_v52 = vshrl.u32 %v11870_v21, 16  ;;  %v4221_v45 = vor.u32 %v4220_v17, %v4217_v58  ;;  %v4232_v53 = vshll.u32 %v11870_v21, 16  ;;  %v4238_v11 = vshll.u32 %v11872_v29, 16 }
 0x21b   : > { %v4257_v51 = vshrl.u32 %v16205_v36, 16  ;;  %v4185_v55 = vsel %vm15125_vm2, %v4180_v50, %v4184_v13  ;;  %v4248_v49 = vrot.slane %v4246_v48, 5  ;;  %v4254_v60 = vrot.slane %v4252_v2, 5  ;;  %v11903_v20 = vld [vmem:[%s15010_s12 + $0x1d0] sm:$0x11] }
 0x21c   : > { %v4231_v63 = vrot.slane %v4229_v52, 4  ;;  %v11887_v31 = vcombine.low %v4185_v55, %v4213_v1  ;;  %v11888_v40 = vcombine.high %v4185_v55, %v4213_v1  ;;  %v4222_v62 = vrot.slane %v4221_v45, 4  ;;  %v11905_v42 = vld [vmem:[%s15010_s12 + $0x1e0] sm:$0xee]  ;;  %v11907_v21 = vld [vmem:[%s15010_s12 + $0x1f0] sm:$0x11] }
 0x21d   : > { %v4234_v61 = vrot.slane %v4232_v53, 5  ;;  %v4249_v4 = vor.u32 %v4248_v49, %v4245_v34  ;;  %v4240_v12 = vrot.slane %v4238_v11, 5  ;;  %v4259_v7 = vrot.slane %v4257_v51, 4  ;;  %v11902_v10 = vld [vmem:[%s15010_s12 + $0x1c8] sm:$0xee] }
 0x21e   : > { %v4260_v22 = vshll.u32 %v16205_v36, 16  ;;  %4344 = vst [vmem:[#allocation3 + $0x7b0] sm:$0xff] %v11887_v31  ;;  %4345 = vst [vmem:[#allocation3 + $0x7b8] sm:$0xff] %v11888_v40  ;;  %v4227_v47 = vsel %vm15125_vm2, %v4222_v62, %v4226_v41  ;;  %v4266_v16 = vshll.u32 %v11876_v44, 16  ;;  %v11925_v27 = vrot.slane %v11893_v32, 9 }
 0x21f   : > { %v4235_v57 = vor.u32 %v4234_v61, %v4231_v63  ;;  %v4250_v3 = vrot.slane %v4249_v4, 4  ;;  %v4416_v5 = vrot.slane %v11895_v43, 5  ;;  %v11927_v39 = vrot.slane %v11897_v54, 9  ;;  %v11904_v46 = vld [vmem:[%s15010_s12 + $0x1d8] sm:$0x11] }
 0x220   : > { %v4262_v6 = vrot.slane %v4260_v22, 5  ;;  %v4268_v30 = vrot.slane %v4266_v16, 5  ;;  %v4424_v8 = vrot.slane %v11899_v38, 5  ;;  %v11926_v15 = vrot.slane %v11894_v14, 9  ;;  %v11906_v17 = vld [vmem:[%s15010_s12 + $0x1e8] sm:$0xee] }
 0x221   : > { %v4236_v36 = vrot.slane %v4235_v57, 4  ;;  %v4255_v18 = vsel %vm15125_vm2, %v4250_v3, %v4254_v60  ;;  %v4417_v13 = vsel %vm15234_vm5, %v11925_v27, %v4416_v5  ;;  %v4420_v0 = vrot.slane %v11896_v26, 5  ;;  %v11908_v41 = vld [vmem:[%s15010_s12 + $0x1f8] sm:$0x11]  ;;  %v11909_v44 = vld [vmem:[%s15010_s12 + $0x200] sm:$0xee] }
 0x222   : > { %v4263_v24 = vor.u32 %v4262_v6, %v4259_v7  ;;  %v11889_v56 = vcombine.low %v4227_v47, %v4255_v18  ;;  %v11890_v19 = vcombine.high %v4227_v47, %v4255_v18  ;;  %v4425_v35 = vsel %vm15234_vm5, %v11927_v39, %v4424_v8  ;;  %v11911_v52 = vld [vmem:[%s15010_s12 + $0x210] sm:$0x11]  ;;  %v11913_v32 = vld [vmem:[%s15010_s12 + $0x220] sm:$0xee]  ;;  %v11912_v31 = vld [vmem:[%s15010_s12 + $0x218] sm:$0x11] }
 0x223   : > { %v4241_v37 = vsel %vm15125_vm2, %v4236_v36, %v4240_v12  ;;  %v11941_v58 = vcombine.low %v4417_v13, %v4425_v35  ;;  %v11942_v29 = vcombine.high %v4417_v13, %v4425_v35  ;;  %v4421_v1 = vsel %vm15234_vm5, %v11926_v15, %v4420_v0  ;;  %v11915_v43 = vld [vmem:[%s15010_s12 + $0x230] sm:$0x11]  ;;  %v11914_v38 = vld [vmem:[%s15010_s12 + $0x228] sm:$0xee]  ;;  %v11916_v4 = vld [vmem:[%s15010_s12 + $0x238] sm:$0x11] }
 0x224   : > { %v4264_v23 = vrot.slane %v4263_v24, 4  ;;  %4346 = vst [vmem:[#allocation3 + $0x8c0] sm:$0xff] %v11889_v56  ;;  %4347 = vst [vmem:[#allocation3 + $0x8c8] sm:$0xff] %v11890_v19  ;;  %v11928_v34 = vrot.slane %v11898_v9, 9  ;;  %v4428_v50 = vrot.slane %v11900_v28, 5  ;;  %v11929_v48 = vrot.slane %v11901_v33, 9 }
 0x225   : > { %v4432_v2 = vrot.slane %v11903_v20, 5  ;;  %4542 = vst [vmem:[#allocation3 + $0x580] sm:$0xff] %v11941_v58  ;;  %4543 = vst [vmem:[#allocation3 + $0x588] sm:$0xff] %v11942_v29  ;;  %v11931_v53 = vrot.slane %v11905_v42, 9  ;;  %v4440_v11 = vrot.slane %v11907_v21, 5  ;;  %v11930_v51 = vrot.slane %v11902_v10, 9 }
 0x226   : > { %v4269_v45 = vsel %vm15125_vm2, %v4264_v23, %v4268_v30  ;;  %v4429_v60 = vsel %vm15234_vm5, %v11928_v34, %v4428_v50  ;;  %v4436_v54 = vrot.slane %v11904_v46, 5  ;;  %v11932_v22 = vrot.slane %v11906_v17, 9  ;;  %v11917_v47 = vld [vmem:[%s15010_s12 + $0x240] sm:$0xee]  ;;  %v11919_v57 = vld [vmem:[%s15010_s12 + $0x250] sm:$0x11] }
 0x227   : > { %v11891_v55 = vcombine.low %v4241_v37, %v4269_v45  ;;  %v11892_v49 = vcombine.high %v4241_v37, %v4269_v45  ;;  %v4433_v63 = vsel %vm15234_vm5, %v11929_v48, %v4432_v2  ;;  %v11943_v40 = vcombine.low %v4421_v1, %v4429_v60  ;;  %v11921_v6 = vld [vmem:[%s15010_s12 + $0x260] sm:$0xee]  ;;  %v11923_v36 = vld [vmem:[%s15010_s12 + $0x270] sm:$0x11]  ;;  %v11918_v18 = vld [vmem:[%s15010_s12 + $0x248] sm:$0xee] }
 0x228   : > { %v11944_v62 = vcombine.high %v4421_v1, %v4429_v60  ;;  %v4441_v61 = vsel %vm15234_vm5, %v11931_v53, %v4440_v11  ;;  %v4444_v14 = vrot.slane %v11908_v41, 5  ;;  %v4437_v16 = vsel %vm15234_vm5, %v11930_v51, %v4436_v54  ;;  %v11920_v24 = vld [vmem:[%s15010_s12 + $0x258] sm:$0x11]  ;;  %v11922_v56 = vld [vmem:[%s15010_s12 + $0x268] sm:$0xee] }
 0x229   : > { %4348 = vst [vmem:[#allocation3 + $0x8d0] sm:$0xff] %v11891_v55  ;;  %4349 = vst [vmem:[#allocation3 + $0x8d8] sm:$0xff] %v11892_v49  ;;  %v11945_v12 = vcombine.low %v4433_v63, %v4441_v61  ;;  %v11946_v7 = vcombine.high %v4433_v63, %v4441_v61  ;;  %v11933_v27 = vrot.slane %v11909_v44, 9  ;;  %v4448_v26 = vrot.slane %v11911_v52, 5  ;;  %v11924_v10 = vld [vmem:[%s15010_s12 + $0x278] sm:$0x11] }
 0x22a   : > { %4544 = vst [vmem:[#allocation3 + $0x590] sm:$0xff] %v11943_v40  ;;  %4545 = vst [vmem:[#allocation3 + $0x598] sm:$0xff] %v11944_v62  ;;  %v11935_v3 = vrot.slane %v11913_v32, 9  ;;  %v4445_v5 = vsel %vm15234_vm5, %v11932_v22, %v4444_v14  ;;  %v4456_v39 = vrot.slane %v11915_v43, 5  ;;  %v11934_v9 = vrot.slane %v11910_v59, 9 }
 0x22b   : > { %4546 = vst [vmem:[#allocation3 + $0x6a0] sm:$0xff] %v11945_v12  ;;  %4547 = vst [vmem:[#allocation3 + $0x6a8] sm:$0xff] %v11946_v7  ;;  %v4452_v28 = vrot.slane %v11912_v31, 5  ;;  %v11947_v30 = vcombine.low %v4437_v16, %v4445_v5  ;;  %v11948_v8 = vcombine.high %v4437_v16, %v4445_v5  ;;  %v4449_v15 = vsel %vm15234_vm5, %v11933_v27, %v4448_v26 }
 0x22c   : > { %v11936_v33 = vrot.slane %v11914_v38, 9  ;;  %v4457_v13 = vsel %vm15234_vm5, %v11935_v3, %v4456_v39  ;;  %v4460_v20 = vrot.slane %v11916_v4, 5  ;;  %v11937_v42 = vrot.slane %v11917_v47, 9 }
 0x22d   : > { %v4453_v0 = vsel %vm15234_vm5, %v11934_v9, %v4452_v28  ;;  %4548 = vst [vmem:[#allocation3 + $0x6b0] sm:$0xff] %v11947_v30  ;;  %4549 = vst [vmem:[#allocation3 + $0x6b8] sm:$0xff] %v11948_v8  ;;  %v11949_v19 = vcombine.low %v4449_v15, %v4457_v13  ;;  %v11950_v37 = vcombine.high %v4449_v15, %v4457_v13  ;;  %v4464_v35 = vrot.slane %v11919_v57, 5 }
 0x22e   : > { %v11939_v21 = vrot.slane %v11921_v6, 9  ;;  %v4461_v46 = vsel %vm15234_vm5, %v11936_v33, %v4460_v20  ;;  %v4472_v23 = vrot.slane %v11923_v36, 5  ;;  %v11938_v58 = vrot.slane %v11918_v18, 9 }
 0x22f   : > { %v4468_v29 = vrot.slane %v11920_v24, 5  ;;  %4550 = vst [vmem:[#allocation3 + $0x7c0] sm:$0xff] %v11949_v19  ;;  %4551 = vst [vmem:[#allocation3 + $0x7c8] sm:$0xff] %v11950_v37  ;;  %v11951_v1 = vcombine.low %v4453_v0, %v4461_v46  ;;  %v11952_v17 = vcombine.high %v4453_v0, %v4461_v46  ;;  %v4465_v41 = vsel %vm15234_vm5, %v11937_v42, %v4464_v35  ;;  %4561 = sbr.rel (%p11957_p6) target bundleno = 580 (0x244), region = 83 }
 0x230   : > { %v11940_v34 = vrot.slane %v11922_v56, 9  ;;  %v4473_v50 = vsel %vm15234_vm5, %v11939_v21, %v4472_v23  ;;  %v4476_v2 = vrot.slane %v11924_v10, 5  ;;  %v14509_v51 = vmov (!%p11957_p6), 0.0  }
 0x231   : > { %v4469_v48 = vsel %vm15234_vm5, %v11938_v58, %v4468_v29  ;;  %4552 = vst [vmem:[#allocation3 + $0x7d0] sm:$0xff] %v11951_v1  ;;  %4553 = vst [vmem:[#allocation3 + $0x7d8] sm:$0xff] %v11952_v17  ;;  %v11953_v44 = vcombine.low %v4465_v41, %v4473_v50  ;;  %v11954_v52 = vcombine.high %v4465_v41, %v4473_v50 }
 0x232   : > { %v4477_v45 = vsel %vm15234_vm5, %v11940_v34, %v4476_v2  ;;  %4562 = vst [vmem:[#allocation2] sm:$0xff] (!%p11957_p6), %v14509_v51  ;;  %4563 = vst [vmem:[#allocation2 + $0x8] sm:$0xff] (!%p11957_p6), %v14509_v51 }
 0x233   : > { %4554 = vst [vmem:[#allocation3 + $0x8e0] sm:$0xff] %v11953_v44  ;;  %4555 = vst [vmem:[#allocation3 + $0x8e8] sm:$0xff] %v11954_v52  ;;  %v11955_v53 = vcombine.low %v4469_v48, %v4477_v45  ;;  %v11956_v11 = vcombine.high %v4469_v48, %v4477_v45 }
 0x234   : > { %4564 = vst [vmem:[#allocation2 + $0x10] sm:$0xff] (!%p11957_p6), %v14509_v51  ;;  %4565 = vst [vmem:[#allocation2 + $0x18] sm:$0xff] (!%p11957_p6), %v14509_v51 }
 0x235   : > { %4556 = vst [vmem:[#allocation3 + $0x8f0] sm:$0xff] %v11955_v53  ;;  %4557 = vst [vmem:[#allocation3 + $0x8f8] sm:$0xff] %v11956_v11 }
 0x236   : > { %4566 = vst [vmem:[#allocation2 + $0x20] sm:$0xff] %v14509_v51  ;;  %4567 = vst [vmem:[#allocation2 + $0x28] sm:$0xff] %v14509_v51 }
 0x237   : > { %4568 = vst [vmem:[#allocation2 + $0x30] sm:$0xff] %v14509_v51  ;;  %4569 = vst [vmem:[#allocation2 + $0x38] sm:$0xff] %v14509_v51 }
 0x238   : > { %4570 = vst [vmem:[#allocation2 + $0x40] sm:$0xff] %v14509_v51  ;;  %4571 = vst [vmem:[#allocation2 + $0x48] sm:$0xff] %v14509_v51 }
 0x239   : > { %4572 = vst [vmem:[#allocation2 + $0x50] sm:$0xff] %v14509_v51  ;;  %4573 = vst [vmem:[#allocation2 + $0x58] sm:$0xff] %v14509_v51 }
 0x23a   : > { %4574 = vst [vmem:[#allocation2 + $0x60] sm:$0xff] %v14509_v51  ;;  %4575 = vst [vmem:[#allocation2 + $0x68] sm:$0xff] %v14509_v51 }
 0x23b   : > { %4576 = vst [vmem:[#allocation2 + $0x70] sm:$0xff] %v14509_v51  ;;  %4577 = vst [vmem:[#allocation2 + $0x78] sm:$0xff] %v14509_v51 }
 0x23c   : > { %4578 = vst [vmem:[#allocation2 + $0x80] sm:$0xff] %v14509_v51  ;;  %4579 = vst [vmem:[#allocation2 + $0x88] sm:$0xff] %v14509_v51 }
 0x23d   : > { %4580 = vst [vmem:[#allocation2 + $0x90] sm:$0xff] %v14509_v51  ;;  %4581 = vst [vmem:[#allocation2 + $0x98] sm:$0xff] %v14509_v51 }
 0x23e   : > { %4582 = vst [vmem:[#allocation2 + $0xa0] sm:$0xff] %v14509_v51  ;;  %4583 = vst [vmem:[#allocation2 + $0xa8] sm:$0xff] %v14509_v51 }
 0x23f   : > { %4584 = vst [vmem:[#allocation2 + $0xb0] sm:$0xff] %v14509_v51  ;;  %4585 = vst [vmem:[#allocation2 + $0xb8] sm:$0xff] %v14509_v51 }
 0x240   : > { %4586 = vst [vmem:[#allocation2 + $0xc0] sm:$0xff] %v14509_v51  ;;  %4587 = vst [vmem:[#allocation2 + $0xc8] sm:$0xff] %v14509_v51 }
 0x241   : > { %4588 = vst [vmem:[#allocation2 + $0xd0] sm:$0xff] %v14509_v51  ;;  %4589 = vst [vmem:[#allocation2 + $0xd8] sm:$0xff] %v14509_v51 }
 0x242   : > { %4590 = vst [vmem:[#allocation2 + $0xe0] sm:$0xff] %v14509_v51  ;;  %4591 = vst [vmem:[#allocation2 + $0xe8] sm:$0xff] %v14509_v51 }
 0x243   : > { %4592 = vst [vmem:[#allocation2 + $0xf0] sm:$0xff] %v14509_v51  ;;  %4593 = vst [vmem:[#allocation2 + $0xf8] sm:$0xff] %v14509_v51 }
 0x244 PF: > { %v13329_v25 = vld [vmem:[%s15012_s13 + $0x4] ss:$8 sps:$4 sm:$0xff]   ;;  %v13333_v55 = vld [vmem:[%s15012_s13] ss:$8 sps:$4 sm:$0xff]   ;;  %v13335_v60 = vld [vmem:[%s15012_s13 + $0x14] ss:$8 sps:$4 sm:$0xff]  }
 0x245   : > { %v13331_v32 = vld [vmem:[%s15012_s13 + $0x904] ss:$8 sps:$4 sm:$0xff]   ;;  %8370 = vmatprep.subr.bf16.mxu1 %v13329_v25  ;;  %v13334_v49 = vld [vmem:[%s15012_s13 + $0x900] ss:$8 sps:$4 sm:$0xff]   ;;  %v13337_v63 = vld [vmem:[%s15012_s13 + $0x914] ss:$8 sps:$4 sm:$0xff]  }
 0x246   : > { %9387 = vmatprep.subr.bf16.mxu0 %v13331_v32  ;;  %8371 = vmatpush1.bf16.msra.mxu1 %v13333_v55  ;;  %v13339_v43 = vld [vmem:[%s15012_s13 + $0x10] ss:$8 sps:$4 sm:$0xff]   ;;  %v13341_v31 = vld [vmem:[%s15012_s13 + $0x24] ss:$8 sps:$4 sm:$0xff]   ;;  %v13345_v62 = vld [vmem:[%s15012_s13 + $0x20] ss:$8 sps:$4 sm:$0xff]  }
 0x247   : > { %9388 = vmatpush1.bf16.msra.mxu0 %v13334_v49  ;;  %8372 = vmatprep.subr.bf16.mxu1 %v13335_v60  ;;  %v13340_v59 = vld [vmem:[%s15012_s13 + $0x910] ss:$8 sps:$4 sm:$0xff]   ;;  %v13343_v40 = vld [vmem:[%s15012_s13 + $0x924] ss:$8 sps:$4 sm:$0xff]   ;;  %v13346_v61 = vld [vmem:[%s15012_s13 + $0x920] ss:$8 sps:$4 sm:$0xff]  }
 0x248   : > { %9389 = vmatprep.subr.bf16.mxu0 %v13337_v63  ;;  %v13347_v54 = vld [vmem:[%s15012_s13 + $0x34] ss:$8 sps:$4 sm:$0xff]   ;;  %v13351_v4 = vld [vmem:[%s15012_s13 + $0x30] ss:$8 sps:$4 sm:$0xff]   ;;  %v13353_v7 = vld [vmem:[%s15012_s13 + $0x44] ss:$8 sps:$4 sm:$0xff]  }
 0x249   : > { %v13349_v38 = vld [vmem:[%s15012_s13 + $0x934] ss:$8 sps:$4 sm:$0xff]   ;;  %v13352_v12 = vld [vmem:[%s15012_s13 + $0x930] ss:$8 sps:$4 sm:$0xff]   ;;  %v13355_v22 = vld [vmem:[%s15012_s13 + $0x944] ss:$8 sps:$4 sm:$0xff]  }
 0x24a   : > { %8373 = vmatpush1.bf16.msra.mxu1 %v13339_v43  ;;  %v13357_v14 = vld [vmem:[%s15012_s13 + $0x40] ss:$8 sps:$4 sm:$0xff]   ;;  %v13359_v57 = vld [vmem:[%s15012_s13 + $0x54] ss:$8 sps:$4 sm:$0xff]   ;;  %v13363_v27 = vld [vmem:[%s15012_s13 + $0x50] ss:$8 sps:$4 sm:$0xff]  }
 0x24b   : > { %9390 = vmatpush1.bf16.msra.mxu0 %v13340_v59  ;;  %8374 = vmatprep.subr.bf16.mxu1 %v13341_v31  ;;  %v13358_v47 = vld [vmem:[%s15012_s13 + $0x940] ss:$8 sps:$4 sm:$0xff]   ;;  %v13361_v16 = vld [vmem:[%s15012_s13 + $0x954] ss:$8 sps:$4 sm:$0xff]   ;;  %v13364_v26 = vld [vmem:[%s15012_s13 + $0x950] ss:$8 sps:$4 sm:$0xff]  }
 0x24c   : > { %9391 = vmatprep.subr.bf16.mxu0 %v13343_v40  ;;  %v13365_v3 = vld [vmem:[%s15012_s13 + $0x64] ss:$8 sps:$4 sm:$0xff]   ;;  %v13369_v5 = vld [vmem:[%s15012_s13 + $0x60] ss:$8 sps:$4 sm:$0xff]   ;;  %v13371_v9 = vld [vmem:[%s15012_s13 + $0x74] ss:$8 sps:$4 sm:$0xff]  }
 0x24d   : > { %v13367_v6 = vld [vmem:[%s15012_s13 + $0x964] ss:$8 sps:$4 sm:$0xff]   ;;  %v13370_v39 = vld [vmem:[%s15012_s13 + $0x960] ss:$8 sps:$4 sm:$0xff]   ;;  %v13373_v28 = vld [vmem:[%s15012_s13 + $0x974] ss:$8 sps:$4 sm:$0xff]  }
 0x24e   : > { %8375 = vmatpush1.bf16.msra.mxu1 %v13345_v62  ;;  %v13375_v36 = vld [vmem:[%s15012_s13 + $0x70] ss:$8 sps:$4 sm:$0xff]   ;;  %v13377_v8 = vld [vmem:[%s15012_s13 + $0x84] ss:$8 sps:$4 sm:$0xff]   ;;  %v13381_v33 = vld [vmem:[%s15012_s13 + $0x80] ss:$8 sps:$4 sm:$0xff]  }
 0x24f   : > { %9392 = vmatpush1.bf16.msra.mxu0 %v13346_v61  ;;  %8376 = vmatprep.subr.bf16.mxu1 %v13347_v54  ;;  %v13376_v30 = vld [vmem:[%s15012_s13 + $0x970] ss:$8 sps:$4 sm:$0xff]   ;;  %v13379_v15 = vld [vmem:[%s15012_s13 + $0x984] ss:$8 sps:$4 sm:$0xff]   ;;  %v13382_v18 = vld [vmem:[%s15012_s13 + $0x980] ss:$8 sps:$4 sm:$0xff]  }
 0x250   : > { %9393 = vmatprep.subr.bf16.mxu0 %v13349_v38  ;;  %v13383_v24 = vld [vmem:[%s15012_s13 + $0x94] ss:$8 sps:$4 sm:$0xff]   ;;  %v13387_v0 = vld [vmem:[%s15012_s13 + $0x90] ss:$8 sps:$4 sm:$0xff]   ;;  %v13389_v42 = vld [vmem:[%s15012_s13 + $0xa4] ss:$8 sps:$4 sm:$0xff]  }
 0x251   : > { %v13385_v13 = vld [vmem:[%s15012_s13 + $0x994] ss:$8 sps:$4 sm:$0xff]   ;;  %v13388_v20 = vld [vmem:[%s15012_s13 + $0x990] ss:$8 sps:$4 sm:$0xff]   ;;  %v13391_v56 = vld [vmem:[%s15012_s13 + $0x9a4] ss:$8 sps:$4 sm:$0xff]  }
 0x252   : > { %8377 = vmatpush1.bf16.msra.mxu1 %v13351_v4  ;;  %v13393_v19 = vld [vmem:[%s15012_s13 + $0xa0] ss:$8 sps:$4 sm:$0xff]   ;;  %v13395_v35 = vld [vmem:[%s15012_s13 + $0xb4] ss:$8 sps:$4 sm:$0xff]   ;;  %v13399_v46 = vld [vmem:[%s15012_s13 + $0xb0] ss:$8 sps:$4 sm:$0xff]  }
 0x253   : > { %9394 = vmatpush1.bf16.msra.mxu0 %v13352_v12  ;;  %8378 = vmatprep.subr.bf16.mxu1 %v13353_v7  ;;  %v13394_v37 = vld [vmem:[%s15012_s13 + $0x9a0] ss:$8 sps:$4 sm:$0xff]   ;;  %v13397_v21 = vld [vmem:[%s15012_s13 + $0x9b4] ss:$8 sps:$4 sm:$0xff]   ;;  %v13400_v58 = vld [vmem:[%s15012_s13 + $0x9b0] ss:$8 sps:$4 sm:$0xff]  }
 0x254   : > { %9395 = vmatprep.subr.bf16.mxu0 %v13355_v22  ;;  %v4627_v10 = vld [vmem:[#allocation3 + $0x8] sm:$0xff]  ;;  %v4645_v23 = vld [vmem:[#allocation3 + $0x98] sm:$0xff]  ;;  %v4626_v60 = vld [vmem:[#allocation3] sm:$0xff]  ;;  %s17252_s0 = sld [smem:[#allocation25_spill]] }
 0x255   : > { %8402 = vmatprep.mubr.bf16.mxu1 %v4627_v10  ;;  %v13401_v29 = vld [vmem:[%s15012_s13 + $0xc4] ss:$8 sps:$4 sm:$0xff]   ;;  %9419 = vmatprep.mubr.bf16.mxu0 %v4645_v23  ;;  %v13405_v17 = vld [vmem:[%s15012_s13 + $0xc0] ss:$8 sps:$4 sm:$0xff]   ;;  %v13407_v34 = vld [vmem:[%s15012_s13 + $0xd4] ss:$8 sps:$4 sm:$0xff]  }
 0x256   : > { %8379 = vmatpush1.bf16.msra.mxu1 %v13357_v14  ;;  %v13403_v1 = vld [vmem:[%s15012_s13 + $0x9c4] ss:$8 sps:$4 sm:$0xff]   ;;  %v13406_v41 = vld [vmem:[%s15012_s13 + $0x9c0] ss:$8 sps:$4 sm:$0xff]   ;;  %v13409_v50 = vld [vmem:[%s15012_s13 + $0x9d4] ss:$8 sps:$4 sm:$0xff]  }
 0x257   : > { %9396 = vmatpush1.bf16.msra.mxu0 %v13358_v47  ;;  %8380 = vmatprep.subr.bf16.mxu1 %v13359_v57  ;;  %v13411_v48 = vld [vmem:[%s15012_s13 + $0xd0] ss:$8 sps:$4 sm:$0xff]   ;;  %v13413_v44 = vld [vmem:[%s15012_s13 + $0xe4] ss:$8 sps:$4 sm:$0xff]   ;;  %v13417_v45 = vld [vmem:[%s15012_s13 + $0xe0] ss:$8 sps:$4 sm:$0xff]  }
 0x258   : > { %9397 = vmatprep.subr.bf16.mxu0 %v13361_v16  ;;  %v13412_v2 = vld [vmem:[%s15012_s13 + $0x9d0] ss:$8 sps:$4 sm:$0xff]   ;;  %v13415_v52 = vld [vmem:[%s15012_s13 + $0x9e4] ss:$8 sps:$4 sm:$0xff]   ;;  %v13418_v53 = vld [vmem:[%s15012_s13 + $0x9e0] ss:$8 sps:$4 sm:$0xff]  }
 0x259   : > { %v13419_v11 = vld [vmem:[%s15012_s13 + $0xf4] ss:$8 sps:$4 sm:$0xff]   ;;  %v13423_v25 = vld [vmem:[%s15012_s13 + $0xf0] ss:$8 sps:$4 sm:$0xff]   ;;  %v13427_v55 = vld [vmem:[%s15012_s13 + $0x104] ss:$8 sps:$4 sm:$0xff]  }
 0x25a   : > { %8381 = vmatpush1.bf16.msra.mxu1 %v13363_v27  ;;  %v13421_v51 = vld [vmem:[%s15012_s13 + $0x9f4] ss:$8 sps:$4 sm:$0xff]   ;;  %v13424_v32 = vld [vmem:[%s15012_s13 + $0x9f0] ss:$8 sps:$4 sm:$0xff]   ;;  %v13430_v49 = vld [vmem:[%s15012_s13 + $0xa04] ss:$8 sps:$4 sm:$0xff]  }
 0x25b   : > { %9398 = vmatpush1.bf16.msra.mxu0 %v13364_v26  ;;  %8382 = vmatprep.subr.bf16.mxu1 %v13365_v3  ;;  %v13425_v63 = vld [vmem:[%s15012_s13 + $0x100] ss:$8 sps:$4 sm:$0xff]   ;;  %v4644_v43 = vld [vmem:[#allocation3 + $0x90] sm:$0xff]  ;;  %v4681_v54 = vld [vmem:[#allocation3 + $0x1b8] sm:$0xff]  ;;  %p12534_p9 = scmp.ne.s32.totalorder %s17252_s0, 3 }
 0x25c   : > { %9399 = vmatprep.subr.bf16.mxu0 %v13367_v6  ;;  %v13428_v59 = vld [vmem:[%s15012_s13 + $0xa00] ss:$8 sps:$4 sm:$0xff]   ;;  %v13433_v31 = vld [vmem:[%s15012_s13 + $0x114] ss:$8 sps:$4 sm:$0xff]   ;;  %v13431_v62 = vld [vmem:[%s15012_s13 + $0x110] ss:$8 sps:$4 sm:$0xff]  }
 0x25d   : > { %v13436_v40 = vld [vmem:[%s15012_s13 + $0xa14] ss:$8 sps:$4 sm:$0xff]   ;;  %v4663_v61 = vld [vmem:[#allocation3 + $0x128] sm:$0xff]  ;;  %v13434_v38 = vld [vmem:[%s15012_s13 + $0xa10] ss:$8 sps:$4 sm:$0xff]  }
 0x25e   : > { %8383 = vmatpush1.bf16.msra.mxu1 %v13369_v5  ;;  %v13439_v4 = vld [vmem:[%s15012_s13 + $0x124] ss:$8 sps:$4 sm:$0xff]   ;;  %v13437_v22 = vld [vmem:[%s15012_s13 + $0x120] ss:$8 sps:$4 sm:$0xff]   ;;  %v4680_v14 = vld [vmem:[#allocation3 + $0x1b0] sm:$0xff] }
 0x25f   : > { %9400 = vmatpush1.bf16.msra.mxu0 %v13370_v39  ;;  %8384 = vmatprep.subr.bf16.mxu1 %v13371_v9  ;;  %v13442_v12 = vld [vmem:[%s15012_s13 + $0xa24] ss:$8 sps:$4 sm:$0xff]   ;;  %v13440_v47 = vld [vmem:[%s15012_s13 + $0xa20] ss:$8 sps:$4 sm:$0xff]   ;;  %v13445_v57 = vld [vmem:[%s15012_s13 + $0x134] ss:$8 sps:$4 sm:$0xff]  }
 0x260   : > { %9401 = vmatprep.subr.bf16.mxu0 %v13373_v28  ;;  %v4662_v7 = vld [vmem:[#allocation3 + $0x120] sm:$0xff]  ;;  %v13448_v16 = vld [vmem:[%s15012_s13 + $0xa34] ss:$8 sps:$4 sm:$0xff]   ;;  %v4699_v27 = vld [vmem:[#allocation3 + $0x248] sm:$0xff] }
 0x261   : > { %v4717_v26 = vld [vmem:[#allocation3 + $0x2d8] sm:$0xff]  ;;  %v13451_v5 = vld [vmem:[%s15012_s13 + $0x144] ss:$8 sps:$4 sm:$0xff]   ;;  %v13449_v28 = vld [vmem:[%s15012_s13 + $0x140] ss:$8 sps:$4 sm:$0xff]  }
 0x262   : > { %8385 = vmatpush1.bf16.msra.mxu1 %v13375_v36  ;;  %v13443_v3 = vld [vmem:[%s15012_s13 + $0x130] ss:$8 sps:$4 sm:$0xff]   ;;  %v13454_v39 = vld [vmem:[%s15012_s13 + $0xa44] ss:$8 sps:$4 sm:$0xff]  }
 0x263   : > { %9402 = vmatpush1.bf16.msra.mxu0 %v13376_v30  ;;  %8386 = vmatprep.subr.bf16.mxu1 %v13377_v8  ;;  %v13446_v6 = vld [vmem:[%s15012_s13 + $0xa30] ss:$8 sps:$4 sm:$0xff]   ;;  %v4698_v9 = vld [vmem:[#allocation3 + $0x240] sm:$0xff]  ;;  %v13457_v8 = vld [vmem:[%s15012_s13 + $0x154] ss:$8 sps:$4 sm:$0xff]  }
 0x264   : > { %9403 = vmatprep.subr.bf16.mxu0 %v13379_v15  ;;  %v4716_v36 = vld [vmem:[#allocation3 + $0x2d0] sm:$0xff]  ;;  %v13452_v30 = vld [vmem:[%s15012_s13 + $0xa40] ss:$8 sps:$4 sm:$0xff]  }
 0x265   : > { %v13460_v15 = vld [vmem:[%s15012_s13 + $0xa54] ss:$8 sps:$4 sm:$0xff]   ;;  %v13467_v10 = vld [vmem:[%s15012_s13 + $0x170] ss:$8 sps:$4 sm:$0xff]   ;;  %v4771_v23 = vld [vmem:[#allocation3 + $0x488] sm:$0xff] }
 0x266   : > { %8387 = vmatpush1.bf16.msra.mxu1 %v13381_v33  ;;  %v13455_v33 = vld [vmem:[%s15012_s13 + $0x150] ss:$8 sps:$4 sm:$0xff]  }
 0x267   : > { %9404 = vmatpush1.bf16.msra.mxu0 %v13382_v18  ;;  %8388 = vmatprep.subr.bf16.mxu1 %v13383_v24  ;;  %v4735_v18 = vld [vmem:[#allocation3 + $0x368] sm:$0xff]  ;;  %v4753_v24 = vld [vmem:[#allocation3 + $0x3f8] sm:$0xff] }
 0x268   : > { %9405 = vmatprep.subr.bf16.mxu0 %v13385_v13  ;;  %v13458_v13 = vld [vmem:[%s15012_s13 + $0xa50] ss:$8 sps:$4 sm:$0xff]  }
 0x26a   : > { %8389 = vmatpush1.bf16.msra.mxu1 %v13387_v0  ;;  %v13463_v0 = vld [vmem:[%s15012_s13 + $0x164] ss:$8 sps:$4 sm:$0xff]  }
 0x26b   : > { %9406 = vmatpush1.bf16.msra.mxu0 %v13388_v20  ;;  %8390 = vmatprep.subr.bf16.mxu1 %v13389_v42  ;;  %v13466_v20 = vld [vmem:[%s15012_s13 + $0xa64] ss:$8 sps:$4 sm:$0xff]  }
 0x26c   : > { %9407 = vmatprep.subr.bf16.mxu0 %v13391_v56  ;;  %v4734_v42 = vld [vmem:[#allocation3 + $0x360] sm:$0xff] }
 0x26d   : > { %v13461_v56 = vld [vmem:[%s15012_s13 + $0x160] ss:$8 sps:$4 sm:$0xff]  }
 0x26e   : > { %8391 = vmatpush1.bf16.msra.mxu1 %v13393_v19  ;;  %v4752_v19 = vld [vmem:[#allocation3 + $0x3f0] sm:$0xff] }
 0x26f   : > { %9408 = vmatpush1.bf16.msra.mxu0 %v13394_v37  ;;  %8392 = vmatprep.subr.bf16.mxu1 %v13395_v35  ;;  %v13464_v37 = vld [vmem:[%s15012_s13 + $0xa60] ss:$8 sps:$4 sm:$0xff]   ;;  %v13469_v35 = vld [vmem:[%s15012_s13 + $0x174] ss:$8 sps:$4 sm:$0xff]  }
 0x270   : > { %9409 = vmatprep.subr.bf16.mxu0 %v13397_v21  ;;  %v13472_v21 = vld [vmem:[%s15012_s13 + $0xa74] ss:$8 sps:$4 sm:$0xff]  }
 0x272   : > { %8393 = vmatpush1.bf16.msra.mxu1 %v13399_v46  ;;  %v13470_v46 = vld [vmem:[%s15012_s13 + $0xa70] ss:$8 sps:$4 sm:$0xff]  }
 0x273   : > { %9410 = vmatpush1.bf16.msra.mxu0 %v13400_v58  ;;  %8394 = vmatprep.subr.bf16.mxu1 %v13401_v29  ;;  %v4789_v58 = vld [vmem:[#allocation3 + $0x518] sm:$0xff]  ;;  %v13475_v29 = vld [vmem:[%s15012_s13 + $0x184] ss:$8 sps:$4 sm:$0xff]  }
 0x274   : > { %9411 = vmatprep.subr.bf16.mxu0 %v13403_v1  ;;  %v13478_v1 = vld [vmem:[%s15012_s13 + $0xa84] ss:$8 sps:$4 sm:$0xff]  }
 0x276   : > { %8395 = vmatpush1.bf16.msra.mxu1 %v13405_v17  ;;  %v4770_v17 = vld [vmem:[#allocation3 + $0x480] sm:$0xff] }
 0x277   : > { %9412 = vmatpush1.bf16.msra.mxu0 %v13406_v41  ;;  %8396 = vmatprep.subr.bf16.mxu1 %v13407_v34  ;;  %v13473_v41 = vld [vmem:[%s15012_s13 + $0x180] ss:$8 sps:$4 sm:$0xff]   ;;  %v4788_v34 = vld [vmem:[#allocation3 + $0x510] sm:$0xff] }
 0x278   : > { %9413 = vmatprep.subr.bf16.mxu0 %v13409_v50  ;;  %v13476_v50 = vld [vmem:[%s15012_s13 + $0xa80] ss:$8 sps:$4 sm:$0xff]  }
 0x27a   : > { %8397 = vmatpush1.bf16.msra.mxu1 %v13411_v48  ;;  %v13481_v48 = vld [vmem:[%s15012_s13 + $0x194] ss:$8 sps:$4 sm:$0xff]  }
 0x27b   : > { %9414 = vmatpush1.bf16.msra.mxu0 %v13412_v2  ;;  %8398 = vmatprep.subr.bf16.mxu1 %v13413_v44  ;;  %v13484_v2 = vld [vmem:[%s15012_s13 + $0xa94] ss:$8 sps:$4 sm:$0xff]   ;;  %v13479_v44 = vld [vmem:[%s15012_s13 + $0x190] ss:$8 sps:$4 sm:$0xff]  }
 0x27c   : > { %9415 = vmatprep.subr.bf16.mxu0 %v13415_v52  ;;  %v13482_v52 = vld [vmem:[%s15012_s13 + $0xa90] ss:$8 sps:$4 sm:$0xff]  }
 0x27e   : > { %8399 = vmatpush1.bf16.msra.mxu1 %v13417_v45  ;;  %v4807_v45 = vld [vmem:[#allocation3 + $0x5a8] sm:$0xff] }
 0x27f   : > { %9416 = vmatpush1.bf16.msra.mxu0 %v13418_v53  ;;  %8400 = vmatprep.subr.bf16.mxu1 %v13419_v11  ;;  %v4825_v53 = vld [vmem:[#allocation3 + $0x638] sm:$0xff]  ;;  %v13487_v11 = vld [vmem:[%s15012_s13 + $0x1a4] ss:$8 sps:$4 sm:$0xff]  }
 0x280   : > { %9417 = vmatprep.subr.bf16.mxu0 %v13421_v51  ;;  %v13490_v51 = vld [vmem:[%s15012_s13 + $0xaa4] ss:$8 sps:$4 sm:$0xff]  }
 0x282   : > { %8401 = vmatpush1.bf16.msra.mxu1 %v13423_v25  ;;  %v4806_v25 = vld [vmem:[#allocation3 + $0x5a0] sm:$0xff] }
 0x283   : > { %9418 = vmatpush1.bf16.msra.mxu0 %v13424_v32  ;;  %8483 = vmatprep.subr.bf16.mxu1 %v13427_v55  ;;  %v13485_v32 = vld [vmem:[%s15012_s13 + $0x1a0] ss:$8 sps:$4 sm:$0xff]   ;;  %v4824_v55 = vld [vmem:[#allocation3 + $0x630] sm:$0xff] }
 0x284   : > { %9500 = vmatprep.subr.bf16.mxu0 %v13430_v49  ;;  %v13488_v49 = vld [vmem:[%s15012_s13 + $0xaa0] ss:$8 sps:$4 sm:$0xff]  }
 0x285   : > { %8403 = vmatmul.mubr.bf16.vlgmr.msra.gmra.mrb[0].mxu1 %v4626_v60  ;;  %v13493_v60 = vld [vmem:[%s15012_s13 + $0x1b4] ss:$8 sps:$4 sm:$0xff]  }
 0x286   : > { %9420 = vmatmul.mubr.bf16.vlgmr.msra.gmra.mrb[0].mxu0 %v4644_v43  ;;  %8484 = vmatpush1.bf16.msra.mxu1 %v13425_v63  ;;  %v13496_v63 = vld [vmem:[%s15012_s13 + $0xab4] ss:$8 sps:$4 sm:$0xff]   ;;  %v13491_v43 = vld [vmem:[%s15012_s13 + $0x1b0] ss:$8 sps:$4 sm:$0xff]  }
 0x287   : > { %9501 = vmatpush1.bf16.msra.mxu0 %v13428_v59  ;;  %8485 = vmatprep.subr.bf16.mxu1 %v13433_v31  ;;  %v4843_v59 = vld [vmem:[#allocation3 + $0x6c8] sm:$0xff]  ;;  %v4861_v31 = vld [vmem:[#allocation3 + $0x758] sm:$0xff] }
 0x288   : > { %9502 = vmatprep.subr.bf16.mxu0 %v13436_v40  ;;  %8412 = vmatprep.mubr.bf16.mxu1 %v4663_v61  ;;  %v13494_v40 = vld [vmem:[%s15012_s13 + $0xab0] ss:$8 sps:$4 sm:$0xff]   ;;  %v13502_v61 = vld [vmem:[%s15012_s13 + $0xac4] ss:$8 sps:$4 sm:$0xff]  }
 0x289   : > { %9429 = vmatprep.mubr.bf16.mxu0 %v4681_v54  ;;  %v4842_v54 = vld [vmem:[#allocation3 + $0x6c0] sm:$0xff] }
 0x28a   : > { %8486 = vmatpush1.bf16.msra.mxu1 %v13431_v62  ;;  %v13499_v62 = vld [vmem:[%s15012_s13 + $0x1c4] ss:$8 sps:$4 sm:$0xff]  }
 0x28b   : > { %9503 = vmatpush1.bf16.msra.mxu0 %v13434_v38  ;;  %8487 = vmatprep.subr.bf16.mxu1 %v13439_v4  ;;  %v13497_v38 = vld [vmem:[%s15012_s13 + $0x1c0] ss:$8 sps:$4 sm:$0xff]   ;;  %v4860_v4 = vld [vmem:[#allocation3 + $0x750] sm:$0xff] }
 0x28c   : > { %9504 = vmatprep.subr.bf16.mxu0 %v13442_v12  ;;  %v13500_v12 = vld [vmem:[%s15012_s13 + $0xac0] ss:$8 sps:$4 sm:$0xff]  }
 0x28d   : > { %8413 = vmatmul.mubr.bf16.gmra.mrb[4].mxu1 %v4662_v7  ;;  %v13505_v7 = vld [vmem:[%s15012_s13 + $0x1d4] ss:$8 sps:$4 sm:$0xff]  }
 0x28e   : > { %9430 = vmatmul.mubr.bf16.gmra.mrb[4].mxu0 %v4680_v14  ;;  %8488 = vmatpush1.bf16.msra.mxu1 %v13437_v22  ;;  %v13508_v22 = vld [vmem:[%s15012_s13 + $0xad4] ss:$8 sps:$4 sm:$0xff]   ;;  %v4879_v14 = vld [vmem:[#allocation3 + $0x7e8] sm:$0xff] }
 0x28f   : > { %9505 = vmatpush1.bf16.msra.mxu0 %v13440_v47  ;;  %8489 = vmatprep.subr.bf16.mxu1 %v13445_v57  ;;  %v4897_v47 = vld [vmem:[#allocation3 + $0x878] sm:$0xff] }
 0x290   : > { %9506 = vmatprep.subr.bf16.mxu0 %v13448_v16  ;;  %8422 = vmatprep.mubr.bf16.mxu1 %v4699_v27  ;;  %v13503_v57 = vld [vmem:[%s15012_s13 + $0x1d0] ss:$8 sps:$4 sm:$0xff]   ;;  %v13511_v27 = vld [vmem:[%s15012_s13 + $0x1e4] ss:$8 sps:$4 sm:$0xff]  }
 0x291   : > { %9439 = vmatprep.mubr.bf16.mxu0 %v4717_v26  ;;  %v13506_v16 = vld [vmem:[%s15012_s13 + $0xad0] ss:$8 sps:$4 sm:$0xff]   ;;  %v13514_v26 = vld [vmem:[%s15012_s13 + $0xae4] ss:$8 sps:$4 sm:$0xff]  }
 0x292   : > { %8490 = vmatpush1.bf16.msra.mxu1 %v13443_v3  ;;  %v4878_v3 = vld [vmem:[#allocation3 + $0x7e0] sm:$0xff] }
 0x293   : > { %9507 = vmatpush1.bf16.msra.mxu0 %v13446_v6  ;;  %8491 = vmatprep.subr.bf16.mxu1 %v13451_v5  ;;  %v13509_v6 = vld [vmem:[%s15012_s13 + $0x1e0] ss:$8 sps:$4 sm:$0xff]   ;;  %v4896_v5 = vld [vmem:[#allocation3 + $0x870] sm:$0xff] }
 0x294   : > { %9508 = vmatprep.subr.bf16.mxu0 %v13454_v39  ;;  %v13512_v39 = vld [vmem:[%s15012_s13 + $0xae0] ss:$8 sps:$4 sm:$0xff]  }
 0x295   : > { %8423 = vmatmul.mubr.bf16.gmra.mrb[8].mxu1 %v4698_v9  ;;  %v13517_v9 = vld [vmem:[%s15012_s13 + $0x1f4] ss:$8 sps:$4 sm:$0xff]  }
 0x296   : > { %9440 = vmatmul.mubr.bf16.gmra.mrb[8].mxu0 %v4716_v36  ;;  %8492 = vmatpush1.bf16.msra.mxu1 %v13449_v28  ;;  %v13520_v28 = vld [vmem:[%s15012_s13 + $0xaf4] ss:$8 sps:$4 sm:$0xff]   ;;  %v13515_v36 = vld [vmem:[%s15012_s13 + $0x1f0] ss:$8 sps:$4 sm:$0xff]  }
 0x297   : > { %9509 = vmatpush1.bf16.msra.mxu0 %v13452_v30  ;;  %8493 = vmatprep.subr.bf16.mxu1 %v13457_v8  ;;  %v4629_v30 = vld [vmem:[#allocation3 + $0x18] sm:$0xff]  ;;  %v4647_v8 = vld [vmem:[#allocation3 + $0xa8] sm:$0xff] }
 0x298   : > { %9510 = vmatprep.subr.bf16.mxu0 %v13460_v15  ;;  %8432 = vmatprep.mubr.bf16.mxu1 %v4735_v18  ;;  %v13518_v15 = vld [vmem:[%s15012_s13 + $0xaf0] ss:$8 sps:$4 sm:$0xff]   ;;  %v13526_v18 = vld [vmem:[%s15012_s13 + $0xb04] ss:$8 sps:$4 sm:$0xff]  }
 0x299   : > { %9449 = vmatprep.mubr.bf16.mxu0 %v4753_v24  ;;  %v4628_v24 = vld [vmem:[#allocation3 + $0x10] sm:$0xff] }
 0x29a   : > { %8494 = vmatpush1.bf16.msra.mxu1 %v13455_v33  ;;  %v13523_v33 = vld [vmem:[%s15012_s13 + $0x204] ss:$8 sps:$4 sm:$0xff]  }
 0x29b   : > { %9511 = vmatpush1.bf16.msra.mxu0 %v13458_v13  ;;  %8495 = vmatprep.subr.bf16.mxu1 %v13463_v0  ;;  %v13521_v13 = vld [vmem:[%s15012_s13 + $0x200] ss:$8 sps:$4 sm:$0xff]  }
 0x29c   : > { %9512 = vmatprep.subr.bf16.mxu0 %v13466_v20  ;;  %v4646_v0 = vld [vmem:[#allocation3 + $0xa0] sm:$0xff] }
 0x29d   : > { %8433 = vmatmul.mubr.bf16.gmra.mrb[12].mxu1 %v4734_v42  ;;  %v13524_v20 = vld [vmem:[%s15012_s13 + $0xb00] ss:$8 sps:$4 sm:$0xff]   ;;  %v13529_v42 = vld [vmem:[%s15012_s13 + $0x214] ss:$8 sps:$4 sm:$0xff]  }
 0x29e   : > { %9450 = vmatmul.mubr.bf16.gmra.mrb[12].mxu0 %v4752_v19  ;;  %8496 = vmatpush1.bf16.msra.mxu1 %v13461_v56  ;;  %v13532_v56 = vld [vmem:[%s15012_s13 + $0xb14] ss:$8 sps:$4 sm:$0xff]   ;;  %v13527_v19 = vld [vmem:[%s15012_s13 + $0x210] ss:$8 sps:$4 sm:$0xff]  }
 0x29f   : > { %9513 = vmatpush1.bf16.msra.mxu0 %v13464_v37  ;;  %8497 = vmatprep.subr.bf16.mxu1 %v13469_v35  ;;  %v13530_v37 = vld [vmem:[%s15012_s13 + $0xb10] ss:$8 sps:$4 sm:$0xff]  }
 0x2a0   : > { %9514 = vmatprep.subr.bf16.mxu0 %v13472_v21  ;;  %8442 = vmatprep.mubr.bf16.mxu1 %v4771_v23  ;;  %v4665_v35 = vld [vmem:[#allocation3 + $0x138] sm:$0xff]  ;;  %v4683_v21 = vld [vmem:[#allocation3 + $0x1c8] sm:$0xff]  ;;  %v4664_v23 = vld [vmem:[#allocation3 + $0x130] sm:$0xff] }
 0x2a1   : > { %9459 = vmatprep.mubr.bf16.mxu0 %v4789_v58  ;;  %v13533_v58 = vld [vmem:[%s15012_s13 + $0x220] ss:$8 sps:$4 sm:$0xff]  }
 0x2a2   : > { %8498 = vmatpush1.bf16.msra.mxu1 %v13467_v10  ;;  %v13535_v10 = vld [vmem:[%s15012_s13 + $0x224] ss:$8 sps:$4 sm:$0xff]  }
 0x2a3   : > { %9515 = vmatpush1.bf16.msra.mxu0 %v13470_v46  ;;  %8499 = vmatprep.subr.bf16.mxu1 %v13475_v29  ;;  %v13538_v46 = vld [vmem:[%s15012_s13 + $0xb24] ss:$8 sps:$4 sm:$0xff]  }
 0x2a4   : > { %9516 = vmatprep.subr.bf16.mxu0 %v13478_v1  ;;  %v4682_v29 = vld [vmem:[#allocation3 + $0x1c0] sm:$0xff] }
 0x2a5   : > { %8443 = vmatmul.mubr.bf16.gmra.mrb[16].mxu1 %v4770_v17  ;;  %v13536_v1 = vld [vmem:[%s15012_s13 + $0xb20] ss:$8 sps:$4 sm:$0xff]   ;;  %v13541_v17 = vld [vmem:[%s15012_s13 + $0x234] ss:$8 sps:$4 sm:$0xff]  }
 0x2a6   : > { %9460 = vmatmul.mubr.bf16.gmra.mrb[16].mxu0 %v4788_v34  ;;  %8500 = vmatpush1.bf16.msra.mxu1 %v13473_v41  ;;  %v13544_v41 = vld [vmem:[%s15012_s13 + $0xb34] ss:$8 sps:$4 sm:$0xff]   ;;  %v13539_v34 = vld [vmem:[%s15012_s13 + $0x230] ss:$8 sps:$4 sm:$0xff]  }
 0x2a7   : > { %9517 = vmatpush1.bf16.msra.mxu0 %v13476_v50  ;;  %8501 = vmatprep.subr.bf16.mxu1 %v13481_v48  ;;  %v13542_v50 = vld [vmem:[%s15012_s13 + $0xb30] ss:$8 sps:$4 sm:$0xff]  }
 0x2a8   : > { %9518 = vmatprep.subr.bf16.mxu0 %v13484_v2  ;;  %8452 = vmatprep.mubr.bf16.mxu1 %v4807_v45  ;;  %v4701_v48 = vld [vmem:[#allocation3 + $0x258] sm:$0xff]  ;;  %v4719_v2 = vld [vmem:[#allocation3 + $0x2e8] sm:$0xff]  ;;  %v4700_v45 = vld [vmem:[#allocation3 + $0x250] sm:$0xff] }
 0x2a9   : > { %9469 = vmatprep.mubr.bf16.mxu0 %v4825_v53  ;;  %v13545_v53 = vld [vmem:[%s15012_s13 + $0x240] ss:$8 sps:$4 sm:$0xff]  }
 0x2aa   : > { %8502 = vmatpush1.bf16.msra.mxu1 %v13479_v44  ;;  %v13547_v44 = vld [vmem:[%s15012_s13 + $0x244] ss:$8 sps:$4 sm:$0xff]  }
 0x2ab   : > { %9519 = vmatpush1.bf16.msra.mxu0 %v13482_v52  ;;  %8503 = vmatprep.subr.bf16.mxu1 %v13487_v11  ;;  %v13550_v52 = vld [vmem:[%s15012_s13 + $0xb44] ss:$8 sps:$4 sm:$0xff]  }
 0x2ac   : > { %9520 = vmatprep.subr.bf16.mxu0 %v13490_v51  ;;  %v4718_v11 = vld [vmem:[#allocation3 + $0x2e0] sm:$0xff] }
 0x2ad   : > { %8453 = vmatmul.mubr.bf16.gmra.mrb[20].mxu1 %v4806_v25  ;;  %v13548_v51 = vld [vmem:[%s15012_s13 + $0xb40] ss:$8 sps:$4 sm:$0xff]   ;;  %v13553_v25 = vld [vmem:[%s15012_s13 + $0x254] ss:$8 sps:$4 sm:$0xff]  }
 0x2ae   : > { %9470 = vmatmul.mubr.bf16.gmra.mrb[20].mxu0 %v4824_v55  ;;  %8504 = vmatpush1.bf16.msra.mxu1 %v13485_v32  ;;  %v13556_v32 = vld [vmem:[%s15012_s13 + $0xb54] ss:$8 sps:$4 sm:$0xff]   ;;  %v13551_v55 = vld [vmem:[%s15012_s13 + $0x250] ss:$8 sps:$4 sm:$0xff]  }
 0x2af   : > { %9521 = vmatpush1.bf16.msra.mxu0 %v13488_v49  ;;  %8505 = vmatprep.subr.bf16.mxu1 %v13493_v60  ;;  %v4737_v49 = vld [vmem:[#allocation3 + $0x378] sm:$0xff]  ;;  %v4755_v60 = vld [vmem:[#allocation3 + $0x408] sm:$0xff] }
 0x2b0   : > { %9522 = vmatprep.subr.bf16.mxu0 %v13496_v63  ;;  %8462 = vmatprep.mubr.bf16.mxu1 %v4843_v59  ;;  %v13554_v63 = vld [vmem:[%s15012_s13 + $0xb50] ss:$8 sps:$4 sm:$0xff]   ;;  %v13562_v59 = vld [vmem:[%s15012_s13 + $0xb64] ss:$8 sps:$4 sm:$0xff]  }
 0x2b1   : > { %9479 = vmatprep.mubr.bf16.mxu0 %v4861_v31  ;;  %v4736_v31 = vld [vmem:[#allocation3 + $0x370] sm:$0xff] }
 0x2b2   : > { %8506 = vmatpush1.bf16.msra.mxu1 %v13491_v43  ;;  %v13559_v43 = vld [vmem:[%s15012_s13 + $0x264] ss:$8 sps:$4 sm:$0xff]  }
 0x2b3   : > { %9523 = vmatpush1.bf16.msra.mxu0 %v13494_v40  ;;  %8507 = vmatprep.subr.bf16.mxu1 %v13499_v62  ;;  %v13557_v40 = vld [vmem:[%s15012_s13 + $0x260] ss:$8 sps:$4 sm:$0xff]  }
 0x2b4   : > { %9524 = vmatprep.subr.bf16.mxu0 %v13502_v61  ;;  %v4754_v62 = vld [vmem:[#allocation3 + $0x400] sm:$0xff] }
 0x2b5   : > { %8463 = vmatmul.mubr.bf16.gmra.mrb[24].mxu1 %v4842_v54  ;;  %v13560_v61 = vld [vmem:[%s15012_s13 + $0xb60] ss:$8 sps:$4 sm:$0xff]   ;;  %v13565_v54 = vld [vmem:[%s15012_s13 + $0x274] ss:$8 sps:$4 sm:$0xff]  }
 0x2b6   : > { %9480 = vmatmul.mubr.bf16.gmra.mrb[24].mxu0 %v4860_v4  ;;  %8508 = vmatpush1.bf16.msra.mxu1 %v13497_v38  ;;  %v13568_v38 = vld [vmem:[%s15012_s13 + $0xb74] ss:$8 sps:$4 sm:$0xff]  }
 0x2b7   : > { %9525 = vmatpush1.bf16.msra.mxu0 %v13500_v12  ;;  %8509 = vmatprep.subr.bf16.mxu1 %v13505_v7  ;;  %v4773_v4 = vld [vmem:[#allocation3 + $0x498] sm:$0xff]  ;;  %v4791_v12 = vld [vmem:[#allocation3 + $0x528] sm:$0xff] }
 0x2b8   : > { %9526 = vmatprep.subr.bf16.mxu0 %v13508_v22  ;;  %8472 = vmatprep.mubr.bf16.mxu1 %v4879_v14  ;;  %v13563_v7 = vld [vmem:[%s15012_s13 + $0x270] ss:$8 sps:$4 sm:$0xff]   ;;  %v13571_v14 = vld [vmem:[%s15012_s13 + $0x284] ss:$8 sps:$4 sm:$0xff]  }
 0x2b9   : > { %9489 = vmatprep.mubr.bf16.mxu0 %v4897_v47  ;;  %v13566_v22 = vld [vmem:[%s15012_s13 + $0xb70] ss:$8 sps:$4 sm:$0xff]   ;;  %v13574_v47 = vld [vmem:[%s15012_s13 + $0xb84] ss:$8 sps:$4 sm:$0xff]  }
 0x2ba   : > { %8510 = vmatpush1.bf16.msra.mxu1 %v13503_v57  ;;  %v4772_v57 = vld [vmem:[#allocation3 + $0x490] sm:$0xff] }
 0x2bb   : > { %9527 = vmatpush1.bf16.msra.mxu0 %v13506_v16  ;;  %8511 = vmatprep.subr.bf16.mxu1 %v13511_v27  ;;  %v13569_v16 = vld [vmem:[%s15012_s13 + $0x280] ss:$8 sps:$4 sm:$0xff]  }
 0x2bc   : > { %9528 = vmatprep.subr.bf16.mxu0 %v13514_v26  ;;  %v4790_v27 = vld [vmem:[#allocation3 + $0x520] sm:$0xff] }
 0x2bd   : > { %8473 = vmatmul.mubr.bf16.gmra.mrb[28].mxu1 %v4878_v3  ;;  %v13572_v26 = vld [vmem:[%s15012_s13 + $0xb80] ss:$8 sps:$4 sm:$0xff]   ;;  %v13577_v3 = vld [vmem:[%s15012_s13 + $0x294] ss:$8 sps:$4 sm:$0xff]  }
 0x2be   : > { %9490 = vmatmul.mubr.bf16.gmra.mrb[28].mxu0 %v4896_v5  ;;  %8512 = vmatpush1.bf16.msra.mxu1 %v13509_v6  ;;  %v13580_v6 = vld [vmem:[%s15012_s13 + $0xb94] ss:$8 sps:$4 sm:$0xff]   ;;  %v13575_v5 = vld [vmem:[%s15012_s13 + $0x290] ss:$8 sps:$4 sm:$0xff]  }
 0x2bf   : > { %9529 = vmatpush1.bf16.msra.mxu0 %v13512_v39  ;;  %8513 = vmatprep.subr.bf16.mxu1 %v13517_v9  ;;  %v4809_v39 = vld [vmem:[#allocation3 + $0x5b8] sm:$0xff]  ;;  %v4827_v9 = vld [vmem:[#allocation3 + $0x648] sm:$0xff] }
 0x2c0   : > { %9530 = vmatprep.subr.bf16.mxu0 %v13520_v28  ;;  %8515 = vmatprep.mubr.bf16.mxu1 %v4629_v30  ;;  %v13578_v28 = vld [vmem:[%s15012_s13 + $0xb90] ss:$8 sps:$4 sm:$0xff]   ;;  %v13586_v30 = vld [vmem:[%s15012_s13 + $0xba4] ss:$8 sps:$4 sm:$0xff]  }
 0x2c1   : > { %9532 = vmatprep.mubr.bf16.mxu0 %v4647_v8  ;;  %v4808_v8 = vld [vmem:[#allocation3 + $0x5b0] sm:$0xff] }
 0x2c2   : > { %8514 = vmatpush1.bf16.msra.mxu1 %v13515_v36  ;;  %v13583_v36 = vld [vmem:[%s15012_s13 + $0x2a4] ss:$8 sps:$4 sm:$0xff]  }
 0x2c3   : > { %9531 = vmatpush1.bf16.msra.mxu0 %v13518_v15  ;;  %8596 = vmatprep.subr.bf16.mxu1 %v13523_v33  ;;  %v13581_v15 = vld [vmem:[%s15012_s13 + $0x2a0] ss:$8 sps:$4 sm:$0xff]  }
 0x2c4   : > { %9613 = vmatprep.subr.bf16.mxu0 %v13526_v18  ;;  %v4826_v33 = vld [vmem:[#allocation3 + $0x640] sm:$0xff] }
 0x2c5   : > { %8516 = vmatmul.mubr.bf16.vlgmr.msra.gmra.mrb[0].mxu1 %v4628_v24  ;;  %v13584_v18 = vld [vmem:[%s15012_s13 + $0xba0] ss:$8 sps:$4 sm:$0xff]   ;;  %v13589_v24 = vld [vmem:[%s15012_s13 + $0x2b4] ss:$8 sps:$4 sm:$0xff]  }
 0x2c6   : > { %9533 = vmatmul.mubr.bf16.vlgmr.msra.gmra.mrb[0].mxu0 %v4646_v0  ;;  %8597 = vmatpush1.bf16.msra.mxu1 %v13521_v13  ;;  %v13592_v13 = vld [vmem:[%s15012_s13 + $0xbb4] ss:$8 sps:$4 sm:$0xff]   ;;  %v13587_v0 = vld [vmem:[%s15012_s13 + $0x2b0] ss:$8 sps:$4 sm:$0xff]  }
 0x2c7   : > { %9614 = vmatpush1.bf16.msra.mxu0 %v13524_v20  ;;  %8598 = vmatprep.subr.bf16.mxu1 %v13529_v42  ;;  %v13590_v20 = vld [vmem:[%s15012_s13 + $0xbb0] ss:$8 sps:$4 sm:$0xff]  }
 0x2c8   : > { %9615 = vmatprep.subr.bf16.mxu0 %v13532_v56  ;;  %8525 = vmatprep.mubr.bf16.mxu1 %v4665_v35  ;;  %v4845_v42 = vld [vmem:[#allocation3 + $0x6d8] sm:$0xff]  ;;  %v4863_v56 = vld [vmem:[#allocation3 + $0x768] sm:$0xff]  ;;  %v4844_v35 = vld [vmem:[#allocation3 + $0x6d0] sm:$0xff] }
 0x2c9   : > { %9542 = vmatprep.mubr.bf16.mxu0 %v4683_v21  ;;  %v13593_v21 = vld [vmem:[%s15012_s13 + $0x2c0] ss:$8 sps:$4 sm:$0xff]  }
 0x2ca   : > { %8599 = vmatpush1.bf16.msra.mxu1 %v13527_v19  ;;  %v13595_v19 = vld [vmem:[%s15012_s13 + $0x2c4] ss:$8 sps:$4 sm:$0xff]  }
 0x2cb   : > { %9616 = vmatpush1.bf16.msra.mxu0 %v13530_v37  ;;  %8600 = vmatprep.subr.bf16.mxu1 %v13535_v10  ;;  %v13598_v37 = vld [vmem:[%s15012_s13 + $0xbc4] ss:$8 sps:$4 sm:$0xff]  }
 0x2cc   : > { %9617 = vmatprep.subr.bf16.mxu0 %v13538_v46  ;;  %v4862_v10 = vld [vmem:[#allocation3 + $0x760] sm:$0xff] }
 0x2cd   : > { %8526 = vmatmul.mubr.bf16.gmra.mrb[4].mxu1 %v4664_v23  ;;  %v13596_v46 = vld [vmem:[%s15012_s13 + $0xbc0] ss:$8 sps:$4 sm:$0xff]   ;;  %v13601_v23 = vld [vmem:[%s15012_s13 + $0x2d4] ss:$8 sps:$4 sm:$0xff]  }
 0x2ce   : > { %9543 = vmatmul.mubr.bf16.gmra.mrb[4].mxu0 %v4682_v29  ;;  %8601 = vmatpush1.bf16.msra.mxu1 %v13533_v58  ;;  %v13604_v58 = vld [vmem:[%s15012_s13 + $0xbd4] ss:$8 sps:$4 sm:$0xff]   ;;  %v13599_v29 = vld [vmem:[%s15012_s13 + $0x2d0] ss:$8 sps:$4 sm:$0xff]  }
 0x2cf   : > { %9618 = vmatpush1.bf16.msra.mxu0 %v13536_v1  ;;  %8602 = vmatprep.subr.bf16.mxu1 %v13541_v17  ;;  %v13602_v1 = vld [vmem:[%s15012_s13 + $0xbd0] ss:$8 sps:$4 sm:$0xff]  }
 0x2d0   : > { %9619 = vmatprep.subr.bf16.mxu0 %v13544_v41  ;;  %8535 = vmatprep.mubr.bf16.mxu1 %v4701_v48  ;;  %v4881_v17 = vld [vmem:[#allocation3 + $0x7f8] sm:$0xff]  ;;  %v4899_v41 = vld [vmem:[#allocation3 + $0x888] sm:$0xff]  ;;  %v4880_v48 = vld [vmem:[#allocation3 + $0x7f0] sm:$0xff] }
 0x2d1   : > { %9552 = vmatprep.mubr.bf16.mxu0 %v4719_v2  ;;  %v13605_v2 = vld [vmem:[%s15012_s13 + $0x2e0] ss:$8 sps:$4 sm:$0xff]  }
 0x2d2   : > { %8603 = vmatpush1.bf16.msra.mxu1 %v13539_v34  ;;  %v13607_v34 = vld [vmem:[%s15012_s13 + $0x2e4] ss:$8 sps:$4 sm:$0xff]  }
 0x2d3   : > { %9620 = vmatpush1.bf16.msra.mxu0 %v13542_v50  ;;  %8604 = vmatprep.subr.bf16.mxu1 %v13547_v44  ;;  %v13610_v50 = vld [vmem:[%s15012_s13 + $0xbe4] ss:$8 sps:$4 sm:$0xff]  }
 0x2d4   : > { %9621 = vmatprep.subr.bf16.mxu0 %v13550_v52  ;;  %v4898_v44 = vld [vmem:[#allocation3 + $0x880] sm:$0xff] }
 0x2d5   : > { %8536 = vmatmul.mubr.bf16.gmra.mrb[8].mxu1 %v4700_v45  ;;  %v13608_v52 = vld [vmem:[%s15012_s13 + $0xbe0] ss:$8 sps:$4 sm:$0xff]   ;;  %v13613_v45 = vld [vmem:[%s15012_s13 + $0x2f4] ss:$8 sps:$4 sm:$0xff]  }
 0x2d6   : > { %9553 = vmatmul.mubr.bf16.gmra.mrb[8].mxu0 %v4718_v11  ;;  %8605 = vmatpush1.bf16.msra.mxu1 %v13545_v53  ;;  %v13616_v53 = vld [vmem:[%s15012_s13 + $0xbf4] ss:$8 sps:$4 sm:$0xff]   ;;  %v13611_v11 = vld [vmem:[%s15012_s13 + $0x2f0] ss:$8 sps:$4 sm:$0xff]  }
 0x2d7   : > { %9622 = vmatpush1.bf16.msra.mxu0 %v13548_v51  ;;  %8606 = vmatprep.subr.bf16.mxu1 %v13553_v25  ;;  %v4631_v51 = vld [vmem:[#allocation3 + $0x28] sm:$0xff]  ;;  %v4649_v25 = vld [vmem:[#allocation3 + $0xb8] sm:$0xff] }
 0x2d8   : > { %9623 = vmatprep.subr.bf16.mxu0 %v13556_v32  ;;  %8545 = vmatprep.mubr.bf16.mxu1 %v4737_v49  ;;  %v13614_v32 = vld [vmem:[%s15012_s13 + $0xbf0] ss:$8 sps:$4 sm:$0xff]   ;;  %v13622_v49 = vld [vmem:[%s15012_s13 + $0xc04] ss:$8 sps:$4 sm:$0xff]  }
 0x2d9   : > { %9562 = vmatprep.mubr.bf16.mxu0 %v4755_v60  ;;  %v4630_v60 = vld [vmem:[#allocation3 + $0x20] sm:$0xff] }
 0x2da   : > { %8607 = vmatpush1.bf16.msra.mxu1 %v13551_v55  ;;  %v13619_v55 = vld [vmem:[%s15012_s13 + $0x304] ss:$8 sps:$4 sm:$0xff]  }
 0x2db   : > { %9624 = vmatpush1.bf16.msra.mxu0 %v13554_v63  ;;  %8608 = vmatprep.subr.bf16.mxu1 %v13559_v43  ;;  %v13617_v63 = vld [vmem:[%s15012_s13 + $0x300] ss:$8 sps:$4 sm:$0xff]   ;;  %v4648_v43 = vld [vmem:[#allocation3 + $0xb0] sm:$0xff] }
 0x2dc   : > { %9625 = vmatprep.subr.bf16.mxu0 %v13562_v59  ;;  %v13620_v59 = vld [vmem:[%s15012_s13 + $0xc00] ss:$8 sps:$4 sm:$0xff]  }
 0x2dd   : > { %8546 = vmatmul.mubr.bf16.gmra.mrb[12].mxu1 %v4736_v31  ;;  %v13625_v31 = vld [vmem:[%s15012_s13 + $0x314] ss:$8 sps:$4 sm:$0xff]  }
 0x2de   : > { %9563 = vmatmul.mubr.bf16.gmra.mrb[12].mxu0 %v4754_v62  ;;  %8609 = vmatpush1.bf16.msra.mxu1 %v13557_v40  ;;  %v13628_v40 = vld [vmem:[%s15012_s13 + $0xc14] ss:$8 sps:$4 sm:$0xff]   ;;  %v4667_v62 = vld [vmem:[#allocation3 + $0x148] sm:$0xff] }
 0x2df   : > { %9626 = vmatpush1.bf16.msra.mxu0 %v13560_v61  ;;  %8610 = vmatprep.subr.bf16.mxu1 %v13565_v54  ;;  %v4685_v61 = vld [vmem:[#allocation3 + $0x1d8] sm:$0xff] }
 0x2e0   : > { %9627 = vmatprep.subr.bf16.mxu0 %v13568_v38  ;;  %8555 = vmatprep.mubr.bf16.mxu1 %v4773_v4  ;;  %v13623_v54 = vld [vmem:[%s15012_s13 + $0x310] ss:$8 sps:$4 sm:$0xff]   ;;  %v13631_v4 = vld [vmem:[%s15012_s13 + $0x324] ss:$8 sps:$4 sm:$0xff]  }
 0x2e1   : > { %9572 = vmatprep.mubr.bf16.mxu0 %v4791_v12  ;;  %v13626_v38 = vld [vmem:[%s15012_s13 + $0xc10] ss:$8 sps:$4 sm:$0xff]   ;;  %v13634_v12 = vld [vmem:[%s15012_s13 + $0xc24] ss:$8 sps:$4 sm:$0xff]  }
 0x2e2   : > { %8611 = vmatpush1.bf16.msra.mxu1 %v13563_v7  ;;  %v4666_v7 = vld [vmem:[#allocation3 + $0x140] sm:$0xff] }
 0x2e3   : > { %9628 = vmatpush1.bf16.msra.mxu0 %v13566_v22  ;;  %8612 = vmatprep.subr.bf16.mxu1 %v13571_v14  ;;  %v13629_v22 = vld [vmem:[%s15012_s13 + $0x320] ss:$8 sps:$4 sm:$0xff]   ;;  %v4684_v14 = vld [vmem:[#allocation3 + $0x1d0] sm:$0xff] }
 0x2e4   : > { %9629 = vmatprep.subr.bf16.mxu0 %v13574_v47  ;;  %v13632_v47 = vld [vmem:[%s15012_s13 + $0xc20] ss:$8 sps:$4 sm:$0xff]  }
 0x2e5   : > { %8556 = vmatmul.mubr.bf16.gmra.mrb[16].mxu1 %v4772_v57  ;;  %v13637_v57 = vld [vmem:[%s15012_s13 + $0x334] ss:$8 sps:$4 sm:$0xff]  }
 0x2e6   : > { %9573 = vmatmul.mubr.bf16.gmra.mrb[16].mxu0 %v4790_v27  ;;  %8613 = vmatpush1.bf16.msra.mxu1 %v13569_v16  ;;  %v13640_v16 = vld [vmem:[%s15012_s13 + $0xc34] ss:$8 sps:$4 sm:$0xff]   ;;  %v13635_v27 = vld [vmem:[%s15012_s13 + $0x330] ss:$8 sps:$4 sm:$0xff]  }
 0x2e7   : > { %9630 = vmatpush1.bf16.msra.mxu0 %v13572_v26  ;;  %8614 = vmatprep.subr.bf16.mxu1 %v13577_v3  ;;  %v4703_v26 = vld [vmem:[#allocation3 + $0x268] sm:$0xff]  ;;  %v4721_v3 = vld [vmem:[#allocation3 + $0x2f8] sm:$0xff] }
 0x2e8   : > { %9631 = vmatprep.subr.bf16.mxu0 %v13580_v6  ;;  %8565 = vmatprep.mubr.bf16.mxu1 %v4809_v39  ;;  %v13638_v6 = vld [vmem:[%s15012_s13 + $0xc30] ss:$8 sps:$4 sm:$0xff]   ;;  %v13646_v39 = vld [vmem:[%s15012_s13 + $0xc44] ss:$8 sps:$4 sm:$0xff]  }
 0x2e9   : > { %9582 = vmatprep.mubr.bf16.mxu0 %v4827_v9  ;;  %v4702_v9 = vld [vmem:[#allocation3 + $0x260] sm:$0xff] }
 0x2ea   : > { %8615 = vmatpush1.bf16.msra.mxu1 %v13575_v5  ;;  %v13643_v5 = vld [vmem:[%s15012_s13 + $0x344] ss:$8 sps:$4 sm:$0xff]  }
 0x2eb   : > { %9632 = vmatpush1.bf16.msra.mxu0 %v13578_v28  ;;  %8616 = vmatprep.subr.bf16.mxu1 %v13583_v36  ;;  %v13641_v28 = vld [vmem:[%s15012_s13 + $0x340] ss:$8 sps:$4 sm:$0xff]   ;;  %v4720_v36 = vld [vmem:[#allocation3 + $0x2f0] sm:$0xff] }
 0x2ec   : > { %9633 = vmatprep.subr.bf16.mxu0 %v13586_v30  ;;  %v13644_v30 = vld [vmem:[%s15012_s13 + $0xc40] ss:$8 sps:$4 sm:$0xff]  }
 0x2ed   : > { %8566 = vmatmul.mubr.bf16.gmra.mrb[20].mxu1 %v4808_v8  ;;  %v13649_v8 = vld [vmem:[%s15012_s13 + $0x354] ss:$8 sps:$4 sm:$0xff]  }
 0x2ee   : > { %9583 = vmatmul.mubr.bf16.gmra.mrb[20].mxu0 %v4826_v33  ;;  %8617 = vmatpush1.bf16.msra.mxu1 %v13581_v15  ;;  %v13652_v15 = vld [vmem:[%s15012_s13 + $0xc54] ss:$8 sps:$4 sm:$0xff]   ;;  %v13647_v33 = vld [vmem:[%s15012_s13 + $0x350] ss:$8 sps:$4 sm:$0xff]  }
 0x2ef   : > { %9634 = vmatpush1.bf16.msra.mxu0 %v13584_v18  ;;  %8618 = vmatprep.subr.bf16.mxu1 %v13589_v24  ;;  %v13650_v18 = vld [vmem:[%s15012_s13 + $0xc50] ss:$8 sps:$4 sm:$0xff]   ;;  %v4739_v24 = vld [vmem:[#allocation3 + $0x388] sm:$0xff] }
 0x2f0   : > { %9635 = vmatprep.subr.bf16.mxu0 %v13592_v13  ;;  %8575 = vmatprep.mubr.bf16.mxu1 %v4845_v42  ;;  %v4757_v13 = vld [vmem:[#allocation3 + $0x418] sm:$0xff]  ;;  %v4738_v42 = vld [vmem:[#allocation3 + $0x380] sm:$0xff] }
 0x2f1   : > { %9592 = vmatprep.mubr.bf16.mxu0 %v4863_v56  ;;  %v13653_v56 = vld [vmem:[%s15012_s13 + $0x360] ss:$8 sps:$4 sm:$0xff]  }
 0x2f2   : > { %8619 = vmatpush1.bf16.msra.mxu1 %v13587_v0  ;;  %v13655_v0 = vld [vmem:[%s15012_s13 + $0x364] ss:$8 sps:$4 sm:$0xff]  }
 0x2f3   : > { %9636 = vmatpush1.bf16.msra.mxu0 %v13590_v20  ;;  %8620 = vmatprep.subr.bf16.mxu1 %v13595_v19  ;;  %v13658_v20 = vld [vmem:[%s15012_s13 + $0xc64] ss:$8 sps:$4 sm:$0xff]   ;;  %v4756_v19 = vld [vmem:[#allocation3 + $0x410] sm:$0xff] }
 0x2f4   : > { %9637 = vmatprep.subr.bf16.mxu0 %v13598_v37  ;;  %v13656_v37 = vld [vmem:[%s15012_s13 + $0xc60] ss:$8 sps:$4 sm:$0xff]  }
 0x2f5   : > { %8576 = vmatmul.mubr.bf16.gmra.mrb[24].mxu1 %v4844_v35  ;;  %v13661_v35 = vld [vmem:[%s15012_s13 + $0x374] ss:$8 sps:$4 sm:$0xff]  }
 0x2f6   : > { %9593 = vmatmul.mubr.bf16.gmra.mrb[24].mxu0 %v4862_v10  ;;  %8621 = vmatpush1.bf16.msra.mxu1 %v13593_v21  ;;  %v13664_v21 = vld [vmem:[%s15012_s13 + $0xc74] ss:$8 sps:$4 sm:$0xff]   ;;  %v13659_v10 = vld [vmem:[%s15012_s13 + $0x370] ss:$8 sps:$4 sm:$0xff]  }
 0x2f7   : > { %9638 = vmatpush1.bf16.msra.mxu0 %v13596_v46  ;;  %8622 = vmatprep.subr.bf16.mxu1 %v13601_v23  ;;  %v13662_v46 = vld [vmem:[%s15012_s13 + $0xc70] ss:$8 sps:$4 sm:$0xff]   ;;  %v4775_v23 = vld [vmem:[#allocation3 + $0x4a8] sm:$0xff] }
 0x2f8   : > { %9639 = vmatprep.subr.bf16.mxu0 %v13604_v58  ;;  %8585 = vmatprep.mubr.bf16.mxu1 %v4881_v17  ;;  %v4793_v58 = vld [vmem:[#allocation3 + $0x538] sm:$0xff]  ;;  %v4774_v17 = vld [vmem:[#allocation3 + $0x4a0] sm:$0xff] }
 0x2f9   : > { %9602 = vmatprep.mubr.bf16.mxu0 %v4899_v41  ;;  %v13665_v41 = vld [vmem:[%s15012_s13 + $0x380] ss:$8 sps:$4 sm:$0xff]  }
 0x2fa   : > { %8623 = vmatpush1.bf16.msra.mxu1 %v13599_v29  ;;  %v13667_v29 = vld [vmem:[%s15012_s13 + $0x384] ss:$8 sps:$4 sm:$0xff]  }
 0x2fb   : > { %9640 = vmatpush1.bf16.msra.mxu0 %v13602_v1  ;;  %8624 = vmatprep.subr.bf16.mxu1 %v13607_v34  ;;  %v13670_v1 = vld [vmem:[%s15012_s13 + $0xc84] ss:$8 sps:$4 sm:$0xff]   ;;  %v4792_v34 = vld [vmem:[#allocation3 + $0x530] sm:$0xff] }
 0x2fc   : > { %9641 = vmatprep.subr.bf16.mxu0 %v13610_v50  ;;  %v13668_v50 = vld [vmem:[%s15012_s13 + $0xc80] ss:$8 sps:$4 sm:$0xff]  }
 0x2fd   : > { %8586 = vmatmul.mubr.bf16.gmra.mrb[28].mxu1 %v4880_v48  ;;  %v13673_v48 = vld [vmem:[%s15012_s13 + $0x394] ss:$8 sps:$4 sm:$0xff]  }
 0x2fe   : > { %9603 = vmatmul.mubr.bf16.gmra.mrb[28].mxu0 %v4898_v44  ;;  %8625 = vmatpush1.bf16.msra.mxu1 %v13605_v2  ;;  %v13676_v2 = vld [vmem:[%s15012_s13 + $0xc94] ss:$8 sps:$4 sm:$0xff]   ;;  %v13671_v44 = vld [vmem:[%s15012_s13 + $0x390] ss:$8 sps:$4 sm:$0xff]  }
 0x2ff   : > { %9642 = vmatpush1.bf16.msra.mxu0 %v13608_v52  ;;  %8626 = vmatprep.subr.bf16.mxu1 %v13613_v45  ;;  %v4811_v52 = vld [vmem:[#allocation3 + $0x5c8] sm:$0xff]  ;;  %v4829_v45 = vld [vmem:[#allocation3 + $0x658] sm:$0xff] }
 0x300   : > { %9643 = vmatprep.subr.bf16.mxu0 %v13616_v53  ;;  %8628 = vmatprep.mubr.bf16.mxu1 %v4631_v51  ;;  %v13674_v53 = vld [vmem:[%s15012_s13 + $0xc90] ss:$8 sps:$4 sm:$0xff]   ;;  %v13682_v51 = vld [vmem:[%s15012_s13 + $0xca4] ss:$8 sps:$4 sm:$0xff]  }
 0x301   : > { %9645 = vmatprep.mubr.bf16.mxu0 %v4649_v25  ;;  %v4810_v25 = vld [vmem:[#allocation3 + $0x5c0] sm:$0xff] }
 0x302   : > { %8627 = vmatpush1.bf16.msra.mxu1 %v13611_v11  ;;  %v13679_v11 = vld [vmem:[%s15012_s13 + $0x3a4] ss:$8 sps:$4 sm:$0xff]  }
 0x303   : > { %9644 = vmatpush1.bf16.msra.mxu0 %v13614_v32  ;;  %8709 = vmatprep.subr.bf16.mxu1 %v13619_v55  ;;  %v13677_v32 = vld [vmem:[%s15012_s13 + $0x3a0] ss:$8 sps:$4 sm:$0xff]   ;;  %v4828_v55 = vld [vmem:[#allocation3 + $0x650] sm:$0xff] }
 0x304   : > { %9726 = vmatprep.subr.bf16.mxu0 %v13622_v49  ;;  %v13680_v49 = vld [vmem:[%s15012_s13 + $0xca0] ss:$8 sps:$4 sm:$0xff]  }
 0x305   : > { %8629 = vmatmul.mubr.bf16.vlgmr.msra.gmra.mrb[0].mxu1 %v4630_v60  ;;  %v13685_v60 = vld [vmem:[%s15012_s13 + $0x3b4] ss:$8 sps:$4 sm:$0xff]  }
 0x306   : > { %9646 = vmatmul.mubr.bf16.vlgmr.msra.gmra.mrb[0].mxu0 %v4648_v43  ;;  %8710 = vmatpush1.bf16.msra.mxu1 %v13617_v63  ;;  %v13688_v63 = vld [vmem:[%s15012_s13 + $0xcb4] ss:$8 sps:$4 sm:$0xff]   ;;  %v4847_v43 = vld [vmem:[#allocation3 + $0x6e8] sm:$0xff] }
 0x307   : > { %9727 = vmatpush1.bf16.msra.mxu0 %v13620_v59  ;;  %8711 = vmatprep.subr.bf16.mxu1 %v13625_v31  ;;  %v4865_v59 = vld [vmem:[#allocation3 + $0x778] sm:$0xff] }
 0x308   : > { %9728 = vmatprep.subr.bf16.mxu0 %v13628_v40  ;;  %8638 = vmatprep.mubr.bf16.mxu1 %v4667_v62  ;;  %v13683_v31 = vld [vmem:[%s15012_s13 + $0x3b0] ss:$8 sps:$4 sm:$0xff]   ;;  %v13691_v62 = vld [vmem:[%s15012_s13 + $0x3c4] ss:$8 sps:$4 sm:$0xff]  }
 0x309   : > { %9655 = vmatprep.mubr.bf16.mxu0 %v4685_v61  ;;  %v13686_v40 = vld [vmem:[%s15012_s13 + $0xcb0] ss:$8 sps:$4 sm:$0xff]   ;;  %v13694_v61 = vld [vmem:[%s15012_s13 + $0xcc4] ss:$8 sps:$4 sm:$0xff]  }
 0x30a   : > { %8712 = vmatpush1.bf16.msra.mxu1 %v13623_v54  ;;  %v4846_v54 = vld [vmem:[#allocation3 + $0x6e0] sm:$0xff] }
 0x30b   : > { %9729 = vmatpush1.bf16.msra.mxu0 %v13626_v38  ;;  %8713 = vmatprep.subr.bf16.mxu1 %v13631_v4  ;;  %v13689_v38 = vld [vmem:[%s15012_s13 + $0x3c0] ss:$8 sps:$4 sm:$0xff]   ;;  %v4864_v4 = vld [vmem:[#allocation3 + $0x770] sm:$0xff] }
 0x30c   : > { %9730 = vmatprep.subr.bf16.mxu0 %v13634_v12  ;;  %v13692_v12 = vld [vmem:[%s15012_s13 + $0xcc0] ss:$8 sps:$4 sm:$0xff]  }
 0x30d   : > { %8639 = vmatmul.mubr.bf16.gmra.mrb[4].mxu1 %v4666_v7  ;;  %v13697_v7 = vld [vmem:[%s15012_s13 + $0x3d4] ss:$8 sps:$4 sm:$0xff]  }
 0x30e   : > { %9656 = vmatmul.mubr.bf16.gmra.mrb[4].mxu0 %v4684_v14  ;;  %8714 = vmatpush1.bf16.msra.mxu1 %v13629_v22  ;;  %v13700_v22 = vld [vmem:[%s15012_s13 + $0xcd4] ss:$8 sps:$4 sm:$0xff]   ;;  %v13695_v14 = vld [vmem:[%s15012_s13 + $0x3d0] ss:$8 sps:$4 sm:$0xff]  }
 0x30f   : > { %9731 = vmatpush1.bf16.msra.mxu0 %v13632_v47  ;;  %8715 = vmatprep.subr.bf16.mxu1 %v13637_v57  ;;  %v4883_v47 = vld [vmem:[#allocation3 + $0x808] sm:$0xff]  ;;  %v4901_v57 = vld [vmem:[#allocation3 + $0x898] sm:$0xff] }
 0x310   : > { %9732 = vmatprep.subr.bf16.mxu0 %v13640_v16  ;;  %8648 = vmatprep.mubr.bf16.mxu1 %v4703_v26  ;;  %v13698_v16 = vld [vmem:[%s15012_s13 + $0xcd0] ss:$8 sps:$4 sm:$0xff]   ;;  %v13706_v26 = vld [vmem:[%s15012_s13 + $0xce4] ss:$8 sps:$4 sm:$0xff]  }
 0x311   : > { %9665 = vmatprep.mubr.bf16.mxu0 %v4721_v3  ;;  %v4882_v3 = vld [vmem:[#allocation3 + $0x800] sm:$0xff] }
 0x312   : > { %8716 = vmatpush1.bf16.msra.mxu1 %v13635_v27  ;;  %v13703_v27 = vld [vmem:[%s15012_s13 + $0x3e4] ss:$8 sps:$4 sm:$0xff]  }
 0x313   : > { %9733 = vmatpush1.bf16.msra.mxu0 %v13638_v6  ;;  %8717 = vmatprep.subr.bf16.mxu1 %v13643_v5  ;;  %v13701_v6 = vld [vmem:[%s15012_s13 + $0x3e0] ss:$8 sps:$4 sm:$0xff]   ;;  %v4900_v5 = vld [vmem:[#allocation3 + $0x890] sm:$0xff] }
 0x314   : > { %9734 = vmatprep.subr.bf16.mxu0 %v13646_v39  ;;  %v13704_v39 = vld [vmem:[%s15012_s13 + $0xce0] ss:$8 sps:$4 sm:$0xff]  }
 0x315   : > { %8649 = vmatmul.mubr.bf16.gmra.mrb[8].mxu1 %v4702_v9  ;;  %v13709_v9 = vld [vmem:[%s15012_s13 + $0x3f4] ss:$8 sps:$4 sm:$0xff]  }
 0x316   : > { %9666 = vmatmul.mubr.bf16.gmra.mrb[8].mxu0 %v4720_v36  ;;  %8718 = vmatpush1.bf16.msra.mxu1 %v13641_v28  ;;  %v13712_v28 = vld [vmem:[%s15012_s13 + $0xcf4] ss:$8 sps:$4 sm:$0xff]   ;;  %v13707_v36 = vld [vmem:[%s15012_s13 + $0x3f0] ss:$8 sps:$4 sm:$0xff]  }
 0x317   : > { %9735 = vmatpush1.bf16.msra.mxu0 %v13644_v30  ;;  %8719 = vmatprep.subr.bf16.mxu1 %v13649_v8  ;;  %v13710_v30 = vld [vmem:[%s15012_s13 + $0xcf0] ss:$8 sps:$4 sm:$0xff]  }
 0x318   : > { %9736 = vmatprep.subr.bf16.mxu0 %v13652_v15  ;;  %8658 = vmatprep.mubr.bf16.mxu1 %v4739_v24  ;;  %v4633_v8 = vld [vmem:[#allocation3 + $0x38] sm:$0xff]  ;;  %v4651_v15 = vld [vmem:[#allocation3 + $0xc8] sm:$0xff]  ;;  %v4632_v24 = vld [vmem:[#allocation3 + $0x30] sm:$0xff] }
 0x319   : > { %9675 = vmatprep.mubr.bf16.mxu0 %v4757_v13  ;;  %v13713_v13 = vld [vmem:[%s15012_s13 + $0x400] ss:$8 sps:$4 sm:$0xff]  }
 0x31a   : > { %8720 = vmatpush1.bf16.msra.mxu1 %v13647_v33  ;;  %v13715_v33 = vld [vmem:[%s15012_s13 + $0x404] ss:$8 sps:$4 sm:$0xff]  }
 0x31b   : > { %9737 = vmatpush1.bf16.msra.mxu0 %v13650_v18  ;;  %8721 = vmatprep.subr.bf16.mxu1 %v13655_v0  ;;  %v13718_v18 = vld [vmem:[%s15012_s13 + $0xd04] ss:$8 sps:$4 sm:$0xff]  }
 0x31c   : > { %9738 = vmatprep.subr.bf16.mxu0 %v13658_v20  ;;  %v4650_v0 = vld [vmem:[#allocation3 + $0xc0] sm:$0xff] }
 0x31d   : > { %8659 = vmatmul.mubr.bf16.gmra.mrb[12].mxu1 %v4738_v42  ;;  %v13716_v20 = vld [vmem:[%s15012_s13 + $0xd00] ss:$8 sps:$4 sm:$0xff]   ;;  %v13721_v42 = vld [vmem:[%s15012_s13 + $0x414] ss:$8 sps:$4 sm:$0xff]  }
 0x31e   : > { %9676 = vmatmul.mubr.bf16.gmra.mrb[12].mxu0 %v4756_v19  ;;  %8722 = vmatpush1.bf16.msra.mxu1 %v13653_v56  ;;  %v13724_v56 = vld [vmem:[%s15012_s13 + $0xd14] ss:$8 sps:$4 sm:$0xff]   ;;  %v13719_v19 = vld [vmem:[%s15012_s13 + $0x410] ss:$8 sps:$4 sm:$0xff]  }
 0x31f   : > { %9739 = vmatpush1.bf16.msra.mxu0 %v13656_v37  ;;  %8723 = vmatprep.subr.bf16.mxu1 %v13661_v35  ;;  %v13722_v37 = vld [vmem:[%s15012_s13 + $0xd10] ss:$8 sps:$4 sm:$0xff]  }
 0x320   : > { %9740 = vmatprep.subr.bf16.mxu0 %v13664_v21  ;;  %8668 = vmatprep.mubr.bf16.mxu1 %v4775_v23  ;;  %v4669_v35 = vld [vmem:[#allocation3 + $0x158] sm:$0xff]  ;;  %v4687_v21 = vld [vmem:[#allocation3 + $0x1e8] sm:$0xff]  ;;  %v4668_v23 = vld [vmem:[#allocation3 + $0x150] sm:$0xff] }
 0x321   : > { %9685 = vmatprep.mubr.bf16.mxu0 %v4793_v58  ;;  %v13725_v58 = vld [vmem:[%s15012_s13 + $0x420] ss:$8 sps:$4 sm:$0xff]  }
 0x322   : > { %8724 = vmatpush1.bf16.msra.mxu1 %v13659_v10  ;;  %v13727_v10 = vld [vmem:[%s15012_s13 + $0x424] ss:$8 sps:$4 sm:$0xff]  }
 0x323   : > { %9741 = vmatpush1.bf16.msra.mxu0 %v13662_v46  ;;  %8725 = vmatprep.subr.bf16.mxu1 %v13667_v29  ;;  %v13730_v46 = vld [vmem:[%s15012_s13 + $0xd24] ss:$8 sps:$4 sm:$0xff]  }
 0x324   : > { %9742 = vmatprep.subr.bf16.mxu0 %v13670_v1  ;;  %v4686_v29 = vld [vmem:[#allocation3 + $0x1e0] sm:$0xff] }
 0x325   : > { %8669 = vmatmul.mubr.bf16.gmra.mrb[16].mxu1 %v4774_v17  ;;  %v13728_v1 = vld [vmem:[%s15012_s13 + $0xd20] ss:$8 sps:$4 sm:$0xff]   ;;  %v13733_v17 = vld [vmem:[%s15012_s13 + $0x434] ss:$8 sps:$4 sm:$0xff]  }
 0x326   : > { %9686 = vmatmul.mubr.bf16.gmra.mrb[16].mxu0 %v4792_v34  ;;  %8726 = vmatpush1.bf16.msra.mxu1 %v13665_v41  ;;  %v13736_v41 = vld [vmem:[%s15012_s13 + $0xd34] ss:$8 sps:$4 sm:$0xff]   ;;  %v13731_v34 = vld [vmem:[%s15012_s13 + $0x430] ss:$8 sps:$4 sm:$0xff]  }
 0x327   : > { %9743 = vmatpush1.bf16.msra.mxu0 %v13668_v50  ;;  %8727 = vmatprep.subr.bf16.mxu1 %v13673_v48  ;;  %v4705_v50 = vld [vmem:[#allocation3 + $0x278] sm:$0xff]  ;;  %v4723_v48 = vld [vmem:[#allocation3 + $0x308] sm:$0xff] }
 0x328   : > { %9744 = vmatprep.subr.bf16.mxu0 %v13676_v2  ;;  %8678 = vmatprep.mubr.bf16.mxu1 %v4811_v52  ;;  %v13734_v2 = vld [vmem:[%s15012_s13 + $0xd30] ss:$8 sps:$4 sm:$0xff]   ;;  %v13742_v52 = vld [vmem:[%s15012_s13 + $0xd44] ss:$8 sps:$4 sm:$0xff]  }
 0x329   : > { %9695 = vmatprep.mubr.bf16.mxu0 %v4829_v45  ;;  %v4704_v45 = vld [vmem:[#allocation3 + $0x270] sm:$0xff] }
 0x32a   : > { %8728 = vmatpush1.bf16.msra.mxu1 %v13671_v44  ;;  %v13739_v44 = vld [vmem:[%s15012_s13 + $0x444] ss:$8 sps:$4 sm:$0xff]  }
 0x32b   : > { %9745 = vmatpush1.bf16.msra.mxu0 %v13674_v53  ;;  %8729 = vmatprep.subr.bf16.mxu1 %v13679_v11  ;;  %v13737_v53 = vld [vmem:[%s15012_s13 + $0x440] ss:$8 sps:$4 sm:$0xff]  }
 0x32c   : > { %9746 = vmatprep.subr.bf16.mxu0 %v13682_v51  ;;  %v4722_v11 = vld [vmem:[#allocation3 + $0x300] sm:$0xff] }
 0x32d   : > { %8679 = vmatmul.mubr.bf16.gmra.mrb[20].mxu1 %v4810_v25  ;;  %v13740_v51 = vld [vmem:[%s15012_s13 + $0xd40] ss:$8 sps:$4 sm:$0xff]   ;;  %v13745_v25 = vld [vmem:[%s15012_s13 + $0x454] ss:$8 sps:$4 sm:$0xff]  }
 0x32e   : > { %9696 = vmatmul.mubr.bf16.gmra.mrb[20].mxu0 %v4828_v55  ;;  %8730 = vmatpush1.bf16.msra.mxu1 %v13677_v32  ;;  %v13748_v32 = vld [vmem:[%s15012_s13 + $0xd54] ss:$8 sps:$4 sm:$0xff]  }
 0x32f   : > { %9747 = vmatpush1.bf16.msra.mxu0 %v13680_v49  ;;  %8731 = vmatprep.subr.bf16.mxu1 %v13685_v60  ;;  %v4741_v55 = vld [vmem:[#allocation3 + $0x398] sm:$0xff]  ;;  %v4759_v49 = vld [vmem:[#allocation3 + $0x428] sm:$0xff] }
 0x330   : > { %9748 = vmatprep.subr.bf16.mxu0 %v13688_v63  ;;  %8688 = vmatprep.mubr.bf16.mxu1 %v4847_v43  ;;  %v13743_v60 = vld [vmem:[%s15012_s13 + $0x450] ss:$8 sps:$4 sm:$0xff]   ;;  %v13751_v43 = vld [vmem:[%s15012_s13 + $0x464] ss:$8 sps:$4 sm:$0xff]  }
 0x331   : > { %9705 = vmatprep.mubr.bf16.mxu0 %v4865_v59  ;;  %v13746_v63 = vld [vmem:[%s15012_s13 + $0xd50] ss:$8 sps:$4 sm:$0xff]   ;;  %v13754_v59 = vld [vmem:[%s15012_s13 + $0xd64] ss:$8 sps:$4 sm:$0xff]  }
 0x332   : > { %8732 = vmatpush1.bf16.msra.mxu1 %v13683_v31  ;;  %v4740_v31 = vld [vmem:[#allocation3 + $0x390] sm:$0xff] }
 0x333   : > { %9749 = vmatpush1.bf16.msra.mxu0 %v13686_v40  ;;  %8733 = vmatprep.subr.bf16.mxu1 %v13691_v62  ;;  %v13749_v40 = vld [vmem:[%s15012_s13 + $0x460] ss:$8 sps:$4 sm:$0xff]  }
 0x334   : > { %9750 = vmatprep.subr.bf16.mxu0 %v13694_v61  ;;  %v4758_v62 = vld [vmem:[#allocation3 + $0x420] sm:$0xff] }
 0x335   : > { %8689 = vmatmul.mubr.bf16.gmra.mrb[24].mxu1 %v4846_v54  ;;  %v13752_v61 = vld [vmem:[%s15012_s13 + $0xd60] ss:$8 sps:$4 sm:$0xff]   ;;  %v13757_v54 = vld [vmem:[%s15012_s13 + $0x474] ss:$8 sps:$4 sm:$0xff]  }
 0x336   : > { %9706 = vmatmul.mubr.bf16.gmra.mrb[24].mxu0 %v4864_v4  ;;  %8734 = vmatpush1.bf16.msra.mxu1 %v13689_v38  ;;  %v13760_v38 = vld [vmem:[%s15012_s13 + $0xd74] ss:$8 sps:$4 sm:$0xff]   ;;  %v13755_v4 = vld [vmem:[%s15012_s13 + $0x470] ss:$8 sps:$4 sm:$0xff]  }
 0x337   : > { %9751 = vmatpush1.bf16.msra.mxu0 %v13692_v12  ;;  %8735 = vmatprep.subr.bf16.mxu1 %v13697_v7  ;;  %v4777_v12 = vld [vmem:[#allocation3 + $0x4b8] sm:$0xff]  ;;  %v4795_v7 = vld [vmem:[#allocation3 + $0x548] sm:$0xff] }
 0x338   : > { %9752 = vmatprep.subr.bf16.mxu0 %v13700_v22  ;;  %8698 = vmatprep.mubr.bf16.mxu1 %v4883_v47  ;;  %v13758_v22 = vld [vmem:[%s15012_s13 + $0xd70] ss:$8 sps:$4 sm:$0xff]   ;;  %v13766_v47 = vld [vmem:[%s15012_s13 + $0xd84] ss:$8 sps:$4 sm:$0xff]  }
 0x339   : > { %9715 = vmatprep.mubr.bf16.mxu0 %v4901_v57  ;;  %v4776_v57 = vld [vmem:[#allocation3 + $0x4b0] sm:$0xff] }
 0x33a   : > { %8736 = vmatpush1.bf16.msra.mxu1 %v13695_v14  ;;  %v13763_v14 = vld [vmem:[%s15012_s13 + $0x484] ss:$8 sps:$4 sm:$0xff]  }
 0x33b   : > { %9753 = vmatpush1.bf16.msra.mxu0 %v13698_v16  ;;  %8737 = vmatprep.subr.bf16.mxu1 %v13703_v27  ;;  %v13761_v16 = vld [vmem:[%s15012_s13 + $0x480] ss:$8 sps:$4 sm:$0xff]  }
 0x33c   : > { %9754 = vmatprep.subr.bf16.mxu0 %v13706_v26  ;;  %v4794_v27 = vld [vmem:[#allocation3 + $0x540] sm:$0xff] }
 0x33d   : > { %8699 = vmatmul.mubr.bf16.gmra.mrb[28].mxu1 %v4882_v3  ;;  %v13764_v26 = vld [vmem:[%s15012_s13 + $0xd80] ss:$8 sps:$4 sm:$0xff]   ;;  %v13769_v3 = vld [vmem:[%s15012_s13 + $0x494] ss:$8 sps:$4 sm:$0xff]  }
 0x33e   : > { %9716 = vmatmul.mubr.bf16.gmra.mrb[28].mxu0 %v4900_v5  ;;  %8738 = vmatpush1.bf16.msra.mxu1 %v13701_v6  ;;  %v13772_v6 = vld [vmem:[%s15012_s13 + $0xd94] ss:$8 sps:$4 sm:$0xff]   ;;  %v13767_v5 = vld [vmem:[%s15012_s13 + $0x490] ss:$8 sps:$4 sm:$0xff]  }
 0x33f   : > { %9755 = vmatpush1.bf16.msra.mxu0 %v13704_v39  ;;  %8739 = vmatprep.subr.bf16.mxu1 %v13709_v9  ;;  %v13770_v39 = vld [vmem:[%s15012_s13 + $0xd90] ss:$8 sps:$4 sm:$0xff]  }
 0x340   : > { %9756 = vmatprep.subr.bf16.mxu0 %v13712_v28  ;;  %8741 = vmatprep.mubr.bf16.mxu1 %v4633_v8  ;;  %v4813_v9 = vld [vmem:[#allocation3 + $0x5d8] sm:$0xff]  ;;  %v4831_v28 = vld [vmem:[#allocation3 + $0x668] sm:$0xff]  ;;  %v4812_v8 = vld [vmem:[#allocation3 + $0x5d0] sm:$0xff] }
 0x341   : > { %9758 = vmatprep.mubr.bf16.mxu0 %v4651_v15  ;;  %v13773_v15 = vld [vmem:[%s15012_s13 + $0x4a0] ss:$8 sps:$4 sm:$0xff]  }
 0x342   : > { %8740 = vmatpush1.bf16.msra.mxu1 %v13707_v36  ;;  %v13775_v36 = vld [vmem:[%s15012_s13 + $0x4a4] ss:$8 sps:$4 sm:$0xff]  }
 0x343   : > { %9757 = vmatpush1.bf16.msra.mxu0 %v13710_v30  ;;  %8822 = vmatprep.subr.bf16.mxu1 %v13715_v33  ;;  %v13778_v30 = vld [vmem:[%s15012_s13 + $0xda4] ss:$8 sps:$4 sm:$0xff]  }
 0x344   : > { %9839 = vmatprep.subr.bf16.mxu0 %v13718_v18  ;;  %v4830_v33 = vld [vmem:[#allocation3 + $0x660] sm:$0xff] }
 0x345   : > { %8742 = vmatmul.mubr.bf16.vlgmr.msra.gmra.mrb[0].mxu1 %v4632_v24  ;;  %v13776_v18 = vld [vmem:[%s15012_s13 + $0xda0] ss:$8 sps:$4 sm:$0xff]   ;;  %v13781_v24 = vld [vmem:[%s15012_s13 + $0x4b4] ss:$8 sps:$4 sm:$0xff]  }
 0x346   : > { %9759 = vmatmul.mubr.bf16.vlgmr.msra.gmra.mrb[0].mxu0 %v4650_v0  ;;  %8823 = vmatpush1.bf16.msra.mxu1 %v13713_v13  ;;  %v13784_v13 = vld [vmem:[%s15012_s13 + $0xdb4] ss:$8 sps:$4 sm:$0xff]   ;;  %v13779_v0 = vld [vmem:[%s15012_s13 + $0x4b0] ss:$8 sps:$4 sm:$0xff]  }
 0x347   : > { %9840 = vmatpush1.bf16.msra.mxu0 %v13716_v20  ;;  %8824 = vmatprep.subr.bf16.mxu1 %v13721_v42  ;;  %v13782_v20 = vld [vmem:[%s15012_s13 + $0xdb0] ss:$8 sps:$4 sm:$0xff]  }
 0x348   : > { %9841 = vmatprep.subr.bf16.mxu0 %v13724_v56  ;;  %8751 = vmatprep.mubr.bf16.mxu1 %v4669_v35  ;;  %v4849_v42 = vld [vmem:[#allocation3 + $0x6f8] sm:$0xff]  ;;  %v4867_v56 = vld [vmem:[#allocation3 + $0x788] sm:$0xff]  ;;  %v4848_v35 = vld [vmem:[#allocation3 + $0x6f0] sm:$0xff] }
 0x349   : > { %9768 = vmatprep.mubr.bf16.mxu0 %v4687_v21  ;;  %v13785_v21 = vld [vmem:[%s15012_s13 + $0x4c0] ss:$8 sps:$4 sm:$0xff]  }
 0x34a   : > { %8825 = vmatpush1.bf16.msra.mxu1 %v13719_v19  ;;  %v13787_v19 = vld [vmem:[%s15012_s13 + $0x4c4] ss:$8 sps:$4 sm:$0xff]  }
 0x34b   : > { %9842 = vmatpush1.bf16.msra.mxu0 %v13722_v37  ;;  %8826 = vmatprep.subr.bf16.mxu1 %v13727_v10  ;;  %v13790_v37 = vld [vmem:[%s15012_s13 + $0xdc4] ss:$8 sps:$4 sm:$0xff]  }
 0x34c   : > { %9843 = vmatprep.subr.bf16.mxu0 %v13730_v46  ;;  %v4866_v10 = vld [vmem:[#allocation3 + $0x780] sm:$0xff] }
 0x34d   : > { %8752 = vmatmul.mubr.bf16.gmra.mrb[4].mxu1 %v4668_v23  ;;  %v13788_v46 = vld [vmem:[%s15012_s13 + $0xdc0] ss:$8 sps:$4 sm:$0xff]   ;;  %v13793_v23 = vld [vmem:[%s15012_s13 + $0x4d4] ss:$8 sps:$4 sm:$0xff]  }
 0x34e   : > { %9769 = vmatmul.mubr.bf16.gmra.mrb[4].mxu0 %v4686_v29  ;;  %8827 = vmatpush1.bf16.msra.mxu1 %v13725_v58  ;;  %v13796_v58 = vld [vmem:[%s15012_s13 + $0xdd4] ss:$8 sps:$4 sm:$0xff]   ;;  %v13791_v29 = vld [vmem:[%s15012_s13 + $0x4d0] ss:$8 sps:$4 sm:$0xff]  }
 0x34f   : > { %9844 = vmatpush1.bf16.msra.mxu0 %v13728_v1  ;;  %8828 = vmatprep.subr.bf16.mxu1 %v13733_v17  ;;  %v4885_v1 = vld [vmem:[#allocation3 + $0x818] sm:$0xff]  ;;  %v4903_v17 = vld [vmem:[#allocation3 + $0x8a8] sm:$0xff] }
 0x350   : > { %9845 = vmatprep.subr.bf16.mxu0 %v13736_v41  ;;  %8761 = vmatprep.mubr.bf16.mxu1 %v4705_v50  ;;  %v13794_v41 = vld [vmem:[%s15012_s13 + $0xdd0] ss:$8 sps:$4 sm:$0xff]   ;;  %v13802_v50 = vld [vmem:[%s15012_s13 + $0xde4] ss:$8 sps:$4 sm:$0xff]  }
 0x351   : > { %9778 = vmatprep.mubr.bf16.mxu0 %v4723_v48  ;;  %v4884_v48 = vld [vmem:[#allocation3 + $0x810] sm:$0xff] }
 0x352   : > { %8829 = vmatpush1.bf16.msra.mxu1 %v13731_v34  ;;  %v13799_v34 = vld [vmem:[%s15012_s13 + $0x4e4] ss:$8 sps:$4 sm:$0xff]  }
 0x353   : > { %9846 = vmatpush1.bf16.msra.mxu0 %v13734_v2  ;;  %8830 = vmatprep.subr.bf16.mxu1 %v13739_v44  ;;  %v13797_v2 = vld [vmem:[%s15012_s13 + $0x4e0] ss:$8 sps:$4 sm:$0xff]  }
 0x354   : > { %9847 = vmatprep.subr.bf16.mxu0 %v13742_v52  ;;  %v4902_v44 = vld [vmem:[#allocation3 + $0x8a0] sm:$0xff] }
 0x355   : > { %8762 = vmatmul.mubr.bf16.gmra.mrb[8].mxu1 %v4704_v45  ;;  %v13800_v52 = vld [vmem:[%s15012_s13 + $0xde0] ss:$8 sps:$4 sm:$0xff]   ;;  %v13805_v45 = vld [vmem:[%s15012_s13 + $0x4f4] ss:$8 sps:$4 sm:$0xff]  }
 0x356   : > { %9779 = vmatmul.mubr.bf16.gmra.mrb[8].mxu0 %v4722_v11  ;;  %8831 = vmatpush1.bf16.msra.mxu1 %v13737_v53  ;;  %v13808_v53 = vld [vmem:[%s15012_s13 + $0xdf4] ss:$8 sps:$4 sm:$0xff]   ;;  %v4635_v11 = vld [vmem:[#allocation3 + $0x48] sm:$0xff] }
 0x357   : > { %9848 = vmatpush1.bf16.msra.mxu0 %v13740_v51  ;;  %8832 = vmatprep.subr.bf16.mxu1 %v13745_v25  ;;  %v4653_v51 = vld [vmem:[#allocation3 + $0xd8] sm:$0xff] }
 0x358   : > { %9849 = vmatprep.subr.bf16.mxu0 %v13748_v32  ;;  %8771 = vmatprep.mubr.bf16.mxu1 %v4741_v55  ;;  %v13803_v25 = vld [vmem:[%s15012_s13 + $0x4f0] ss:$8 sps:$4 sm:$0xff]   ;;  %v13811_v55 = vld [vmem:[%s15012_s13 + $0x504] ss:$8 sps:$4 sm:$0xff]  }
 0x359   : > { %9788 = vmatprep.mubr.bf16.mxu0 %v4759_v49  ;;  %v13806_v32 = vld [vmem:[%s15012_s13 + $0xdf0] ss:$8 sps:$4 sm:$0xff]   ;;  %v13814_v49 = vld [vmem:[%s15012_s13 + $0xe04] ss:$8 sps:$4 sm:$0xff]  }
 0x35a   : > { %8833 = vmatpush1.bf16.msra.mxu1 %v13743_v60  ;;  %v4634_v60 = vld [vmem:[#allocation3 + $0x40] sm:$0xff] }
 0x35b   : > { %9850 = vmatpush1.bf16.msra.mxu0 %v13746_v63  ;;  %8834 = vmatprep.subr.bf16.mxu1 %v13751_v43  ;;  %v13809_v63 = vld [vmem:[%s15012_s13 + $0x500] ss:$8 sps:$4 sm:$0xff]   ;;  %v4652_v43 = vld [vmem:[#allocation3 + $0xd0] sm:$0xff] }
 0x35c   : > { %9851 = vmatprep.subr.bf16.mxu0 %v13754_v59  ;;  %v13812_v59 = vld [vmem:[%s15012_s13 + $0xe00] ss:$8 sps:$4 sm:$0xff]  }
 0x35d   : > { %8772 = vmatmul.mubr.bf16.gmra.mrb[12].mxu1 %v4740_v31  ;;  %v13817_v31 = vld [vmem:[%s15012_s13 + $0x514] ss:$8 sps:$4 sm:$0xff]  }
 0x35e   : > { %9789 = vmatmul.mubr.bf16.gmra.mrb[12].mxu0 %v4758_v62  ;;  %8835 = vmatpush1.bf16.msra.mxu1 %v13749_v40  ;;  %v13820_v40 = vld [vmem:[%s15012_s13 + $0xe14] ss:$8 sps:$4 sm:$0xff]   ;;  %v13815_v62 = vld [vmem:[%s15012_s13 + $0x510] ss:$8 sps:$4 sm:$0xff]  }
 0x35f   : > { %9852 = vmatpush1.bf16.msra.mxu0 %v13752_v61  ;;  %8836 = vmatprep.subr.bf16.mxu1 %v13757_v54  ;;  %v4671_v61 = vld [vmem:[#allocation3 + $0x168] sm:$0xff]  ;;  %v4689_v54 = vld [vmem:[#allocation3 + $0x1f8] sm:$0xff] }
 0x360   : > { %9853 = vmatprep.subr.bf16.mxu0 %v13760_v38  ;;  %8781 = vmatprep.mubr.bf16.mxu1 %v4777_v12  ;;  %v13818_v38 = vld [vmem:[%s15012_s13 + $0xe10] ss:$8 sps:$4 sm:$0xff]   ;;  %v13826_v12 = vld [vmem:[%s15012_s13 + $0xe24] ss:$8 sps:$4 sm:$0xff]  }
 0x361   : > { %9798 = vmatprep.mubr.bf16.mxu0 %v4795_v7  ;;  %v4670_v7 = vld [vmem:[#allocation3 + $0x160] sm:$0xff] }
 0x362   : > { %8837 = vmatpush1.bf16.msra.mxu1 %v13755_v4  ;;  %v13823_v4 = vld [vmem:[%s15012_s13 + $0x524] ss:$8 sps:$4 sm:$0xff]  }
 0x363   : > { %9854 = vmatpush1.bf16.msra.mxu0 %v13758_v22  ;;  %8838 = vmatprep.subr.bf16.mxu1 %v13763_v14  ;;  %v13821_v22 = vld [vmem:[%s15012_s13 + $0x520] ss:$8 sps:$4 sm:$0xff]   ;;  %v4688_v14 = vld [vmem:[#allocation3 + $0x1f0] sm:$0xff] }
 0x364   : > { %9855 = vmatprep.subr.bf16.mxu0 %v13766_v47  ;;  %v13824_v47 = vld [vmem:[%s15012_s13 + $0xe20] ss:$8 sps:$4 sm:$0xff]  }
 0x365   : > { %8782 = vmatmul.mubr.bf16.gmra.mrb[16].mxu1 %v4776_v57  ;;  %v13829_v57 = vld [vmem:[%s15012_s13 + $0x534] ss:$8 sps:$4 sm:$0xff]  }
 0x366   : > { %9799 = vmatmul.mubr.bf16.gmra.mrb[16].mxu0 %v4794_v27  ;;  %8839 = vmatpush1.bf16.msra.mxu1 %v13761_v16  ;;  %v13832_v16 = vld [vmem:[%s15012_s13 + $0xe34] ss:$8 sps:$4 sm:$0xff]   ;;  %v13827_v27 = vld [vmem:[%s15012_s13 + $0x530] ss:$8 sps:$4 sm:$0xff]  }
 0x367   : > { %9856 = vmatpush1.bf16.msra.mxu0 %v13764_v26  ;;  %8840 = vmatprep.subr.bf16.mxu1 %v13769_v3  ;;  %v13830_v26 = vld [vmem:[%s15012_s13 + $0xe30] ss:$8 sps:$4 sm:$0xff]   ;;  %v4707_v3 = vld [vmem:[#allocation3 + $0x288] sm:$0xff] }
 0x368   : > { %9857 = vmatprep.subr.bf16.mxu0 %v13772_v6  ;;  %8791 = vmatprep.mubr.bf16.mxu1 %v4813_v9  ;;  %v4725_v6 = vld [vmem:[#allocation3 + $0x318] sm:$0xff]  ;;  %v4706_v9 = vld [vmem:[#allocation3 + $0x280] sm:$0xff] }
 0x369   : > { %9808 = vmatprep.mubr.bf16.mxu0 %v4831_v28  ;;  %v13833_v28 = vld [vmem:[%s15012_s13 + $0x540] ss:$8 sps:$4 sm:$0xff]  }
 0x36a   : > { %8841 = vmatpush1.bf16.msra.mxu1 %v13767_v5  ;;  %v13835_v5 = vld [vmem:[%s15012_s13 + $0x544] ss:$8 sps:$4 sm:$0xff]  }
 0x36b   : > { %9858 = vmatpush1.bf16.msra.mxu0 %v13770_v39  ;;  %8842 = vmatprep.subr.bf16.mxu1 %v13775_v36  ;;  %v13838_v39 = vld [vmem:[%s15012_s13 + $0xe44] ss:$8 sps:$4 sm:$0xff]   ;;  %v4724_v36 = vld [vmem:[#allocation3 + $0x310] sm:$0xff] }
 0x36c   : > { %9859 = vmatprep.subr.bf16.mxu0 %v13778_v30  ;;  %v13836_v30 = vld [vmem:[%s15012_s13 + $0xe40] ss:$8 sps:$4 sm:$0xff]  }
 0x36d   : > { %8792 = vmatmul.mubr.bf16.gmra.mrb[20].mxu1 %v4812_v8  ;;  %v13841_v8 = vld [vmem:[%s15012_s13 + $0x554] ss:$8 sps:$4 sm:$0xff]  }
 0x36e   : > { %9809 = vmatmul.mubr.bf16.gmra.mrb[20].mxu0 %v4830_v33  ;;  %8843 = vmatpush1.bf16.msra.mxu1 %v13773_v15  ;;  %v13844_v15 = vld [vmem:[%s15012_s13 + $0xe54] ss:$8 sps:$4 sm:$0xff]   ;;  %v13839_v33 = vld [vmem:[%s15012_s13 + $0x550] ss:$8 sps:$4 sm:$0xff]  }
 0x36f   : > { %9860 = vmatpush1.bf16.msra.mxu0 %v13776_v18  ;;  %8844 = vmatprep.subr.bf16.mxu1 %v13781_v24  ;;  %v13842_v18 = vld [vmem:[%s15012_s13 + $0xe50] ss:$8 sps:$4 sm:$0xff]   ;;  %v4743_v24 = vld [vmem:[#allocation3 + $0x3a8] sm:$0xff] }
 0x370   : > { %9861 = vmatprep.subr.bf16.mxu0 %v13784_v13  ;;  %8801 = vmatprep.mubr.bf16.mxu1 %v4849_v42  ;;  %v4761_v13 = vld [vmem:[#allocation3 + $0x438] sm:$0xff]  ;;  %v4742_v42 = vld [vmem:[#allocation3 + $0x3a0] sm:$0xff] }
 0x371   : > { %9818 = vmatprep.mubr.bf16.mxu0 %v4867_v56  ;;  %v13845_v56 = vld [vmem:[%s15012_s13 + $0x560] ss:$8 sps:$4 sm:$0xff]  }
 0x372   : > { %8845 = vmatpush1.bf16.msra.mxu1 %v13779_v0  ;;  %v13847_v0 = vld [vmem:[%s15012_s13 + $0x564] ss:$8 sps:$4 sm:$0xff]  }
 0x373   : > { %9862 = vmatpush1.bf16.msra.mxu0 %v13782_v20  ;;  %8846 = vmatprep.subr.bf16.mxu1 %v13787_v19  ;;  %v13850_v20 = vld [vmem:[%s15012_s13 + $0xe64] ss:$8 sps:$4 sm:$0xff]   ;;  %v4760_v19 = vld [vmem:[#allocation3 + $0x430] sm:$0xff] }
 0x374   : > { %9863 = vmatprep.subr.bf16.mxu0 %v13790_v37  ;;  %v13848_v37 = vld [vmem:[%s15012_s13 + $0xe60] ss:$8 sps:$4 sm:$0xff]  }
 0x375   : > { %8802 = vmatmul.mubr.bf16.gmra.mrb[24].mxu1 %v4848_v35  ;;  %v13853_v35 = vld [vmem:[%s15012_s13 + $0x574] ss:$8 sps:$4 sm:$0xff]  }
 0x376   : > { %9819 = vmatmul.mubr.bf16.gmra.mrb[24].mxu0 %v4866_v10  ;;  %8847 = vmatpush1.bf16.msra.mxu1 %v13785_v21  ;;  %v13856_v21 = vld [vmem:[%s15012_s13 + $0xe74] ss:$8 sps:$4 sm:$0xff]   ;;  %v13851_v10 = vld [vmem:[%s15012_s13 + $0x570] ss:$8 sps:$4 sm:$0xff]  }
 0x377   : > { %9864 = vmatpush1.bf16.msra.mxu0 %v13788_v46  ;;  %8848 = vmatprep.subr.bf16.mxu1 %v13793_v23  ;;  %v4779_v46 = vld [vmem:[#allocation3 + $0x4c8] sm:$0xff]  ;;  %v4797_v23 = vld [vmem:[#allocation3 + $0x558] sm:$0xff] }
 0x378   : > { %9865 = vmatprep.subr.bf16.mxu0 %v13796_v58  ;;  %8811 = vmatprep.mubr.bf16.mxu1 %v4885_v1  ;;  %v13854_v58 = vld [vmem:[%s15012_s13 + $0xe70] ss:$8 sps:$4 sm:$0xff]   ;;  %v13862_v1 = vld [vmem:[%s15012_s13 + $0xe84] ss:$8 sps:$4 sm:$0xff]  }
 0x379   : > { %9828 = vmatprep.mubr.bf16.mxu0 %v4903_v17  ;;  %v4778_v17 = vld [vmem:[#allocation3 + $0x4c0] sm:$0xff] }
 0x37a   : > { %8849 = vmatpush1.bf16.msra.mxu1 %v13791_v29  ;;  %v13859_v29 = vld [vmem:[%s15012_s13 + $0x584] ss:$8 sps:$4 sm:$0xff]  }
 0x37b   : > { %9866 = vmatpush1.bf16.msra.mxu0 %v13794_v41  ;;  %8850 = vmatprep.subr.bf16.mxu1 %v13799_v34  ;;  %v13857_v41 = vld [vmem:[%s15012_s13 + $0x580] ss:$8 sps:$4 sm:$0xff]   ;;  %v4796_v34 = vld [vmem:[#allocation3 + $0x550] sm:$0xff] }
 0x37c   : > { %9867 = vmatprep.subr.bf16.mxu0 %v13802_v50  ;;  %v13860_v50 = vld [vmem:[%s15012_s13 + $0xe80] ss:$8 sps:$4 sm:$0xff]  }
 0x37d   : > { %8812 = vmatmul.mubr.bf16.gmra.mrb[28].mxu1 %v4884_v48  ;;  %v13865_v48 = vld [vmem:[%s15012_s13 + $0x594] ss:$8 sps:$4 sm:$0xff]  }
 0x37e   : > { %9829 = vmatmul.mubr.bf16.gmra.mrb[28].mxu0 %v4902_v44  ;;  %8851 = vmatpush1.bf16.msra.mxu1 %v13797_v2  ;;  %v13868_v2 = vld [vmem:[%s15012_s13 + $0xe94] ss:$8 sps:$4 sm:$0xff]   ;;  %v4815_v44 = vld [vmem:[#allocation3 + $0x5e8] sm:$0xff] }
 0x37f   : > { %9868 = vmatpush1.bf16.msra.mxu0 %v13800_v52  ;;  %8852 = vmatprep.subr.bf16.mxu1 %v13805_v45  ;;  %v4833_v52 = vld [vmem:[#allocation3 + $0x678] sm:$0xff] }
 0x380   : > { %9869 = vmatprep.subr.bf16.mxu0 %v13808_v53  ;;  %8854 = vmatprep.mubr.bf16.mxu1 %v4635_v11  ;;  %v13863_v45 = vld [vmem:[%s15012_s13 + $0x590] ss:$8 sps:$4 sm:$0xff]   ;;  %v13871_v11 = vld [vmem:[%s15012_s13 + $0x5a4] ss:$8 sps:$4 sm:$0xff]  }
 0x381   : > { %9871 = vmatprep.mubr.bf16.mxu0 %v4653_v51  ;;  %v13866_v53 = vld [vmem:[%s15012_s13 + $0xe90] ss:$8 sps:$4 sm:$0xff]   ;;  %v13874_v51 = vld [vmem:[%s15012_s13 + $0xea4] ss:$8 sps:$4 sm:$0xff]  }
 0x382   : > { %8853 = vmatpush1.bf16.msra.mxu1 %v13803_v25  ;;  %v4814_v25 = vld [vmem:[#allocation3 + $0x5e0] sm:$0xff] }
 0x383   : > { %9870 = vmatpush1.bf16.msra.mxu0 %v13806_v32  ;;  %8935 = vmatprep.subr.bf16.mxu1 %v13811_v55  ;;  %v13869_v32 = vld [vmem:[%s15012_s13 + $0x5a0] ss:$8 sps:$4 sm:$0xff]   ;;  %v4832_v55 = vld [vmem:[#allocation3 + $0x670] sm:$0xff] }
 0x384   : > { %9952 = vmatprep.subr.bf16.mxu0 %v13814_v49  ;;  %v13872_v49 = vld [vmem:[%s15012_s13 + $0xea0] ss:$8 sps:$4 sm:$0xff]  }
 0x385   : > { %8855 = vmatmul.mubr.bf16.vlgmr.msra.gmra.mrb[0].mxu1 %v4634_v60  ;;  %v13877_v60 = vld [vmem:[%s15012_s13 + $0x5b4] ss:$8 sps:$4 sm:$0xff]  }
 0x386   : > { %9872 = vmatmul.mubr.bf16.vlgmr.msra.gmra.mrb[0].mxu0 %v4652_v43  ;;  %8936 = vmatpush1.bf16.msra.mxu1 %v13809_v63  ;;  %v13880_v63 = vld [vmem:[%s15012_s13 + $0xeb4] ss:$8 sps:$4 sm:$0xff]   ;;  %v13875_v43 = vld [vmem:[%s15012_s13 + $0x5b0] ss:$8 sps:$4 sm:$0xff]  }
 0x387   : > { %9953 = vmatpush1.bf16.msra.mxu0 %v13812_v59  ;;  %8937 = vmatprep.subr.bf16.mxu1 %v13817_v31  ;;  %v4851_v59 = vld [vmem:[#allocation3 + $0x708] sm:$0xff]  ;;  %v4869_v31 = vld [vmem:[#allocation3 + $0x798] sm:$0xff] }
 0x388   : > { %9954 = vmatprep.subr.bf16.mxu0 %v13820_v40  ;;  %8864 = vmatprep.mubr.bf16.mxu1 %v4671_v61  ;;  %v13878_v40 = vld [vmem:[%s15012_s13 + $0xeb0] ss:$8 sps:$4 sm:$0xff]   ;;  %v13886_v61 = vld [vmem:[%s15012_s13 + $0xec4] ss:$8 sps:$4 sm:$0xff]  }
 0x389   : > { %9881 = vmatprep.mubr.bf16.mxu0 %v4689_v54  ;;  %v4850_v54 = vld [vmem:[#allocation3 + $0x700] sm:$0xff] }
 0x38a   : > { %8938 = vmatpush1.bf16.msra.mxu1 %v13815_v62  ;;  %v13883_v62 = vld [vmem:[%s15012_s13 + $0x5c4] ss:$8 sps:$4 sm:$0xff]  }
 0x38b   : > { %9955 = vmatpush1.bf16.msra.mxu0 %v13818_v38  ;;  %8939 = vmatprep.subr.bf16.mxu1 %v13823_v4  ;;  %v13881_v38 = vld [vmem:[%s15012_s13 + $0x5c0] ss:$8 sps:$4 sm:$0xff]   ;;  %v4868_v4 = vld [vmem:[#allocation3 + $0x790] sm:$0xff] }
 0x38c   : > { %9956 = vmatprep.subr.bf16.mxu0 %v13826_v12  ;;  %v13884_v12 = vld [vmem:[%s15012_s13 + $0xec0] ss:$8 sps:$4 sm:$0xff]  }
 0x38d   : > { %8865 = vmatmul.mubr.bf16.gmra.mrb[4].mxu1 %v4670_v7  ;;  %v13889_v7 = vld [vmem:[%s15012_s13 + $0x5d4] ss:$8 sps:$4 sm:$0xff]  }
 0x38e   : > { %9882 = vmatmul.mubr.bf16.gmra.mrb[4].mxu0 %v4688_v14  ;;  %8940 = vmatpush1.bf16.msra.mxu1 %v13821_v22  ;;  %v13892_v22 = vld [vmem:[%s15012_s13 + $0xed4] ss:$8 sps:$4 sm:$0xff]   ;;  %v13887_v14 = vld [vmem:[%s15012_s13 + $0x5d0] ss:$8 sps:$4 sm:$0xff]  }
 0x38f   : > { %9957 = vmatpush1.bf16.msra.mxu0 %v13824_v47  ;;  %8941 = vmatprep.subr.bf16.mxu1 %v13829_v57  ;;  %v13890_v47 = vld [vmem:[%s15012_s13 + $0xed0] ss:$8 sps:$4 sm:$0xff]   ;;  %v4887_v57 = vld [vmem:[#allocation3 + $0x828] sm:$0xff] }
 0x390   : > { %9958 = vmatprep.subr.bf16.mxu0 %v13832_v16  ;;  %8874 = vmatprep.mubr.bf16.mxu1 %v4707_v3  ;;  %v4905_v16 = vld [vmem:[#allocation3 + $0x8b8] sm:$0xff]  ;;  %v4886_v3 = vld [vmem:[#allocation3 + $0x820] sm:$0xff] }
 0x391   : > { %9891 = vmatprep.mubr.bf16.mxu0 %v4725_v6  ;;  %v13893_v6 = vld [vmem:[%s15012_s13 + $0x5e0] ss:$8 sps:$4 sm:$0xff]  }
 0x392   : > { %8942 = vmatpush1.bf16.msra.mxu1 %v13827_v27  ;;  %v13895_v27 = vld [vmem:[%s15012_s13 + $0x5e4] ss:$8 sps:$4 sm:$0xff]  }
 0x393   : > { %9959 = vmatpush1.bf16.msra.mxu0 %v13830_v26  ;;  %8943 = vmatprep.subr.bf16.mxu1 %v13835_v5  ;;  %v13898_v26 = vld [vmem:[%s15012_s13 + $0xee4] ss:$8 sps:$4 sm:$0xff]   ;;  %v4904_v5 = vld [vmem:[#allocation3 + $0x8b0] sm:$0xff] }
 0x394   : > { %9960 = vmatprep.subr.bf16.mxu0 %v13838_v39  ;;  %v13896_v39 = vld [vmem:[%s15012_s13 + $0xee0] ss:$8 sps:$4 sm:$0xff]  }
 0x395   : > { %8875 = vmatmul.mubr.bf16.gmra.mrb[8].mxu1 %v4706_v9  ;;  %v13901_v9 = vld [vmem:[%s15012_s13 + $0x5f4] ss:$8 sps:$4 sm:$0xff]  }
 0x396   : > { %9892 = vmatmul.mubr.bf16.gmra.mrb[8].mxu0 %v4724_v36  ;;  %8944 = vmatpush1.bf16.msra.mxu1 %v13833_v28  ;;  %v13904_v28 = vld [vmem:[%s15012_s13 + $0xef4] ss:$8 sps:$4 sm:$0xff]   ;;  %v13899_v36 = vld [vmem:[%s15012_s13 + $0x5f0] ss:$8 sps:$4 sm:$0xff]  }
 0x397   : > { %9961 = vmatpush1.bf16.msra.mxu0 %v13836_v30  ;;  %8945 = vmatprep.subr.bf16.mxu1 %v13841_v8  ;;  %v13902_v30 = vld [vmem:[%s15012_s13 + $0xef0] ss:$8 sps:$4 sm:$0xff]  }
 0x398   : > { %9962 = vmatprep.subr.bf16.mxu0 %v13844_v15  ;;  %8884 = vmatprep.mubr.bf16.mxu1 %v4743_v24  ;;  %v4637_v8 = vld [vmem:[#allocation3 + $0x58] sm:$0xff]  ;;  %v4655_v15 = vld [vmem:[#allocation3 + $0xe8] sm:$0xff]  ;;  %v4636_v24 = vld [vmem:[#allocation3 + $0x50] sm:$0xff] }
 0x399   : > { %9901 = vmatprep.mubr.bf16.mxu0 %v4761_v13  ;;  %v13905_v13 = vld [vmem:[%s15012_s13 + $0x600] ss:$8 sps:$4 sm:$0xff]  }
 0x39a   : > { %8946 = vmatpush1.bf16.msra.mxu1 %v13839_v33  ;;  %v13907_v33 = vld [vmem:[%s15012_s13 + $0x604] ss:$8 sps:$4 sm:$0xff]  }
 0x39b   : > { %9963 = vmatpush1.bf16.msra.mxu0 %v13842_v18  ;;  %8947 = vmatprep.subr.bf16.mxu1 %v13847_v0  ;;  %v13910_v18 = vld [vmem:[%s15012_s13 + $0xf04] ss:$8 sps:$4 sm:$0xff]  }
 0x39c   : > { %9964 = vmatprep.subr.bf16.mxu0 %v13850_v20  ;;  %v4654_v0 = vld [vmem:[#allocation3 + $0xe0] sm:$0xff] }
 0x39d   : > { %8885 = vmatmul.mubr.bf16.gmra.mrb[12].mxu1 %v4742_v42  ;;  %v13908_v20 = vld [vmem:[%s15012_s13 + $0xf00] ss:$8 sps:$4 sm:$0xff]   ;;  %v13913_v42 = vld [vmem:[%s15012_s13 + $0x614] ss:$8 sps:$4 sm:$0xff]  }
 0x39e   : > { %9902 = vmatmul.mubr.bf16.gmra.mrb[12].mxu0 %v4760_v19  ;;  %8948 = vmatpush1.bf16.msra.mxu1 %v13845_v56  ;;  %v13916_v56 = vld [vmem:[%s15012_s13 + $0xf14] ss:$8 sps:$4 sm:$0xff]   ;;  %v13911_v19 = vld [vmem:[%s15012_s13 + $0x610] ss:$8 sps:$4 sm:$0xff]  }
 0x39f   : > { %9965 = vmatpush1.bf16.msra.mxu0 %v13848_v37  ;;  %8949 = vmatprep.subr.bf16.mxu1 %v13853_v35  ;;  %v4673_v37 = vld [vmem:[#allocation3 + $0x178] sm:$0xff]  ;;  %v4691_v35 = vld [vmem:[#allocation3 + $0x208] sm:$0xff] }
 0x3a0   : > { %9966 = vmatprep.subr.bf16.mxu0 %v13856_v21  ;;  %8894 = vmatprep.mubr.bf16.mxu1 %v4779_v46  ;;  %v13914_v21 = vld [vmem:[%s15012_s13 + $0xf10] ss:$8 sps:$4 sm:$0xff]   ;;  %v13922_v46 = vld [vmem:[%s15012_s13 + $0xf24] ss:$8 sps:$4 sm:$0xff]  }
 0x3a1   : > { %9911 = vmatprep.mubr.bf16.mxu0 %v4797_v23  ;;  %v4672_v23 = vld [vmem:[#allocation3 + $0x170] sm:$0xff] }
 0x3a2   : > { %8950 = vmatpush1.bf16.msra.mxu1 %v13851_v10  ;;  %v13919_v10 = vld [vmem:[%s15012_s13 + $0x624] ss:$8 sps:$4 sm:$0xff]  }
 0x3a3   : > { %9967 = vmatpush1.bf16.msra.mxu0 %v13854_v58  ;;  %8951 = vmatprep.subr.bf16.mxu1 %v13859_v29  ;;  %v13917_v58 = vld [vmem:[%s15012_s13 + $0x620] ss:$8 sps:$4 sm:$0xff]  }
 0x3a4   : > { %9968 = vmatprep.subr.bf16.mxu0 %v13862_v1  ;;  %v4690_v29 = vld [vmem:[#allocation3 + $0x200] sm:$0xff] }
 0x3a5   : > { %8895 = vmatmul.mubr.bf16.gmra.mrb[16].mxu1 %v4778_v17  ;;  %v13920_v1 = vld [vmem:[%s15012_s13 + $0xf20] ss:$8 sps:$4 sm:$0xff]   ;;  %v13925_v17 = vld [vmem:[%s15012_s13 + $0x634] ss:$8 sps:$4 sm:$0xff]  }
 0x3a6   : > { %9912 = vmatmul.mubr.bf16.gmra.mrb[16].mxu0 %v4796_v34  ;;  %8952 = vmatpush1.bf16.msra.mxu1 %v13857_v41  ;;  %v13928_v41 = vld [vmem:[%s15012_s13 + $0xf34] ss:$8 sps:$4 sm:$0xff]  }
 0x3a7   : > { %9969 = vmatpush1.bf16.msra.mxu0 %v13860_v50  ;;  %8953 = vmatprep.subr.bf16.mxu1 %v13865_v48  ;;  %v4709_v34 = vld [vmem:[#allocation3 + $0x298] sm:$0xff]  ;;  %v4727_v50 = vld [vmem:[#allocation3 + $0x328] sm:$0xff] }
 0x3a8   : > { %9970 = vmatprep.subr.bf16.mxu0 %v13868_v2  ;;  %8904 = vmatprep.mubr.bf16.mxu1 %v4815_v44  ;;  %v13923_v48 = vld [vmem:[%s15012_s13 + $0x630] ss:$8 sps:$4 sm:$0xff]   ;;  %v13931_v44 = vld [vmem:[%s15012_s13 + $0x644] ss:$8 sps:$4 sm:$0xff]  }
 0x3a9   : > { %9921 = vmatprep.mubr.bf16.mxu0 %v4833_v52  ;;  %v13926_v2 = vld [vmem:[%s15012_s13 + $0xf30] ss:$8 sps:$4 sm:$0xff]   ;;  %v13934_v52 = vld [vmem:[%s15012_s13 + $0xf44] ss:$8 sps:$4 sm:$0xff]  }
 0x3aa   : > { %8954 = vmatpush1.bf16.msra.mxu1 %v13863_v45  ;;  %v4708_v45 = vld [vmem:[#allocation3 + $0x290] sm:$0xff] }
 0x3ab   : > { %9971 = vmatpush1.bf16.msra.mxu0 %v13866_v53  ;;  %8955 = vmatprep.subr.bf16.mxu1 %v13871_v11  ;;  %v13929_v53 = vld [vmem:[%s15012_s13 + $0x640] ss:$8 sps:$4 sm:$0xff]  }
 0x3ac   : > { %9972 = vmatprep.subr.bf16.mxu0 %v13874_v51  ;;  %v4726_v11 = vld [vmem:[#allocation3 + $0x320] sm:$0xff] }
 0x3ad   : > { %8905 = vmatmul.mubr.bf16.gmra.mrb[20].mxu1 %v4814_v25  ;;  %v13932_v51 = vld [vmem:[%s15012_s13 + $0xf40] ss:$8 sps:$4 sm:$0xff]   ;;  %v13937_v25 = vld [vmem:[%s15012_s13 + $0x654] ss:$8 sps:$4 sm:$0xff]  }
 0x3ae   : > { %9922 = vmatmul.mubr.bf16.gmra.mrb[20].mxu0 %v4832_v55  ;;  %8956 = vmatpush1.bf16.msra.mxu1 %v13869_v32  ;;  %v13940_v32 = vld [vmem:[%s15012_s13 + $0xf54] ss:$8 sps:$4 sm:$0xff]   ;;  %v13935_v55 = vld [vmem:[%s15012_s13 + $0x650] ss:$8 sps:$4 sm:$0xff]  }
 0x3af   : > { %9973 = vmatpush1.bf16.msra.mxu0 %v13872_v49  ;;  %8957 = vmatprep.subr.bf16.mxu1 %v13877_v60  ;;  %v4745_v49 = vld [vmem:[#allocation3 + $0x3b8] sm:$0xff]  ;;  %v4763_v60 = vld [vmem:[#allocation3 + $0x448] sm:$0xff] }
 0x3b0   : > { %9974 = vmatprep.subr.bf16.mxu0 %v13880_v63  ;;  %8914 = vmatprep.mubr.bf16.mxu1 %v4851_v59  ;;  %v13938_v63 = vld [vmem:[%s15012_s13 + $0xf50] ss:$8 sps:$4 sm:$0xff]   ;;  %v13946_v59 = vld [vmem:[%s15012_s13 + $0xf64] ss:$8 sps:$4 sm:$0xff]  }
 0x3b1   : > { %9931 = vmatprep.mubr.bf16.mxu0 %v4869_v31  ;;  %v4744_v31 = vld [vmem:[#allocation3 + $0x3b0] sm:$0xff] }
 0x3b2   : > { %8958 = vmatpush1.bf16.msra.mxu1 %v13875_v43  ;;  %v13943_v43 = vld [vmem:[%s15012_s13 + $0x664] ss:$8 sps:$4 sm:$0xff]  }
 0x3b3   : > { %9975 = vmatpush1.bf16.msra.mxu0 %v13878_v40  ;;  %8959 = vmatprep.subr.bf16.mxu1 %v13883_v62  ;;  %v13941_v40 = vld [vmem:[%s15012_s13 + $0x660] ss:$8 sps:$4 sm:$0xff]  }
 0x3b4   : > { %9976 = vmatprep.subr.bf16.mxu0 %v13886_v61  ;;  %v4762_v62 = vld [vmem:[#allocation3 + $0x440] sm:$0xff] }
 0x3b5   : > { %8915 = vmatmul.mubr.bf16.gmra.mrb[24].mxu1 %v4850_v54  ;;  %v13944_v61 = vld [vmem:[%s15012_s13 + $0xf60] ss:$8 sps:$4 sm:$0xff]   ;;  %v13949_v54 = vld [vmem:[%s15012_s13 + $0x674] ss:$8 sps:$4 sm:$0xff]  }
 0x3b6   : > { %9932 = vmatmul.mubr.bf16.gmra.mrb[24].mxu0 %v4868_v4  ;;  %8960 = vmatpush1.bf16.msra.mxu1 %v13881_v38  ;;  %v13952_v38 = vld [vmem:[%s15012_s13 + $0xf74] ss:$8 sps:$4 sm:$0xff]   ;;  %v13947_v4 = vld [vmem:[%s15012_s13 + $0x670] ss:$8 sps:$4 sm:$0xff]  }
 0x3b7   : > { %9977 = vmatpush1.bf16.msra.mxu0 %v13884_v12  ;;  %8961 = vmatprep.subr.bf16.mxu1 %v13889_v7  ;;  %v13950_v12 = vld [vmem:[%s15012_s13 + $0xf70] ss:$8 sps:$4 sm:$0xff]  }
 0x3b8   : > { %9978 = vmatprep.subr.bf16.mxu0 %v13892_v22  ;;  %8924 = vmatprep.mubr.bf16.mxu1 %v4887_v57  ;;  %v4781_v7 = vld [vmem:[#allocation3 + $0x4d8] sm:$0xff]  ;;  %v4799_v22 = vld [vmem:[#allocation3 + $0x568] sm:$0xff]  ;;  %v4780_v57 = vld [vmem:[#allocation3 + $0x4d0] sm:$0xff] }
 0x3b9   : > { %9941 = vmatprep.mubr.bf16.mxu0 %v4905_v16  ;;  %v13953_v16 = vld [vmem:[%s15012_s13 + $0x680] ss:$8 sps:$4 sm:$0xff]  }
 0x3ba   : > { %8962 = vmatpush1.bf16.msra.mxu1 %v13887_v14  ;;  %v13955_v14 = vld [vmem:[%s15012_s13 + $0x684] ss:$8 sps:$4 sm:$0xff]  }
 0x3bb   : > { %9979 = vmatpush1.bf16.msra.mxu0 %v13890_v47  ;;  %8963 = vmatprep.subr.bf16.mxu1 %v13895_v27  ;;  %v13958_v47 = vld [vmem:[%s15012_s13 + $0xf84] ss:$8 sps:$4 sm:$0xff]  }
 0x3bc   : > { %9980 = vmatprep.subr.bf16.mxu0 %v13898_v26  ;;  %v4798_v27 = vld [vmem:[#allocation3 + $0x560] sm:$0xff] }
 0x3bd   : > { %8925 = vmatmul.mubr.bf16.gmra.mrb[28].mxu1 %v4886_v3  ;;  %v13956_v26 = vld [vmem:[%s15012_s13 + $0xf80] ss:$8 sps:$4 sm:$0xff]   ;;  %v13961_v3 = vld [vmem:[%s15012_s13 + $0x694] ss:$8 sps:$4 sm:$0xff]  }
 0x3be   : > { %9942 = vmatmul.mubr.bf16.gmra.mrb[28].mxu0 %v4904_v5  ;;  %8964 = vmatpush1.bf16.msra.mxu1 %v13893_v6  ;;  %v13964_v6 = vld [vmem:[%s15012_s13 + $0xf94] ss:$8 sps:$4 sm:$0xff]   ;;  %v13959_v5 = vld [vmem:[%s15012_s13 + $0x690] ss:$8 sps:$4 sm:$0xff]  }
 0x3bf   : > { %9981 = vmatpush1.bf16.msra.mxu0 %v13896_v39  ;;  %8965 = vmatprep.subr.bf16.mxu1 %v13901_v9  ;;  %v13962_v39 = vld [vmem:[%s15012_s13 + $0xf90] ss:$8 sps:$4 sm:$0xff]  }
 0x3c0   : > { %9982 = vmatprep.subr.bf16.mxu0 %v13904_v28  ;;  %8967 = vmatprep.mubr.bf16.mxu1 %v4637_v8  ;;  %v4817_v9 = vld [vmem:[#allocation3 + $0x5f8] sm:$0xff]  ;;  %v4835_v28 = vld [vmem:[#allocation3 + $0x688] sm:$0xff]  ;;  %v4816_v8 = vld [vmem:[#allocation3 + $0x5f0] sm:$0xff] }
 0x3c1   : > { %9984 = vmatprep.mubr.bf16.mxu0 %v4655_v15  ;;  %v13965_v15 = vld [vmem:[%s15012_s13 + $0x6a0] ss:$8 sps:$4 sm:$0xff]  }
 0x3c2   : > { %8966 = vmatpush1.bf16.msra.mxu1 %v13899_v36  ;;  %v13967_v36 = vld [vmem:[%s15012_s13 + $0x6a4] ss:$8 sps:$4 sm:$0xff]  }
 0x3c3   : > { %9983 = vmatpush1.bf16.msra.mxu0 %v13902_v30  ;;  %9048 = vmatprep.subr.bf16.mxu1 %v13907_v33  ;;  %v13970_v30 = vld [vmem:[%s15012_s13 + $0xfa4] ss:$8 sps:$4 sm:$0xff]  }
 0x3c4   : > { %10065 = vmatprep.subr.bf16.mxu0 %v13910_v18  ;;  %v4834_v33 = vld [vmem:[#allocation3 + $0x680] sm:$0xff] }
 0x3c5   : > { %8968 = vmatmul.mubr.bf16.vlgmr.msra.gmra.mrb[0].mxu1 %v4636_v24  ;;  %v13968_v18 = vld [vmem:[%s15012_s13 + $0xfa0] ss:$8 sps:$4 sm:$0xff]   ;;  %v13973_v24 = vld [vmem:[%s15012_s13 + $0x6b4] ss:$8 sps:$4 sm:$0xff]  }
 0x3c6   : > { %9985 = vmatmul.mubr.bf16.vlgmr.msra.gmra.mrb[0].mxu0 %v4654_v0  ;;  %9049 = vmatpush1.bf16.msra.mxu1 %v13905_v13  ;;  %v13976_v13 = vld [vmem:[%s15012_s13 + $0xfb4] ss:$8 sps:$4 sm:$0xff]   ;;  %v13971_v0 = vld [vmem:[%s15012_s13 + $0x6b0] ss:$8 sps:$4 sm:$0xff]  }
 0x3c7   : > { %10066 = vmatpush1.bf16.msra.mxu0 %v13908_v20  ;;  %9050 = vmatprep.subr.bf16.mxu1 %v13913_v42  ;;  %v4853_v20 = vld [vmem:[#allocation3 + $0x718] sm:$0xff]  ;;  %v4871_v42 = vld [vmem:[#allocation3 + $0x7a8] sm:$0xff] }
 0x3c8   : > { %10067 = vmatprep.subr.bf16.mxu0 %v13916_v56  ;;  %8977 = vmatprep.mubr.bf16.mxu1 %v4673_v37  ;;  %v13974_v56 = vld [vmem:[%s15012_s13 + $0xfb0] ss:$8 sps:$4 sm:$0xff]   ;;  %v13982_v37 = vld [vmem:[%s15012_s13 + $0xfc4] ss:$8 sps:$4 sm:$0xff]  }
 0x3c9   : > { %9994 = vmatprep.mubr.bf16.mxu0 %v4691_v35  ;;  %v4852_v35 = vld [vmem:[#allocation3 + $0x710] sm:$0xff] }
 0x3ca   : > { %9051 = vmatpush1.bf16.msra.mxu1 %v13911_v19  ;;  %v13979_v19 = vld [vmem:[%s15012_s13 + $0x6c4] ss:$8 sps:$4 sm:$0xff]  }
 0x3cb   : > { %10068 = vmatpush1.bf16.msra.mxu0 %v13914_v21  ;;  %9052 = vmatprep.subr.bf16.mxu1 %v13919_v10  ;;  %v13977_v21 = vld [vmem:[%s15012_s13 + $0x6c0] ss:$8 sps:$4 sm:$0xff]  }
 0x3cc   : > { %10069 = vmatprep.subr.bf16.mxu0 %v13922_v46  ;;  %v4870_v10 = vld [vmem:[#allocation3 + $0x7a0] sm:$0xff] }
 0x3cd   : > { %8978 = vmatmul.mubr.bf16.gmra.mrb[4].mxu1 %v4672_v23  ;;  %v13980_v46 = vld [vmem:[%s15012_s13 + $0xfc0] ss:$8 sps:$4 sm:$0xff]   ;;  %v13985_v23 = vld [vmem:[%s15012_s13 + $0x6d4] ss:$8 sps:$4 sm:$0xff]  }
 0x3ce   : > { %9995 = vmatmul.mubr.bf16.gmra.mrb[4].mxu0 %v4690_v29  ;;  %9053 = vmatpush1.bf16.msra.mxu1 %v13917_v58  ;;  %v13988_v58 = vld [vmem:[%s15012_s13 + $0xfd4] ss:$8 sps:$4 sm:$0xff]  }
 0x3cf   : > { %10070 = vmatpush1.bf16.msra.mxu0 %v13920_v1  ;;  %9054 = vmatprep.subr.bf16.mxu1 %v13925_v17  ;;  %v4889_v29 = vld [vmem:[#allocation3 + $0x838] sm:$0xff]  ;;  %v4907_v1 = vld [vmem:[#allocation3 + $0x8c8] sm:$0xff] }
 0x3d0   : > { %10071 = vmatprep.subr.bf16.mxu0 %v13928_v41  ;;  %8987 = vmatprep.mubr.bf16.mxu1 %v4709_v34  ;;  %v13983_v17 = vld [vmem:[%s15012_s13 + $0x6d0] ss:$8 sps:$4 sm:$0xff]   ;;  %v13991_v34 = vld [vmem:[%s15012_s13 + $0x6e4] ss:$8 sps:$4 sm:$0xff]  }
 0x3d1   : > { %10004 = vmatprep.mubr.bf16.mxu0 %v4727_v50  ;;  %v13986_v41 = vld [vmem:[%s15012_s13 + $0xfd0] ss:$8 sps:$4 sm:$0xff]   ;;  %v13994_v50 = vld [vmem:[%s15012_s13 + $0xfe4] ss:$8 sps:$4 sm:$0xff]  }
 0x3d2   : > { %9055 = vmatpush1.bf16.msra.mxu1 %v13923_v48  ;;  %v4888_v48 = vld [vmem:[#allocation3 + $0x830] sm:$0xff] }
 0x3d3   : > { %10072 = vmatpush1.bf16.msra.mxu0 %v13926_v2  ;;  %9056 = vmatprep.subr.bf16.mxu1 %v13931_v44  ;;  %v13989_v2 = vld [vmem:[%s15012_s13 + $0x6e0] ss:$8 sps:$4 sm:$0xff]  }
 0x3d4   : > { %10073 = vmatprep.subr.bf16.mxu0 %v13934_v52  ;;  %v4906_v44 = vld [vmem:[#allocation3 + $0x8c0] sm:$0xff] }
 0x3d5   : > { %8988 = vmatmul.mubr.bf16.gmra.mrb[8].mxu1 %v4708_v45  ;;  %v13992_v52 = vld [vmem:[%s15012_s13 + $0xfe0] ss:$8 sps:$4 sm:$0xff]   ;;  %v13997_v45 = vld [vmem:[%s15012_s13 + $0x6f4] ss:$8 sps:$4 sm:$0xff]  }
 0x3d6   : > { %10005 = vmatmul.mubr.bf16.gmra.mrb[8].mxu0 %v4726_v11  ;;  %9057 = vmatpush1.bf16.msra.mxu1 %v13929_v53  ;;  %v14000_v53 = vld [vmem:[%s15012_s13 + $0xff4] ss:$8 sps:$4 sm:$0xff]   ;;  %v13995_v11 = vld [vmem:[%s15012_s13 + $0x6f0] ss:$8 sps:$4 sm:$0xff]  }
 0x3d7   : > { %10074 = vmatpush1.bf16.msra.mxu0 %v13932_v51  ;;  %9058 = vmatprep.subr.bf16.mxu1 %v13937_v25  ;;  %v4639_v51 = vld [vmem:[#allocation3 + $0x68] sm:$0xff]  ;;  %v4657_v25 = vld [vmem:[#allocation3 + $0xf8] sm:$0xff] }
 0x3d8   : > { %10075 = vmatprep.subr.bf16.mxu0 %v13940_v32  ;;  %8997 = vmatprep.mubr.bf16.mxu1 %v4745_v49  ;;  %v13998_v32 = vld [vmem:[%s15012_s13 + $0xff0] ss:$8 sps:$4 sm:$0xff]   ;;  %v14006_v49 = vld [vmem:[%s15012_s13 + $0x1004] ss:$8 sps:$4 sm:$0xff]  }
 0x3d9   : > { %10014 = vmatprep.mubr.bf16.mxu0 %v4763_v60  ;;  %v4638_v60 = vld [vmem:[#allocation3 + $0x60] sm:$0xff] }
 0x3da   : > { %9059 = vmatpush1.bf16.msra.mxu1 %v13935_v55  ;;  %v14003_v55 = vld [vmem:[%s15012_s13 + $0x704] ss:$8 sps:$4 sm:$0xff]  }
 0x3db   : > { %10076 = vmatpush1.bf16.msra.mxu0 %v13938_v63  ;;  %9060 = vmatprep.subr.bf16.mxu1 %v13943_v43  ;;  %v14001_v63 = vld [vmem:[%s15012_s13 + $0x700] ss:$8 sps:$4 sm:$0xff]   ;;  %v4656_v43 = vld [vmem:[#allocation3 + $0xf0] sm:$0xff] }
 0x3dc   : > { %10077 = vmatprep.subr.bf16.mxu0 %v13946_v59  ;;  %v14004_v59 = vld [vmem:[%s15012_s13 + $0x1000] ss:$8 sps:$4 sm:$0xff]  }
 0x3dd   : > { %8998 = vmatmul.mubr.bf16.gmra.mrb[12].mxu1 %v4744_v31  ;;  %v14009_v31 = vld [vmem:[%s15012_s13 + $0x714] ss:$8 sps:$4 sm:$0xff]  }
 0x3de   : > { %10015 = vmatmul.mubr.bf16.gmra.mrb[12].mxu0 %v4762_v62  ;;  %9061 = vmatpush1.bf16.msra.mxu1 %v13941_v40  ;;  %v14012_v40 = vld [vmem:[%s15012_s13 + $0x1014] ss:$8 sps:$4 sm:$0xff]   ;;  %v14007_v62 = vld [vmem:[%s15012_s13 + $0x710] ss:$8 sps:$4 sm:$0xff]  }
 0x3df   : > { %10078 = vmatpush1.bf16.msra.mxu0 %v13944_v61  ;;  %9062 = vmatprep.subr.bf16.mxu1 %v13949_v54  ;;  %v14010_v61 = vld [vmem:[%s15012_s13 + $0x1010] ss:$8 sps:$4 sm:$0xff]   ;;  %v4675_v54 = vld [vmem:[#allocation3 + $0x188] sm:$0xff] }
 0x3e0   : > { %10079 = vmatprep.subr.bf16.mxu0 %v13952_v38  ;;  %9007 = vmatprep.mubr.bf16.mxu1 %v4781_v7  ;;  %v4693_v38 = vld [vmem:[#allocation3 + $0x218] sm:$0xff]  ;;  %v4674_v7 = vld [vmem:[#allocation3 + $0x180] sm:$0xff] }
 0x3e1   : > { %10024 = vmatprep.mubr.bf16.mxu0 %v4799_v22  ;;  %v14013_v22 = vld [vmem:[%s15012_s13 + $0x720] ss:$8 sps:$4 sm:$0xff]  }
 0x3e2   : > { %9063 = vmatpush1.bf16.msra.mxu1 %v13947_v4  ;;  %v14015_v4 = vld [vmem:[%s15012_s13 + $0x724] ss:$8 sps:$4 sm:$0xff]  }
 0x3e3   : > { %10080 = vmatpush1.bf16.msra.mxu0 %v13950_v12  ;;  %9064 = vmatprep.subr.bf16.mxu1 %v13955_v14  ;;  %v14018_v12 = vld [vmem:[%s15012_s13 + $0x1024] ss:$8 sps:$4 sm:$0xff]   ;;  %v4692_v14 = vld [vmem:[#allocation3 + $0x210] sm:$0xff] }
 0x3e4   : > { %10081 = vmatprep.subr.bf16.mxu0 %v13958_v47  ;;  %v14016_v47 = vld [vmem:[%s15012_s13 + $0x1020] ss:$8 sps:$4 sm:$0xff]  }
 0x3e5   : > { %9008 = vmatmul.mubr.bf16.gmra.mrb[16].mxu1 %v4780_v57  ;;  %v14021_v57 = vld [vmem:[%s15012_s13 + $0x734] ss:$8 sps:$4 sm:$0xff]  }
 0x3e6   : > { %10025 = vmatmul.mubr.bf16.gmra.mrb[16].mxu0 %v4798_v27  ;;  %9065 = vmatpush1.bf16.msra.mxu1 %v13953_v16  ;;  %v14024_v16 = vld [vmem:[%s15012_s13 + $0x1034] ss:$8 sps:$4 sm:$0xff]   ;;  %v14019_v27 = vld [vmem:[%s15012_s13 + $0x730] ss:$8 sps:$4 sm:$0xff]  }
 0x3e7   : > { %10082 = vmatpush1.bf16.msra.mxu0 %v13956_v26  ;;  %9066 = vmatprep.subr.bf16.mxu1 %v13961_v3  ;;  %v14022_v26 = vld [vmem:[%s15012_s13 + $0x1030] ss:$8 sps:$4 sm:$0xff]   ;;  %v4711_v3 = vld [vmem:[#allocation3 + $0x2a8] sm:$0xff] }
 0x3e8   : > { %10083 = vmatprep.subr.bf16.mxu0 %v13964_v6  ;;  %9017 = vmatprep.mubr.bf16.mxu1 %v4817_v9  ;;  %v4729_v6 = vld [vmem:[#allocation3 + $0x338] sm:$0xff]  ;;  %v4710_v9 = vld [vmem:[#allocation3 + $0x2a0] sm:$0xff] }
 0x3e9   : > { %10034 = vmatprep.mubr.bf16.mxu0 %v4835_v28  ;;  %v14025_v28 = vld [vmem:[%s15012_s13 + $0x740] ss:$8 sps:$4 sm:$0xff]  }
 0x3ea   : > { %9067 = vmatpush1.bf16.msra.mxu1 %v13959_v5  ;;  %v14027_v5 = vld [vmem:[%s15012_s13 + $0x744] ss:$8 sps:$4 sm:$0xff]  }
 0x3eb   : > { %10084 = vmatpush1.bf16.msra.mxu0 %v13962_v39  ;;  %9068 = vmatprep.subr.bf16.mxu1 %v13967_v36  ;;  %v14030_v39 = vld [vmem:[%s15012_s13 + $0x1044] ss:$8 sps:$4 sm:$0xff]   ;;  %v4728_v36 = vld [vmem:[#allocation3 + $0x330] sm:$0xff] }
 0x3ec   : > { %10085 = vmatprep.subr.bf16.mxu0 %v13970_v30  ;;  %v14028_v30 = vld [vmem:[%s15012_s13 + $0x1040] ss:$8 sps:$4 sm:$0xff]  }
 0x3ed   : > { %9018 = vmatmul.mubr.bf16.gmra.mrb[20].mxu1 %v4816_v8  ;;  %v14033_v8 = vld [vmem:[%s15012_s13 + $0x754] ss:$8 sps:$4 sm:$0xff]  }
 0x3ee   : > { %10035 = vmatmul.mubr.bf16.gmra.mrb[20].mxu0 %v4834_v33  ;;  %9069 = vmatpush1.bf16.msra.mxu1 %v13965_v15  ;;  %v14036_v15 = vld [vmem:[%s15012_s13 + $0x1054] ss:$8 sps:$4 sm:$0xff]   ;;  %v14031_v33 = vld [vmem:[%s15012_s13 + $0x750] ss:$8 sps:$4 sm:$0xff]  }
 0x3ef   : > { %10086 = vmatpush1.bf16.msra.mxu0 %v13968_v18  ;;  %9070 = vmatprep.subr.bf16.mxu1 %v13973_v24  ;;  %v4747_v18 = vld [vmem:[#allocation3 + $0x3c8] sm:$0xff]  ;;  %v4765_v24 = vld [vmem:[#allocation3 + $0x458] sm:$0xff] }
 0x3f0   : > { %10087 = vmatprep.subr.bf16.mxu0 %v13976_v13  ;;  %9027 = vmatprep.mubr.bf16.mxu1 %v4853_v20  ;;  %v14034_v13 = vld [vmem:[%s15012_s13 + $0x1050] ss:$8 sps:$4 sm:$0xff]   ;;  %v14042_v20 = vld [vmem:[%s15012_s13 + $0x1064] ss:$8 sps:$4 sm:$0xff]  }
 0x3f1   : > { %10044 = vmatprep.mubr.bf16.mxu0 %v4871_v42  ;;  %v4746_v42 = vld [vmem:[#allocation3 + $0x3c0] sm:$0xff] }
 0x3f2   : > { %9071 = vmatpush1.bf16.msra.mxu1 %v13971_v0  ;;  %v14039_v0 = vld [vmem:[%s15012_s13 + $0x764] ss:$8 sps:$4 sm:$0xff]  }
 0x3f3   : > { %10088 = vmatpush1.bf16.msra.mxu0 %v13974_v56  ;;  %9072 = vmatprep.subr.bf16.mxu1 %v13979_v19  ;;  %v14037_v56 = vld [vmem:[%s15012_s13 + $0x760] ss:$8 sps:$4 sm:$0xff]   ;;  %v4764_v19 = vld [vmem:[#allocation3 + $0x450] sm:$0xff] }
 0x3f4   : > { %10089 = vmatprep.subr.bf16.mxu0 %v13982_v37  ;;  %v14040_v37 = vld [vmem:[%s15012_s13 + $0x1060] ss:$8 sps:$4 sm:$0xff]  }
 0x3f5   : > { %9028 = vmatmul.mubr.bf16.gmra.mrb[24].mxu1 %v4852_v35  ;;  %v14045_v35 = vld [vmem:[%s15012_s13 + $0x774] ss:$8 sps:$4 sm:$0xff]  }
 0x3f6   : > { %10045 = vmatmul.mubr.bf16.gmra.mrb[24].mxu0 %v4870_v10  ;;  %9073 = vmatpush1.bf16.msra.mxu1 %v13977_v21  ;;  %v14048_v21 = vld [vmem:[%s15012_s13 + $0x1074] ss:$8 sps:$4 sm:$0xff]   ;;  %v4783_v10 = vld [vmem:[#allocation3 + $0x4e8] sm:$0xff] }
 0x3f7   : > { %10090 = vmatpush1.bf16.msra.mxu0 %v13980_v46  ;;  %9074 = vmatprep.subr.bf16.mxu1 %v13985_v23  ;;  %v4801_v46 = vld [vmem:[#allocation3 + $0x578] sm:$0xff] }
 0x3f8   : > { %10091 = vmatprep.subr.bf16.mxu0 %v13988_v58  ;;  %9037 = vmatprep.mubr.bf16.mxu1 %v4889_v29  ;;  %v14043_v23 = vld [vmem:[%s15012_s13 + $0x770] ss:$8 sps:$4 sm:$0xff]   ;;  %v14051_v29 = vld [vmem:[%s15012_s13 + $0x784] ss:$8 sps:$4 sm:$0xff]  }
 0x3f9   : > { %10054 = vmatprep.mubr.bf16.mxu0 %v4907_v1  ;;  %v14046_v58 = vld [vmem:[%s15012_s13 + $0x1070] ss:$8 sps:$4 sm:$0xff]   ;;  %v14054_v1 = vld [vmem:[%s15012_s13 + $0x1084] ss:$8 sps:$4 sm:$0xff]  }
 0x3fa   : > { %9075 = vmatpush1.bf16.msra.mxu1 %v13983_v17  ;;  %v4782_v17 = vld [vmem:[#allocation3 + $0x4e0] sm:$0xff] }
 0x3fb   : > { %10092 = vmatpush1.bf16.msra.mxu0 %v13986_v41  ;;  %9076 = vmatprep.subr.bf16.mxu1 %v13991_v34  ;;  %v14049_v41 = vld [vmem:[%s15012_s13 + $0x780] ss:$8 sps:$4 sm:$0xff]   ;;  %v4800_v34 = vld [vmem:[#allocation3 + $0x570] sm:$0xff] }
 0x3fc   : > { %10093 = vmatprep.subr.bf16.mxu0 %v13994_v50  ;;  %v14052_v50 = vld [vmem:[%s15012_s13 + $0x1080] ss:$8 sps:$4 sm:$0xff]  }
 0x3fd   : > { %9038 = vmatmul.mubr.bf16.gmra.mrb[28].mxu1 %v4888_v48  ;;  %v14057_v48 = vld [vmem:[%s15012_s13 + $0x794] ss:$8 sps:$4 sm:$0xff]  }
 0x3fe   : > { %10055 = vmatmul.mubr.bf16.gmra.mrb[28].mxu0 %v4906_v44  ;;  %9077 = vmatpush1.bf16.msra.mxu1 %v13989_v2  ;;  %v14060_v2 = vld [vmem:[%s15012_s13 + $0x1094] ss:$8 sps:$4 sm:$0xff]   ;;  %v4819_v44 = vld [vmem:[#allocation3 + $0x608] sm:$0xff] }
 0x3ff   : > { %10094 = vmatpush1.bf16.msra.mxu0 %v13992_v52  ;;  %9078 = vmatprep.subr.bf16.mxu1 %v13997_v45  ;;  %v4837_v52 = vld [vmem:[#allocation3 + $0x698] sm:$0xff] }
 0x400   : > { %10095 = vmatprep.subr.bf16.mxu0 %v14000_v53  ;;  %9080 = vmatprep.mubr.bf16.mxu1 %v4639_v51  ;;  %v14055_v45 = vld [vmem:[%s15012_s13 + $0x790] ss:$8 sps:$4 sm:$0xff]   ;;  %v14066_v51 = vld [vmem:[%s15012_s13 + $0x10a4] ss:$8 sps:$4 sm:$0xff]  }
 0x401   : > { %10097 = vmatprep.mubr.bf16.mxu0 %v4657_v25  ;;  %v14058_v53 = vld [vmem:[%s15012_s13 + $0x1090] ss:$8 sps:$4 sm:$0xff]   ;;  %v4818_v25 = vld [vmem:[#allocation3 + $0x600] sm:$0xff] }
 0x402   : > { %9079 = vmatpush1.bf16.msra.mxu1 %v13995_v11  ;;  %v14063_v11 = vld [vmem:[%s15012_s13 + $0x7a4] ss:$8 sps:$4 sm:$0xff]  }
 0x403   : > { %10096 = vmatpush1.bf16.msra.mxu0 %v13998_v32  ;;  %9161 = vmatprep.subr.bf16.mxu1 %v14003_v55  ;;  %v14061_v32 = vld [vmem:[%s15012_s13 + $0x7a0] ss:$8 sps:$4 sm:$0xff]   ;;  %v4836_v55 = vld [vmem:[#allocation3 + $0x690] sm:$0xff] }
 0x404   : > { %10178 = vmatprep.subr.bf16.mxu0 %v14006_v49  ;;  %v14064_v49 = vld [vmem:[%s15012_s13 + $0x10a0] ss:$8 sps:$4 sm:$0xff]  }
 0x405   : > { %9081 = vmatmul.mubr.bf16.vlgmr.msra.gmra.mrb[0].mxu1 %v4638_v60  ;;  %v14069_v60 = vld [vmem:[%s15012_s13 + $0x7b4] ss:$8 sps:$4 sm:$0xff]  }
 0x406   : > { %10098 = vmatmul.mubr.bf16.vlgmr.msra.gmra.mrb[0].mxu0 %v4656_v43  ;;  %9162 = vmatpush1.bf16.msra.mxu1 %v14001_v63  ;;  %v14072_v63 = vld [vmem:[%s15012_s13 + $0x10b4] ss:$8 sps:$4 sm:$0xff]   ;;  %v4855_v43 = vld [vmem:[#allocation3 + $0x728] sm:$0xff] }
 0x407   : > { %10179 = vmatpush1.bf16.msra.mxu0 %v14004_v59  ;;  %9163 = vmatprep.subr.bf16.mxu1 %v14009_v31  ;;  %v4873_v59 = vld [vmem:[#allocation3 + $0x7b8] sm:$0xff] }
 0x408   : > { %10180 = vmatprep.subr.bf16.mxu0 %v14012_v40  ;;  %9090 = vmatprep.mubr.bf16.mxu1 %v4675_v54  ;;  %v14067_v31 = vld [vmem:[%s15012_s13 + $0x7b0] ss:$8 sps:$4 sm:$0xff]   ;;  %v4854_v54 = vld [vmem:[#allocation3 + $0x720] sm:$0xff] }
 0x409   : > { %10107 = vmatprep.mubr.bf16.mxu0 %v4693_v38  ;;  %v14070_v40 = vld [vmem:[%s15012_s13 + $0x10b0] ss:$8 sps:$4 sm:$0xff]   ;;  %v14073_v38 = vld [vmem:[%s15012_s13 + $0x7c0] ss:$8 sps:$4 sm:$0xff]  }
 0x40a   : > { %9164 = vmatpush1.bf16.msra.mxu1 %v14007_v62  ;;  %v14075_v62 = vld [vmem:[%s15012_s13 + $0x7c4] ss:$8 sps:$4 sm:$0xff]  }
 0x40b   : > { %10181 = vmatpush1.bf16.msra.mxu0 %v14010_v61  ;;  %9165 = vmatprep.subr.bf16.mxu1 %v14015_v4  ;;  %v14078_v61 = vld [vmem:[%s15012_s13 + $0x10c4] ss:$8 sps:$4 sm:$0xff]   ;;  %v4872_v4 = vld [vmem:[#allocation3 + $0x7b0] sm:$0xff] }
 0x40c   : > { %10182 = vmatprep.subr.bf16.mxu0 %v14018_v12  ;;  %v14076_v12 = vld [vmem:[%s15012_s13 + $0x10c0] ss:$8 sps:$4 sm:$0xff]  }
 0x40d   : > { %9091 = vmatmul.mubr.bf16.gmra.mrb[4].mxu1 %v4674_v7  ;;  %v14081_v7 = vld [vmem:[%s15012_s13 + $0x7d4] ss:$8 sps:$4 sm:$0xff]  }
 0x40e   : > { %10108 = vmatmul.mubr.bf16.gmra.mrb[4].mxu0 %v4692_v14  ;;  %9166 = vmatpush1.bf16.msra.mxu1 %v14013_v22  ;;  %v14084_v22 = vld [vmem:[%s15012_s13 + $0x10d4] ss:$8 sps:$4 sm:$0xff]   ;;  %v4891_v14 = vld [vmem:[#allocation3 + $0x848] sm:$0xff] }
 0x40f   : > { %10183 = vmatpush1.bf16.msra.mxu0 %v14016_v47  ;;  %9167 = vmatprep.subr.bf16.mxu1 %v14021_v57  ;;  %v4909_v47 = vld [vmem:[#allocation3 + $0x8d8] sm:$0xff] }
 0x410   : > { %10184 = vmatprep.subr.bf16.mxu0 %v14024_v16  ;;  %9100 = vmatprep.mubr.bf16.mxu1 %v4711_v3  ;;  %v14079_v57 = vld [vmem:[%s15012_s13 + $0x7d0] ss:$8 sps:$4 sm:$0xff]   ;;  %v4890_v3 = vld [vmem:[#allocation3 + $0x840] sm:$0xff] }
 0x411   : > { %10117 = vmatprep.mubr.bf16.mxu0 %v4729_v6  ;;  %v14082_v16 = vld [vmem:[%s15012_s13 + $0x10d0] ss:$8 sps:$4 sm:$0xff]   ;;  %v14085_v6 = vld [vmem:[%s15012_s13 + $0x7e0] ss:$8 sps:$4 sm:$0xff]  }
 0x412   : > { %9168 = vmatpush1.bf16.msra.mxu1 %v14019_v27  ;;  %v14087_v27 = vld [vmem:[%s15012_s13 + $0x7e4] ss:$8 sps:$4 sm:$0xff]  }
 0x413   : > { %10185 = vmatpush1.bf16.msra.mxu0 %v14022_v26  ;;  %9169 = vmatprep.subr.bf16.mxu1 %v14027_v5  ;;  %v14090_v26 = vld [vmem:[%s15012_s13 + $0x10e4] ss:$8 sps:$4 sm:$0xff]   ;;  %v4908_v5 = vld [vmem:[#allocation3 + $0x8d0] sm:$0xff] }
 0x414   : > { %10186 = vmatprep.subr.bf16.mxu0 %v14030_v39  ;;  %v14088_v39 = vld [vmem:[%s15012_s13 + $0x10e0] ss:$8 sps:$4 sm:$0xff]  }
 0x415   : > { %9101 = vmatmul.mubr.bf16.gmra.mrb[8].mxu1 %v4710_v9  ;;  %v14093_v9 = vld [vmem:[%s15012_s13 + $0x7f4] ss:$8 sps:$4 sm:$0xff]  }
 0x416   : > { %10118 = vmatmul.mubr.bf16.gmra.mrb[8].mxu0 %v4728_v36  ;;  %9170 = vmatpush1.bf16.msra.mxu1 %v14025_v28  ;;  %v14096_v28 = vld [vmem:[%s15012_s13 + $0x10f4] ss:$8 sps:$4 sm:$0xff]  }
 0x417   : > { %10187 = vmatpush1.bf16.msra.mxu0 %v14028_v30  ;;  %9171 = vmatprep.subr.bf16.mxu1 %v14033_v8  ;;  %v4641_v36 = vld [vmem:[#allocation3 + $0x78] sm:$0xff]  ;;  %v4659_v30 = vld [vmem:[#allocation3 + $0x108] sm:$0xff] }
 0x418   : > { %10188 = vmatprep.subr.bf16.mxu0 %v14036_v15  ;;  %9110 = vmatprep.mubr.bf16.mxu1 %v4747_v18  ;;  %v14091_v8 = vld [vmem:[%s15012_s13 + $0x7f0] ss:$8 sps:$4 sm:$0xff]   ;;  %v14102_v18 = vld [vmem:[%s15012_s13 + $0x1104] ss:$8 sps:$4 sm:$0xff]  }
 0x419   : > { %10127 = vmatprep.mubr.bf16.mxu0 %v4765_v24  ;;  %v14094_v15 = vld [vmem:[%s15012_s13 + $0x10f0] ss:$8 sps:$4 sm:$0xff]  }
 0x41a   : > { %9172 = vmatpush1.bf16.msra.mxu1 %v14031_v33  ;;  %v14099_v33 = vld [vmem:[%s15012_s13 + $0x804] ss:$8 sps:$4 sm:$0xff]   ;;  %v4640_v24 = vld [vmem:[#allocation3 + $0x70] sm:$0xff] }
 0x41b   : > { %10189 = vmatpush1.bf16.msra.mxu0 %v14034_v13  ;;  %9173 = vmatprep.subr.bf16.mxu1 %v14039_v0  ;;  %v14097_v13 = vld [vmem:[%s15012_s13 + $0x800] ss:$8 sps:$4 sm:$0xff]  }
 0x41c   : > { %10190 = vmatprep.subr.bf16.mxu0 %v14042_v20  ;;  %v4658_v0 = vld [vmem:[#allocation3 + $0x100] sm:$0xff] }
 0x41d   : > { %9111 = vmatmul.mubr.bf16.gmra.mrb[12].mxu1 %v4746_v42  ;;  %v14100_v20 = vld [vmem:[%s15012_s13 + $0x1100] ss:$8 sps:$4 sm:$0xff]   ;;  %v14105_v42 = vld [vmem:[%s15012_s13 + $0x814] ss:$8 sps:$4 sm:$0xff]  }
 0x41e   : > { %10128 = vmatmul.mubr.bf16.gmra.mrb[12].mxu0 %v4764_v19  ;;  %9174 = vmatpush1.bf16.msra.mxu1 %v14037_v56  ;;  %v14108_v56 = vld [vmem:[%s15012_s13 + $0x1114] ss:$8 sps:$4 sm:$0xff]  }
 0x41f   : > { %10191 = vmatpush1.bf16.msra.mxu0 %v14040_v37  ;;  %9175 = vmatprep.subr.bf16.mxu1 %v14045_v35  ;;  %v4677_v19 = vld [vmem:[#allocation3 + $0x198] sm:$0xff]  ;;  %v4695_v37 = vld [vmem:[#allocation3 + $0x228] sm:$0xff] }
 0x420   : > { %10192 = vmatprep.subr.bf16.mxu0 %v14048_v21  ;;  %9120 = vmatprep.mubr.bf16.mxu1 %v4783_v10  ;;  %v14103_v35 = vld [vmem:[%s15012_s13 + $0x810] ss:$8 sps:$4 sm:$0xff]   ;;  %v14111_v10 = vld [vmem:[%s15012_s13 + $0x824] ss:$8 sps:$4 sm:$0xff]  }
 0x421   : > { %10137 = vmatprep.mubr.bf16.mxu0 %v4801_v46  ;;  %v14106_v21 = vld [vmem:[%s15012_s13 + $0x1110] ss:$8 sps:$4 sm:$0xff]   ;;  %v14114_v46 = vld [vmem:[%s15012_s13 + $0x1124] ss:$8 sps:$4 sm:$0xff]  }
 0x422   : > { %9176 = vmatpush1.bf16.msra.mxu1 %v14043_v23  ;;  %v4676_v23 = vld [vmem:[#allocation3 + $0x190] sm:$0xff] }
 0x423   : > { %10193 = vmatpush1.bf16.msra.mxu0 %v14046_v58  ;;  %9177 = vmatprep.subr.bf16.mxu1 %v14051_v29  ;;  %v14109_v58 = vld [vmem:[%s15012_s13 + $0x820] ss:$8 sps:$4 sm:$0xff]  }
 0x424   : > { %10194 = vmatprep.subr.bf16.mxu0 %v14054_v1  ;;  %v4694_v29 = vld [vmem:[#allocation3 + $0x220] sm:$0xff] }
 0x425   : > { %9121 = vmatmul.mubr.bf16.gmra.mrb[16].mxu1 %v4782_v17  ;;  %v14112_v1 = vld [vmem:[%s15012_s13 + $0x1120] ss:$8 sps:$4 sm:$0xff]   ;;  %v14117_v17 = vld [vmem:[%s15012_s13 + $0x834] ss:$8 sps:$4 sm:$0xff]  }
 0x426   : > { %10138 = vmatmul.mubr.bf16.gmra.mrb[16].mxu0 %v4800_v34  ;;  %9178 = vmatpush1.bf16.msra.mxu1 %v14049_v41  ;;  %v14120_v41 = vld [vmem:[%s15012_s13 + $0x1134] ss:$8 sps:$4 sm:$0xff]  }
 0x427   : > { %10195 = vmatpush1.bf16.msra.mxu0 %v14052_v50  ;;  %9179 = vmatprep.subr.bf16.mxu1 %v14057_v48  ;;  %v4713_v34 = vld [vmem:[#allocation3 + $0x2b8] sm:$0xff]  ;;  %v4731_v50 = vld [vmem:[#allocation3 + $0x348] sm:$0xff] }
 0x428   : > { %10196 = vmatprep.subr.bf16.mxu0 %v14060_v2  ;;  %9130 = vmatprep.mubr.bf16.mxu1 %v4819_v44  ;;  %v14115_v48 = vld [vmem:[%s15012_s13 + $0x830] ss:$8 sps:$4 sm:$0xff]   ;;  %v14123_v44 = vld [vmem:[%s15012_s13 + $0x844] ss:$8 sps:$4 sm:$0xff]  }
 0x429   : > { %10147 = vmatprep.mubr.bf16.mxu0 %v4837_v52  ;;  %v14118_v2 = vld [vmem:[%s15012_s13 + $0x1130] ss:$8 sps:$4 sm:$0xff]   ;;  %v14126_v52 = vld [vmem:[%s15012_s13 + $0x1144] ss:$8 sps:$4 sm:$0xff]  }
 0x42a   : > { %9180 = vmatpush1.bf16.msra.mxu1 %v14055_v45  ;;  %v4712_v45 = vld [vmem:[#allocation3 + $0x2b0] sm:$0xff] }
 0x42b   : > { %10197 = vmatpush1.bf16.msra.mxu0 %v14058_v53  ;;  %9181 = vmatprep.subr.bf16.mxu1 %v14063_v11  ;;  %v14121_v53 = vld [vmem:[%s15012_s13 + $0x840] ss:$8 sps:$4 sm:$0xff]  }
 0x42c   : > { %10198 = vmatprep.subr.bf16.mxu0 %v14066_v51  ;;  %v4730_v11 = vld [vmem:[#allocation3 + $0x340] sm:$0xff] }
 0x42d   : > { %9131 = vmatmul.mubr.bf16.gmra.mrb[20].mxu1 %v4818_v25  ;;  %v14124_v51 = vld [vmem:[%s15012_s13 + $0x1140] ss:$8 sps:$4 sm:$0xff]   ;;  %v14129_v25 = vld [vmem:[%s15012_s13 + $0x854] ss:$8 sps:$4 sm:$0xff]  }
 0x42e   : > { %10148 = vmatmul.mubr.bf16.gmra.mrb[20].mxu0 %v4836_v55  ;;  %9182 = vmatpush1.bf16.msra.mxu1 %v14061_v32  ;;  %v14132_v32 = vld [vmem:[%s15012_s13 + $0x1154] ss:$8 sps:$4 sm:$0xff]  }
 0x42f   : > { %10199 = vmatpush1.bf16.msra.mxu0 %v14064_v49  ;;  %9183 = vmatprep.subr.bf16.mxu1 %v14069_v60  ;;  %v4749_v55 = vld [vmem:[#allocation3 + $0x3d8] sm:$0xff]  ;;  %v4767_v49 = vld [vmem:[#allocation3 + $0x468] sm:$0xff] }
 0x430   : > { %10200 = vmatprep.subr.bf16.mxu0 %v14072_v63  ;;  %9140 = vmatprep.mubr.bf16.mxu1 %v4855_v43  ;;  %v14127_v60 = vld [vmem:[%s15012_s13 + $0x850] ss:$8 sps:$4 sm:$0xff]   ;;  %v14135_v43 = vld [vmem:[%s15012_s13 + $0x864] ss:$8 sps:$4 sm:$0xff]  }
 0x431   : > { %10157 = vmatprep.mubr.bf16.mxu0 %v4873_v59  ;;  %v14130_v63 = vld [vmem:[%s15012_s13 + $0x1150] ss:$8 sps:$4 sm:$0xff]   ;;  %v14138_v59 = vld [vmem:[%s15012_s13 + $0x1164] ss:$8 sps:$4 sm:$0xff]  }
 0x432   : > { %9184 = vmatpush1.bf16.msra.mxu1 %v14067_v31  ;;  %v4748_v31 = vld [vmem:[#allocation3 + $0x3d0] sm:$0xff] }
 0x433   : > { %10201 = vmatpush1.bf16.msra.mxu0 %v14070_v40  ;;  %9185 = vmatprep.subr.bf16.mxu1 %v14075_v62  ;;  %v14133_v40 = vld [vmem:[%s15012_s13 + $0x860] ss:$8 sps:$4 sm:$0xff]  }
 0x434   : > { %10202 = vmatprep.subr.bf16.mxu0 %v14078_v61  ;;  %v4766_v62 = vld [vmem:[#allocation3 + $0x460] sm:$0xff] }
 0x435   : > { %9141 = vmatmul.mubr.bf16.gmra.mrb[24].mxu1 %v4854_v54  ;;  %v14136_v61 = vld [vmem:[%s15012_s13 + $0x1160] ss:$8 sps:$4 sm:$0xff]   ;;  %v14141_v54 = vld [vmem:[%s15012_s13 + $0x874] ss:$8 sps:$4 sm:$0xff]  }
 0x436   : > { %10158 = vmatmul.mubr.bf16.gmra.mrb[24].mxu0 %v4872_v4  ;;  %9186 = vmatpush1.bf16.msra.mxu1 %v14073_v38  ;;  %v14144_v38 = vld [vmem:[%s15012_s13 + $0x1174] ss:$8 sps:$4 sm:$0xff]  }
 0x437   : > { %10203 = vmatpush1.bf16.msra.mxu0 %v14076_v12  ;;  %9187 = vmatprep.subr.bf16.mxu1 %v14081_v7  ;;  %v4785_v4 = vld [vmem:[#allocation3 + $0x4f8] sm:$0xff]  ;;  %v4803_v12 = vld [vmem:[#allocation3 + $0x588] sm:$0xff] }
 0x438   : > { %10204 = vmatprep.subr.bf16.mxu0 %v14084_v22  ;;  %9150 = vmatprep.mubr.bf16.mxu1 %v4891_v14  ;;  %v14139_v7 = vld [vmem:[%s15012_s13 + $0x870] ss:$8 sps:$4 sm:$0xff]   ;;  %v14147_v14 = vld [vmem:[%s15012_s13 + $0x884] ss:$8 sps:$4 sm:$0xff]  }
 0x439   : > { %10167 = vmatprep.mubr.bf16.mxu0 %v4909_v47  ;;  %v14142_v22 = vld [vmem:[%s15012_s13 + $0x1170] ss:$8 sps:$4 sm:$0xff]   ;;  %v14150_v47 = vld [vmem:[%s15012_s13 + $0x1184] ss:$8 sps:$4 sm:$0xff]  }
 0x43a   : > { %9188 = vmatpush1.bf16.msra.mxu1 %v14079_v57  ;;  %v4784_v57 = vld [vmem:[#allocation3 + $0x4f0] sm:$0xff] }
 0x43b   : > { %10205 = vmatpush1.bf16.msra.mxu0 %v14082_v16  ;;  %9189 = vmatprep.subr.bf16.mxu1 %v14087_v27  ;;  %v14145_v16 = vld [vmem:[%s15012_s13 + $0x880] ss:$8 sps:$4 sm:$0xff]  }
 0x43c   : > { %10206 = vmatprep.subr.bf16.mxu0 %v14090_v26  ;;  %v4802_v27 = vld [vmem:[#allocation3 + $0x580] sm:$0xff] }
 0x43d   : > { %9151 = vmatmul.mubr.bf16.gmra.mrb[28].mxu1 %v4890_v3  ;;  %v14148_v26 = vld [vmem:[%s15012_s13 + $0x1180] ss:$8 sps:$4 sm:$0xff]   ;;  %v14153_v3 = vld [vmem:[%s15012_s13 + $0x894] ss:$8 sps:$4 sm:$0xff]  }
 0x43e   : > { %10168 = vmatmul.mubr.bf16.gmra.mrb[28].mxu0 %v4908_v5  ;;  %9190 = vmatpush1.bf16.msra.mxu1 %v14085_v6  ;;  %v14156_v6 = vld [vmem:[%s15012_s13 + $0x1194] ss:$8 sps:$4 sm:$0xff]  }
 0x43f   : > { %10207 = vmatpush1.bf16.msra.mxu0 %v14088_v39  ;;  %9191 = vmatprep.subr.bf16.mxu1 %v14093_v9  ;;  %v4821_v5 = vld [vmem:[#allocation3 + $0x618] sm:$0xff]  ;;  %v4839_v39 = vld [vmem:[#allocation3 + $0x6a8] sm:$0xff] }
 0x440   : > { %10208 = vmatprep.subr.bf16.mxu0 %v14096_v28  ;;  %9193 = vmatprep.mubr.bf16.mxu1 %v4641_v36  ;;  %v14151_v9 = vld [vmem:[%s15012_s13 + $0x890] ss:$8 sps:$4 sm:$0xff]   ;;  %v14159_v36 = vld [vmem:[%s15012_s13 + $0x8a4] ss:$8 sps:$4 sm:$0xff]  }
 0x441   : > { %10210 = vmatprep.mubr.bf16.mxu0 %v4659_v30  ;;  %v14154_v28 = vld [vmem:[%s15012_s13 + $0x1190] ss:$8 sps:$4 sm:$0xff]   ;;  %v14162_v30 = vld [vmem:[%s15012_s13 + $0x11a4] ss:$8 sps:$4 sm:$0xff]  }
 0x442   : > { %9192 = vmatpush1.bf16.msra.mxu1 %v14091_v8  ;;  %v4820_v8 = vld [vmem:[#allocation3 + $0x610] sm:$0xff] }
 0x443   : > { %10209 = vmatpush1.bf16.msra.mxu0 %v14094_v15  ;;  %9274 = vmatprep.subr.bf16.mxu1 %v14099_v33  ;;  %v14157_v15 = vld [vmem:[%s15012_s13 + $0x8a0] ss:$8 sps:$4 sm:$0xff]  }
 0x444   : > { %10291 = vmatprep.subr.bf16.mxu0 %v14102_v18  ;;  %v4838_v33 = vld [vmem:[#allocation3 + $0x6a0] sm:$0xff] }
 0x445   : > { %9194 = vmatmul.mubr.bf16.vlgmr.msra.gmra.mrb[0].mxu1 %v4640_v24  ;;  %v14160_v18 = vld [vmem:[%s15012_s13 + $0x11a0] ss:$8 sps:$4 sm:$0xff]   ;;  %v14165_v24 = vld [vmem:[%s15012_s13 + $0x8b4] ss:$8 sps:$4 sm:$0xff]  }
 0x446   : > { %10211 = vmatmul.mubr.bf16.vlgmr.msra.gmra.mrb[0].mxu0 %v4658_v0  ;;  %9275 = vmatpush1.bf16.msra.mxu1 %v14097_v13  ;;  %v14168_v13 = vld [vmem:[%s15012_s13 + $0x11b4] ss:$8 sps:$4 sm:$0xff]  }
 0x447   : > { %10292 = vmatpush1.bf16.msra.mxu0 %v14100_v20  ;;  %9276 = vmatprep.subr.bf16.mxu1 %v14105_v42  ;;  %v4857_v0 = vld [vmem:[#allocation3 + $0x738] sm:$0xff]  ;;  %v4875_v20 = vld [vmem:[#allocation3 + $0x7c8] sm:$0xff] }
 0x448   : > { %10293 = vmatprep.subr.bf16.mxu0 %v14108_v56  ;;  %9203 = vmatprep.mubr.bf16.mxu1 %v4677_v19  ;;  %v14163_v42 = vld [vmem:[%s15012_s13 + $0x8b0] ss:$8 sps:$4 sm:$0xff]   ;;  %v14171_v19 = vld [vmem:[%s15012_s13 + $0x8c4] ss:$8 sps:$4 sm:$0xff]  }
 0x449   : > { %10220 = vmatprep.mubr.bf16.mxu0 %v4695_v37  ;;  %v14166_v56 = vld [vmem:[%s15012_s13 + $0x11b0] ss:$8 sps:$4 sm:$0xff]   ;;  %v14174_v37 = vld [vmem:[%s15012_s13 + $0x11c4] ss:$8 sps:$4 sm:$0xff]  }
 0x44a   : > { %9277 = vmatpush1.bf16.msra.mxu1 %v14103_v35  ;;  %v4856_v35 = vld [vmem:[#allocation3 + $0x730] sm:$0xff] }
 0x44b   : > { %10294 = vmatpush1.bf16.msra.mxu0 %v14106_v21  ;;  %9278 = vmatprep.subr.bf16.mxu1 %v14111_v10  ;;  %v14169_v21 = vld [vmem:[%s15012_s13 + $0x8c0] ss:$8 sps:$4 sm:$0xff]  }
 0x44c   : > { %10295 = vmatprep.subr.bf16.mxu0 %v14114_v46  ;;  %v4874_v10 = vld [vmem:[#allocation3 + $0x7c0] sm:$0xff] }
 0x44d   : > { %9204 = vmatmul.mubr.bf16.gmra.mrb[4].mxu1 %v4676_v23  ;;  %v14172_v46 = vld [vmem:[%s15012_s13 + $0x11c0] ss:$8 sps:$4 sm:$0xff]   ;;  %v14177_v23 = vld [vmem:[%s15012_s13 + $0x8d4] ss:$8 sps:$4 sm:$0xff]  }
 0x44e   : > { %10221 = vmatmul.mubr.bf16.gmra.mrb[4].mxu0 %v4694_v29  ;;  %9279 = vmatpush1.bf16.msra.mxu1 %v14109_v58  ;;  %v14180_v58 = vld [vmem:[%s15012_s13 + $0x11d4] ss:$8 sps:$4 sm:$0xff]  }
 0x44f   : > { %10296 = vmatpush1.bf16.msra.mxu0 %v14112_v1  ;;  %9280 = vmatprep.subr.bf16.mxu1 %v14117_v17  ;;  %v4893_v29 = vld [vmem:[#allocation3 + $0x858] sm:$0xff]  ;;  %v4911_v1 = vld [vmem:[#allocation3 + $0x8e8] sm:$0xff] }
 0x450   : > { %10297 = vmatprep.subr.bf16.mxu0 %v14120_v41  ;;  %9213 = vmatprep.mubr.bf16.mxu1 %v4713_v34  ;;  %v14175_v17 = vld [vmem:[%s15012_s13 + $0x8d0] ss:$8 sps:$4 sm:$0xff]   ;;  %v14183_v34 = vld [vmem:[%s15012_s13 + $0x8e4] ss:$8 sps:$4 sm:$0xff]  }
 0x451   : > { %10230 = vmatprep.mubr.bf16.mxu0 %v4731_v50  ;;  %v14178_v41 = vld [vmem:[%s15012_s13 + $0x11d0] ss:$8 sps:$4 sm:$0xff]   ;;  %v14186_v50 = vld [vmem:[%s15012_s13 + $0x11e4] ss:$8 sps:$4 sm:$0xff]  }
 0x452   : > { %9281 = vmatpush1.bf16.msra.mxu1 %v14115_v48  ;;  %v4892_v48 = vld [vmem:[#allocation3 + $0x850] sm:$0xff] }
 0x453   : > { %10298 = vmatpush1.bf16.msra.mxu0 %v14118_v2  ;;  %9282 = vmatprep.subr.bf16.mxu1 %v14123_v44  ;;  %v14181_v2 = vld [vmem:[%s15012_s13 + $0x8e0] ss:$8 sps:$4 sm:$0xff]  }
 0x454   : > { %10299 = vmatprep.subr.bf16.mxu0 %v14126_v52  ;;  %v4910_v44 = vld [vmem:[#allocation3 + $0x8e0] sm:$0xff] }
 0x455   : > { %9214 = vmatmul.mubr.bf16.gmra.mrb[8].mxu1 %v4712_v45  ;;  %v14184_v52 = vld [vmem:[%s15012_s13 + $0x11e0] ss:$8 sps:$4 sm:$0xff]   ;;  %v14189_v45 = vld [vmem:[%s15012_s13 + $0x8f4] ss:$8 sps:$4 sm:$0xff]  }
 0x456   : > { %10231 = vmatmul.mubr.bf16.gmra.mrb[8].mxu0 %v4730_v11  ;;  %9283 = vmatpush1.bf16.msra.mxu1 %v14121_v53  ;;  %v14192_v53 = vld [vmem:[%s15012_s13 + $0x11f4] ss:$8 sps:$4 sm:$0xff]   ;;  %v4643_v11 = vld [vmem:[#allocation3 + $0x88] sm:$0xff] }
 0x457   : > { %10300 = vmatpush1.bf16.msra.mxu0 %v14124_v51  ;;  %9284 = vmatprep.subr.bf16.mxu1 %v14129_v25  ;;  %v4661_v51 = vld [vmem:[#allocation3 + $0x118] sm:$0xff] }
 0x458   : > { %10301 = vmatprep.subr.bf16.mxu0 %v14132_v32  ;;  %9223 = vmatprep.mubr.bf16.mxu1 %v4749_v55  ;;  %v14187_v25 = vld [vmem:[%s15012_s13 + $0x8f0] ss:$8 sps:$4 sm:$0xff]   ;;  %v4642_v55 = vld [vmem:[#allocation3 + $0x80] sm:$0xff] }
 0x459   : > { %10240 = vmatprep.mubr.bf16.mxu0 %v4767_v49  ;;  %v14190_v32 = vld [vmem:[%s15012_s13 + $0x11f0] ss:$8 sps:$4 sm:$0xff]  }
 0x45a   : > { %9285 = vmatpush1.bf16.msra.mxu1 %v14127_v60  ;;  %v4660_v49 = vld [vmem:[#allocation3 + $0x110] sm:$0xff]  ;;  %v4679_v60 = vld [vmem:[#allocation3 + $0x1a8] sm:$0xff] }
 0x45b   : > { %10302 = vmatpush1.bf16.msra.mxu0 %v14130_v63  ;;  %9286 = vmatprep.subr.bf16.mxu1 %v14135_v43  ;;  %v4697_v63 = vld [vmem:[#allocation3 + $0x238] sm:$0xff]  ;;  %v4678_v43 = vld [vmem:[#allocation3 + $0x1a0] sm:$0xff] }
 0x45c   : > { %10303 = vmatprep.subr.bf16.mxu0 %v14138_v59  ;;  %v4696_v59 = vld [vmem:[#allocation3 + $0x230] sm:$0xff] }
 0x45d   : > { %9224 = vmatmul.mubr.bf16.gmra.mrb[12].mxu1 %v4748_v31  ;;  %v4715_v31 = vld [vmem:[#allocation3 + $0x2c8] sm:$0xff] }
 0x45e   : > { %10241 = vmatmul.mubr.bf16.gmra.mrb[12].mxu0 %v4766_v62  ;;  %9287 = vmatpush1.bf16.msra.mxu1 %v14133_v40  ;;  %v4733_v40 = vld [vmem:[#allocation3 + $0x358] sm:$0xff]  ;;  %v4714_v62 = vld [vmem:[#allocation3 + $0x2c0] sm:$0xff] }
 0x45f   : > { %10304 = vmatpush1.bf16.msra.mxu0 %v14136_v61  ;;  %9288 = vmatprep.subr.bf16.mxu1 %v14141_v54  ;;  %v4732_v61 = vld [vmem:[#allocation3 + $0x350] sm:$0xff]  ;;  %v4751_v54 = vld [vmem:[#allocation3 + $0x3e8] sm:$0xff] }
 0x460   : > { %10305 = vmatprep.subr.bf16.mxu0 %v14144_v38  ;;  %9233 = vmatprep.mubr.bf16.mxu1 %v4785_v4  ;;  %v4769_v38 = vld [vmem:[#allocation3 + $0x478] sm:$0xff]  ;;  %v4750_v4 = vld [vmem:[#allocation3 + $0x3e0] sm:$0xff] }
 0x461   : > { %10250 = vmatprep.mubr.bf16.mxu0 %v4803_v12  ;;  %v4768_v12 = vld [vmem:[#allocation3 + $0x470] sm:$0xff] }
 0x462   : > { %9289 = vmatpush1.bf16.msra.mxu1 %v14139_v7  ;;  %v4787_v7 = vld [vmem:[#allocation3 + $0x508] sm:$0xff] }
 0x463   : > { %10306 = vmatpush1.bf16.msra.mxu0 %v14142_v22  ;;  %9290 = vmatprep.subr.bf16.mxu1 %v14147_v14  ;;  %v4805_v22 = vld [vmem:[#allocation3 + $0x598] sm:$0xff]  ;;  %v4786_v14 = vld [vmem:[#allocation3 + $0x500] sm:$0xff] }
 0x464   : > { %10307 = vmatprep.subr.bf16.mxu0 %v14150_v47  ;;  %v4804_v47 = vld [vmem:[#allocation3 + $0x590] sm:$0xff] }
 0x465   : > { %9234 = vmatmul.mubr.bf16.gmra.mrb[16].mxu1 %v4784_v57  ;;  %v4823_v57 = vld [vmem:[#allocation3 + $0x628] sm:$0xff] }
 0x466   : > { %10251 = vmatmul.mubr.bf16.gmra.mrb[16].mxu0 %v4802_v27  ;;  %9291 = vmatpush1.bf16.msra.mxu1 %v14145_v16  ;;  %v4841_v16 = vld [vmem:[#allocation3 + $0x6b8] sm:$0xff]  ;;  %v4822_v27 = vld [vmem:[#allocation3 + $0x620] sm:$0xff] }
 0x467   : > { %10308 = vmatpush1.bf16.msra.mxu0 %v14148_v26  ;;  %9292 = vmatprep.subr.bf16.mxu1 %v14153_v3  ;;  %v4840_v26 = vld [vmem:[#allocation3 + $0x6b0] sm:$0xff]  ;;  %v4859_v3 = vld [vmem:[#allocation3 + $0x748] sm:$0xff] }
 0x468   : > { %10309 = vmatprep.subr.bf16.mxu0 %v14156_v6  ;;  %9243 = vmatprep.mubr.bf16.mxu1 %v4821_v5  ;;  %v4877_v6 = vld [vmem:[#allocation3 + $0x7d8] sm:$0xff]  ;;  %v4858_v5 = vld [vmem:[#allocation3 + $0x740] sm:$0xff] }
 0x469   : > { %10260 = vmatprep.mubr.bf16.mxu0 %v4839_v39  ;;  %v4876_v39 = vld [vmem:[#allocation3 + $0x7d0] sm:$0xff] }
 0x46a   : > { %9293 = vmatpush1.bf16.msra.mxu1 %v14151_v9  ;;  %v4895_v9 = vld [vmem:[#allocation3 + $0x868] sm:$0xff] }
 0x46b   : > { %10310 = vmatpush1.bf16.msra.mxu0 %v14154_v28  ;;  %9294 = vmatprep.subr.bf16.mxu1 %v14159_v36  ;;  %v4913_v28 = vld [vmem:[#allocation3 + $0x8f8] sm:$0xff]  ;;  %v4894_v36 = vld [vmem:[#allocation3 + $0x860] sm:$0xff] }
 0x46c   : > { %10311 = vmatprep.subr.bf16.mxu0 %v14162_v30  ;;  %v4912_v30 = vld [vmem:[#allocation3 + $0x8f0] sm:$0xff] }
 0x46d   : > { %9244 = vmatmul.mubr.bf16.gmra.mrb[20].mxu1 %v4820_v8 }
 0x46e   : > { %10261 = vmatmul.mubr.bf16.gmra.mrb[20].mxu0 %v4838_v33  ;;  %9295 = vmatpush1.bf16.msra.mxu1 %v14157_v15  ;;  %v4594_v15 = vld [vmem:[#allocation2] sm:$0xff] }
 0x46f   : > { %10312 = vmatpush1.bf16.msra.mxu0 %v14160_v18  ;;  %9296 = vmatprep.subr.bf16.mxu1 %v14165_v24 }
 0x470   : > { %10313 = vmatprep.subr.bf16.mxu0 %v14168_v13  ;;  %9253 = vmatprep.mubr.bf16.mxu1 %v4857_v0  ;;  %v4595_v13 = vld [vmem:[#allocation2 + $0x8] sm:$0xff] }
 0x471   : > { %10270 = vmatprep.mubr.bf16.mxu0 %v4875_v20 }
 0x472   : > { %9297 = vmatpush1.bf16.msra.mxu1 %v14163_v42 }
 0x473   : > { %10314 = vmatpush1.bf16.msra.mxu0 %v14166_v56  ;;  %9298 = vmatprep.subr.bf16.mxu1 %v14171_v19  ;;  %v4596_v56 = vld [vmem:[#allocation2 + $0x10] sm:$0xff] }
 0x474   : > { %10315 = vmatprep.subr.bf16.mxu0 %v14174_v37 }
 0x475   : > { %9254 = vmatmul.mubr.bf16.gmra.mrb[24].mxu1 %v4856_v35 }
 0x476   : > { %10271 = vmatmul.mubr.bf16.gmra.mrb[24].mxu0 %v4874_v10  ;;  %9299 = vmatpush1.bf16.msra.mxu1 %v14169_v21  ;;  %v4597_v10 = vld [vmem:[#allocation2 + $0x18] sm:$0xff] }
 0x477   : > { %10316 = vmatpush1.bf16.msra.mxu0 %v14172_v46  ;;  %9300 = vmatprep.subr.bf16.mxu1 %v14177_v23 }
 0x478   : > { %10317 = vmatprep.subr.bf16.mxu0 %v14180_v58  ;;  %9263 = vmatprep.mubr.bf16.mxu1 %v4893_v29 }
 0x479   : > { %10280 = vmatprep.mubr.bf16.mxu0 %v4911_v1 }
 0x47a   : > { %9301 = vmatpush1.bf16.msra.mxu1 %v14175_v17 }
 0x47b   : > { %10318 = vmatpush1.bf16.msra.mxu0 %v14178_v41  ;;  %9302 = vmatprep.subr.bf16.mxu1 %v14183_v34  ;;  %v4598_v41 = vld [vmem:[#allocation2 + $0x20] sm:$0xff] }
 0x47c   : > { %10319 = vmatprep.subr.bf16.mxu0 %v14186_v50 }
 0x47d   : > { %9264 = vmatmul.mubr.bf16.gmra.mrb[28].mxu1 %v4892_v48 }
 0x47e   : > { %10281 = vmatmul.mubr.bf16.gmra.mrb[28].mxu0 %v4910_v44  ;;  %9303 = vmatpush1.bf16.msra.mxu1 %v14181_v2  ;;  %v4599_v2 = vld [vmem:[#allocation2 + $0x28] sm:$0xff] }
 0x47f   : > { %10320 = vmatpush1.bf16.msra.mxu0 %v14184_v52  ;;  %9304 = vmatprep.subr.bf16.mxu1 %v14189_v45 }
 0x480   : > { %10321 = vmatprep.subr.bf16.mxu0 %v14192_v53  ;;  %9306 = vmatprep.mubr.bf16.mxu1 %v4643_v11  ;;  %v4600_v53 = vld [vmem:[#allocation2 + $0x30] sm:$0xff] }
 0x481   : > { %10323 = vmatprep.mubr.bf16.mxu0 %v4661_v51 }
 0x482   : > { %9305 = vmatpush1.bf16.msra.mxu1 %v14187_v25 }
 0x483   : > { %10322 = vmatpush1.bf16.msra.mxu0 %v14190_v32 }
 0x485   : > { %9307 = vmatmul.mubr.bf16.vlgmr.msra.gmra.mrb[0].mxu1 %v4642_v55  ;;  %v4601_v55 = vld [vmem:[#allocation2 + $0x38] sm:$0xff] }
 0x486   : > { %10324 = vmatmul.mubr.bf16.vlgmr.msra.gmra.mrb[0].mxu0 %v4660_v49  ;;  %9316 = vmatprep.mubr.bf16.mxu1 %v4679_v60 }
 0x487   : > { %10333 = vmatprep.mubr.bf16.mxu0 %v4697_v63 }
 0x48d   : > { %9317 = vmatmul.mubr.bf16.gmra.mrb[4].mxu1 %v4678_v43 }
 0x48e   : > { %10334 = vmatmul.mubr.bf16.gmra.mrb[4].mxu0 %v4696_v59  ;;  %9326 = vmatprep.mubr.bf16.mxu1 %v4715_v31 }
 0x48f   : > { %10343 = vmatprep.mubr.bf16.mxu0 %v4733_v40  ;;  %v4602_v40 = vld [vmem:[#allocation2 + $0x40] sm:$0xff] }
 0x495   : > { %9327 = vmatmul.mubr.bf16.gmra.mrb[8].mxu1 %v4714_v62 }
 0x496   : > { %10344 = vmatmul.mubr.bf16.gmra.mrb[8].mxu0 %v4732_v61  ;;  %9336 = vmatprep.mubr.bf16.mxu1 %v4751_v54 }
 0x497   : > { %10353 = vmatprep.mubr.bf16.mxu0 %v4769_v38  ;;  %v4603_v38 = vld [vmem:[#allocation2 + $0x48] sm:$0xff] }
 0x49d   : > { %9337 = vmatmul.mubr.bf16.gmra.mrb[12].mxu1 %v4750_v4 }
 0x49e   : > { %10354 = vmatmul.mubr.bf16.gmra.mrb[12].mxu0 %v4768_v12  ;;  %9346 = vmatprep.mubr.bf16.mxu1 %v4787_v7 }
 0x49f   : > { %10363 = vmatprep.mubr.bf16.mxu0 %v4805_v22  ;;  %v4604_v22 = vld [vmem:[#allocation2 + $0x50] sm:$0xff] }
 0x4a5   : > { %9347 = vmatmul.mubr.bf16.gmra.mrb[16].mxu1 %v4786_v14 }
 0x4a6   : > { %10364 = vmatmul.mubr.bf16.gmra.mrb[16].mxu0 %v4804_v47  ;;  %9356 = vmatprep.mubr.bf16.mxu1 %v4823_v57 }
 0x4a7   : > { %10373 = vmatprep.mubr.bf16.mxu0 %v4841_v16 }
 0x4ad   : > { %9357 = vmatmul.mubr.bf16.gmra.mrb[20].mxu1 %v4822_v27  ;;  %v4605_v27 = vld [vmem:[#allocation2 + $0x58] sm:$0xff] }
 0x4ae   : > { %10374 = vmatmul.mubr.bf16.gmra.mrb[20].mxu0 %v4840_v26  ;;  %9366 = vmatprep.mubr.bf16.mxu1 %v4859_v3 }
 0x4af   : > { %10383 = vmatprep.mubr.bf16.mxu0 %v4877_v6 }
 0x4b5   : > { %9367 = vmatmul.mubr.bf16.gmra.mrb[24].mxu1 %v4858_v5 }
 0x4b6   : > { %10384 = vmatmul.mubr.bf16.gmra.mrb[24].mxu0 %v4876_v39  ;;  %9376 = vmatprep.mubr.bf16.mxu1 %v4895_v9 }
 0x4b7   : > { %10393 = vmatprep.mubr.bf16.mxu0 %v4913_v28  ;;  %v4606_v28 = vld [vmem:[#allocation2 + $0x60] sm:$0xff] }
 0x4bd   : > { %9377 = vmatmul.mubr.bf16.gmra.mrb[28].mxu1 %v4894_v36 }
 0x4be   : > { %10394 = vmatmul.mubr.bf16.gmra.mrb[28].mxu0 %v4912_v30 }
 0x558   : > { %v9308_v8 = vpop.f32.mrb[0].mxu1 }
 0x559   : > { %v10325_v33 = vpop.f32.mrb[0].mxu0  ;;  %v9310_v24 = vpop.f32.mrb[1].mxu1 }
 0x55a   : > { %v12629_v18 = vadd.f32 %v10325_v33, %v9308_v8  ;;  %v10327_v0 = vpop.f32.mrb[1].mxu0  ;;  %v9312_v42 = vpop.f32.mrb[2].mxu1 }
 0x55b   : > { %v12630_v20 = vadd.f32 %v10327_v0, %v9310_v24  ;;  %v10329_v19 = vpop.f32.mrb[2].mxu0  ;;  %v9314_v21 = vpop.f32.mrb[3].mxu1 }
 0x55c   : > { %v10404_v37 = vadd.f32 %v12629_v18, %v4594_v15  ;;  %v12631_v35 = vadd.f32 %v10329_v19, %v9312_v42  ;;  %v10331_v46 = vpop.f32.mrb[3].mxu0  ;;  %v4607_v15 = vld [vmem:[#allocation2 + $0x68] sm:$0xff]  ;;  %v4609_v19 = vld [vmem:[#allocation2 + $0x78] sm:$0xff] }
 0x55d   : > { %v10405_v23 = vadd.f32 %v12630_v20, %v4595_v13  ;;  %v12632_v58 = vadd.f32 %v10331_v46, %v9314_v21  ;;  %v4608_v13 = vld [vmem:[#allocation2 + $0x70] sm:$0xff] }
 0x55e   : > { %10436 = vst [vmem:[#allocation2] sm:$0xff] %v10404_v37  ;;  %v10406_v29 = vadd.f32 %v12631_v35, %v4596_v56 }
 0x55f   : > { %10437 = vst [vmem:[#allocation2 + $0x8] sm:$0xff] %v10405_v23  ;;  %v10407_v1 = vadd.f32 %v12632_v58, %v4597_v10  ;;  %v4610_v58 = vld [vmem:[#allocation2 + $0x80] sm:$0xff] }
 0x560   : > { %10438 = vst [vmem:[#allocation2 + $0x10] sm:$0xff] %v10406_v29  ;;  %v9318_v17 = vpop.f32.mrb[4].mxu1 }
 0x561   : > { %10439 = vst [vmem:[#allocation2 + $0x18] sm:$0xff] %v10407_v1  ;;  %v10335_v34 = vpop.f32.mrb[4].mxu0  ;;  %v9320_v48 = vpop.f32.mrb[5].mxu1 }
 0x562   : > { %v12633_v50 = vadd.f32 %v10335_v34, %v9318_v17  ;;  %v10337_v44 = vpop.f32.mrb[5].mxu0  ;;  %v9322_v45 = vpop.f32.mrb[6].mxu1 }
 0x563   : > { %v12634_v52 = vadd.f32 %v10337_v44, %v9320_v48  ;;  %v10339_v11 = vpop.f32.mrb[6].mxu0  ;;  %v9324_v32 = vpop.f32.mrb[7].mxu1 }
 0x564   : > { %v10408_v51 = vadd.f32 %v12633_v50, %v4598_v41  ;;  %v12635_v25 = vadd.f32 %v10339_v11, %v9322_v45  ;;  %v10341_v49 = vpop.f32.mrb[7].mxu0  ;;  %v4611_v41 = vld [vmem:[#allocation2 + $0x88] sm:$0xff]  ;;  %v4613_v11 = vld [vmem:[#allocation2 + $0x98] sm:$0xff] }
 0x565   : > { %v10409_v60 = vadd.f32 %v12634_v52, %v4599_v2  ;;  %v12636_v63 = vadd.f32 %v10341_v49, %v9324_v32  ;;  %v4612_v2 = vld [vmem:[#allocation2 + $0x90] sm:$0xff] }
 0x566   : > { %10440 = vst [vmem:[#allocation2 + $0x20] sm:$0xff] %v10408_v51  ;;  %v10410_v43 = vadd.f32 %v12635_v25, %v4600_v53 }
 0x567   : > { %10441 = vst [vmem:[#allocation2 + $0x28] sm:$0xff] %v10409_v60  ;;  %v10411_v59 = vadd.f32 %v12636_v63, %v4601_v55  ;;  %v4614_v63 = vld [vmem:[#allocation2 + $0xa0] sm:$0xff] }
 0x568   : > { %10442 = vst [vmem:[#allocation2 + $0x30] sm:$0xff] %v10410_v43  ;;  %v9328_v31 = vpop.f32.mrb[8].mxu1 }
 0x569   : > { %10443 = vst [vmem:[#allocation2 + $0x38] sm:$0xff] %v10411_v59  ;;  %v10345_v62 = vpop.f32.mrb[8].mxu0  ;;  %v9330_v54 = vpop.f32.mrb[9].mxu1 }
 0x56a   : > { %v12637_v61 = vadd.f32 %v10345_v62, %v9328_v31  ;;  %v10347_v4 = vpop.f32.mrb[9].mxu0  ;;  %v9332_v7 = vpop.f32.mrb[10].mxu1 }
 0x56b   : > { %v12638_v12 = vadd.f32 %v10347_v4, %v9330_v54  ;;  %v10349_v14 = vpop.f32.mrb[10].mxu0  ;;  %v9334_v16 = vpop.f32.mrb[11].mxu1 }
 0x56c   : > { %v10412_v47 = vadd.f32 %v12637_v61, %v4602_v40  ;;  %v12639_v57 = vadd.f32 %v10349_v14, %v9332_v7  ;;  %v10351_v26 = vpop.f32.mrb[11].mxu0  ;;  %v4615_v40 = vld [vmem:[#allocation2 + $0xa8] sm:$0xff]  ;;  %v4617_v14 = vld [vmem:[#allocation2 + $0xb8] sm:$0xff] }
 0x56d   : > { %v10413_v3 = vadd.f32 %v12638_v12, %v4603_v38  ;;  %v12640_v6 = vadd.f32 %v10351_v26, %v9334_v16  ;;  %v4616_v38 = vld [vmem:[#allocation2 + $0xb0] sm:$0xff] }
 0x56e   : > { %10444 = vst [vmem:[#allocation2 + $0x40] sm:$0xff] %v10412_v47  ;;  %v10414_v5 = vadd.f32 %v12639_v57, %v4604_v22 }
 0x56f   : > { %10445 = vst [vmem:[#allocation2 + $0x48] sm:$0xff] %v10413_v3  ;;  %v10415_v39 = vadd.f32 %v12640_v6, %v4605_v27  ;;  %v4618_v6 = vld [vmem:[#allocation2 + $0xc0] sm:$0xff] }
 0x570   : > { %10446 = vst [vmem:[#allocation2 + $0x50] sm:$0xff] %v10414_v5  ;;  %v9338_v9 = vpop.f32.mrb[12].mxu1 }
 0x571   : > { %10447 = vst [vmem:[#allocation2 + $0x58] sm:$0xff] %v10415_v39  ;;  %v10355_v36 = vpop.f32.mrb[12].mxu0  ;;  %v9340_v8 = vpop.f32.mrb[13].mxu1 }
 0x572   : > { %v12641_v30 = vadd.f32 %v10355_v36, %v9338_v9  ;;  %v10357_v33 = vpop.f32.mrb[13].mxu0  ;;  %v9342_v24 = vpop.f32.mrb[14].mxu1 }
 0x573   : > { %v12642_v18 = vadd.f32 %v10357_v33, %v9340_v8  ;;  %v10359_v0 = vpop.f32.mrb[14].mxu0  ;;  %v9344_v56 = vpop.f32.mrb[15].mxu1 }
 0x574   : > { %v10416_v20 = vadd.f32 %v12641_v30, %v4606_v28  ;;  %v12643_v42 = vadd.f32 %v10359_v0, %v9342_v24  ;;  %v10361_v37 = vpop.f32.mrb[15].mxu0  ;;  %v4619_v28 = vld [vmem:[#allocation2 + $0xc8] sm:$0xff]  ;;  %v4621_v0 = vld [vmem:[#allocation2 + $0xd8] sm:$0xff] }
 0x575   : > { %v10417_v35 = vadd.f32 %v12642_v18, %v4607_v15  ;;  %v12644_v21 = vadd.f32 %v10361_v37, %v9344_v56  ;;  %v4620_v15 = vld [vmem:[#allocation2 + $0xd0] sm:$0xff] }
 0x576   : > { %10448 = vst [vmem:[#allocation2 + $0x60] sm:$0xff] %v10416_v20  ;;  %v10418_v10 = vadd.f32 %v12643_v42, %v4608_v13 }
 0x577   : > { %10449 = vst [vmem:[#allocation2 + $0x68] sm:$0xff] %v10417_v35  ;;  %v10419_v46 = vadd.f32 %v12644_v21, %v4609_v19  ;;  %v4622_v21 = vld [vmem:[#allocation2 + $0xe0] sm:$0xff] }
 0x578   : > { %10450 = vst [vmem:[#allocation2 + $0x70] sm:$0xff] %v10418_v10  ;;  %v9348_v23 = vpop.f32.mrb[16].mxu1 }
 0x579   : > { %10451 = vst [vmem:[#allocation2 + $0x78] sm:$0xff] %v10419_v46  ;;  %v10365_v29 = vpop.f32.mrb[16].mxu0  ;;  %v9350_v17 = vpop.f32.mrb[17].mxu1 }
 0x57a   : > { %v12645_v1 = vadd.f32 %v10365_v29, %v9348_v23  ;;  %v10367_v34 = vpop.f32.mrb[17].mxu0  ;;  %v9352_v48 = vpop.f32.mrb[18].mxu1 }
 0x57b   : > { %v12646_v50 = vadd.f32 %v10367_v34, %v9350_v17  ;;  %v10369_v44 = vpop.f32.mrb[18].mxu0  ;;  %v9354_v53 = vpop.f32.mrb[19].mxu1 }
 0x57c   : > { %v10420_v52 = vadd.f32 %v12645_v1, %v4610_v58  ;;  %v12647_v45 = vadd.f32 %v10369_v44, %v9352_v48  ;;  %v10371_v51 = vpop.f32.mrb[19].mxu0  ;;  %v4623_v58 = vld [vmem:[#allocation2 + $0xe8] sm:$0xff]  ;;  %v4625_v44 = vld [vmem:[#allocation2 + $0xf8] sm:$0xff] }
 0x57d   : > { %v10421_v25 = vadd.f32 %v12646_v50, %v4611_v41  ;;  %v12648_v32 = vadd.f32 %v10371_v51, %v9354_v53  ;;  %v4624_v41 = vld [vmem:[#allocation2 + $0xf0] sm:$0xff] }
 0x57e   : > { %10452 = vst [vmem:[#allocation2 + $0x80] sm:$0xff] %v10420_v52  ;;  %v10422_v55 = vadd.f32 %v12647_v45, %v4612_v2 }
 0x57f   : > { %10453 = vst [vmem:[#allocation2 + $0x88] sm:$0xff] %v10421_v25  ;;  %v10423_v49 = vadd.f32 %v12648_v32, %v4613_v11  ;;  %v14193_v25 = vld [vmem:[%s15035_s19 + $0x40] sm:$0xff] (!%p12534_p9)  }
 0x580   : > { %10454 = vst [vmem:[#allocation2 + $0x90] sm:$0xff] %v10422_v55  ;;  %v9358_v60 = vpop.f32.mrb[20].mxu1  ;;  %v14194_v32 = vld [vmem:[%s15035_s19] sm:$0xff] (!%p12534_p9)   ;;  %12565 = vmatprep.subr.bf16.mxu0 (!%p12534_p9), %v14193_v25  ;;  %13173 = vmatprep.subr.bf16.mxu1 (!%p12534_p9), %v14193_v25  ;;  %v14195_v55 = vld [vmem:[%s15035_s19 + $0x48] sm:$0xff] (!%p12534_p9)  }
 0x581   : > { %10455 = vst [vmem:[#allocation2 + $0x98] sm:$0xff] %v10423_v49  ;;  %v10375_v43 = vpop.f32.mrb[20].mxu0  ;;  %v9360_v31 = vpop.f32.mrb[21].mxu1  ;;  %12566 = vmatpush3.bf16.msra.mxu0 (!%p12534_p9), %v14194_v32  ;;  %13181 = vmatpush3.bf16.msra.mxu1 (!%p12534_p9), %v14194_v32  ;;  %v14196_v49 = vld [vmem:[%s15035_s19 + $0x8] sm:$0xff] (!%p12534_p9)  }
 0x582   : > { %v12649_v59 = vadd.f32 %v10375_v43, %v9358_v60  ;;  %v10377_v62 = vpop.f32.mrb[21].mxu0  ;;  %v9362_v54 = vpop.f32.mrb[22].mxu1  ;;  %12567 = vmatprep.subr.bf16.mxu0 (!%p12534_p9), %v14195_v55  ;;  %13174 = vmatprep.subr.bf16.mxu1 (!%p12534_p9), %v14195_v55  ;;  %v14197_v60 = vld [vmem:[%s15035_s19 + $0x50] sm:$0xff] (!%p12534_p9)  }
 0x583   : > { %v12650_v61 = vadd.f32 %v10377_v62, %v9360_v31  ;;  %v10379_v4 = vpop.f32.mrb[22].mxu0  ;;  %v9364_v22 = vpop.f32.mrb[23].mxu1  ;;  %v14198_v43 = vld [vmem:[%s15035_s19 + $0x10] sm:$0xff] (!%p12534_p9)   ;;  %v14201_v62 = vld [vmem:[%s15035_s19 + $0x60] sm:$0xff] (!%p12534_p9)  }
 0x584   : > { %v10424_v12 = vadd.f32 %v12649_v59, %v4614_v63  ;;  %v12651_v7 = vadd.f32 %v10379_v4, %v9362_v54  ;;  %v10381_v47 = vpop.f32.mrb[23].mxu0  ;;  %v10506_v63 = vlaneseq (!%p12534_p9)  ;;  %v14199_v59 = vld [vmem:[%s15035_s19 + $0x58] sm:$0xff] (!%p12534_p9)   ;;  %v14203_v4 = vld [vmem:[%s15035_s19 + $0x68] sm:$0xff] (!%p12534_p9)  }
 0x585   : > { %v10425_v57 = vadd.f32 %v12650_v61, %v4615_v40  ;;  %v12652_v16 = vadd.f32 %v10381_v47, %v9364_v22  ;;  %12568 = vmatpush3.bf16.msra.mxu0 (!%p12534_p9), %v14196_v49  ;;  %13182 = vmatpush3.bf16.msra.mxu1 (!%p12534_p9), %v14196_v49  ;;  %v14200_v40 = vld [vmem:[%s15035_s19 + $0x18] sm:$0xff] (!%p12534_p9)  }
 0x586   : > { %10456 = vst [vmem:[#allocation2 + $0xa0] sm:$0xff] %v10424_v12  ;;  %v10426_v27 = vadd.f32 %v12651_v7, %v4616_v38  ;;  %12569 = vmatprep.subr.bf16.mxu0 (!%p12534_p9), %v14197_v60  ;;  %13175 = vmatprep.subr.bf16.mxu1 (!%p12534_p9), %v14197_v60  ;;  %v10507_v31 = vshrl.u32 (!%p12534_p9), %v10506_v63, 7  ;;  %v14202_v38 = vld [vmem:[%s15035_s19 + $0x20] sm:$0xff] (!%p12534_p9)   ;;  %v10475_v7 = vld [vmem:[#allocation2 + $0x18] sm:$0xff] (!%p12534_p9)  ;;  %v10504_v22 = vld [vmem:[%s15023_s11] sm:$0x3] (!%p12534_p9) }
 0x587   : > { %10457 = vst [vmem:[#allocation2 + $0xa8] sm:$0xff] %v10425_v57  ;;  %v10427_v26 = vadd.f32 %v12652_v16, %v4617_v14  ;;  %v10473_v12 = vld [vmem:[#allocation2 + $0x8] sm:$0xff] (!%p12534_p9)  ;;  %v10548_v57 = vld [vmem:[%s15030_s6] sm:$0x3] (!%p12534_p9)  ;;  %v10478_v60 = vld [vmem:[#allocation2 + $0x30] sm:$0xff] (!%p12534_p9) }
 0x588   : > { %10458 = vst [vmem:[#allocation2 + $0xb0] sm:$0xff] %v10426_v27  ;;  %v9368_v3 = vpop.f32.mrb[24].mxu1  ;;  %v10508_v61 = vsub.s32 (!%p12534_p9), 0, %v10507_v31  ;;  %v10512_v54 = vsub.s32 (!%p12534_p9), 1, %v10507_v31  ;;  %v10489_v16 = vld [vmem:[#allocation2 + $0x88] sm:$0xff] (!%p12534_p9)  ;;  %v10491_v27 = vld [vmem:[#allocation2 + $0x98] sm:$0xff] (!%p12534_p9) }
 0x589   : > { %10459 = vst [vmem:[#allocation2 + $0xb8] sm:$0xff] %v10427_v26  ;;  %v10385_v5 = vpop.f32.mrb[24].mxu0  ;;  %v9370_v9 = vpop.f32.mrb[25].mxu1  ;;  %12570 = vmatpush3.bf16.msra.mxu0 (!%p12534_p9), %v14198_v43  ;;  %13183 = vmatpush3.bf16.msra.mxu1 (!%p12534_p9), %v14198_v43  ;;  %v14208_v63 = vld [vmem:[%s15035_s19 + $0x38] sm:$0xff] (!%p12534_p9)  }
 0x58a   : > { %v12653_v39 = vadd.f32 %v10385_v5, %v9368_v3  ;;  %v10387_v36 = vpop.f32.mrb[25].mxu0  ;;  %v9372_v8 = vpop.f32.mrb[26].mxu1  ;;  %12571 = vmatprep.subr.bf16.mxu0 (!%p12534_p9), %v14199_v59  ;;  %13176 = vmatprep.subr.bf16.mxu1 (!%p12534_p9), %v14199_v59  ;;  %v16946_v14 = vrot.slane (!%p12534_p9), %v10504_v22, %v10508_v61  ;;  %v16948_v47 = vrot.slane (!%p12534_p9), %v10504_v22, %v10512_v54  ;;  %v10474_v5 = vld [vmem:[#allocation2 + $0x10] sm:$0xff] (!%p12534_p9) }
 0x58b   : > { %v12654_v30 = vadd.f32 %v10387_v36, %v9370_v9  ;;  %v10389_v33 = vpop.f32.mrb[26].mxu0  ;;  %v9374_v13 = vpop.f32.mrb[27].mxu1  ;;  %v16951_v26 = vrot.slane (!%p12534_p9), %v10548_v57, %v10508_v61  ;;  %v16953_v3 = vrot.slane (!%p12534_p9), %v10548_v57, %v10512_v54  ;;  %v14204_v9 = vld [vmem:[%s15035_s19 + $0x28] sm:$0xff] (!%p12534_p9)  }
 0x58c   : > { %v10428_v18 = vadd.f32 %v12653_v39, %v4618_v6  ;;  %v12655_v24 = vadd.f32 %v10389_v33, %v9372_v8  ;;  %v10391_v20 = vpop.f32.mrb[27].mxu0  ;;  %v10472_v6 = vld [vmem:[#allocation2] sm:$0xff] (!%p12534_p9)  ;;  %v10519_v36 = vmul.f32 (!%p12534_p9), %v16948_v47, %v10475_v7  ;;  %v10490_v8 = vld [vmem:[#allocation2 + $0x90] sm:$0xff] (!%p12534_p9)  ;;  %v10535_v33 = vmul.f32 (!%p12534_p9), %v16948_v47, %v10491_v27 }
 0x58d   : > { %v10429_v42 = vadd.f32 %v12654_v30, %v4619_v28  ;;  %v12656_v56 = vadd.f32 %v10391_v20, %v9374_v13  ;;  %12572 = vmatpush3.bf16.msra.mxu0 (!%p12534_p9), %v14200_v40  ;;  %13184 = vmatpush3.bf16.msra.mxu1 (!%p12534_p9), %v14200_v40  ;;  %v10488_v39 = vld [vmem:[#allocation2 + $0x80] sm:$0xff] (!%p12534_p9)  ;;  %v10517_v28 = vmul.f32 (!%p12534_p9), %v16948_v47, %v10473_v12 }
 0x58e   : > { %10460 = vst [vmem:[#allocation2 + $0xc0] sm:$0xff] %v10428_v18  ;;  %v10430_v19 = vadd.f32 %v12655_v24, %v4620_v15  ;;  %12573 = vmatprep.subr.bf16.mxu0 (!%p12534_p9), %v14201_v62  ;;  %13177 = vmatprep.subr.bf16.mxu1 (!%p12534_p9), %v14201_v62  ;;  %v10533_v30 = vmul.f32 (!%p12534_p9), %v16948_v47, %v10489_v16  ;;  %v14205_v15 = vld [vmem:[%s15035_s19 + $0x70] sm:$0xff] (!%p12534_p9)   ;;  %v10492_v40 = vld [vmem:[#allocation2 + $0xa0] sm:$0xff] (!%p12534_p9) }
 0x58f   : > { %10461 = vst [vmem:[#allocation2 + $0xc8] sm:$0xff] %v10429_v42  ;;  %v10431_v37 = vadd.f32 %v12656_v56, %v4621_v0  ;;  %v10516_v18 = vmul.f32 (!%p12534_p9), %v16946_v14, %v10472_v6  ;;  %v10518_v24 = vmul.f32 (!%p12534_p9), %v16946_v14, %v10474_v5  ;;  %v10561_v13 = vadd.f32 (!%p12534_p9), %v16953_v3, %v10517_v28  ;;  %v10494_v62 = vld [vmem:[#allocation2 + $0xb0] sm:$0xff] (!%p12534_p9)  ;;  %v10483_v16 = vld [vmem:[#allocation2 + $0x58] sm:$0xff] (!%p12534_p9) }
 0x590   : > { %10462 = vst [vmem:[#allocation2 + $0xd0] sm:$0xff] %v10430_v19  ;;  %v9378_v35 = vpop.f32.mrb[28].mxu1  ;;  %v10563_v0 = vadd.f32 (!%p12534_p9), %v16953_v3, %v10519_v36  ;;  %v10577_v20 = vadd.f32 (!%p12534_p9), %v16953_v3, %v10533_v30  ;;  %v10532_v42 = vmul.f32 (!%p12534_p9), %v16946_v14, %v10488_v39  ;;  %v10579_v56 = vadd.f32 (!%p12534_p9), %v16953_v3, %v10535_v33 }
 0x591   : > { %10463 = vst [vmem:[#allocation2 + $0xd8] sm:$0xff] %v10431_v37  ;;  %v10395_v10 = vpop.f32.mrb[28].mxu0  ;;  %v9380_v23 = vpop.f32.mrb[29].mxu1  ;;  %12574 = vmatpush3.bf16.msra.mxu0 (!%p12534_p9), %v14202_v38  ;;  %13185 = vmatpush3.bf16.msra.mxu1 (!%p12534_p9), %v14202_v38  ;;  %v10560_v19 = vadd.f32 (!%p12534_p9), %v16951_v26, %v10516_v18  ;;  %v10562_v37 = vadd.f32 (!%p12534_p9), %v16951_v26, %v10518_v24  ;;  %10593 = vst [vmem:[%s16354_s16 + $0x8] sm:$0xff] (!%p12534_p9), %v10561_v13 }
 0x592   : > { %v12657_v46 = vadd.f32 %v10395_v10, %v9378_v35  ;;  %v10397_v29 = vpop.f32.mrb[29].mxu0  ;;  %v9382_v17 = vpop.f32.mrb[30].mxu1  ;;  %12575 = vmatprep.subr.bf16.mxu0 (!%p12534_p9), %v14203_v4  ;;  %13178 = vmatprep.subr.bf16.mxu1 (!%p12534_p9), %v14203_v4  ;;  %v10534_v35 = vmul.f32 (!%p12534_p9), %v16946_v14, %v10490_v8  ;;  %v10479_v10 = vld [vmem:[#allocation2 + $0x38] sm:$0xff] (!%p12534_p9)  ;;  %10595 = vst [vmem:[%s16354_s16 + $0x18] sm:$0xff] (!%p12534_p9), %v10563_v0  ;;  %10609 = vst [vmem:[%s16354_s16 + $0x88] sm:$0xff] (!%p12534_p9), %v10577_v20  ;;  %v10481_v4 = vld [vmem:[#allocation2 + $0x48] sm:$0xff] (!%p12534_p9) }
 0x593   : > { %v12658_v1 = vadd.f32 %v10397_v29, %v9380_v23  ;;  %v10399_v34 = vpop.f32.mrb[30].mxu0  ;;  %v9384_v2 = vpop.f32.mrb[31].mxu1  ;;  %10471 = sbr.rel (%p12534_p9) target bundleno = 1682 (0x692), region = 87  ;;  %v10625_v23 = vmax.f32 (!%p12534_p9), %v10561_v13, 0.0  ;;  %v10641_v29 = vmax.f32 (!%p12534_p9), %v10577_v20, 0.0  ;;  %10611 = vst [vmem:[%s16354_s16 + $0x98] sm:$0xff] (!%p12534_p9), %v10579_v56  ;;  %10592 = vst [vmem:[%s16354_s16] sm:$0xff] (!%p12534_p9), %v10560_v19  ;;  %v10522_v57 = vmul.f32 (!%p12534_p9), %v16946_v14, %v10478_v60 }
 0x594   : > { %v10432_v50 = vadd.f32 %v12657_v46, %v4622_v21  ;;  %v12659_v48 = vadd.f32 %v10399_v34, %v9382_v17  ;;  %v10401_v52 = vpop.f32.mrb[31].mxu0  ;;  %v10477_v21 = vld [vmem:[#allocation2 + $0x28] sm:$0xff] (!%p12534_p9)  ;;  %v14206_v46 = vld [vmem:[%s15035_s19 + $0x30] sm:$0xff] (!%p12534_p9)   ;;  %v10643_v34 = vmax.f32 (!%p12534_p9), %v10579_v56, 0.0  ;;  %10594 = vst [vmem:[%s16354_s16 + $0x10] sm:$0xff] (!%p12534_p9), %v10562_v37  ;;  %v10536_v5 = vmul.f32 (!%p12534_p9), %v16946_v14, %v10492_v40  ;;  %v10484_v40 = vld [vmem:[#allocation2 + $0x60] sm:$0xff] (!%p12534_p9) }
 0x595   : > { %v10433_v45 = vadd.f32 %v12658_v1, %v4623_v58  ;;  %v12660_v53 = vadd.f32 %v10401_v52, %v9384_v2  ;;  %12576 = vmatpush3.bf16.msra.mxu0 (!%p12534_p9), %v14204_v9  ;;  %13186 = vmatpush3.bf16.msra.mxu1 (!%p12534_p9), %v14204_v9  ;;  %v10627_v58 = vmax.f32 (!%p12534_p9), %v10563_v0, 0.0  ;;  %v10576_v1 = vadd.f32 (!%p12534_p9), %v16951_v26, %v10532_v42  ;;  %v10493_v17 = vld [vmem:[#allocation2 + $0xa8] sm:$0xff] (!%p12534_p9)  ;;  %v10480_v0 = vld [vmem:[#allocation2 + $0x40] sm:$0xff] (!%p12534_p9) }
 0x596   : > { %10464 = vst [vmem:[#allocation2 + $0xe0] sm:$0xff] %v10432_v50  ;;  %v10434_v11 = vadd.f32 %v12659_v48, %v4624_v41  ;;  %12577 = vmatprep.subr.bf16.mxu0 (!%p12534_p9), %v14205_v15  ;;  %13179 = vmatprep.subr.bf16.mxu1 (!%p12534_p9), %v14205_v15  ;;  %v14207_v41 = vld [vmem:[%s15035_s19 + $0x78] sm:$0xff] (!%p12534_p9)   ;;  %v10624_v50 = vmax.f32 (!%p12534_p9), %v10560_v19, 0.0  ;;  %v10626_v48 = vmax.f32 (!%p12534_p9), %v10562_v37, 0.0  ;;  %v10578_v2 = vadd.f32 (!%p12534_p9), %v16951_v26, %v10534_v35  ;;  %v10497_v9 = vld [vmem:[#allocation2 + $0xc8] sm:$0xff] (!%p12534_p9)  ;;  %v10482_v37 = vld [vmem:[#allocation2 + $0x50] sm:$0xff] (!%p12534_p9) }
 0x597   : > { %10465 = vst [vmem:[#allocation2 + $0xe8] sm:$0xff] %v10433_v45  ;;  %v10435_v51 = vadd.f32 %v12660_v53, %v4625_v44  ;;  %v10495_v44 = vld [vmem:[#allocation2 + $0xb8] sm:$0xff] (!%p12534_p9)  ;;  %v10657_v52 = vpack.c.bf16 (!%p12534_p9), %v10627_v58, %v10625_v23  ;;  %10608 = vst [vmem:[%s16354_s16 + $0x80] sm:$0xff] (!%p12534_p9), %v10576_v1  ;;  %v10640_v45 = vmax.f32 (!%p12534_p9), %v10576_v1, 0.0  ;;  %v10521_v53 = vmul.f32 (!%p12534_p9), %v16948_v47, %v10477_v21  ;;  %v10496_v23 = vld [vmem:[#allocation2 + $0xc0] sm:$0xff] (!%p12534_p9) }
 0x598   : > { %10466 = vst [vmem:[#allocation2 + $0xf0] sm:$0xff] %v10434_v11  ;;  %v10523_v11 = vmul.f32 (!%p12534_p9), %v16948_v47, %v10479_v10  ;;  %v10665_v25 = vpack.c.bf16 (!%p12534_p9), %v10643_v34, %v10641_v29  ;;  %v10656_v32 = vpack.c.bf16 (!%p12534_p9), %v10626_v48, %v10624_v50  ;;  %10610 = vst [vmem:[%s16354_s16 + $0x90] sm:$0xff] (!%p12534_p9), %v10578_v2  ;;  %v10642_v55 = vmax.f32 (!%p12534_p9), %v10578_v2, 0.0  ;;  %v10499_v15 = vld [vmem:[#allocation2 + $0xd8] sm:$0xff] (!%p12534_p9)  ;;  %v10498_v58 = vld [vmem:[#allocation2 + $0xd0] sm:$0xff] (!%p12534_p9) }
 0x599   : > { %10467 = vst [vmem:[#allocation2 + $0xf8] sm:$0xff] %v10435_v51  ;;  %v10476_v51 = vld [vmem:[#allocation2 + $0x20] sm:$0xff] (!%p12534_p9)  ;;  %v10537_v49 = vmul.f32 (!%p12534_p9), %v16948_v47, %v10493_v17  ;;  %12578 = vmatpush3.bf16.msra.mxu0 (!%p12534_p9), %v14206_v46  ;;  %13187 = vmatpush3.bf16.msra.mxu1 (!%p12534_p9), %v14206_v46  ;;  %v10565_v43 = vadd.f32 (!%p12534_p9), %v16953_v3, %v10521_v53 }
 0x59a   : > { %v10567_v59 = vadd.f32 %v16953_v3, %v10523_v11  ;;  %v10539_v31 = vmul.f32 %v16948_v47, %v10495_v44  ;;  %12579 = vmatprep.subr.bf16.mxu0 %v14207_v41  ;;  %13180 = vmatprep.subr.bf16.mxu1 %v14207_v41  ;;  %v10664_v61 = vpack.c.bf16 %v10642_v55, %v10640_v45  ;;  %v10485_v41 = vld [vmem:[#allocation2 + $0x68] sm:$0xff]  ;;  %v10487_v44 = vld [vmem:[#allocation2 + $0x78] sm:$0xff] }
 0x59b   : > { %v10581_v54 = vadd.f32 %v16953_v3, %v10537_v49  ;;  %v10520_v38 = vmul.f32 %v16946_v14, %v10476_v51  ;;  %10832 = vmatprep.mubr.bf16.mxu0 %v10657_v52  ;;  %10864 = vmatprep.mubr.bf16.mxu1 %v10665_v25  ;;  %10597 = vst [vmem:[%s16354_s16 + $0x28] sm:$0xff] %v10565_v43  ;;  %v10629_v12 = vmax.f32 %v10565_v43, 0.0 }
 0x59c   : > { %10599 = vst [vmem:[%s16354_s16 + $0x38] sm:$0xff] %v10567_v59  ;;  %v10631_v7 = vmax.f32 %v10567_v59, 0.0  ;;  %v10583_v22 = vadd.f32 %v16953_v3, %v10539_v31  ;;  %v10538_v39 = vmul.f32 %v16946_v14, %v10494_v62  ;;  %v10566_v30 = vadd.f32 %v16951_v26, %v10522_v57 }
 0x59d   : > { %10613 = vst [vmem:[%s16354_s16 + $0xa8] sm:$0xff] %v10581_v54  ;;  %v10645_v27 = vmax.f32 %v10581_v54, 0.0  ;;  %v10564_v6 = vadd.f32 %v16951_v26, %v10520_v38  ;;  %12580 = vmatpush3.bf16.msra.mxu0 %v14208_v63  ;;  %13188 = vmatpush3.bf16.msra.mxu1 %v14208_v63  ;;  %v10525_v8 = vmul.f32 %v16948_v47, %v10481_v4  ;;  %v10486_v38 = vld [vmem:[#allocation2 + $0x70] sm:$0xff]  ;;  %v10500_v57 = vld [vmem:[#allocation2 + $0xe0] sm:$0xff] }
 0x59e   : > { %v10659_v28 = vpack.c.bf16 %v10631_v7, %v10629_v12  ;;  %10615 = vst [vmem:[%s16354_s16 + $0xb8] sm:$0xff] %v10583_v22  ;;  %v10647_v36 = vmax.f32 %v10583_v22, 0.0  ;;  %v10580_v18 = vadd.f32 %v16951_v26, %v10536_v5  ;;  %v10582_v24 = vadd.f32 %v16951_v26, %v10538_v39  ;;  %10598 = vst [vmem:[%s16354_s16 + $0x30] sm:$0xff] %v10566_v30  ;;  %v10501_v51 = vld [vmem:[#allocation2 + $0xe8] sm:$0xff] }
 0x59f   : > { %10596 = vst [vmem:[%s16354_s16 + $0x20] sm:$0xff] %v10564_v6  ;;  %v10628_v33 = vmax.f32 %v10564_v6, 0.0  ;;  %v10527_v13 = vmul.f32 %v16948_v47, %v10483_v16  ;;  %v10630_v42 = vmax.f32 %v10566_v30, 0.0  ;;  %v10569_v56 = vadd.f32 %v16953_v3, %v10525_v8  ;;  %v10502_v16 = vld [vmem:[#allocation2 + $0xf0] sm:$0xff] }
 0x5a0   : > { %v10667_v20 = vpack.c.bf16 %v10647_v36, %v10645_v27  ;;  %v10541_v19 = vmul.f32 %v16948_v47, %v10497_v9  ;;  %10833 = vmatmul.mubr.bf16.vlgmr.msra.gmra.mrb[0].mxu0 %v10656_v32  ;;  %10865 = vmatmul.mubr.bf16.vlgmr.msra.gmra.mrb[0].mxu1 %v10664_v61  ;;  %10612 = vst [vmem:[%s16354_s16 + $0xa0] sm:$0xff] %v10580_v18  ;;  %10614 = vst [vmem:[%s16354_s16 + $0xb0] sm:$0xff] %v10582_v24  ;;  %v10644_v35 = vmax.f32 %v10580_v18, 0.0  ;;  %v10503_v60 = vld [vmem:[#allocation2 + $0xf8] sm:$0xff] }
 0x5a1   : > { %v10646_v21 = vmax.f32 %v10582_v24, 0.0  ;;  %v10571_v10 = vadd.f32 %v16953_v3, %v10527_v13  ;;  %v10543_v46 = vmul.f32 %v16948_v47, %v10499_v15  ;;  %10840 = vmatprep.mubr.bf16.mxu0 %v10659_v28  ;;  %10601 = vst [vmem:[%s16354_s16 + $0x48] sm:$0xff] %v10569_v56  ;;  %v10633_v29 = vmax.f32 %v10569_v56, 0.0 }
 0x5a2   : > { %10872 = vmatprep.mubr.bf16.mxu1 %v10667_v20  ;;  %v10585_v1 = vadd.f32 %v16953_v3, %v10541_v19  ;;  %v10524_v17 = vmul.f32 %v16946_v14, %v10480_v0  ;;  %v10658_v34 = vpack.c.bf16 %v10630_v42, %v10628_v33  ;;  %v10526_v2 = vmul.f32 %v16946_v14, %v10482_v37 }
 0x5a3   : > { %10603 = vst [vmem:[%s16354_s16 + $0x58] sm:$0xff] %v10571_v10  ;;  %v10635_v50 = vmax.f32 %v10571_v10, 0.0  ;;  %v10587_v48 = vadd.f32 %v16953_v3, %v10543_v46  ;;  %v10540_v53 = vmul.f32 %v16946_v14, %v10496_v23  ;;  %v10542_v11 = vmul.f32 %v16946_v14, %v10498_v58 }
 0x5a4   : > { %10617 = vst [vmem:[%s16354_s16 + $0xc8] sm:$0xff] %v10585_v1  ;;  %v10649_v52 = vmax.f32 %v10585_v1, 0.0  ;;  %v10568_v45 = vadd.f32 %v16951_v26, %v10524_v17  ;;  %v10666_v25 = vpack.c.bf16 %v10646_v21, %v10644_v35  ;;  %v10570_v55 = vadd.f32 %v16951_v26, %v10526_v2 }
 0x5a5   : > { %10619 = vst [vmem:[%s16354_s16 + $0xd8] sm:$0xff] %v10587_v48  ;;  %v10651_v32 = vmax.f32 %v10587_v48, 0.0  ;;  %v10529_v49 = vmul.f32 %v16948_v47, %v10485_v41  ;;  %v10661_v63 = vpack.c.bf16 %v10635_v50, %v10633_v29  ;;  %v10584_v43 = vadd.f32 %v16951_v26, %v10540_v53 }
 0x5a6   : > { %10600 = vst [vmem:[%s16354_s16 + $0x40] sm:$0xff] %v10568_v45  ;;  %v10586_v59 = vadd.f32 %v16951_v26, %v10542_v11  ;;  %v10531_v31 = vmul.f32 %v16948_v47, %v10487_v44  ;;  %10602 = vst [vmem:[%s16354_s16 + $0x50] sm:$0xff] %v10570_v55  ;;  %v10545_v54 = vmul.f32 %v16948_v47, %v10501_v51  ;;  %v10632_v4 = vmax.f32 %v10568_v45, 0.0 }
 0x5a7   : > { %v10669_v62 = vpack.c.bf16 %v10651_v32, %v10649_v52  ;;  %v10573_v61 = vadd.f32 %v16953_v3, %v10529_v49  ;;  %v10634_v12 = vmax.f32 %v10570_v55, 0.0  ;;  %10616 = vst [vmem:[%s16354_s16 + $0xc0] sm:$0xff] %v10584_v43  ;;  %v10547_v22 = vmul.f32 %v16948_v47, %v10503_v60 }
 0x5a8   : > { %10618 = vst [vmem:[%s16354_s16 + $0xd0] sm:$0xff] %v10586_v59  ;;  %v10575_v7 = vadd.f32 %v16953_v3, %v10531_v31  ;;  %10841 = vmatmul.mubr.bf16.gmra.mrb[4].mxu0 %v10658_v34  ;;  %10873 = vmatmul.mubr.bf16.gmra.mrb[4].mxu1 %v10666_v25  ;;  %v10648_v27 = vmax.f32 %v10584_v43, 0.0  ;;  %v10650_v6 = vmax.f32 %v10586_v59, 0.0  ;;  %v10589_v5 = vadd.f32 %v16953_v3, %v10545_v54 }
 0x5a9   : > { %10605 = vst [vmem:[%s16354_s16 + $0x68] sm:$0xff] %v10573_v61  ;;  %v10528_v39 = vmul.f32 %v16946_v14, %v10484_v40  ;;  %10848 = vmatprep.mubr.bf16.mxu0 %v10661_v63  ;;  %10880 = vmatprep.mubr.bf16.mxu1 %v10669_v62  ;;  %v10637_v9 = vmax.f32 %v10573_v61, 0.0  ;;  %v10591_v47 = vadd.f32 %v16953_v3, %v10547_v22 }
 0x5aa   : > { %10607 = vst [vmem:[%s16354_s16 + $0x78] sm:$0xff] %v10575_v7  ;;  %v10639_v28 = vmax.f32 %v10575_v7, 0.0  ;;  %v10530_v36 = vmul.f32 %v16946_v14, %v10486_v38  ;;  %10621 = vst [vmem:[%s16354_s16 + $0xe8] sm:$0xff] %v10589_v5  ;;  %v10653_v30 = vmax.f32 %v10589_v5, 0.0  ;;  %v10544_v15 = vmul.f32 %v16946_v14, %v10500_v57 }
 0x5ab   : > { %v10572_v8 = vadd.f32 %v16951_v26, %v10528_v39  ;;  %v10546_v33 = vmul.f32 %v16946_v14, %v10502_v16  ;;  %10623 = vst [vmem:[%s16354_s16 + $0xf8] sm:$0xff] %v10591_v47  ;;  %v10655_v18 = vmax.f32 %v10591_v47, 0.0  ;;  %v10660_v13 = vpack.c.bf16 %v10634_v12, %v10632_v4 }
 0x5ac   : > { %v10574_v24 = vadd.f32 %v16951_v26, %v10530_v36  ;;  %v10668_v0 = vpack.c.bf16 %v10650_v6, %v10648_v27  ;;  %v10588_v3 = vadd.f32 %v16951_v26, %v10544_v15  ;;  %v10663_v42 = vpack.c.bf16 %v10639_v28, %v10637_v9 }
 0x5ad   : > { %10604 = vst [vmem:[%s16354_s16 + $0x60] sm:$0xff] %v10572_v8  ;;  %v10590_v20 = vadd.f32 %v16951_v26, %v10546_v33  ;;  %v10671_v56 = vpack.c.bf16 %v10655_v18, %v10653_v30  ;;  %v10636_v19 = vmax.f32 %v10572_v8, 0.0 }
 0x5ae   : > { %10606 = vst [vmem:[%s16354_s16 + $0x70] sm:$0xff] %v10574_v24  ;;  %10620 = vst [vmem:[%s16354_s16 + $0xe0] sm:$0xff] %v10588_v3  ;;  %v10638_v14 = vmax.f32 %v10574_v24, 0.0  ;;  %v10652_v37 = vmax.f32 %v10588_v3, 0.0 }
 0x5af   : > { %10622 = vst [vmem:[%s16354_s16 + $0xf0] sm:$0xff] %v10590_v20  ;;  %v10654_v35 = vmax.f32 %v10590_v20, 0.0 }
 0x5b0   : > { %10849 = vmatmul.mubr.bf16.gmra.mrb[8].mxu0 %v10660_v13  ;;  %10881 = vmatmul.mubr.bf16.gmra.mrb[8].mxu1 %v10668_v0  ;;  %v10662_v21 = vpack.c.bf16 %v10638_v14, %v10636_v19 }
 0x5b1   : > { %10856 = vmatprep.mubr.bf16.mxu0 %v10663_v42  ;;  %10888 = vmatprep.mubr.bf16.mxu1 %v10671_v56  ;;  %v10670_v10 = vpack.c.bf16 %v10654_v35, %v10652_v37 }
 0x5b8   : > { %10857 = vmatmul.mubr.bf16.gmra.mrb[12].mxu0 %v10662_v21  ;;  %10889 = vmatmul.mubr.bf16.gmra.mrb[12].mxu1 %v10670_v10 }
 0x673   : > { %v12581_v26 = vpop.f32.mrb[0].mxu0  ;;  %v12605_v46 = vpop.f32.mrb[0].mxu1 }
 0x674   : > { %v12582_v23 = vpop.f32.mrb[1].mxu0  ;;  %v12606_v58 = vpop.f32.mrb[1].mxu1 }
 0x675   : > { %v12583_v29 = vadd.f32 %v12582_v23, %v12581_v26  ;;  %v12607_v1 = vadd.f32 %v12606_v58, %v12605_v46  ;;  %v12584_v17 = vpop.f32.mrb[2].mxu0  ;;  %v12608_v41 = vpop.f32.mrb[2].mxu1 }
 0x676   : > { %v12585_v34 = vpop.f32.mrb[3].mxu0  ;;  %v12609_v50 = vpop.f32.mrb[3].mxu1 }
 0x677   : > { %10897 = vst [vmem:[%s16350_s20] sm:$0xff] %v12583_v29  ;;  %10905 = vst [vmem:[%s16350_s20 + $0x40] sm:$0xff] %v12607_v1  ;;  %v12586_v48 = vadd.f32 %v12585_v34, %v12584_v17  ;;  %v12610_v2 = vadd.f32 %v12609_v50, %v12608_v41 }
 0x679   : > { %10898 = vst [vmem:[%s16350_s20 + $0x8] sm:$0xff] %v12586_v48  ;;  %10906 = vst [vmem:[%s16350_s20 + $0x48] sm:$0xff] %v12610_v2 }
 0x67b   : > { %v12587_v44 = vpop.f32.mrb[4].mxu0  ;;  %v12611_v52 = vpop.f32.mrb[4].mxu1 }
 0x67c   : > { %v12588_v45 = vpop.f32.mrb[5].mxu0  ;;  %v12612_v53 = vpop.f32.mrb[5].mxu1 }
 0x67d   : > { %v12589_v11 = vadd.f32 %v12588_v45, %v12587_v44  ;;  %v12613_v51 = vadd.f32 %v12612_v53, %v12611_v52  ;;  %v12590_v25 = vpop.f32.mrb[6].mxu0  ;;  %v12614_v32 = vpop.f32.mrb[6].mxu1 }
 0x67e   : > { %v12591_v55 = vpop.f32.mrb[7].mxu0  ;;  %v12615_v49 = vpop.f32.mrb[7].mxu1 }
 0x67f   : > { %10899 = vst [vmem:[%s16350_s20 + $0x10] sm:$0xff] %v12589_v11  ;;  %10907 = vst [vmem:[%s16350_s20 + $0x50] sm:$0xff] %v12613_v51  ;;  %v12592_v60 = vadd.f32 %v12591_v55, %v12590_v25  ;;  %v12616_v63 = vadd.f32 %v12615_v49, %v12614_v32 }
 0x681   : > { %10900 = vst [vmem:[%s16350_s20 + $0x18] sm:$0xff] %v12592_v60  ;;  %10908 = vst [vmem:[%s16350_s20 + $0x58] sm:$0xff] %v12616_v63 }
 0x683   : > { %v12593_v43 = vpop.f32.mrb[8].mxu0  ;;  %v12617_v59 = vpop.f32.mrb[8].mxu1 }
 0x684   : > { %v12594_v31 = vpop.f32.mrb[9].mxu0  ;;  %v12618_v40 = vpop.f32.mrb[9].mxu1 }
 0x685   : > { %v12595_v62 = vadd.f32 %v12594_v31, %v12593_v43  ;;  %v12619_v61 = vadd.f32 %v12618_v40, %v12617_v59  ;;  %v12596_v54 = vpop.f32.mrb[10].mxu0  ;;  %v12620_v38 = vpop.f32.mrb[10].mxu1 }
 0x686   : > { %v12597_v4 = vpop.f32.mrb[11].mxu0  ;;  %v12621_v12 = vpop.f32.mrb[11].mxu1 }
 0x687   : > { %10901 = vst [vmem:[%s16350_s20 + $0x20] sm:$0xff] %v12595_v62  ;;  %10909 = vst [vmem:[%s16350_s20 + $0x60] sm:$0xff] %v12619_v61  ;;  %v12598_v7 = vadd.f32 %v12597_v4, %v12596_v54  ;;  %v12622_v22 = vadd.f32 %v12621_v12, %v12620_v38 }
 0x689   : > { %10902 = vst [vmem:[%s16350_s20 + $0x28] sm:$0xff] %v12598_v7  ;;  %10910 = vst [vmem:[%s16350_s20 + $0x68] sm:$0xff] %v12622_v22 }
 0x68b   : > { %v12599_v57 = vpop.f32.mrb[12].mxu0  ;;  %v12623_v16 = vpop.f32.mrb[12].mxu1 }
 0x68c   : > { %v12600_v27 = vpop.f32.mrb[13].mxu0  ;;  %v12624_v6 = vpop.f32.mrb[13].mxu1 }
 0x68d   : > { %v12601_v5 = vadd.f32 %v12600_v27, %v12599_v57  ;;  %v12625_v39 = vadd.f32 %v12624_v6, %v12623_v16  ;;  %v12602_v9 = vpop.f32.mrb[14].mxu0  ;;  %v12626_v28 = vpop.f32.mrb[14].mxu1 }
 0x68e   : > { %v12603_v47 = vpop.f32.mrb[15].mxu0  ;;  %v12627_v36 = vpop.f32.mrb[15].mxu1 }
 0x68f   : > { %10903 = vst [vmem:[%s16350_s20 + $0x30] sm:$0xff] %v12601_v5  ;;  %10911 = vst [vmem:[%s16350_s20 + $0x70] sm:$0xff] %v12625_v39  ;;  %v12604_v30 = vadd.f32 %v12603_v47, %v12602_v9  ;;  %v12628_v8 = vadd.f32 %v12627_v36, %v12626_v28 }
 0x691   : > { %10904 = vst [vmem:[%s16350_s20 + $0x38] sm:$0xff] %v12604_v30  ;;  %10912 = vst [vmem:[%s16350_s20 + $0x78] sm:$0xff] %v12628_v8 }
 0x692 PF: > { %s17253_s30 = sld [smem:[#allocation26_spill]]  ;;  %s17254_s21 = sld [smem:[#allocation33_spill]] }
 0x693   : > { %s17255_s28 = sld [smem:[#allocation37_spill]]  ;;  %s10932_s17 = sshll.u32 %s16350_s20, 4  ;;  %s17079_s17 = int_to_ptr.vmem [resolvable:$true] %s10932_s17 }
 0x694   : > { %s10914_s22 = scalar_lea.sflag [#allocation7], %s15020_s23  ;;  %s14321_s27 = scalar_lea.vmem %s17079_s17, 2048 }
 0x695   : > { %p14322_p11 = scmp.ne.s32.totalorder %s17079_s17, %s14321_s27  ;;  %s14510_s15 = smov [#allocation13]  }
 0x696   : > { %s14325_s11 = sshll.u32 %s14510_s15, 4  ;;  %s14326_s11 = int_to_ptr.vmem [resolvable:$false] %s14325_s11 }
 0x697   : > { %s14327_s5 = scalar_lea.vmem %s14326_s11, 4096  ;;  %p14328_p5 = scmp.lt.s32.totalorder %s17079_s17, %s14326_s11 }
 0x698   : > { %s12563_s24 = sshll.u32 %s17253_s30, 11  ;;  %p17257_p8 = scmp.ne.s32.totalorder %s17254_s21, 0 }
 0x699   : > { %s17256_s13 = smov %s17255_s28  ;;  %s17076_s18 = scalar_lea.hbm %s17255_s28, %s12563_s24 }
 0x69a   : > { %p14323_p4 = pnand %p14322_p11, %p17257_p8  ;;  %p14329_p3 = scmp.lt.s32.totalorder %s14327_s5, %s14321_s27 }
 0x69c   : > { %p14324_p2 = pneg %p14323_p4  ;;  %p14330_p10 = por %p14329_p3, %p14328_p5 }
 0x69e   : > { %p14331_p7 = pnand %p14330_p10, %p14324_p2 }
 0x6a0   : > { %14334 = shalt.err (!%p14331_p7)
}
 0x6a1   : > { %s14335_s6 = scalar_lea.hbm %s17076_s18, 2048  ;;  %s14339_s2 = scalar_lea.hbm %s17256_s13, 4096 }
 0x6a2   : > { %p14336_p13 = scmp.ne.s32.totalorder %s17076_s18, %s14335_s6  ;;  %p14340_p12 = scmp.lt.u32.totalorder %s17076_s18, %s17256_s13 }
 0x6a3   : > { %p14341_p6 = scmp.lt.u32.totalorder %s14339_s2, %s14335_s6  ;;  %p14343_p11 = scmp.lt.u32.totalorder %s14335_s6, %s17076_s18 }
 0x6a4   : > { %p14337_p1 = pnand %p14336_p13, %p17257_p8 }
 0x6a5   : > { %p14342_p9 = por %p14341_p6, %p14340_p12 }
 0x6a6   : > { %p14338_p0 = pneg %p14337_p1 }
 0x6a7   : > { %p14344_p4 = por %p14343_p11, %p14342_p9 }
 0x6a9   : > { %p14345_p2 = pnand %p14344_p4, %p14338_p0 }
 0x6ab   : > { %14348 = shalt.err (!%p14345_p2)
}
 0x6ac   : > { %s14511_s0 = smov 128   ;;  %s14512_s24 = smov 8  }
 0x6ad   : > { %13203 = dma.vmem_to_hbm [thread:$0]  (%p17257_p8), %s17079_s17, 2048, %s17076_s18, %s10914_s22, %s14511_s0, %s14511_s0, %s14512_s24  }
 0x6ae   : > { %s12564_s29 = sshll.u32 %s17253_s30, 8  ;;  %s10948_s12 = sshll.u32 %s16354_s16, 4  ;;  %s17112_s12 = int_to_ptr.vmem [resolvable:$true] %s10948_s12 }
 0x6af   : > { %s17258_s15 = sld [smem:[#allocation38_spill]]  ;;  %s10919_s5 = scalar_lea.sflag [#allocation15], %s15020_s23 }
 0x6b0   : > { %s14349_s6 = scalar_lea.vmem %s17112_s12, 4096  ;;  %s14513_s10 = smov [#allocation14]  }
 0x6b1   : > { %p14350_p5 = scmp.ne.s32.totalorder %s17112_s12, %s14349_s6  ;;  %s14353_s18 = sshll.u32 %s14513_s10, 4  ;;  %s14354_s18 = int_to_ptr.vmem [resolvable:$false] %s14353_s18 }
 0x6b2   : > { %s14355_s16 = scalar_lea.vmem %s14354_s18, 8192  ;;  %p14356_p7 = scmp.lt.s32.totalorder %s17112_s12, %s14354_s18 }
 0x6b3   : > { %p14351_p3 = pnand %p14350_p5, %p17257_p8  ;;  %p14357_p13 = scmp.lt.s32.totalorder %s14355_s16, %s14349_s6 }
 0x6b5   : > { %s17110_s11 = scalar_lea.hbm %s17258_s15, %s12564_s29  ;;  %p14352_p10 = pneg %p14351_p3 }
 0x6b6   : > { %p14358_p1 = por %p14357_p13, %p14356_p7 }
 0x6b8   : > { %p14359_p0 = pnand %p14358_p1, %p14352_p10 }
 0x6ba   : > { %14362 = shalt.err (!%p14359_p0)
}
 0x6bb   : > { %s14363_s30 = scalar_lea.hbm %s17110_s11, 4096  ;;  %s14367_s19 = scalar_lea.hbm %s17258_s15, 8192 }
 0x6bc   : > { %p14364_p12 = scmp.ne.s32.totalorder %s17110_s11, %s14363_s30  ;;  %p14368_p11 = scmp.lt.u32.totalorder %s17110_s11, %s17258_s15 }
 0x6bd   : > { %p14369_p4 = scmp.lt.u32.totalorder %s14367_s19, %s14363_s30  ;;  %p14371_p5 = scmp.lt.u32.totalorder %s14363_s30, %s17110_s11 }
 0x6be   : > { %p14365_p6 = pnand %p14364_p12, %p17257_p8 }
 0x6bf   : > { %p14370_p2 = por %p14369_p4, %p14368_p11 }
 0x6c0   : > { %p14366_p9 = pneg %p14365_p6 }
 0x6c1   : > { %p14372_p3 = por %p14371_p5, %p14370_p2 }
 0x6c3   : > { %p14373_p10 = pnand %p14372_p3, %p14366_p9 }
 0x6c5   : > { %14376 = shalt.err (!%p14373_p10)
}
 0x6c6   : > { %s14514_s14 = smov 256   ;;  %s14515_s0 = smov 512  }
 0x6c7   : > { %s14516_s24 = smov 16  }
 0x6c8   : > { %13204 = dma.vmem_to_hbm [thread:$0]  (%p17257_p8), %s17112_s12, 4096, %s17110_s11, %s10919_s5, %s14514_s14, %s14515_s0, %s14516_s24  }
 0x6c9 PF: > { %s17259_s29 = sld [smem:[#allocation21_spill]]  ;;  %s17260_s28 = sld [smem:[#allocation34_spill]] }
 0x6ca   : > { %p13214_p7 = scmp.ge.s32.totalorder %s14499_s9, 2 }
 0x6cf   : > { %s10963_s27 = sand.u32 1, %s17259_s29   ;;  %p17261_p13 = scmp.ne.s32.totalorder %s17260_s28, 0 }
 0x6d0   : > { %s10964_s6 = scalar_lea.sflag [#allocation7], %s10963_s27 }
 0x6d1   : > { %p13208_p1 = pnand %p13214_p7, %p17261_p13 }
 0x6d3   : > { %14442 = dma.done.wait (!%p13208_p1), %s10964_s6, 2048  }
 0x6d4   : > { %14444 = vsyncadd (!%p13208_p1), %s10964_s6, 4294965248  ;;  %s10973_s10 = scalar_lea.sflag [#allocation15], %s10963_s27 }
 0x6d5   : > { %14446 = dma.done.wait (!%p13208_p1), %s10973_s10, 4096  }
 0x6d6   : > { %14448 = vsyncadd (!%p13208_p1), %s10973_s10, 4294963200  ;;  %s32_s9 = sadd.s32 1, %s14499_s9   ;;  %s17263_s23 = sld [smem:[#allocation22_spill]] }
 0x6d7   : > { %p17143_p0 = scmp.ge.s32.totalorder %s32_s9, 10   ;;  %s17264_s22 = sld [smem:[#allocation23_spill]] }
 0x6d8   : > { %s17265_s12 = sld [smem:[#allocation31_spill]]  ;;  %s17266_s11 = sld [smem:[#allocation30_spill]] }
 0x6d9   : > { %s17267_s27 = sld [smem:[#allocation24_spill]]  ;;  %s17268_s28 = sld [smem:[#allocation29_spill]] }
 0x6da   : > { %s17269_s5 = sld [smem:[#allocation27_spill]]  ;;  %s17270_s18 = sld [smem:[#allocation28_spill]] }
 0x6db   : > { %s17274_s24 = smov %s14467_s25  ;;  %s17275_s25 = smov %s14471_s26 }
 0x6dc   : > { %s17272_s21 = smov %s17263_s23  ;;  %s17277_s29 = smov %s14491_s7 }
 0x6dd   : > { %s17278_s30 = smov %s14495_s8  ;;  %31 = sbr.rel (!%p17143_p0) target bundleno = 21 (0x15), region = 183 }
 0x6de   : > { %s17273_s23 = smov %s17265_s12  ;;  %s17276_s26 = smov %s17266_s11 }
 0x6e0   : > { %s17279_s7 = smov %s17269_s5  ;;  %s17280_s8 = smov %s17270_s18 }
 0x6e4   :  { %10978 = vsyncpa [#allocation6], 1 }
 0x6e5   :  { %10980 = vsyncpa [#allocation6 + $0x1], 1 }
 0x6e6   :  { %10981 = vsyncpa [#allocation9], 1 }
 0x6e7   :  { %10983 = vsyncpa [#allocation9 + $0x1], 1 }
 0x6e8   :  { %10984 = vsyncpa [#allocation12], 1 }
 0x6e9   :  { %10986 = vsyncpa [#allocation12 + $0x1], 1 }
 0x6ea   :  { %10987 = vsyncpa [#allocation7], 1 }
 0x6eb   :  { %10989 = vsyncpa [#allocation7 + $0x1], 1 }
 0x6ec   :  { %10990 = vsyncpa [#allocation15], 1 }
 0x6ed   :  { %10992 = vsyncpa [#allocation15 + $0x1], 1 }

</bundles_post_ra>
